<compile_context>
chip_gen: v5e
topology: v5e:2x2
jax: 0.10.0
libtpu: 0.0.40
codegen_flags: <defaults>
</compile_context>

<pallas_src>
import math

import jax
import jax.numpy as jnp
from jax.experimental import pallas as pl
from jax.experimental.pallas import tpu as pltpu

# ---------------------------------------------------------------------------
# Small configuration consistent with the module's forward.
# ---------------------------------------------------------------------------
NUM_FEATURES = 32        # original: 246
D_MODEL = 32             # original: 64
NHEAD = 4
HEAD_DIM = D_MODEL // NHEAD
NUM_ENCODER_LAYERS = 2   # num_layers in the module
NUM_DECODER_LAYERS = 6   # PyTorch nn.Transformer default (not overridden by module)
DIM_FF = 64              # original default: 2048
SRC_LEN = 8              # original input_seq_len: 10
TGT_LEN = 4              # original output_seq_len: 1
BATCH = 2                # original: 1
LN_EPS = 1e-5
_ATTN_SCALE = 1.0 / math.sqrt(HEAD_DIM)


# ---------------------------------------------------------------------------
# In-kernel helpers (traced inside the Pallas kernels; values only, no refs)
# ---------------------------------------------------------------------------
def _mm(a, b):
    # a @ b with f32 accumulation on the MXU
    return jax.lax.dot_general(a, b, (((1,), (0,)), ((), ())),
                               preferred_element_type=jnp.float32)


def _mm_nt(a, b):
    # a @ b.T (contract last dims of both operands)
    return jax.lax.dot_general(a, b, (((1,), (1,)), ((), ())),
                               preferred_element_type=jnp.float32)


def _layernorm(z, g, b):
    mean = jnp.mean(z, axis=-1, keepdims=True)
    var = jnp.mean((z - mean) ** 2, axis=-1, keepdims=True)
    return (z - mean) * jax.lax.rsqrt(var + LN_EPS) * g + b


def _softmax_rows(s):
    s = s - jnp.max(s, axis=-1, keepdims=True)
    p = jnp.exp(s)
    # divide via EUP approx reciprocal (frees VALU slots)
    return p * pl.reciprocal(jnp.sum(p, axis=-1, keepdims=True), approx=True)


def _attn_heads_to_scratch(q_all, k_all, v_all, scr):
    """Scaled dot-product attention for all (batch, head) pairs.

    q_all: (BATCH*tq, D_MODEL); k_all, v_all: (BATCH*tk, D_MODEL).
    Writes the merged-head output (BATCH*tq, D_MODEL) into the VMEM scratch `scr`.
    Batch rows are contiguous (batch-major slab) and heads are static lane slices,
    so everything stays in vregs/VMEM with no transposes or HBM traffic.
    """
    tq = q_all.shape[0] // BATCH
    tk = k_all.shape[0] // BATCH
    for b in range(BATCH):
        for h in range(NHEAD):
            c0 = h * HEAD_DIM
            q = q_all[b * tq:(b + 1) * tq, c0:c0 + HEAD_DIM]
            k = k_all[b * tk:(b + 1) * tk, c0:c0 + HEAD_DIM]
            v = v_all[b * tk:(b + 1) * tk, c0:c0 + HEAD_DIM]
            s = _mm_nt(q, k) * _ATTN_SCALE
            p = _softmax_rows(s)
            scr[pl.ds(b * tq, tq), pl.ds(c0, HEAD_DIM)] = _mm(p, v)


# ---------------------------------------------------------------------------
# Pallas kernels (one per fused stage)
# ---------------------------------------------------------------------------
def _input_proj_kernel(src_ref, tgt_ref, w_ref, b_ref, src_o_ref, tgt_o_ref):
    # shared input_linear applied to both src and tgt in one launch
    w = w_ref[...]
    b = b_ref[...]
    src_o_ref[...] = _mm(src_ref[...], w) + b
    tgt_o_ref[...] = _mm(tgt_ref[...], w) + b


def _enc_layer_kernel(x_ref,
                      qkv_w_ref, qkv_b_ref, ao_w_ref, ao_b_ref,
                      ln1_g_ref, ln1_b_ref,
                      ff1_w_ref, ff1_b_ref, ff2_w_ref, ff2_b_ref,
                      ln2_g_ref, ln2_b_ref,
                      o_ref, attn_scr):
    x = x_ref[...]                                           # (B*S, D)

    # --- self attention: single fused (D, 3D) QKV matmul ---
    qkv = _mm(x, qkv_w_ref[...]) + qkv_b_ref[...]            # (B*S, 3D)
    _attn_heads_to_scratch(qkv[:, :D_MODEL],
                           qkv[:, D_MODEL:2 * D_MODEL],
                           qkv[:, 2 * D_MODEL:],
                           attn_scr)
    sa = _mm(attn_scr[...], ao_w_ref[...]) + ao_b_ref[...]
    x = _layernorm(x + sa, ln1_g_ref[...], ln1_b_ref[...])   # post-norm

    # --- feed-forward (ReLU) ---
    h = jnp.maximum(_mm(x, ff1_w_ref[...]) + ff1_b_ref[...], 0.0)
    ff = _mm(h, ff2_w_ref[...]) + ff2_b_ref[...]
    o_ref[...] = _layernorm(x + ff, ln2_g_ref[...], ln2_b_ref[...])


def _dec_layer_kernel(x_ref, mem_ref,
                      sa_qkv_w_ref, sa_qkv_b_ref, sa_ao_w_ref, sa_ao_b_ref,
                      ln1_g_ref, ln1_b_ref,
                      ca_qkv_w_ref, ca_qkv_b_ref, ca_ao_w_ref, ca_ao_b_ref,
                      ln2_g_ref, ln2_b_ref,
                      ff1_w_ref, ff1_b_ref, ff2_w_ref, ff2_b_ref,
                      ln3_g_ref, ln3_b_ref,
                      o_ref, attn_scr):
    x = x_ref[...]                                           # (B*T, D)
    mem = mem_ref[...]                                       # (B*S, D)

    # --- self attention (no tgt_mask, matching the reference call) ---
    qkv = _mm(x, sa_qkv_w_ref[...]) + sa_qkv_b_ref[...]
    _attn_heads_to_scratch(qkv[:, :D_MODEL],
                           qkv[:, D_MODEL:2 * D_MODEL],
                           qkv[:, 2 * D_MODEL:],
                           attn_scr)
    sa = _mm(attn_scr[...], sa_ao_w_ref[...]) + sa_ao_b_ref[...]
    x = _layernorm(x + sa, ln1_g_ref[...], ln1_b_ref[...])

    # --- cross attention: Q from decoder stream, fused KV matmul from memory ---
    ca_w = ca_qkv_w_ref[...]
    ca_b = ca_qkv_b_ref[...]
    q_all = _mm(x, ca_w[:, :D_MODEL]) + ca_b[:, :D_MODEL]    # (B*T, D)
    kv = _mm(mem, ca_w[:, D_MODEL:]) + ca_b[:, D_MODEL:]     # (B*S, 2D)
    _attn_heads_to_scratch(q_all, kv[:, :D_MODEL], kv[:, D_MODEL:], attn_scr)
    ca = _mm(attn_scr[...], ca_ao_w_ref[...]) + ca_ao_b_ref[...]
    x = _layernorm(x + ca, ln2_g_ref[...], ln2_b_ref[...])

    # --- feed-forward (ReLU) ---
    h = jnp.maximum(_mm(x, ff1_w_ref[...]) + ff1_b_ref[...], 0.0)
    ff = _mm(h, ff2_w_ref[...]) + ff2_b_ref[...]
    o_ref[...] = _layernorm(x + ff, ln3_g_ref[...], ln3_b_ref[...])


def _layernorm_kernel(x_ref, g_ref, b_ref, o_ref):
    # dedicated LayerNorm kernel (no zeros tensor / no residual input)
    o_ref[...] = _layernorm(x_ref[...], g_ref[...], b_ref[...])


def _final_kernel(x_ref, g_ref, b_ref, ow_ref, ob_ref, o_ref):
    # decoder final LayerNorm + output_linear (D_MODEL -> 1) folded in as a
    # lane reduction (weight is passed pre-transposed as (1, D_MODEL)).
    y = _layernorm(x_ref[...], g_ref[...], b_ref[...])
    o_ref[...] = jnp.sum(y * ow_ref[...], axis=-1, keepdims=True) + ob_ref[...]


# ---------------------------------------------------------------------------
# Thin wrappers around pallas_call (whole arrays resident in VMEM; no grid)
# ---------------------------------------------------------------------------
def input_proj(src2, tgt2, p):
    return pl.pallas_call(
        _input_proj_kernel,
        out_shape=(jax.ShapeDtypeStruct((src2.shape[0], D_MODEL), jnp.float32),
                   jax.ShapeDtypeStruct((tgt2.shape[0], D_MODEL), jnp.float32)),
    )(src2, tgt2, p["w"], p["b"])


def encoder_layer(x, p):
    return pl.pallas_call(
        _enc_layer_kernel,
        out_shape=jax.ShapeDtypeStruct(x.shape, jnp.float32),
        scratch_shapes=[pltpu.VMEM(x.shape, jnp.float32)],
    )(x,
      p["sa"]["qkv_w"], p["sa"]["qkv_b"], p["sa"]["ao_w"], p["sa"]["ao_b"],
      p["ln1"]["g"], p["ln1"]["b"],
      p["ff"]["w1"], p["ff"]["b1"], p["ff"]["w2"], p["ff"]["b2"],
      p["ln2"]["g"], p["ln2"]["b"])


def decoder_layer(x, mem, p):
    return pl.pallas_call(
        _dec_layer_kernel,
        out_shape=jax.ShapeDtypeStruct(x.shape, jnp.float32),
        scratch_shapes=[pltpu.VMEM(x.shape, jnp.float32)],
    )(x, mem,
      p["sa"]["qkv_w"], p["sa"]["qkv_b"], p["sa"]["ao_w"], p["sa"]["ao_b"],
      p["ln1"]["g"], p["ln1"]["b"],
      p["ca"]["qkv_w"], p["ca"]["qkv_b"], p["ca"]["ao_w"], p["ca"]["ao_b"],
      p["ln2"]["g"], p["ln2"]["b"],
      p["ff"]["w1"], p["ff"]["b1"], p["ff"]["w2"], p["ff"]["b2"],
      p["ln3"]["g"], p["ln3"]["b"])


def layernorm(x, p):
    return pl.pallas_call(
        _layernorm_kernel,
        out_shape=jax.ShapeDtypeStruct(x.shape, jnp.float32),
    )(x, p["g"], p["b"])


def final_norm_project(x, ln_p, out_p):
    return pl.pallas_call(
        _final_kernel,
        out_shape=jax.ShapeDtypeStruct((x.shape[0], 1), jnp.float32),
    )(x, ln_p["g"], ln_p["b"], out_p["w"], out_p["b"])


# ---------------------------------------------------------------------------
# Full forward pass (11 pallas_call launches total)
# ---------------------------------------------------------------------------
def forward(src, tgt, params):
    # src: (S, B, NUM_FEATURES), tgt: (T, B, NUM_FEATURES)  -- PyTorch seq-first layout
    s_len, b, f = src.shape
    t_len = tgt.shape[0]

    # batch-major 2-D slabs so each batch's rows are contiguous inside the kernels
    src2 = src.transpose(1, 0, 2).reshape(b * s_len, f)
    tgt2 = tgt.transpose(1, 0, 2).reshape(b * t_len, f)

    src_p, tgt_p = input_proj(src2, tgt2, params["input_linear"])

    mem = src_p
    for lp in params["encoder"]:
        mem = encoder_layer(mem, lp)
    mem = layernorm(mem, params["encoder_norm"])

    x = tgt_p
    for lp in params["decoder"]:
        x = decoder_layer(x, mem, lp)
    out2 = final_norm_project(x, params["decoder_norm"], params["output_linear"])  # (B*T, 1)

    return out2.reshape(b, t_len, 1).transpose(1, 0, 2)  # (T, B, 1)


# ---------------------------------------------------------------------------
# Deterministic parameter initialization (PyTorch-style uniform fan-in bounds)
# ---------------------------------------------------------------------------
def init_params(key):
    keys = iter(jax.random.split(key, 512))

    def uni(shape, bound):
        return jax.random.uniform(next(keys), shape, jnp.float32, -bound, bound)

    def dense(fan_in, fan_out):
        bound = 1.0 / math.sqrt(fan_in)
        return {"w": uni((fan_in, fan_out), bound), "b": uni((1, fan_out), bound)}

    def mha():
        bound = 1.0 / math.sqrt(D_MODEL)
        return {
            "qkv_w": uni((D_MODEL, 3 * D_MODEL), bound),   # fused in-proj (D, 3D)
            "qkv_b": uni((1, 3 * D_MODEL), bound),
            "ao_w": uni((D_MODEL, D_MODEL), bound),        # out-proj
            "ao_b": uni((1, D_MODEL), bound),
        }

    def ln():
        return {"g": jnp.ones((1, D_MODEL), jnp.float32),
                "b": jnp.zeros((1, D_MODEL), jnp.float32)}

    def ff():
        d1 = dense(D_MODEL, DIM_FF)
        d2 = dense(DIM_FF, D_MODEL)
        return {"w1": d1["w"], "b1": d1["b"], "w2": d2["w"], "b2": d2["b"]}

    def enc_layer_p():
        return {"sa": mha(), "ln1": ln(), "ff": ff(), "ln2": ln()}

    def dec_layer_p():
        return {"sa": mha(), "ln1": ln(), "ca": mha(), "ln2": ln(),
                "ff": ff(), "ln3": ln()}

    out_lin = dense(D_MODEL, 1)
    return {
        "input_linear": dense(NUM_FEATURES, D_MODEL),
        "encoder": [enc_layer_p() for _ in range(NUM_ENCODER_LAYERS)],
        "encoder_norm": ln(),
        "decoder": [dec_layer_p() for _ in range(NUM_DECODER_LAYERS)],
        "decoder_norm": ln(),
        # output_linear weight stored transposed as (1, D) so the final kernel can
        # fold the D->1 projection into a lane reduction (no N=1 matmul/output block).
        "output_linear": {"w": out_lin["w"].reshape(1, D_MODEL), "b": out_lin["b"]},
    }


if __name__ == "__main__":
    key = jax.random.PRNGKey(0)
    k_src, k_params = jax.random.split(key)
    src = jax.random.uniform(k_src, (SRC_LEN, BATCH, NUM_FEATURES), jnp.float32)
    tgt = jnp.zeros((TGT_LEN, BATCH, NUM_FEATURES), jnp.float32)
    params = init_params(k_params)

    out = jax.jit(forward)(src, tgt, params)
    out = jax.block_until_ready(out)

    assert out.shape == (TGT_LEN, BATCH, 1), out.shape
    assert out.dtype == jnp.float32
    assert bool(jnp.all(jnp.isfinite(out)))
    print("KERNEL_OK")
</pallas_src>

<mosaic_0001>
module attributes {stable_mosaic.version = 11 : i64} {
  func.func @_input_proj_kernel(%arg0: memref<16x32xf32, #tpu.memory_space<vmem>>, %arg1: memref<8x32xf32, #tpu.memory_space<vmem>>, %arg2: memref<32x32xf32, #tpu.memory_space<vmem>>, %arg3: memref<1x32xf32, #tpu.memory_space<vmem>>, %arg4: memref<16x32xf32, #tpu.memory_space<vmem>>, %arg5: memref<8x32xf32, #tpu.memory_space<vmem>>) attributes {dimension_semantics = [], scalar_prefetch = 0 : i64, scratch_operands = 0 : i64, tpu.core_type = #tpu.core_type<tc>} {
    %c0 = arith.constant 0 : index
    %c0_0 = arith.constant 0 : index
    %0 = vector.load %arg2[%c0, %c0_0] : memref<32x32xf32, #tpu.memory_space<vmem>>, vector<32x32xf32>
    %c0_1 = arith.constant 0 : index
    %c0_2 = arith.constant 0 : index
    %1 = vector.load %arg3[%c0_1, %c0_2] : memref<1x32xf32, #tpu.memory_space<vmem>>, vector<1x32xf32>
    %c0_3 = arith.constant 0 : index
    %c0_4 = arith.constant 0 : index
    %2 = vector.load %arg0[%c0_3, %c0_4] : memref<16x32xf32, #tpu.memory_space<vmem>>, vector<16x32xf32>
    %cst = arith.constant dense<0.000000e+00> : vector<16x32xf32>
    %3 = tpu.matmul %2, %0, %cst {dimension_numbers = #tpu.dot_dimension_numbers<[1], [0], [0], [1], [0, 0, 1, 1], [], []>} : vector<16x32xf32>, vector<32x32xf32>, vector<16x32xf32> -> vector<16x32xf32>
    %4 = vector.broadcast %1 : vector<1x32xf32> to vector<16x32xf32>
    %5 = arith.addf %3, %4 : vector<16x32xf32>
    %c0_5 = arith.constant 0 : index
    %c0_6 = arith.constant 0 : index
    %6 = vector.load %arg4[%c0_5, %c0_6] : memref<16x32xf32, #tpu.memory_space<vmem>>, vector<16x32xf32>
    tpu.vector_store %arg4[%c0_5, %c0_6], %5 {strides = array<i32>} : memref<16x32xf32, #tpu.memory_space<vmem>>, vector<16x32xf32>,
    %c0_7 = arith.constant 0 : index
    %c0_8 = arith.constant 0 : index
    %7 = vector.load %arg1[%c0_7, %c0_8] : memref<8x32xf32, #tpu.memory_space<vmem>>, vector<8x32xf32>
    %cst_9 = arith.constant dense<0.000000e+00> : vector<8x32xf32>
    %8 = tpu.matmul %7, %0, %cst_9 {dimension_numbers = #tpu.dot_dimension_numbers<[1], [0], [0], [1], [0, 0, 1, 1], [], []>} : vector<8x32xf32>, vector<32x32xf32>, vector<8x32xf32> -> vector<8x32xf32>
    %9 = vector.broadcast %1 : vector<1x32xf32> to vector<8x32xf32>
    %10 = arith.addf %8, %9 : vector<8x32xf32>
    %c0_10 = arith.constant 0 : index
    %c0_11 = arith.constant 0 : index
    %11 = vector.load %arg5[%c0_10, %c0_11] : memref<8x32xf32, #tpu.memory_space<vmem>>, vector<8x32xf32>
    tpu.vector_store %arg5[%c0_10, %c0_11], %10 {strides = array<i32>} : memref<8x32xf32, #tpu.memory_space<vmem>>, vector<8x32xf32>,
    return
  }
}

module attributes {stable_mosaic.version = 11 : i64} {
  func.func @_layernorm_kernel(%arg0: memref<16x32xf32, #tpu.memory_space<vmem>>, %arg1: memref<1x32xf32, #tpu.memory_space<vmem>>, %arg2: memref<1x32xf32, #tpu.memory_space<vmem>>, %arg3: memref<16x32xf32, #tpu.memory_space<vmem>>) attributes {dimension_semantics = [], scalar_prefetch = 0 : i64, scratch_operands = 0 : i64, tpu.core_type = #tpu.core_type<tc>} {
    %c0 = arith.constant 0 : index
    %c0_0 = arith.constant 0 : index
    %0 = vector.load %arg0[%c0, %c0_0] : memref<16x32xf32, #tpu.memory_space<vmem>>, vector<16x32xf32>
    %c0_1 = arith.constant 0 : index
    %c0_2 = arith.constant 0 : index
    %1 = vector.load %arg1[%c0_1, %c0_2] : memref<1x32xf32, #tpu.memory_space<vmem>>, vector<1x32xf32>
    %c0_3 = arith.constant 0 : index
    %c0_4 = arith.constant 0 : index
    %2 = vector.load %arg2[%c0_3, %c0_4] : memref<1x32xf32, #tpu.memory_space<vmem>>, vector<1x32xf32>
    %cst = arith.constant dense<0.000000e+00> : vector<16xf32>
    %3 = vector.multi_reduction <add>, %0, %cst [1] : vector<16x32xf32> to vector<16xf32>
    %4 = vector.shape_cast %3 : vector<16xf32> to vector<16x1xf32>
    %cst_5 = arith.constant 3.200000e+01 : f32
    %5 = vector.broadcast %cst_5 : f32 to vector<16x1xf32>
    %6 = arith.divf %4, %5 : vector<16x1xf32>
    %7 = vector.broadcast %6 : vector<16x1xf32> to vector<16x32xf32>
    %8 = arith.subf %0, %7 : vector<16x32xf32>
    %9 = arith.mulf %8, %8 : vector<16x32xf32>
    %cst_6 = arith.constant dense<0.000000e+00> : vector<16xf32>
    %10 = vector.multi_reduction <add>, %9, %cst_6 [1] : vector<16x32xf32> to vector<16xf32>
    %11 = vector.shape_cast %10 : vector<16xf32> to vector<16x1xf32>
    %cst_7 = arith.constant 3.200000e+01 : f32
    %12 = vector.broadcast %cst_7 : f32 to vector<16x1xf32>
    %13 = arith.divf %11, %12 : vector<16x1xf32>
    %14 = vector.broadcast %6 : vector<16x1xf32> to vector<16x32xf32>
    %15 = arith.subf %0, %14 : vector<16x32xf32>
    %cst_8 = arith.constant 9.99999974E-6 : f32
    %16 = vector.broadcast %cst_8 : f32 to vector<16x1xf32>
    %17 = arith.addf %13, %16 : vector<16x1xf32>
    %18 = math.rsqrt %17 : vector<16x1xf32>
    %19 = vector.broadcast %18 : vector<16x1xf32> to vector<16x32xf32>
    %20 = arith.mulf %15, %19 : vector<16x32xf32>
    %21 = vector.broadcast %1 : vector<1x32xf32> to vector<16x32xf32>
    %22 = arith.mulf %20, %21 : vector<16x32xf32>
    %23 = vector.broadcast %2 : vector<1x32xf32> to vector<16x32xf32>
    %24 = arith.addf %22, %23 : vector<16x32xf32>
    %c0_9 = arith.constant 0 : index
    %c0_10 = arith.constant 0 : index
    %25 = vector.load %arg3[%c0_9, %c0_10] : memref<16x32xf32, #tpu.memory_space<vmem>>, vector<16x32xf32>
    tpu.vector_store %arg3[%c0_9, %c0_10], %24 {strides = array<i32>} : memref<16x32xf32, #tpu.memory_space<vmem>>, vector<16x32xf32>,
    return
  }
}

module attributes {stable_mosaic.version = 11 : i64} {
  func.func @_enc_layer_kernel(%arg0: memref<16x32xf32, #tpu.memory_space<vmem>>, %arg1: memref<32x96xf32, #tpu.memory_space<vmem>>, %arg2: memref<1x96xf32, #tpu.memory_space<vmem>>, %arg3: memref<32x32xf32, #tpu.memory_space<vmem>>, %arg4: memref<1x32xf32, #tpu.memory_space<vmem>>, %arg5: memref<1x32xf32, #tpu.memory_space<vmem>>, %arg6: memref<1x32xf32, #tpu.memory_space<vmem>>, %arg7: memref<32x64xf32, #tpu.memory_space<vmem>>, %arg8: memref<1x64xf32, #tpu.memory_space<vmem>>, %arg9: memref<64x32xf32, #tpu.memory_space<vmem>>, %arg10: memref<1x32xf32, #tpu.memory_space<vmem>>, %arg11: memref<1x32xf32, #tpu.memory_space<vmem>>, %arg12: memref<1x32xf32, #tpu.memory_space<vmem>>, %arg13: memref<16x32xf32, #tpu.memory_space<vmem>>, %arg14: memref<16x32xf32, #tpu.memory_space<vmem>>) attributes {dimension_semantics = [], scalar_prefetch = 0 : i64, scratch_operands = 1 : i64, tpu.core_type = #tpu.core_type<tc>} {
    %c0 = arith.constant 0 : index
    %c0_0 = arith.constant 0 : index
    %0 = vector.load %arg0[%c0, %c0_0] : memref<16x32xf32, #tpu.memory_space<vmem>>, vector<16x32xf32>
    %c0_1 = arith.constant 0 : index
    %c0_2 = arith.constant 0 : index
    %1 = vector.load %arg1[%c0_1, %c0_2] : memref<32x96xf32, #tpu.memory_space<vmem>>, vector<32x96xf32>
    %cst = arith.constant dense<0.000000e+00> : vector<16x96xf32>
    %2 = tpu.matmul %0, %1, %cst {dimension_numbers = #tpu.dot_dimension_numbers<[1], [0], [0], [1], [0, 0, 1, 1], [], []>} : vector<16x32xf32>, vector<32x96xf32>, vector<16x96xf32> -> vector<16x96xf32>
    %c0_3 = arith.constant 0 : index
    %c0_4 = arith.constant 0 : index
    %3 = vector.load %arg2[%c0_3, %c0_4] : memref<1x96xf32, #tpu.memory_space<vmem>>, vector<1x96xf32>
    %4 = vector.broadcast %3 : vector<1x96xf32> to vector<16x96xf32>
    %5 = arith.addf %2, %4 : vector<16x96xf32>
    %6 = vector.extract_strided_slice %5 {offsets = [0, 0], sizes = [16, 32], strides = [1, 1]} : vector<16x96xf32> to vector<16x32xf32>
    %7 = vector.extract_strided_slice %5 {offsets = [0, 32], sizes = [16, 32], strides = [1, 1]} : vector<16x96xf32> to vector<16x32xf32>
    %8 = vector.extract_strided_slice %5 {offsets = [0, 64], sizes = [16, 32], strides = [1, 1]} : vector<16x96xf32> to vector<16x32xf32>
    %9 = vector.extract_strided_slice %6 {offsets = [0, 0], sizes = [8, 8], strides = [1, 1]} : vector<16x32xf32> to vector<8x8xf32>
    %10 = vector.extract_strided_slice %7 {offsets = [0, 0], sizes = [8, 8], strides = [1, 1]} : vector<16x32xf32> to vector<8x8xf32>
    %11 = vector.extract_strided_slice %8 {offsets = [0, 0], sizes = [8, 8], strides = [1, 1]} : vector<16x32xf32> to vector<8x8xf32>
    %cst_5 = arith.constant dense<0.000000e+00> : vector<8x8xf32>
    %12 = tpu.matmul %9, %10, %cst_5 {dimension_numbers = #tpu.dot_dimension_numbers<[1], [1], [0], [0], [0, 0, 1, 0], [], []>} : vector<8x8xf32>, vector<8x8xf32>, vector<8x8xf32> -> vector<8x8xf32>
    %cst_6 = arith.constant 0.353553385 : f32
    %13 = vector.broadcast %cst_6 : f32 to vector<8x8xf32>
    %14 = arith.mulf %12, %13 : vector<8x8xf32>
    %cst_7 = arith.constant dense<0xFF800000> : vector<8xf32>
    %15 = vector.multi_reduction <maximumf>, %14, %cst_7 [1] : vector<8x8xf32> to vector<8xf32>
    %16 = vector.shape_cast %15 : vector<8xf32> to vector<8x1xf32>
    %17 = vector.broadcast %16 : vector<8x1xf32> to vector<8x8xf32>
    %18 = arith.subf %14, %17 : vector<8x8xf32>
    %19 = math.exp %18 : vector<8x8xf32>
    %cst_8 = arith.constant dense<0.000000e+00> : vector<8xf32>
    %20 = vector.multi_reduction <add>, %19, %cst_8 [1] : vector<8x8xf32> to vector<8xf32>
    %21 = vector.shape_cast %20 : vector<8xf32> to vector<8x1xf32>
    %22 = tpu.reciprocal %21 {approx = true} : vector<8x1xf32> -> vector<8x1xf32>
    %23 = vector.broadcast %22 : vector<8x1xf32> to vector<8x8xf32>
    %24 = arith.mulf %19, %23 : vector<8x8xf32>
    %cst_9 = arith.constant dense<0.000000e+00> : vector<8x8xf32>
    %25 = tpu.matmul %24, %11, %cst_9 {dimension_numbers = #tpu.dot_dimension_numbers<[1], [0], [0], [1], [0, 0, 1, 1], [], []>} : vector<8x8xf32>, vector<8x8xf32>, vector<8x8xf32> -> vector<8x8xf32>
    %c0_10 = arith.constant 0 : index
    %c0_11 = arith.constant 0 : index
    %26 = vector.load %arg14[%c0_10, %c0_11] : memref<16x32xf32, #tpu.memory_space<vmem>>, vector<8x8xf32>
    tpu.vector_store %arg14[%c0_10, %c0_11], %25 {strides = array<i32>} : memref<16x32xf32, #tpu.memory_space<vmem>>, vector<8x8xf32>,
    %27 = vector.extract_strided_slice %6 {offsets = [0, 8], sizes = [8, 8], strides = [1, 1]} : vector<16x32xf32> to vector<8x8xf32>
    %28 = vector.extract_strided_slice %7 {offsets = [0, 8], sizes = [8, 8], strides = [1, 1]} : vector<16x32xf32> to vector<8x8xf32>
    %29 = vector.extract_strided_slice %8 {offsets = [0, 8], sizes = [8, 8], strides = [1, 1]} : vector<16x32xf32> to vector<8x8xf32>
    %cst_12 = arith.constant dense<0.000000e+00> : vector<8x8xf32>
    %30 = tpu.matmul %27, %28, %cst_12 {dimension_numbers = #tpu.dot_dimension_numbers<[1], [1], [0], [0], [0, 0, 1, 0], [], []>} : vector<8x8xf32>, vector<8x8xf32>, vector<8x8xf32> -> vector<8x8xf32>
    %cst_13 = arith.constant 0.353553385 : f32
    %31 = vector.broadcast %cst_13 : f32 to vector<8x8xf32>
    %32 = arith.mulf %30, %31 : vector<8x8xf32>
    %cst_14 = arith.constant dense<0xFF800000> : vector<8xf32>
    %33 = vector.multi_reduction <maximumf>, %32, %cst_14 [1] : vector<8x8xf32> to vector<8xf32>
    %34 = vector.shape_cast %33 : vector<8xf32> to vector<8x1xf32>
    %35 = vector.broadcast %34 : vector<8x1xf32> to vector<8x8xf32>
    %36 = arith.subf %32, %35 : vector<8x8xf32>
    %37 = math.exp %36 : vector<8x8xf32>
    %cst_15 = arith.constant dense<0.000000e+00> : vector<8xf32>
    %38 = vector.multi_reduction <add>, %37, %cst_15 [1] : vector<8x8xf32> to vector<8xf32>
    %39 = vector.shape_cast %38 : vector<8xf32> to vector<8x1xf32>
    %40 = tpu.reciprocal %39 {approx = true} : vector<8x1xf32> -> vector<8x1xf32>
    %41 = vector.broadcast %40 : vector<8x1xf32> to vector<8x8xf32>
    %42 = arith.mulf %37, %41 : vector<8x8xf32>
    %cst_16 = arith.constant dense<0.000000e+00> : vector<8x8xf32>
    %43 = tpu.matmul %42, %29, %cst_16 {dimension_numbers = #tpu.dot_dimension_numbers<[1], [0], [0], [1], [0, 0, 1, 1], [], []>} : vector<8x8xf32>, vector<8x8xf32>, vector<8x8xf32> -> vector<8x8xf32>
    %c0_17 = arith.constant 0 : index
    %c8 = arith.constant 8 : index
    %44 = vector.load %arg14[%c0_17, %c8] : memref<16x32xf32, #tpu.memory_space<vmem>>, vector<8x8xf32>
    tpu.vector_store %arg14[%c0_17, %c8], %43 {strides = array<i32>} : memref<16x32xf32, #tpu.memory_space<vmem>>, vector<8x8xf32>,
    %45 = vector.extract_strided_slice %6 {offsets = [0, 16], sizes = [8, 8], strides = [1, 1]} : vector<16x32xf32> to vector<8x8xf32>
    %46 = vector.extract_strided_slice %7 {offsets = [0, 16], sizes = [8, 8], strides = [1, 1]} : vector<16x32xf32> to vector<8x8xf32>
    %47 = vector.extract_strided_slice %8 {offsets = [0, 16], sizes = [8, 8], strides = [1, 1]} : vector<16x32xf32> to vector<8x8xf32>
    %cst_18 = arith.constant dense<0.000000e+00> : vector<8x8xf32>
    %48 = tpu.matmul %45, %46, %cst_18 {dimension_numbers = #tpu.dot_dimension_numbers<[1], [1], [0], [0], [0, 0, 1, 0], [], []>} : vector<8x8xf32>, vector<8x8xf32>, vector<8x8xf32> -> vector<8x8xf32>
    %cst_19 = arith.constant 0.353553385 : f32
    %49 = vector.broadcast %cst_19 : f32 to vector<8x8xf32>
    %50 = arith.mulf %48, %49 : vector<8x8xf32>
    %cst_20 = arith.constant dense<0xFF800000> : vector<8xf32>
    %51 = vector.multi_reduction <maximumf>, %50, %cst_20 [1] : vector<8x8xf32> to vector<8xf32>
    %52 = vector.shape_cast %51 : vector<8xf32> to vector<8x1xf32>
    %53 = vector.broadcast %52 : vector<8x1xf32> to vector<8x8xf32>
    %54 = arith.subf %50, %53 : vector<8x8xf32>
    %55 = math.exp %54 : vector<8x8xf32>
    %cst_21 = arith.constant dense<0.000000e+00> : vector<8xf32>
    %56 = vector.multi_reduction <add>, %55, %cst_21 [1] : vector<8x8xf32> to vector<8xf32>
    %57 = vector.shape_cast %56 : vector<8xf32> to vector<8x1xf32>
    %58 = tpu.reciprocal %57 {approx = true} : vector<8x1xf32> -> vector<8x1xf32>
    %59 = vector.broadcast %58 : vector<8x1xf32> to vector<8x8xf32>
    %60 = arith.mulf %55, %59 : vector<8x8xf32>
    %cst_22 = arith.constant dense<0.000000e+00> : vector<8x8xf32>
    %61 = tpu.matmul %60, %47, %cst_22 {dimension_numbers = #tpu.dot_dimension_numbers<[1], [0], [0], [1], [0, 0, 1, 1], [], []>} : vector<8x8xf32>, vector<8x8xf32>, vector<8x8xf32> -> vector<8x8xf32>
    %c0_23 = arith.constant 0 : index
    %c16 = arith.constant 16 : index
    %62 = vector.load %arg14[%c0_23, %c16] : memref<16x32xf32, #tpu.memory_space<vmem>>, vector<8x8xf32>
    tpu.vector_store %arg14[%c0_23, %c16], %61 {strides = array<i32>} : memref<16x32xf32, #tpu.memory_space<vmem>>, vector<8x8xf32>,
    %63 = vector.extract_strided_slice %6 {offsets = [0, 24], sizes = [8, 8], strides = [1, 1]} : vector<16x32xf32> to vector<8x8xf32>
    %64 = vector.extract_strided_slice %7 {offsets = [0, 24], sizes = [8, 8], strides = [1, 1]} : vector<16x32xf32> to vector<8x8xf32>
    %65 = vector.extract_strided_slice %8 {offsets = [0, 24], sizes = [8, 8], strides = [1, 1]} : vector<16x32xf32> to vector<8x8xf32>
    %cst_24 = arith.constant dense<0.000000e+00> : vector<8x8xf32>
    %66 = tpu.matmul %63, %64, %cst_24 {dimension_numbers = #tpu.dot_dimension_numbers<[1], [1], [0], [0], [0, 0, 1, 0], [], []>} : vector<8x8xf32>, vector<8x8xf32>, vector<8x8xf32> -> vector<8x8xf32>
    %cst_25 = arith.constant 0.353553385 : f32
    %67 = vector.broadcast %cst_25 : f32 to vector<8x8xf32>
    %68 = arith.mulf %66, %67 : vector<8x8xf32>
    %cst_26 = arith.constant dense<0xFF800000> : vector<8xf32>
    %69 = vector.multi_reduction <maximumf>, %68, %cst_26 [1] : vector<8x8xf32> to vector<8xf32>
    %70 = vector.shape_cast %69 : vector<8xf32> to vector<8x1xf32>
    %71 = vector.broadcast %70 : vector<8x1xf32> to vector<8x8xf32>
    %72 = arith.subf %68, %71 : vector<8x8xf32>
    %73 = math.exp %72 : vector<8x8xf32>
    %cst_27 = arith.constant dense<0.000000e+00> : vector<8xf32>
    %74 = vector.multi_reduction <add>, %73, %cst_27 [1] : vector<8x8xf32> to vector<8xf32>
    %75 = vector.shape_cast %74 : vector<8xf32> to vector<8x1xf32>
    %76 = tpu.reciprocal %75 {approx = true} : vector<8x1xf32> -> vector<8x1xf32>
    %77 = vector.broadcast %76 : vector<8x1xf32> to vector<8x8xf32>
    %78 = arith.mulf %73, %77 : vector<8x8xf32>
    %cst_28 = arith.constant dense<0.000000e+00> : vector<8x8xf32>
    %79 = tpu.matmul %78, %65, %cst_28 {dimension_numbers = #tpu.dot_dimension_numbers<[1], [0], [0], [1], [0, 0, 1, 1], [], []>} : vector<8x8xf32>, vector<8x8xf32>, vector<8x8xf32> -> vector<8x8xf32>
    %c0_29 = arith.constant 0 : index
    %c24 = arith.constant 24 : index
    %80 = vector.load %arg14[%c0_29, %c24] : memref<16x32xf32, #tpu.memory_space<vmem>>, vector<8x8xf32>
    tpu.vector_store %arg14[%c0_29, %c24], %79 {strides = array<i32>} : memref<16x32xf32, #tpu.memory_space<vmem>>, vector<8x8xf32>,
    %81 = vector.extract_strided_slice %6 {offsets = [8, 0], sizes = [8, 8], strides = [1, 1]} : vector<16x32xf32> to vector<8x8xf32>
    %82 = vector.extract_strided_slice %7 {offsets = [8, 0], sizes = [8, 8], strides = [1, 1]} : vector<16x32xf32> to vector<8x8xf32>
    %83 = vector.extract_strided_slice %8 {offsets = [8, 0], sizes = [8, 8], strides = [1, 1]} : vector<16x32xf32> to vector<8x8xf32>
    %cst_30 = arith.constant dense<0.000000e+00> : vector<8x8xf32>
    %84 = tpu.matmul %81, %82, %cst_30 {dimension_numbers = #tpu.dot_dimension_numbers<[1], [1], [0], [0], [0, 0, 1, 0], [], []>} : vector<8x8xf32>, vector<8x8xf32>, vector<8x8xf32> -> vector<8x8xf32>
    %cst_31 = arith.constant 0.353553385 : f32
    %85 = vector.broadcast %cst_31 : f32 to vector<8x8xf32>
    %86 = arith.mulf %84, %85 : vector<8x8xf32>
    %cst_32 = arith.constant dense<0xFF800000> : vector<8xf32>
    %87 = vector.multi_reduction <maximumf>, %86, %cst_32 [1] : vector<8x8xf32> to vector<8xf32>
    %88 = vector.shape_cast %87 : vector<8xf32> to vector<8x1xf32>
    %89 = vector.broadcast %88 : vector<8x1xf32> to vector<8x8xf32>
    %90 = arith.subf %86, %89 : vector<8x8xf32>
    %91 = math.exp %90 : vector<8x8xf32>
    %cst_33 = arith.constant dense<0.000000e+00> : vector<8xf32>
    %92 = vector.multi_reduction <add>, %91, %cst_33 [1] : vector<8x8xf32> to vector<8xf32>
    %93 = vector.shape_cast %92 : vector<8xf32> to vector<8x1xf32>
    %94 = tpu.reciprocal %93 {approx = true} : vector<8x1xf32> -> vector<8x1xf32>
    %95 = vector.broadcast %94 : vector<8x1xf32> to vector<8x8xf32>
    %96 = arith.mulf %91, %95 : vector<8x8xf32>
    %cst_34 = arith.constant dense<0.000000e+00> : vector<8x8xf32>
    %97 = tpu.matmul %96, %83, %cst_34 {dimension_numbers = #tpu.dot_dimension_numbers<[1], [0], [0], [1], [0, 0, 1, 1], [], []>} : vector<8x8xf32>, vector<8x8xf32>, vector<8x8xf32> -> vector<8x8xf32>
    %c8_35 = arith.constant 8 : index
    %c0_36 = arith.constant 0 : index
    %98 = vector.load %arg14[%c8_35, %c0_36] : memref<16x32xf32, #tpu.memory_space<vmem>>, vector<8x8xf32>
    tpu.vector_store %arg14[%c8_35, %c0_36], %97 {strides = array<i32>} : memref<16x32xf32, #tpu.memory_space<vmem>>, vector<8x8xf32>,
    %99 = vector.extract_strided_slice %6 {offsets = [8, 8], sizes = [8, 8], strides = [1, 1]} : vector<16x32xf32> to vector<8x8xf32>
    %100 = vector.extract_strided_slice %7 {offsets = [8, 8], sizes = [8, 8], strides = [1, 1]} : vector<16x32xf32> to vector<8x8xf32>
    %101 = vector.extract_strided_slice %8 {offsets = [8, 8], sizes = [8, 8], strides = [1, 1]} : vector<16x32xf32> to vector<8x8xf32>
    %cst_37 = arith.constant dense<0.000000e+00> : vector<8x8xf32>
    %102 = tpu.matmul %99, %100, %cst_37 {dimension_numbers = #tpu.dot_dimension_numbers<[1], [1], [0], [0], [0, 0, 1, 0], [], []>} : vector<8x8xf32>, vector<8x8xf32>, vector<8x8xf32> -> vector<8x8xf32>
    %cst_38 = arith.constant 0.353553385 : f32
    %103 = vector.broadcast %cst_38 : f32 to vector<8x8xf32>
    %104 = arith.mulf %102, %103 : vector<8x8xf32>
    %cst_39 = arith.constant dense<0xFF800000> : vector<8xf32>
    %105 = vector.multi_reduction <maximumf>, %104, %cst_39 [1] : vector<8x8xf32> to vector<8xf32>
    %106 = vector.shape_cast %105 : vector<8xf32> to vector<8x1xf32>
    %107 = vector.broadcast %106 : vector<8x1xf32> to vector<8x8xf32>
    %108 = arith.subf %104, %107 : vector<8x8xf32>
    %109 = math.exp %108 : vector<8x8xf32>
    %cst_40 = arith.constant dense<0.000000e+00> : vector<8xf32>
    %110 = vector.multi_reduction <add>, %109, %cst_40 [1] : vector<8x8xf32> to vector<8xf32>
    %111 = vector.shape_cast %110 : vector<8xf32> to vector<8x1xf32>
    %112 = tpu.reciprocal %111 {approx = true} : vector<8x1xf32> -> vector<8x1xf32>
    %113 = vector.broadcast %112 : vector<8x1xf32> to vector<8x8xf32>
    %114 = arith.mulf %109, %113 : vector<8x8xf32>
    %cst_41 = arith.constant dense<0.000000e+00> : vector<8x8xf32>
    %115 = tpu.matmul %114, %101, %cst_41 {dimension_numbers = #tpu.dot_dimension_numbers<[1], [0], [0], [1], [0, 0, 1, 1], [], []>} : vector<8x8xf32>, vector<8x8xf32>, vector<8x8xf32> -> vector<8x8xf32>
    %c8_42 = arith.constant 8 : index
    %c8_43 = arith.constant 8 : index
    %116 = vector.load %arg14[%c8_42, %c8_43] : memref<16x32xf32, #tpu.memory_space<vmem>>, vector<8x8xf32>
    tpu.vector_store %arg14[%c8_42, %c8_43], %115 {strides = array<i32>} : memref<16x32xf32, #tpu.memory_space<vmem>>, vector<8x8xf32>,
    %117 = vector.extract_strided_slice %6 {offsets = [8, 16], sizes = [8, 8], strides = [1, 1]} : vector<16x32xf32> to vector<8x8xf32>
    %118 = vector.extract_strided_slice %7 {offsets = [8, 16], sizes = [8, 8], strides = [1, 1]} : vector<16x32xf32> to vector<8x8xf32>
    %119 = vector.extract_strided_slice %8 {offsets = [8, 16], sizes = [8, 8], strides = [1, 1]} : vector<16x32xf32> to vector<8x8xf32>
    %cst_44 = arith.constant dense<0.000000e+00> : vector<8x8xf32>
    %120 = tpu.matmul %117, %118, %cst_44 {dimension_numbers = #tpu.dot_dimension_numbers<[1], [1], [0], [0], [0, 0, 1, 0], [], []>} : vector<8x8xf32>, vector<8x8xf32>, vector<8x8xf32> -> vector<8x8xf32>
    %cst_45 = arith.constant 0.353553385 : f32
    %121 = vector.broadcast %cst_45 : f32 to vector<8x8xf32>
    %122 = arith.mulf %120, %121 : vector<8x8xf32>
    %cst_46 = arith.constant dense<0xFF800000> : vector<8xf32>
    %123 = vector.multi_reduction <maximumf>, %122, %cst_46 [1] : vector<8x8xf32> to vector<8xf32>
    %124 = vector.shape_cast %123 : vector<8xf32> to vector<8x1xf32>
    %125 = vector.broadcast %124 : vector<8x1xf32> to vector<8x8xf32>
    %126 = arith.subf %122, %125 : vector<8x8xf32>
    %127 = math.exp %126 : vector<8x8xf32>
    %cst_47 = arith.constant dense<0.000000e+00> : vector<8xf32>
    %128 = vector.multi_reduction <add>, %127, %cst_47 [1] : vector<8x8xf32> to vector<8xf32>
    %129 = vector.shape_cast %128 : vector<8xf32> to vector<8x1xf32>
    %130 = tpu.reciprocal %129 {approx = true} : vector<8x1xf32> -> vector<8x1xf32>
    %131 = vector.broadcast %130 : vector<8x1xf32> to vector<8x8xf32>
    %132 = arith.mulf %127, %131 : vector<8x8xf32>
    %cst_48 = arith.constant dense<0.000000e+00> : vector<8x8xf32>
    %133 = tpu.matmul %132, %119, %cst_48 {dimension_numbers = #tpu.dot_dimension_numbers<[1], [0], [0], [1], [0, 0, 1, 1], [], []>} : vector<8x8xf32>, vector<8x8xf32>, vector<8x8xf32> -> vector<8x8xf32>
    %c8_49 = arith.constant 8 : index
    %c16_50 = arith.constant 16 : index
    %134 = vector.load %arg14[%c8_49, %c16_50] : memref<16x32xf32, #tpu.memory_space<vmem>>, vector<8x8xf32>
    tpu.vector_store %arg14[%c8_49, %c16_50], %133 {strides = array<i32>} : memref<16x32xf32, #tpu.memory_space<vmem>>, vector<8x8xf32>,
    %135 = vector.extract_strided_slice %6 {offsets = [8, 24], sizes = [8, 8], strides = [1, 1]} : vector<16x32xf32> to vector<8x8xf32>
    %136 = vector.extract_strided_slice %7 {offsets = [8, 24], sizes = [8, 8], strides = [1, 1]} : vector<16x32xf32> to vector<8x8xf32>
    %137 = vector.extract_strided_slice %8 {offsets = [8, 24], sizes = [8, 8], strides = [1, 1]} : vector<16x32xf32> to vector<8x8xf32>
    %cst_51 = arith.constant dense<0.000000e+00> : vector<8x8xf32>
    %138 = tpu.matmul %135, %136, %cst_51 {dimension_numbers = #tpu.dot_dimension_numbers<[1], [1], [0], [0], [0, 0, 1, 0], [], []>} : vector<8x8xf32>, vector<8x8xf32>, vector<8x8xf32> -> vector<8x8xf32>
    %cst_52 = arith.constant 0.353553385 : f32
    %139 = vector.broadcast %cst_52 : f32 to vector<8x8xf32>
    %140 = arith.mulf %138, %139 : vector<8x8xf32>
    %cst_53 = arith.constant dense<0xFF800000> : vector<8xf32>
    %141 = vector.multi_reduction <maximumf>, %140, %cst_53 [1] : vector<8x8xf32> to vector<8xf32>
    %142 = vector.shape_cast %141 : vector<8xf32> to vector<8x1xf32>
    %143 = vector.broadcast %142 : vector<8x1xf32> to vector<8x8xf32>
    %144 = arith.subf %140, %143 : vector<8x8xf32>
    %145 = math.exp %144 : vector<8x8xf32>
    %cst_54 = arith.constant dense<0.000000e+00> : vector<8xf32>
    %146 = vector.multi_reduction <add>, %145, %cst_54 [1] : vector<8x8xf32> to vector<8xf32>
    %147 = vector.shape_cast %146 : vector<8xf32> to vector<8x1xf32>
    %148 = tpu.reciprocal %147 {approx = true} : vector<8x1xf32> -> vector<8x1xf32>
    %149 = vector.broadcast %148 : vector<8x1xf32> to vector<8x8xf32>
    %150 = arith.mulf %145, %149 : vector<8x8xf32>
    %cst_55 = arith.constant dense<0.000000e+00> : vector<8x8xf32>
    %151 = tpu.matmul %150, %137, %cst_55 {dimension_numbers = #tpu.dot_dimension_numbers<[1], [0], [0], [1], [0, 0, 1, 1], [], []>} : vector<8x8xf32>, vector<8x8xf32>, vector<8x8xf32> -> vector<8x8xf32>
    %c8_56 = arith.constant 8 : index
    %c24_57 = arith.constant 24 : index
    %152 = vector.load %arg14[%c8_56, %c24_57] : memref<16x32xf32, #tpu.memory_space<vmem>>, vector<8x8xf32>
    tpu.vector_store %arg14[%c8_56, %c24_57], %151 {strides = array<i32>} : memref<16x32xf32, #tpu.memory_space<vmem>>, vector<8x8xf32>,
    %c0_58 = arith.constant 0 : index
    %c0_59 = arith.constant 0 : index
    %153 = vector.load %arg14[%c0_58, %c0_59] : memref<16x32xf32, #tpu.memory_space<vmem>>, vector<16x32xf32>
    %c0_60 = arith.constant 0 : index
    %c0_61 = arith.constant 0 : index
    %154 = vector.load %arg3[%c0_60, %c0_61] : memref<32x32xf32, #tpu.memory_space<vmem>>, vector<32x32xf32>
    %cst_62 = arith.constant dense<0.000000e+00> : vector<16x32xf32>
    %155 = tpu.matmul %153, %154, %cst_62 {dimension_numbers = #tpu.dot_dimension_numbers<[1], [0], [0], [1], [0, 0, 1, 1], [], []>} : vector<16x32xf32>, vector<32x32xf32>, vector<16x32xf32> -> vector<16x32xf32>
    %c0_63 = arith.constant 0 : index
    %c0_64 = arith.constant 0 : index
    %156 = vector.load %arg4[%c0_63, %c0_64] : memref<1x32xf32, #tpu.memory_space<vmem>>, vector<1x32xf32>
    %157 = vector.broadcast %156 : vector<1x32xf32> to vector<16x32xf32>
    %158 = arith.addf %155, %157 : vector<16x32xf32>
    %159 = arith.addf %0, %158 : vector<16x32xf32>
    %c0_65 = arith.constant 0 : index
    %c0_66 = arith.constant 0 : index
    %160 = vector.load %arg5[%c0_65, %c0_66] : memref<1x32xf32, #tpu.memory_space<vmem>>, vector<1x32xf32>
    %c0_67 = arith.constant 0 : index
    %c0_68 = arith.constant 0 : index
    %161 = vector.load %arg6[%c0_67, %c0_68] : memref<1x32xf32, #tpu.memory_space<vmem>>, vector<1x32xf32>
    %cst_69 = arith.constant dense<0.000000e+00> : vector<16xf32>
    %162 = vector.multi_reduction <add>, %159, %cst_69 [1] : vector<16x32xf32> to vector<16xf32>
    %163 = vector.shape_cast %162 : vector<16xf32> to vector<16x1xf32>
    %cst_70 = arith.constant 3.200000e+01 : f32
    %164 = vector.broadcast %cst_70 : f32 to vector<16x1xf32>
    %165 = arith.divf %163, %164 : vector<16x1xf32>
    %166 = vector.broadcast %165 : vector<16x1xf32> to vector<16x32xf32>
    %167 = arith.subf %159, %166 : vector<16x32xf32>
    %168 = arith.mulf %167, %167 : vector<16x32xf32>
    %cst_71 = arith.constant dense<0.000000e+00> : vector<16xf32>
    %169 = vector.multi_reduction <add>, %168, %cst_71 [1] : vector<16x32xf32> to vector<16xf32>
    %170 = vector.shape_cast %169 : vector<16xf32> to vector<16x1xf32>
    %cst_72 = arith.constant 3.200000e+01 : f32
    %171 = vector.broadcast %cst_72 : f32 to vector<16x1xf32>
    %172 = arith.divf %170, %171 : vector<16x1xf32>
    %173 = vector.broadcast %165 : vector<16x1xf32> to vector<16x32xf32>
    %174 = arith.subf %159, %173 : vector<16x32xf32>
    %cst_73 = arith.constant 9.99999974E-6 : f32
    %175 = vector.broadcast %cst_73 : f32 to vector<16x1xf32>
    %176 = arith.addf %172, %175 : vector<16x1xf32>
    %177 = math.rsqrt %176 : vector<16x1xf32>
    %178 = vector.broadcast %177 : vector<16x1xf32> to vector<16x32xf32>
    %179 = arith.mulf %174, %178 : vector<16x32xf32>
    %180 = vector.broadcast %160 : vector<1x32xf32> to vector<16x32xf32>
    %181 = arith.mulf %179, %180 : vector<16x32xf32>
    %182 = vector.broadcast %161 : vector<1x32xf32> to vector<16x32xf32>
    %183 = arith.addf %181, %182 : vector<16x32xf32>
    %c0_74 = arith.constant 0 : index
    %c0_75 = arith.constant 0 : index
    %184 = vector.load %arg7[%c0_74, %c0_75] : memref<32x64xf32, #tpu.memory_space<vmem>>, vector<32x64xf32>
    %cst_76 = arith.constant dense<0.000000e+00> : vector<16x64xf32>
    %185 = tpu.matmul %183, %184, %cst_76 {dimension_numbers = #tpu.dot_dimension_numbers<[1], [0], [0], [1], [0, 0, 1, 1], [], []>} : vector<16x32xf32>, vector<32x64xf32>, vector<16x64xf32> -> vector<16x64xf32>
    %c0_77 = arith.constant 0 : index
    %c0_78 = arith.constant 0 : index
    %186 = vector.load %arg8[%c0_77, %c0_78] : memref<1x64xf32, #tpu.memory_space<vmem>>, vector<1x64xf32>
    %187 = vector.broadcast %186 : vector<1x64xf32> to vector<16x64xf32>
    %188 = arith.addf %185, %187 : vector<16x64xf32>
    %cst_79 = arith.constant 0.000000e+00 : f32
    %189 = vector.broadcast %cst_79 : f32 to vector<16x64xf32>
    %190 = arith.maximumf %188, %189 : vector<16x64xf32>
    %c0_80 = arith.constant 0 : index
    %c0_81 = arith.constant 0 : index
    %191 = vector.load %arg9[%c0_80, %c0_81] : memref<64x32xf32, #tpu.memory_space<vmem>>, vector<64x32xf32>
    %cst_82 = arith.constant dense<0.000000e+00> : vector<16x32xf32>
    %192 = tpu.matmul %190, %191, %cst_82 {dimension_numbers = #tpu.dot_dimension_numbers<[1], [0], [0], [1], [0, 0, 1, 1], [], []>} : vector<16x64xf32>, vector<64x32xf32>, vector<16x32xf32> -> vector<16x32xf32>
    %c0_83 = arith.constant 0 : index
    %c0_84 = arith.constant 0 : index
    %193 = vector.load %arg10[%c0_83, %c0_84] : memref<1x32xf32, #tpu.memory_space<vmem>>, vector<1x32xf32>
    %194 = vector.broadcast %193 : vector<1x32xf32> to vector<16x32xf32>
    %195 = arith.addf %192, %194 : vector<16x32xf32>
    %196 = arith.addf %183, %195 : vector<16x32xf32>
    %c0_85 = arith.constant 0 : index
    %c0_86 = arith.constant 0 : index
    %197 = vector.load %arg11[%c0_85, %c0_86] : memref<1x32xf32, #tpu.memory_space<vmem>>, vector<1x32xf32>
    %c0_87 = arith.constant 0 : index
    %c0_88 = arith.constant 0 : index
    %198 = vector.load %arg12[%c0_87, %c0_88] : memref<1x32xf32, #tpu.memory_space<vmem>>, vector<1x32xf32>
    %cst_89 = arith.constant dense<0.000000e+00> : vector<16xf32>
    %199 = vector.multi_reduction <add>, %196, %cst_89 [1] : vector<16x32xf32> to vector<16xf32>
    %200 = vector.shape_cast %199 : vector<16xf32> to vector<16x1xf32>
    %cst_90 = arith.constant 3.200000e+01 : f32
    %201 = vector.broadcast %cst_90 : f32 to vector<16x1xf32>
    %202 = arith.divf %200, %201 : vector<16x1xf32>
    %203 = vector.broadcast %202 : vector<16x1xf32> to vector<16x32xf32>
    %204 = arith.subf %196, %203 : vector<16x32xf32>
    %205 = arith.mulf %204, %204 : vector<16x32xf32>
    %cst_91 = arith.constant dense<0.000000e+00> : vector<16xf32>
    %206 = vector.multi_reduction <add>, %205, %cst_91 [1] : vector<16x32xf32> to vector<16xf32>
    %207 = vector.shape_cast %206 : vector<16xf32> to vector<16x1xf32>
    %cst_92 = arith.constant 3.200000e+01 : f32
    %208 = vector.broadcast %cst_92 : f32 to vector<16x1xf32>
    %209 = arith.divf %207, %208 : vector<16x1xf32>
    %210 = vector.broadcast %202 : vector<16x1xf32> to vector<16x32xf32>
    %211 = arith.subf %196, %210 : vector<16x32xf32>
    %cst_93 = arith.constant 9.99999974E-6 : f32
    %212 = vector.broadcast %cst_93 : f32 to vector<16x1xf32>
    %213 = arith.addf %209, %212 : vector<16x1xf32>
    %214 = math.rsqrt %213 : vector<16x1xf32>
    %215 = vector.broadcast %214 : vector<16x1xf32> to vector<16x32xf32>
    %216 = arith.mulf %211, %215 : vector<16x32xf32>
    %217 = vector.broadcast %197 : vector<1x32xf32> to vector<16x32xf32>
    %218 = arith.mulf %216, %217 : vector<16x32xf32>
    %219 = vector.broadcast %198 : vector<1x32xf32> to vector<16x32xf32>
    %220 = arith.addf %218, %219 : vector<16x32xf32>
    %c0_94 = arith.constant 0 : index
    %c0_95 = arith.constant 0 : index
    %221 = vector.load %arg13[%c0_94, %c0_95] : memref<16x32xf32, #tpu.memory_space<vmem>>, vector<16x32xf32>
    tpu.vector_store %arg13[%c0_94, %c0_95], %220 {strides = array<i32>} : memref<16x32xf32, #tpu.memory_space<vmem>>, vector<16x32xf32>,
    return
  }
}

module attributes {stable_mosaic.version = 11 : i64} {
  func.func @_enc_layer_kernel(%arg0: memref<16x32xf32, #tpu.memory_space<vmem>>, %arg1: memref<32x96xf32, #tpu.memory_space<vmem>>, %arg2: memref<1x96xf32, #tpu.memory_space<vmem>>, %arg3: memref<32x32xf32, #tpu.memory_space<vmem>>, %arg4: memref<1x32xf32, #tpu.memory_space<vmem>>, %arg5: memref<1x32xf32, #tpu.memory_space<vmem>>, %arg6: memref<1x32xf32, #tpu.memory_space<vmem>>, %arg7: memref<32x64xf32, #tpu.memory_space<vmem>>, %arg8: memref<1x64xf32, #tpu.memory_space<vmem>>, %arg9: memref<64x32xf32, #tpu.memory_space<vmem>>, %arg10: memref<1x32xf32, #tpu.memory_space<vmem>>, %arg11: memref<1x32xf32, #tpu.memory_space<vmem>>, %arg12: memref<1x32xf32, #tpu.memory_space<vmem>>, %arg13: memref<16x32xf32, #tpu.memory_space<vmem>>, %arg14: memref<16x32xf32, #tpu.memory_space<vmem>>) attributes {dimension_semantics = [], scalar_prefetch = 0 : i64, scratch_operands = 1 : i64, tpu.core_type = #tpu.core_type<tc>} {
    %c0 = arith.constant 0 : index
    %c0_0 = arith.constant 0 : index
    %0 = vector.load %arg0[%c0, %c0_0] : memref<16x32xf32, #tpu.memory_space<vmem>>, vector<16x32xf32>
    %c0_1 = arith.constant 0 : index
    %c0_2 = arith.constant 0 : index
    %1 = vector.load %arg1[%c0_1, %c0_2] : memref<32x96xf32, #tpu.memory_space<vmem>>, vector<32x96xf32>
    %cst = arith.constant dense<0.000000e+00> : vector<16x96xf32>
    %2 = tpu.matmul %0, %1, %cst {dimension_numbers = #tpu.dot_dimension_numbers<[1], [0], [0], [1], [0, 0, 1, 1], [], []>} : vector<16x32xf32>, vector<32x96xf32>, vector<16x96xf32> -> vector<16x96xf32>
    %c0_3 = arith.constant 0 : index
    %c0_4 = arith.constant 0 : index
    %3 = vector.load %arg2[%c0_3, %c0_4] : memref<1x96xf32, #tpu.memory_space<vmem>>, vector<1x96xf32>
    %4 = vector.broadcast %3 : vector<1x96xf32> to vector<16x96xf32>
    %5 = arith.addf %2, %4 : vector<16x96xf32>
    %6 = vector.extract_strided_slice %5 {offsets = [0, 0], sizes = [16, 32], strides = [1, 1]} : vector<16x96xf32> to vector<16x32xf32>
    %7 = vector.extract_strided_slice %5 {offsets = [0, 32], sizes = [16, 32], strides = [1, 1]} : vector<16x96xf32> to vector<16x32xf32>
    %8 = vector.extract_strided_slice %5 {offsets = [0, 64], sizes = [16, 32], strides = [1, 1]} : vector<16x96xf32> to vector<16x32xf32>
    %9 = vector.extract_strided_slice %6 {offsets = [0, 0], sizes = [8, 8], strides = [1, 1]} : vector<16x32xf32> to vector<8x8xf32>
    %10 = vector.extract_strided_slice %7 {offsets = [0, 0], sizes = [8, 8], strides = [1, 1]} : vector<16x32xf32> to vector<8x8xf32>
    %11 = vector.extract_strided_slice %8 {offsets = [0, 0], sizes = [8, 8], strides = [1, 1]} : vector<16x32xf32> to vector<8x8xf32>
    %cst_5 = arith.constant dense<0.000000e+00> : vector<8x8xf32>
    %12 = tpu.matmul %9, %10, %cst_5 {dimension_numbers = #tpu.dot_dimension_numbers<[1], [1], [0], [0], [0, 0, 1, 0], [], []>} : vector<8x8xf32>, vector<8x8xf32>, vector<8x8xf32> -> vector<8x8xf32>
    %cst_6 = arith.constant 0.353553385 : f32
    %13 = vector.broadcast %cst_6 : f32 to vector<8x8xf32>
    %14 = arith.mulf %12, %13 : vector<8x8xf32>
    %cst_7 = arith.constant dense<0xFF800000> : vector<8xf32>
    %15 = vector.multi_reduction <maximumf>, %14, %cst_7 [1] : vector<8x8xf32> to vector<8xf32>
    %16 = vector.shape_cast %15 : vector<8xf32> to vector<8x1xf32>
    %17 = vector.broadcast %16 : vector<8x1xf32> to vector<8x8xf32>
    %18 = arith.subf %14, %17 : vector<8x8xf32>
    %19 = math.exp %18 : vector<8x8xf32>
    %cst_8 = arith.constant dense<0.000000e+00> : vector<8xf32>
    %20 = vector.multi_reduction <add>, %19, %cst_8 [1] : vector<8x8xf32> to vector<8xf32>
    %21 = vector.shape_cast %20 : vector<8xf32> to vector<8x1xf32>
    %22 = tpu.reciprocal %21 {approx = true} : vector<8x1xf32> -> vector<8x1xf32>
    %23 = vector.broadcast %22 : vector<8x1xf32> to vector<8x8xf32>
    %24 = arith.mulf %19, %23 : vector<8x8xf32>
    %cst_9 = arith.constant dense<0.000000e+00> : vector<8x8xf32>
    %25 = tpu.matmul %24, %11, %cst_9 {dimension_numbers = #tpu.dot_dimension_numbers<[1], [0], [0], [1], [0, 0, 1, 1], [], []>} : vector<8x8xf32>, vector<8x8xf32>, vector<8x8xf32> -> vector<8x8xf32>
    %c0_10 = arith.constant 0 : index
    %c0_11 = arith.constant 0 : index
    %26 = vector.load %arg14[%c0_10, %c0_11] : memref<16x32xf32, #tpu.memory_space<vmem>>, vector<8x8xf32>
    tpu.vector_store %arg14[%c0_10, %c0_11], %25 {strides = array<i32>} : memref<16x32xf32, #tpu.memory_space<vmem>>, vector<8x8xf32>,
    %27 = vector.extract_strided_slice %6 {offsets = [0, 8], sizes = [8, 8], strides = [1, 1]} : vector<16x32xf32> to vector<8x8xf32>
    %28 = vector.extract_strided_slice %7 {offsets = [0, 8], sizes = [8, 8], strides = [1, 1]} : vector<16x32xf32> to vector<8x8xf32>
    %29 = vector.extract_strided_slice %8 {offsets = [0, 8], sizes = [8, 8], strides = [1, 1]} : vector<16x32xf32> to vector<8x8xf32>
    %cst_12 = arith.constant dense<0.000000e+00> : vector<8x8xf32>
    %30 = tpu.matmul %27, %28, %cst_12 {dimension_numbers = #tpu.dot_dimension_numbers<[1], [1], [0], [0], [0, 0, 1, 0], [], []>} : vector<8x8xf32>, vector<8x8xf32>, vector<8x8xf32> -> vector<8x8xf32>
    %cst_13 = arith.constant 0.353553385 : f32
    %31 = vector.broadcast %cst_13 : f32 to vector<8x8xf32>
    %32 = arith.mulf %30, %31 : vector<8x8xf32>
    %cst_14 = arith.constant dense<0xFF800000> : vector<8xf32>
    %33 = vector.multi_reduction <maximumf>, %32, %cst_14 [1] : vector<8x8xf32> to vector<8xf32>
    %34 = vector.shape_cast %33 : vector<8xf32> to vector<8x1xf32>
    %35 = vector.broadcast %34 : vector<8x1xf32> to vector<8x8xf32>
    %36 = arith.subf %32, %35 : vector<8x8xf32>
    %37 = math.exp %36 : vector<8x8xf32>
    %cst_15 = arith.constant dense<0.000000e+00> : vector<8xf32>
    %38 = vector.multi_reduction <add>, %37, %cst_15 [1] : vector<8x8xf32> to vector<8xf32>
    %39 = vector.shape_cast %38 : vector<8xf32> to vector<8x1xf32>
    %40 = tpu.reciprocal %39 {approx = true} : vector<8x1xf32> -> vector<8x1xf32>
    %41 = vector.broadcast %40 : vector<8x1xf32> to vector<8x8xf32>
    %42 = arith.mulf %37, %41 : vector<8x8xf32>
    %cst_16 = arith.constant dense<0.000000e+00> : vector<8x8xf32>
    %43 = tpu.matmul %42, %29, %cst_16 {dimension_numbers = #tpu.dot_dimension_numbers<[1], [0], [0], [1], [0, 0, 1, 1], [], []>} : vector<8x8xf32>, vector<8x8xf32>, vector<8x8xf32> -> vector<8x8xf32>
    %c0_17 = arith.constant 0 : index
    %c8 = arith.constant 8 : index
    %44 = vector.load %arg14[%c0_17, %c8] : memref<16x32xf32, #tpu.memory_space<vmem>>, vector<8x8xf32>
    tpu.vector_store %arg14[%c0_17, %c8], %43 {strides = array<i32>} : memref<16x32xf32, #tpu.memory_space<vmem>>, vector<8x8xf32>,
    %45 = vector.extract_strided_slice %6 {offsets = [0, 16], sizes = [8, 8], strides = [1, 1]} : vector<16x32xf32> to vector<8x8xf32>
    %46 = vector.extract_strided_slice %7 {offsets = [0, 16], sizes = [8, 8], strides = [1, 1]} : vector<16x32xf32> to vector<8x8xf32>
    %47 = vector.extract_strided_slice %8 {offsets = [0, 16], sizes = [8, 8], strides = [1, 1]} : vector<16x32xf32> to vector<8x8xf32>
    %cst_18 = arith.constant dense<0.000000e+00> : vector<8x8xf32>
    %48 = tpu.matmul %45, %46, %cst_18 {dimension_numbers = #tpu.dot_dimension_numbers<[1], [1], [0], [0], [0, 0, 1, 0], [], []>} : vector<8x8xf32>, vector<8x8xf32>, vector<8x8xf32> -> vector<8x8xf32>
    %cst_19 = arith.constant 0.353553385 : f32
    %49 = vector.broadcast %cst_19 : f32 to vector<8x8xf32>
    %50 = arith.mulf %48, %49 : vector<8x8xf32>
    %cst_20 = arith.constant dense<0xFF800000> : vector<8xf32>
    %51 = vector.multi_reduction <maximumf>, %50, %cst_20 [1] : vector<8x8xf32> to vector<8xf32>
    %52 = vector.shape_cast %51 : vector<8xf32> to vector<8x1xf32>
    %53 = vector.broadcast %52 : vector<8x1xf32> to vector<8x8xf32>
    %54 = arith.subf %50, %53 : vector<8x8xf32>
    %55 = math.exp %54 : vector<8x8xf32>
    %cst_21 = arith.constant dense<0.000000e+00> : vector<8xf32>
    %56 = vector.multi_reduction <add>, %55, %cst_21 [1] : vector<8x8xf32> to vector<8xf32>
    %57 = vector.shape_cast %56 : vector<8xf32> to vector<8x1xf32>
    %58 = tpu.reciprocal %57 {approx = true} : vector<8x1xf32> -> vector<8x1xf32>
    %59 = vector.broadcast %58 : vector<8x1xf32> to vector<8x8xf32>
    %60 = arith.mulf %55, %59 : vector<8x8xf32>
    %cst_22 = arith.constant dense<0.000000e+00> : vector<8x8xf32>
    %61 = tpu.matmul %60, %47, %cst_22 {dimension_numbers = #tpu.dot_dimension_numbers<[1], [0], [0], [1], [0, 0, 1, 1], [], []>} : vector<8x8xf32>, vector<8x8xf32>, vector<8x8xf32> -> vector<8x8xf32>
    %c0_23 = arith.constant 0 : index
    %c16 = arith.constant 16 : index
    %62 = vector.load %arg14[%c0_23, %c16] : memref<16x32xf32, #tpu.memory_space<vmem>>, vector<8x8xf32>
    tpu.vector_store %arg14[%c0_23, %c16], %61 {strides = array<i32>} : memref<16x32xf32, #tpu.memory_space<vmem>>, vector<8x8xf32>,
    %63 = vector.extract_strided_slice %6 {offsets = [0, 24], sizes = [8, 8], strides = [1, 1]} : vector<16x32xf32> to vector<8x8xf32>
    %64 = vector.extract_strided_slice %7 {offsets = [0, 24], sizes = [8, 8], strides = [1, 1]} : vector<16x32xf32> to vector<8x8xf32>
    %65 = vector.extract_strided_slice %8 {offsets = [0, 24], sizes = [8, 8], strides = [1, 1]} : vector<16x32xf32> to vector<8x8xf32>
    %cst_24 = arith.constant dense<0.000000e+00> : vector<8x8xf32>
    %66 = tpu.matmul %63, %64, %cst_24 {dimension_numbers = #tpu.dot_dimension_numbers<[1], [1], [0], [0], [0, 0, 1, 0], [], []>} : vector<8x8xf32>, vector<8x8xf32>, vector<8x8xf32> -> vector<8x8xf32>
    %cst_25 = arith.constant 0.353553385 : f32
    %67 = vector.broadcast %cst_25 : f32 to vector<8x8xf32>
    %68 = arith.mulf %66, %67 : vector<8x8xf32>
    %cst_26 = arith.constant dense<0xFF800000> : vector<8xf32>
    %69 = vector.multi_reduction <maximumf>, %68, %cst_26 [1] : vector<8x8xf32> to vector<8xf32>
    %70 = vector.shape_cast %69 : vector<8xf32> to vector<8x1xf32>
    %71 = vector.broadcast %70 : vector<8x1xf32> to vector<8x8xf32>
    %72 = arith.subf %68, %71 : vector<8x8xf32>
    %73 = math.exp %72 : vector<8x8xf32>
    %cst_27 = arith.constant dense<0.000000e+00> : vector<8xf32>
    %74 = vector.multi_reduction <add>, %73, %cst_27 [1] : vector<8x8xf32> to vector<8xf32>
    %75 = vector.shape_cast %74 : vector<8xf32> to vector<8x1xf32>
    %76 = tpu.reciprocal %75 {approx = true} : vector<8x1xf32> -> vector<8x1xf32>
    %77 = vector.broadcast %76 : vector<8x1xf32> to vector<8x8xf32>
    %78 = arith.mulf %73, %77 : vector<8x8xf32>
    %cst_28 = arith.constant dense<0.000000e+00> : vector<8x8xf32>
    %79 = tpu.matmul %78, %65, %cst_28 {dimension_numbers = #tpu.dot_dimension_numbers<[1], [0], [0], [1], [0, 0, 1, 1], [], []>} : vector<8x8xf32>, vector<8x8xf32>, vector<8x8xf32> -> vector<8x8xf32>
    %c0_29 = arith.constant 0 : index
    %c24 = arith.constant 24 : index
    %80 = vector.load %arg14[%c0_29, %c24] : memref<16x32xf32, #tpu.memory_space<vmem>>, vector<8x8xf32>
    tpu.vector_store %arg14[%c0_29, %c24], %79 {strides = array<i32>} : memref<16x32xf32, #tpu.memory_space<vmem>>, vector<8x8xf32>,
    %81 = vector.extract_strided_slice %6 {offsets = [8, 0], sizes = [8, 8], strides = [1, 1]} : vector<16x32xf32> to vector<8x8xf32>
    %82 = vector.extract_strided_slice %7 {offsets = [8, 0], sizes = [8, 8], strides = [1, 1]} : vector<16x32xf32> to vector<8x8xf32>
    %83 = vector.extract_strided_slice %8 {offsets = [8, 0], sizes = [8, 8], strides = [1, 1]} : vector<16x32xf32> to vector<8x8xf32>
    %cst_30 = arith.constant dense<0.000000e+00> : vector<8x8xf32>
    %84 = tpu.matmul %81, %82, %cst_30 {dimension_numbers = #tpu.dot_dimension_numbers<[1], [1], [0], [0], [0, 0, 1, 0], [], []>} : vector<8x8xf32>, vector<8x8xf32>, vector<8x8xf32> -> vector<8x8xf32>
    %cst_31 = arith.constant 0.353553385 : f32
    %85 = vector.broadcast %cst_31 : f32 to vector<8x8xf32>
    %86 = arith.mulf %84, %85 : vector<8x8xf32>
    %cst_32 = arith.constant dense<0xFF800000> : vector<8xf32>
    %87 = vector.multi_reduction <maximumf>, %86, %cst_32 [1] : vector<8x8xf32> to vector<8xf32>
    %88 = vector.shape_cast %87 : vector<8xf32> to vector<8x1xf32>
    %89 = vector.broadcast %88 : vector<8x1xf32> to vector<8x8xf32>
    %90 = arith.subf %86, %89 : vector<8x8xf32>
    %91 = math.exp %90 : vector<8x8xf32>
    %cst_33 = arith.constant dense<0.000000e+00> : vector<8xf32>
    %92 = vector.multi_reduction <add>, %91, %cst_33 [1] : vector<8x8xf32> to vector<8xf32>
    %93 = vector.shape_cast %92 : vector<8xf32> to vector<8x1xf32>
    %94 = tpu.reciprocal %93 {approx = true} : vector<8x1xf32> -> vector<8x1xf32>
    %95 = vector.broadcast %94 : vector<8x1xf32> to vector<8x8xf32>
    %96 = arith.mulf %91, %95 : vector<8x8xf32>
    %cst_34 = arith.constant dense<0.000000e+00> : vector<8x8xf32>
    %97 = tpu.matmul %96, %83, %cst_34 {dimension_numbers = #tpu.dot_dimension_numbers<[1], [0], [0], [1], [0, 0, 1, 1], [], []>} : vector<8x8xf32>, vector<8x8xf32>, vector<8x8xf32> -> vector<8x8xf32>
    %c8_35 = arith.constant 8 : index
    %c0_36 = arith.constant 0 : index
    %98 = vector.load %arg14[%c8_35, %c0_36] : memref<16x32xf32, #tpu.memory_space<vmem>>, vector<8x8xf32>
    tpu.vector_store %arg14[%c8_35, %c0_36], %97 {strides = array<i32>} : memref<16x32xf32, #tpu.memory_space<vmem>>, vector<8x8xf32>,
    %99 = vector.extract_strided_slice %6 {offsets = [8, 8], sizes = [8, 8], strides = [1, 1]} : vector<16x32xf32> to vector<8x8xf32>
    %100 = vector.extract_strided_slice %7 {offsets = [8, 8], sizes = [8, 8], strides = [1, 1]} : vector<16x32xf32> to vector<8x8xf32>
    %101 = vector.extract_strided_slice %8 {offsets = [8, 8], sizes = [8, 8], strides = [1, 1]} : vector<16x32xf32> to vector<8x8xf32>
    %cst_37 = arith.constant dense<0.000000e+00> : vector<8x8xf32>
    %102 = tpu.matmul %99, %100, %cst_37 {dimension_numbers = #tpu.dot_dimension_numbers<[1], [1], [0], [0], [0, 0, 1, 0], [], []>} : vector<8x8xf32>, vector<8x8xf32>, vector<8x8xf32> -> vector<8x8xf32>
    %cst_38 = arith.constant 0.353553385 : f32
    %103 = vector.broadcast %cst_38 : f32 to vector<8x8xf32>
    %104 = arith.mulf %102, %103 : vector<8x8xf32>
    %cst_39 = arith.constant dense<0xFF800000> : vector<8xf32>
    %105 = vector.multi_reduction <maximumf>, %104, %cst_39 [1] : vector<8x8xf32> to vector<8xf32>
    %106 = vector.shape_cast %105 : vector<8xf32> to vector<8x1xf32>
    %107 = vector.broadcast %106 : vector<8x1xf32> to vector<8x8xf32>
    %108 = arith.subf %104, %107 : vector<8x8xf32>
    %109 = math.exp %108 : vector<8x8xf32>
    %cst_40 = arith.constant dense<0.000000e+00> : vector<8xf32>
    %110 = vector.multi_reduction <add>, %109, %cst_40 [1] : vector<8x8xf32> to vector<8xf32>
    %111 = vector.shape_cast %110 : vector<8xf32> to vector<8x1xf32>
    %112 = tpu.reciprocal %111 {approx = true} : vector<8x1xf32> -> vector<8x1xf32>
    %113 = vector.broadcast %112 : vector<8x1xf32> to vector<8x8xf32>
    %114 = arith.mulf %109, %113 : vector<8x8xf32>
    %cst_41 = arith.constant dense<0.000000e+00> : vector<8x8xf32>
    %115 = tpu.matmul %114, %101, %cst_41 {dimension_numbers = #tpu.dot_dimension_numbers<[1], [0], [0], [1], [0, 0, 1, 1], [], []>} : vector<8x8xf32>, vector<8x8xf32>, vector<8x8xf32> -> vector<8x8xf32>
    %c8_42 = arith.constant 8 : index
    %c8_43 = arith.constant 8 : index
    %116 = vector.load %arg14[%c8_42, %c8_43] : memref<16x32xf32, #tpu.memory_space<vmem>>, vector<8x8xf32>
    tpu.vector_store %arg14[%c8_42, %c8_43], %115 {strides = array<i32>} : memref<16x32xf32, #tpu.memory_space<vmem>>, vector<8x8xf32>,
    %117 = vector.extract_strided_slice %6 {offsets = [8, 16], sizes = [8, 8], strides = [1, 1]} : vector<16x32xf32> to vector<8x8xf32>
    %118 = vector.extract_strided_slice %7 {offsets = [8, 16], sizes = [8, 8], strides = [1, 1]} : vector<16x32xf32> to vector<8x8xf32>
    %119 = vector.extract_strided_slice %8 {offsets = [8, 16], sizes = [8, 8], strides = [1, 1]} : vector<16x32xf32> to vector<8x8xf32>
    %cst_44 = arith.constant dense<0.000000e+00> : vector<8x8xf32>
    %120 = tpu.matmul %117, %118, %cst_44 {dimension_numbers = #tpu.dot_dimension_numbers<[1], [1], [0], [0], [0, 0, 1, 0], [], []>} : vector<8x8xf32>, vector<8x8xf32>, vector<8x8xf32> -> vector<8x8xf32>
    %cst_45 = arith.constant 0.353553385 : f32
    %121 = vector.broadcast %cst_45 : f32 to vector<8x8xf32>
    %122 = arith.mulf %120, %121 : vector<8x8xf32>
    %cst_46 = arith.constant dense<0xFF800000> : vector<8xf32>
    %123 = vector.multi_reduction <maximumf>, %122, %cst_46 [1] : vector<8x8xf32> to vector<8xf32>
    %124 = vector.shape_cast %123 : vector<8xf32> to vector<8x1xf32>
    %125 = vector.broadcast %124 : vector<8x1xf32> to vector<8x8xf32>
    %126 = arith.subf %122, %125 : vector<8x8xf32>
    %127 = math.exp %126 : vector<8x8xf32>
    %cst_47 = arith.constant dense<0.000000e+00> : vector<8xf32>
    %128 = vector.multi_reduction <add>, %127, %cst_47 [1] : vector<8x8xf32> to vector<8xf32>
    %129 = vector.shape_cast %128 : vector<8xf32> to vector<8x1xf32>
    %130 = tpu.reciprocal %129 {approx = true} : vector<8x1xf32> -> vector<8x1xf32>
    %131 = vector.broadcast %130 : vector<8x1xf32> to vector<8x8xf32>
    %132 = arith.mulf %127, %131 : vector<8x8xf32>
    %cst_48 = arith.constant dense<0.000000e+00> : vector<8x8xf32>
    %133 = tpu.matmul %132, %119, %cst_48 {dimension_numbers = #tpu.dot_dimension_numbers<[1], [0], [0], [1], [0, 0, 1, 1], [], []>} : vector<8x8xf32>, vector<8x8xf32>, vector<8x8xf32> -> vector<8x8xf32>
    %c8_49 = arith.constant 8 : index
    %c16_50 = arith.constant 16 : index
    %134 = vector.load %arg14[%c8_49, %c16_50] : memref<16x32xf32, #tpu.memory_space<vmem>>, vector<8x8xf32>
    tpu.vector_store %arg14[%c8_49, %c16_50], %133 {strides = array<i32>} : memref<16x32xf32, #tpu.memory_space<vmem>>, vector<8x8xf32>,
    %135 = vector.extract_strided_slice %6 {offsets = [8, 24], sizes = [8, 8], strides = [1, 1]} : vector<16x32xf32> to vector<8x8xf32>
    %136 = vector.extract_strided_slice %7 {offsets = [8, 24], sizes = [8, 8], strides = [1, 1]} : vector<16x32xf32> to vector<8x8xf32>
    %137 = vector.extract_strided_slice %8 {offsets = [8, 24], sizes = [8, 8], strides = [1, 1]} : vector<16x32xf32> to vector<8x8xf32>
    %cst_51 = arith.constant dense<0.000000e+00> : vector<8x8xf32>
    %138 = tpu.matmul %135, %136, %cst_51 {dimension_numbers = #tpu.dot_dimension_numbers<[1], [1], [0], [0], [0, 0, 1, 0], [], []>} : vector<8x8xf32>, vector<8x8xf32>, vector<8x8xf32> -> vector<8x8xf32>
    %cst_52 = arith.constant 0.353553385 : f32
    %139 = vector.broadcast %cst_52 : f32 to vector<8x8xf32>
    %140 = arith.mulf %138, %139 : vector<8x8xf32>
    %cst_53 = arith.constant dense<0xFF800000> : vector<8xf32>
    %141 = vector.multi_reduction <maximumf>, %140, %cst_53 [1] : vector<8x8xf32> to vector<8xf32>
    %142 = vector.shape_cast %141 : vector<8xf32> to vector<8x1xf32>
    %143 = vector.broadcast %142 : vector<8x1xf32> to vector<8x8xf32>
    %144 = arith.subf %140, %143 : vector<8x8xf32>
    %145 = math.exp %144 : vector<8x8xf32>
    %cst_54 = arith.constant dense<0.000000e+00> : vector<8xf32>
    %146 = vector.multi_reduction <add>, %145, %cst_54 [1] : vector<8x8xf32> to vector<8xf32>
    %147 = vector.shape_cast %146 : vector<8xf32> to vector<8x1xf32>
    %148 = tpu.reciprocal %147 {approx = true} : vector<8x1xf32> -> vector<8x1xf32>
    %149 = vector.broadcast %148 : vector<8x1xf32> to vector<8x8xf32>
    %150 = arith.mulf %145, %149 : vector<8x8xf32>
    %cst_55 = arith.constant dense<0.000000e+00> : vector<8x8xf32>
    %151 = tpu.matmul %150, %137, %cst_55 {dimension_numbers = #tpu.dot_dimension_numbers<[1], [0], [0], [1], [0, 0, 1, 1], [], []>} : vector<8x8xf32>, vector<8x8xf32>, vector<8x8xf32> -> vector<8x8xf32>
    %c8_56 = arith.constant 8 : index
    %c24_57 = arith.constant 24 : index
    %152 = vector.load %arg14[%c8_56, %c24_57] : memref<16x32xf32, #tpu.memory_space<vmem>>, vector<8x8xf32>
    tpu.vector_store %arg14[%c8_56, %c24_57], %151 {strides = array<i32>} : memref<16x32xf32, #tpu.memory_space<vmem>>, vector<8x8xf32>,
    %c0_58 = arith.constant 0 : index
    %c0_59 = arith.constant 0 : index
    %153 = vector.load %arg14[%c0_58, %c0_59] : memref<16x32xf32, #tpu.memory_space<vmem>>, vector<16x32xf32>
    %c0_60 = arith.constant 0 : index
    %c0_61 = arith.constant 0 : index
    %154 = vector.load %arg3[%c0_60, %c0_61] : memref<32x32xf32, #tpu.memory_space<vmem>>, vector<32x32xf32>
    %cst_62 = arith.constant dense<0.000000e+00> : vector<16x32xf32>
    %155 = tpu.matmul %153, %154, %cst_62 {dimension_numbers = #tpu.dot_dimension_numbers<[1], [0], [0], [1], [0, 0, 1, 1], [], []>} : vector<16x32xf32>, vector<32x32xf32>, vector<16x32xf32> -> vector<16x32xf32>
    %c0_63 = arith.constant 0 : index
    %c0_64 = arith.constant 0 : index
    %156 = vector.load %arg4[%c0_63, %c0_64] : memref<1x32xf32, #tpu.memory_space<vmem>>, vector<1x32xf32>
    %157 = vector.broadcast %156 : vector<1x32xf32> to vector<16x32xf32>
    %158 = arith.addf %155, %157 : vector<16x32xf32>
    %159 = arith.addf %0, %158 : vector<16x32xf32>
    %c0_65 = arith.constant 0 : index
    %c0_66 = arith.constant 0 : index
    %160 = vector.load %arg5[%c0_65, %c0_66] : memref<1x32xf32, #tpu.memory_space<vmem>>, vector<1x32xf32>
    %c0_67 = arith.constant 0 : index
    %c0_68 = arith.constant 0 : index
    %161 = vector.load %arg6[%c0_67, %c0_68] : memref<1x32xf32, #tpu.memory_space<vmem>>, vector<1x32xf32>
    %cst_69 = arith.constant dense<0.000000e+00> : vector<16xf32>
    %162 = vector.multi_reduction <add>, %159, %cst_69 [1] : vector<16x32xf32> to vector<16xf32>
    %163 = vector.shape_cast %162 : vector<16xf32> to vector<16x1xf32>
    %cst_70 = arith.constant 3.200000e+01 : f32
    %164 = vector.broadcast %cst_70 : f32 to vector<16x1xf32>
    %165 = arith.divf %163, %164 : vector<16x1xf32>
    %166 = vector.broadcast %165 : vector<16x1xf32> to vector<16x32xf32>
    %167 = arith.subf %159, %166 : vector<16x32xf32>
    %168 = arith.mulf %167, %167 : vector<16x32xf32>
    %cst_71 = arith.constant dense<0.000000e+00> : vector<16xf32>
    %169 = vector.multi_reduction <add>, %168, %cst_71 [1] : vector<16x32xf32> to vector<16xf32>
    %170 = vector.shape_cast %169 : vector<16xf32> to vector<16x1xf32>
    %cst_72 = arith.constant 3.200000e+01 : f32
    %171 = vector.broadcast %cst_72 : f32 to vector<16x1xf32>
    %172 = arith.divf %170, %171 : vector<16x1xf32>
    %173 = vector.broadcast %165 : vector<16x1xf32> to vector<16x32xf32>
    %174 = arith.subf %159, %173 : vector<16x32xf32>
    %cst_73 = arith.constant 9.99999974E-6 : f32
    %175 = vector.broadcast %cst_73 : f32 to vector<16x1xf32>
    %176 = arith.addf %172, %175 : vector<16x1xf32>
    %177 = math.rsqrt %176 : vector<16x1xf32>
    %178 = vector.broadcast %177 : vector<16x1xf32> to vector<16x32xf32>
    %179 = arith.mulf %174, %178 : vector<16x32xf32>
    %180 = vector.broadcast %160 : vector<1x32xf32> to vector<16x32xf32>
    %181 = arith.mulf %179, %180 : vector<16x32xf32>
    %182 = vector.broadcast %161 : vector<1x32xf32> to vector<16x32xf32>
    %183 = arith.addf %181, %182 : vector<16x32xf32>
    %c0_74 = arith.constant 0 : index
    %c0_75 = arith.constant 0 : index
    %184 = vector.load %arg7[%c0_74, %c0_75] : memref<32x64xf32, #tpu.memory_space<vmem>>, vector<32x64xf32>
    %cst_76 = arith.constant dense<0.000000e+00> : vector<16x64xf32>
    %185 = tpu.matmul %183, %184, %cst_76 {dimension_numbers = #tpu.dot_dimension_numbers<[1], [0], [0], [1], [0, 0, 1, 1], [], []>} : vector<16x32xf32>, vector<32x64xf32>, vector<16x64xf32> -> vector<16x64xf32>
    %c0_77 = arith.constant 0 : index
    %c0_78 = arith.constant 0 : index
    %186 = vector.load %arg8[%c0_77, %c0_78] : memref<1x64xf32, #tpu.memory_space<vmem>>, vector<1x64xf32>
    %187 = vector.broadcast %186 : vector<1x64xf32> to vector<16x64xf32>
    %188 = arith.addf %185, %187 : vector<16x64xf32>
    %cst_79 = arith.constant 0.000000e+00 : f32
    %189 = vector.broadcast %cst_79 : f32 to vector<16x64xf32>
    %190 = arith.maximumf %188, %189 : vector<16x64xf32>
    %c0_80 = arith.constant 0 : index
    %c0_81 = arith.constant 0 : index
    %191 = vector.load %arg9[%c0_80, %c0_81] : memref<64x32xf32, #tpu.memory_space<vmem>>, vector<64x32xf32>
    %cst_82 = arith.constant dense<0.000000e+00> : vector<16x32xf32>
    %192 = tpu.matmul %190, %191, %cst_82 {dimension_numbers = #tpu.dot_dimension_numbers<[1], [0], [0], [1], [0, 0, 1, 1], [], []>} : vector<16x64xf32>, vector<64x32xf32>, vector<16x32xf32> -> vector<16x32xf32>
    %c0_83 = arith.constant 0 : index
    %c0_84 = arith.constant 0 : index
    %193 = vector.load %arg10[%c0_83, %c0_84] : memref<1x32xf32, #tpu.memory_space<vmem>>, vector<1x32xf32>
    %194 = vector.broadcast %193 : vector<1x32xf32> to vector<16x32xf32>
    %195 = arith.addf %192, %194 : vector<16x32xf32>
    %196 = arith.addf %183, %195 : vector<16x32xf32>
    %c0_85 = arith.constant 0 : index
    %c0_86 = arith.constant 0 : index
    %197 = vector.load %arg11[%c0_85, %c0_86] : memref<1x32xf32, #tpu.memory_space<vmem>>, vector<1x32xf32>
    %c0_87 = arith.constant 0 : index
    %c0_88 = arith.constant 0 : index
    %198 = vector.load %arg12[%c0_87, %c0_88] : memref<1x32xf32, #tpu.memory_space<vmem>>, vector<1x32xf32>
    %cst_89 = arith.constant dense<0.000000e+00> : vector<16xf32>
    %199 = vector.multi_reduction <add>, %196, %cst_89 [1] : vector<16x32xf32> to vector<16xf32>
    %200 = vector.shape_cast %199 : vector<16xf32> to vector<16x1xf32>
    %cst_90 = arith.constant 3.200000e+01 : f32
    %201 = vector.broadcast %cst_90 : f32 to vector<16x1xf32>
    %202 = arith.divf %200, %201 : vector<16x1xf32>
    %203 = vector.broadcast %202 : vector<16x1xf32> to vector<16x32xf32>
    %204 = arith.subf %196, %203 : vector<16x32xf32>
    %205 = arith.mulf %204, %204 : vector<16x32xf32>
    %cst_91 = arith.constant dense<0.000000e+00> : vector<16xf32>
    %206 = vector.multi_reduction <add>, %205, %cst_91 [1] : vector<16x32xf32> to vector<16xf32>
    %207 = vector.shape_cast %206 : vector<16xf32> to vector<16x1xf32>
    %cst_92 = arith.constant 3.200000e+01 : f32
    %208 = vector.broadcast %cst_92 : f32 to vector<16x1xf32>
    %209 = arith.divf %207, %208 : vector<16x1xf32>
    %210 = vector.broadcast %202 : vector<16x1xf32> to vector<16x32xf32>
    %211 = arith.subf %196, %210 : vector<16x32xf32>
    %cst_93 = arith.constant 9.99999974E-6 : f32
    %212 = vector.broadcast %cst_93 : f32 to vector<16x1xf32>
    %213 = arith.addf %209, %212 : vector<16x1xf32>
    %214 = math.rsqrt %213 : vector<16x1xf32>
    %215 = vector.broadcast %214 : vector<16x1xf32> to vector<16x32xf32>
    %216 = arith.mulf %211, %215 : vector<16x32xf32>
    %217 = vector.broadcast %197 : vector<1x32xf32> to vector<16x32xf32>
    %218 = arith.mulf %216, %217 : vector<16x32xf32>
    %219 = vector.broadcast %198 : vector<1x32xf32> to vector<16x32xf32>
    %220 = arith.addf %218, %219 : vector<16x32xf32>
    %c0_94 = arith.constant 0 : index
    %c0_95 = arith.constant 0 : index
    %221 = vector.load %arg13[%c0_94, %c0_95] : memref<16x32xf32, #tpu.memory_space<vmem>>, vector<16x32xf32>
    tpu.vector_store %arg13[%c0_94, %c0_95], %220 {strides = array<i32>} : memref<16x32xf32, #tpu.memory_space<vmem>>, vector<16x32xf32>,
    return
  }
}

module attributes {stable_mosaic.version = 11 : i64} {
  func.func @_dec_layer_kernel(%arg0: memref<8x32xf32, #tpu.memory_space<vmem>>, %arg1: memref<16x32xf32, #tpu.memory_space<vmem>>, %arg2: memref<32x96xf32, #tpu.memory_space<vmem>>, %arg3: memref<1x96xf32, #tpu.memory_space<vmem>>, %arg4: memref<32x32xf32, #tpu.memory_space<vmem>>, %arg5: memref<1x32xf32, #tpu.memory_space<vmem>>, %arg6: memref<1x32xf32, #tpu.memory_space<vmem>>, %arg7: memref<1x32xf32, #tpu.memory_space<vmem>>, %arg8: memref<32x96xf32, #tpu.memory_space<vmem>>, %arg9: memref<1x96xf32, #tpu.memory_space<vmem>>, %arg10: memref<32x32xf32, #tpu.memory_space<vmem>>, %arg11: memref<1x32xf32, #tpu.memory_space<vmem>>, %arg12: memref<1x32xf32, #tpu.memory_space<vmem>>, %arg13: memref<1x32xf32, #tpu.memory_space<vmem>>, %arg14: memref<32x64xf32, #tpu.memory_space<vmem>>, %arg15: memref<1x64xf32, #tpu.memory_space<vmem>>, %arg16: memref<64x32xf32, #tpu.memory_space<vmem>>, %arg17: memref<1x32xf32, #tpu.memory_space<vmem>>, %arg18: memref<1x32xf32, #tpu.memory_space<vmem>>, %arg19: memref<1x32xf32, #tpu.memory_space<vmem>>, %arg20: memref<8x32xf32, #tpu.memory_space<vmem>>, %arg21: memref<8x32xf32, #tpu.memory_space<vmem>>) attributes {dimension_semantics = [], scalar_prefetch = 0 : i64, scratch_operands = 1 : i64, tpu.core_type = #tpu.core_type<tc>} {
    %c0 = arith.constant 0 : index
    %c0_0 = arith.constant 0 : index
    %0 = vector.load %arg0[%c0, %c0_0] : memref<8x32xf32, #tpu.memory_space<vmem>>, vector<8x32xf32>
    %c0_1 = arith.constant 0 : index
    %c0_2 = arith.constant 0 : index
    %1 = vector.load %arg1[%c0_1, %c0_2] : memref<16x32xf32, #tpu.memory_space<vmem>>, vector<16x32xf32>
    %c0_3 = arith.constant 0 : index
    %c0_4 = arith.constant 0 : index
    %2 = vector.load %arg2[%c0_3, %c0_4] : memref<32x96xf32, #tpu.memory_space<vmem>>, vector<32x96xf32>
    %cst = arith.constant dense<0.000000e+00> : vector<8x96xf32>
    %3 = tpu.matmul %0, %2, %cst {dimension_numbers = #tpu.dot_dimension_numbers<[1], [0], [0], [1], [0, 0, 1, 1], [], []>} : vector<8x32xf32>, vector<32x96xf32>, vector<8x96xf32> -> vector<8x96xf32>
    %c0_5 = arith.constant 0 : index
    %c0_6 = arith.constant 0 : index
    %4 = vector.load %arg3[%c0_5, %c0_6] : memref<1x96xf32, #tpu.memory_space<vmem>>, vector<1x96xf32>
    %5 = vector.broadcast %4 : vector<1x96xf32> to vector<8x96xf32>
    %6 = arith.addf %3, %5 : vector<8x96xf32>
    %7 = vector.extract_strided_slice %6 {offsets = [0, 0], sizes = [8, 32], strides = [1, 1]} : vector<8x96xf32> to vector<8x32xf32>
    %8 = vector.extract_strided_slice %6 {offsets = [0, 32], sizes = [8, 32], strides = [1, 1]} : vector<8x96xf32> to vector<8x32xf32>
    %9 = vector.extract_strided_slice %6 {offsets = [0, 64], sizes = [8, 32], strides = [1, 1]} : vector<8x96xf32> to vector<8x32xf32>
    %10 = vector.extract_strided_slice %7 {offsets = [0, 0], sizes = [4, 8], strides = [1, 1]} : vector<8x32xf32> to vector<4x8xf32>
    %11 = vector.extract_strided_slice %8 {offsets = [0, 0], sizes = [4, 8], strides = [1, 1]} : vector<8x32xf32> to vector<4x8xf32>
    %12 = vector.extract_strided_slice %9 {offsets = [0, 0], sizes = [4, 8], strides = [1, 1]} : vector<8x32xf32> to vector<4x8xf32>
    %cst_7 = arith.constant dense<0.000000e+00> : vector<4x4xf32>
    %13 = tpu.matmul %10, %11, %cst_7 {dimension_numbers = #tpu.dot_dimension_numbers<[1], [1], [0], [0], [0, 0, 1, 0], [], []>} : vector<4x8xf32>, vector<4x8xf32>, vector<4x4xf32> -> vector<4x4xf32>
    %cst_8 = arith.constant 0.353553385 : f32
    %14 = vector.broadcast %cst_8 : f32 to vector<4x4xf32>
    %15 = arith.mulf %13, %14 : vector<4x4xf32>
    %cst_9 = arith.constant dense<0xFF800000> : vector<4xf32>
    %16 = vector.multi_reduction <maximumf>, %15, %cst_9 [1] : vector<4x4xf32> to vector<4xf32>
    %17 = vector.shape_cast %16 : vector<4xf32> to vector<4x1xf32>
    %18 = vector.broadcast %17 : vector<4x1xf32> to vector<4x4xf32>
    %19 = arith.subf %15, %18 : vector<4x4xf32>
    %20 = math.exp %19 : vector<4x4xf32>
    %cst_10 = arith.constant dense<0.000000e+00> : vector<4xf32>
    %21 = vector.multi_reduction <add>, %20, %cst_10 [1] : vector<4x4xf32> to vector<4xf32>
    %22 = vector.shape_cast %21 : vector<4xf32> to vector<4x1xf32>
    %23 = tpu.reciprocal %22 {approx = true} : vector<4x1xf32> -> vector<4x1xf32>
    %24 = vector.broadcast %23 : vector<4x1xf32> to vector<4x4xf32>
    %25 = arith.mulf %20, %24 : vector<4x4xf32>
    %cst_11 = arith.constant dense<0.000000e+00> : vector<4x8xf32>
    %26 = tpu.matmul %25, %12, %cst_11 {dimension_numbers = #tpu.dot_dimension_numbers<[1], [0], [0], [1], [0, 0, 1, 1], [], []>} : vector<4x4xf32>, vector<4x8xf32>, vector<4x8xf32> -> vector<4x8xf32>
    %c0_12 = arith.constant 0 : index
    %c0_13 = arith.constant 0 : index
    %27 = vector.load %arg21[%c0_12, %c0_13] : memref<8x32xf32, #tpu.memory_space<vmem>>, vector<4x8xf32>
    tpu.vector_store %arg21[%c0_12, %c0_13], %26 {strides = array<i32>} : memref<8x32xf32, #tpu.memory_space<vmem>>, vector<4x8xf32>,
    %28 = vector.extract_strided_slice %7 {offsets = [0, 8], sizes = [4, 8], strides = [1, 1]} : vector<8x32xf32> to vector<4x8xf32>
    %29 = vector.extract_strided_slice %8 {offsets = [0, 8], sizes = [4, 8], strides = [1, 1]} : vector<8x32xf32> to vector<4x8xf32>
    %30 = vector.extract_strided_slice %9 {offsets = [0, 8], sizes = [4, 8], strides = [1, 1]} : vector<8x32xf32> to vector<4x8xf32>
    %cst_14 = arith.constant dense<0.000000e+00> : vector<4x4xf32>
    %31 = tpu.matmul %28, %29, %cst_14 {dimension_numbers = #tpu.dot_dimension_numbers<[1], [1], [0], [0], [0, 0, 1, 0], [], []>} : vector<4x8xf32>, vector<4x8xf32>, vector<4x4xf32> -> vector<4x4xf32>
    %cst_15 = arith.constant 0.353553385 : f32
    %32 = vector.broadcast %cst_15 : f32 to vector<4x4xf32>
    %33 = arith.mulf %31, %32 : vector<4x4xf32>
    %cst_16 = arith.constant dense<0xFF800000> : vector<4xf32>
    %34 = vector.multi_reduction <maximumf>, %33, %cst_16 [1] : vector<4x4xf32> to vector<4xf32>
    %35 = vector.shape_cast %34 : vector<4xf32> to vector<4x1xf32>
    %36 = vector.broadcast %35 : vector<4x1xf32> to vector<4x4xf32>
    %37 = arith.subf %33, %36 : vector<4x4xf32>
    %38 = math.exp %37 : vector<4x4xf32>
    %cst_17 = arith.constant dense<0.000000e+00> : vector<4xf32>
    %39 = vector.multi_reduction <add>, %38, %cst_17 [1] : vector<4x4xf32> to vector<4xf32>
    %40 = vector.shape_cast %39 : vector<4xf32> to vector<4x1xf32>
    %41 = tpu.reciprocal %40 {approx = true} : vector<4x1xf32> -> vector<4x1xf32>
    %42 = vector.broadcast %41 : vector<4x1xf32> to vector<4x4xf32>
    %43 = arith.mulf %38, %42 : vector<4x4xf32>
    %cst_18 = arith.constant dense<0.000000e+00> : vector<4x8xf32>
    %44 = tpu.matmul %43, %30, %cst_18 {dimension_numbers = #tpu.dot_dimension_numbers<[1], [0], [0], [1], [0, 0, 1, 1], [], []>} : vector<4x4xf32>, vector<4x8xf32>, vector<4x8xf32> -> vector<4x8xf32>
    %c0_19 = arith.constant 0 : index
    %c8 = arith.constant 8 : index
    %45 = vector.load %arg21[%c0_19, %c8] : memref<8x32xf32, #tpu.memory_space<vmem>>, vector<4x8xf32>
    tpu.vector_store %arg21[%c0_19, %c8], %44 {strides = array<i32>} : memref<8x32xf32, #tpu.memory_space<vmem>>, vector<4x8xf32>,
    %46 = vector.extract_strided_slice %7 {offsets = [0, 16], sizes = [4, 8], strides = [1, 1]} : vector<8x32xf32> to vector<4x8xf32>
    %47 = vector.extract_strided_slice %8 {offsets = [0, 16], sizes = [4, 8], strides = [1, 1]} : vector<8x32xf32> to vector<4x8xf32>
    %48 = vector.extract_strided_slice %9 {offsets = [0, 16], sizes = [4, 8], strides = [1, 1]} : vector<8x32xf32> to vector<4x8xf32>
    %cst_20 = arith.constant dense<0.000000e+00> : vector<4x4xf32>
    %49 = tpu.matmul %46, %47, %cst_20 {dimension_numbers = #tpu.dot_dimension_numbers<[1], [1], [0], [0], [0, 0, 1, 0], [], []>} : vector<4x8xf32>, vector<4x8xf32>, vector<4x4xf32> -> vector<4x4xf32>
    %cst_21 = arith.constant 0.353553385 : f32
    %50 = vector.broadcast %cst_21 : f32 to vector<4x4xf32>
    %51 = arith.mulf %49, %50 : vector<4x4xf32>
    %cst_22 = arith.constant dense<0xFF800000> : vector<4xf32>
    %52 = vector.multi_reduction <maximumf>, %51, %cst_22 [1] : vector<4x4xf32> to vector<4xf32>
    %53 = vector.shape_cast %52 : vector<4xf32> to vector<4x1xf32>
    %54 = vector.broadcast %53 : vector<4x1xf32> to vector<4x4xf32>
    %55 = arith.subf %51, %54 : vector<4x4xf32>
    %56 = math.exp %55 : vector<4x4xf32>
    %cst_23 = arith.constant dense<0.000000e+00> : vector<4xf32>
    %57 = vector.multi_reduction <add>, %56, %cst_23 [1] : vector<4x4xf32> to vector<4xf32>
    %58 = vector.shape_cast %57 : vector<4xf32> to vector<4x1xf32>
    %59 = tpu.reciprocal %58 {approx = true} : vector<4x1xf32> -> vector<4x1xf32>
    %60 = vector.broadcast %59 : vector<4x1xf32> to vector<4x4xf32>
    %61 = arith.mulf %56, %60 : vector<4x4xf32>
    %cst_24 = arith.constant dense<0.000000e+00> : vector<4x8xf32>
    %62 = tpu.matmul %61, %48, %cst_24 {dimension_numbers = #tpu.dot_dimension_numbers<[1], [0], [0], [1], [0, 0, 1, 1], [], []>} : vector<4x4xf32>, vector<4x8xf32>, vector<4x8xf32> -> vector<4x8xf32>
    %c0_25 = arith.constant 0 : index
    %c16 = arith.constant 16 : index
    %63 = vector.load %arg21[%c0_25, %c16] : memref<8x32xf32, #tpu.memory_space<vmem>>, vector<4x8xf32>
    tpu.vector_store %arg21[%c0_25, %c16], %62 {strides = array<i32>} : memref<8x32xf32, #tpu.memory_space<vmem>>, vector<4x8xf32>,
    %64 = vector.extract_strided_slice %7 {offsets = [0, 24], sizes = [4, 8], strides = [1, 1]} : vector<8x32xf32> to vector<4x8xf32>
    %65 = vector.extract_strided_slice %8 {offsets = [0, 24], sizes = [4, 8], strides = [1, 1]} : vector<8x32xf32> to vector<4x8xf32>
    %66 = vector.extract_strided_slice %9 {offsets = [0, 24], sizes = [4, 8], strides = [1, 1]} : vector<8x32xf32> to vector<4x8xf32>
    %cst_26 = arith.constant dense<0.000000e+00> : vector<4x4xf32>
    %67 = tpu.matmul %64, %65, %cst_26 {dimension_numbers = #tpu.dot_dimension_numbers<[1], [1], [0], [0], [0, 0, 1, 0], [], []>} : vector<4x8xf32>, vector<4x8xf32>, vector<4x4xf32> -> vector<4x4xf32>
    %cst_27 = arith.constant 0.353553385 : f32
    %68 = vector.broadcast %cst_27 : f32 to vector<4x4xf32>
    %69 = arith.mulf %67, %68 : vector<4x4xf32>
    %cst_28 = arith.constant dense<0xFF800000> : vector<4xf32>
    %70 = vector.multi_reduction <maximumf>, %69, %cst_28 [1] : vector<4x4xf32> to vector<4xf32>
    %71 = vector.shape_cast %70 : vector<4xf32> to vector<4x1xf32>
    %72 = vector.broadcast %71 : vector<4x1xf32> to vector<4x4xf32>
    %73 = arith.subf %69, %72 : vector<4x4xf32>
    %74 = math.exp %73 : vector<4x4xf32>
    %cst_29 = arith.constant dense<0.000000e+00> : vector<4xf32>
    %75 = vector.multi_reduction <add>, %74, %cst_29 [1] : vector<4x4xf32> to vector<4xf32>
    %76 = vector.shape_cast %75 : vector<4xf32> to vector<4x1xf32>
    %77 = tpu.reciprocal %76 {approx = true} : vector<4x1xf32> -> vector<4x1xf32>
    %78 = vector.broadcast %77 : vector<4x1xf32> to vector<4x4xf32>
    %79 = arith.mulf %74, %78 : vector<4x4xf32>
    %cst_30 = arith.constant dense<0.000000e+00> : vector<4x8xf32>
    %80 = tpu.matmul %79, %66, %cst_30 {dimension_numbers = #tpu.dot_dimension_numbers<[1], [0], [0], [1], [0, 0, 1, 1], [], []>} : vector<4x4xf32>, vector<4x8xf32>, vector<4x8xf32> -> vector<4x8xf32>
    %c0_31 = arith.constant 0 : index
    %c24 = arith.constant 24 : index
    %81 = vector.load %arg21[%c0_31, %c24] : memref<8x32xf32, #tpu.memory_space<vmem>>, vector<4x8xf32>
    tpu.vector_store %arg21[%c0_31, %c24], %80 {strides = array<i32>} : memref<8x32xf32, #tpu.memory_space<vmem>>, vector<4x8xf32>,
    %82 = vector.extract_strided_slice %7 {offsets = [4, 0], sizes = [4, 8], strides = [1, 1]} : vector<8x32xf32> to vector<4x8xf32>
    %83 = vector.extract_strided_slice %8 {offsets = [4, 0], sizes = [4, 8], strides = [1, 1]} : vector<8x32xf32> to vector<4x8xf32>
    %84 = vector.extract_strided_slice %9 {offsets = [4, 0], sizes = [4, 8], strides = [1, 1]} : vector<8x32xf32> to vector<4x8xf32>
    %cst_32 = arith.constant dense<0.000000e+00> : vector<4x4xf32>
    %85 = tpu.matmul %82, %83, %cst_32 {dimension_numbers = #tpu.dot_dimension_numbers<[1], [1], [0], [0], [0, 0, 1, 0], [], []>} : vector<4x8xf32>, vector<4x8xf32>, vector<4x4xf32> -> vector<4x4xf32>
    %cst_33 = arith.constant 0.353553385 : f32
    %86 = vector.broadcast %cst_33 : f32 to vector<4x4xf32>
    %87 = arith.mulf %85, %86 : vector<4x4xf32>
    %cst_34 = arith.constant dense<0xFF800000> : vector<4xf32>
    %88 = vector.multi_reduction <maximumf>, %87, %cst_34 [1] : vector<4x4xf32> to vector<4xf32>
    %89 = vector.shape_cast %88 : vector<4xf32> to vector<4x1xf32>
    %90 = vector.broadcast %89 : vector<4x1xf32> to vector<4x4xf32>
    %91 = arith.subf %87, %90 : vector<4x4xf32>
    %92 = math.exp %91 : vector<4x4xf32>
    %cst_35 = arith.constant dense<0.000000e+00> : vector<4xf32>
    %93 = vector.multi_reduction <add>, %92, %cst_35 [1] : vector<4x4xf32> to vector<4xf32>
    %94 = vector.shape_cast %93 : vector<4xf32> to vector<4x1xf32>
    %95 = tpu.reciprocal %94 {approx = true} : vector<4x1xf32> -> vector<4x1xf32>
    %96 = vector.broadcast %95 : vector<4x1xf32> to vector<4x4xf32>
    %97 = arith.mulf %92, %96 : vector<4x4xf32>
    %cst_36 = arith.constant dense<0.000000e+00> : vector<4x8xf32>
    %98 = tpu.matmul %97, %84, %cst_36 {dimension_numbers = #tpu.dot_dimension_numbers<[1], [0], [0], [1], [0, 0, 1, 1], [], []>} : vector<4x4xf32>, vector<4x8xf32>, vector<4x8xf32> -> vector<4x8xf32>
    %c4 = arith.constant 4 : index
    %c0_37 = arith.constant 0 : index
    %99 = vector.load %arg21[%c4, %c0_37] : memref<8x32xf32, #tpu.memory_space<vmem>>, vector<4x8xf32>
    tpu.vector_store %arg21[%c4, %c0_37], %98 {strides = array<i32>} : memref<8x32xf32, #tpu.memory_space<vmem>>, vector<4x8xf32>,
    %100 = vector.extract_strided_slice %7 {offsets = [4, 8], sizes = [4, 8], strides = [1, 1]} : vector<8x32xf32> to vector<4x8xf32>
    %101 = vector.extract_strided_slice %8 {offsets = [4, 8], sizes = [4, 8], strides = [1, 1]} : vector<8x32xf32> to vector<4x8xf32>
    %102 = vector.extract_strided_slice %9 {offsets = [4, 8], sizes = [4, 8], strides = [1, 1]} : vector<8x32xf32> to vector<4x8xf32>
    %cst_38 = arith.constant dense<0.000000e+00> : vector<4x4xf32>
    %103 = tpu.matmul %100, %101, %cst_38 {dimension_numbers = #tpu.dot_dimension_numbers<[1], [1], [0], [0], [0, 0, 1, 0], [], []>} : vector<4x8xf32>, vector<4x8xf32>, vector<4x4xf32> -> vector<4x4xf32>
    %cst_39 = arith.constant 0.353553385 : f32
    %104 = vector.broadcast %cst_39 : f32 to vector<4x4xf32>
    %105 = arith.mulf %103, %104 : vector<4x4xf32>
    %cst_40 = arith.constant dense<0xFF800000> : vector<4xf32>
    %106 = vector.multi_reduction <maximumf>, %105, %cst_40 [1] : vector<4x4xf32> to vector<4xf32>
    %107 = vector.shape_cast %106 : vector<4xf32> to vector<4x1xf32>
    %108 = vector.broadcast %107 : vector<4x1xf32> to vector<4x4xf32>
    %109 = arith.subf %105, %108 : vector<4x4xf32>
    %110 = math.exp %109 : vector<4x4xf32>
    %cst_41 = arith.constant dense<0.000000e+00> : vector<4xf32>
    %111 = vector.multi_reduction <add>, %110, %cst_41 [1] : vector<4x4xf32> to vector<4xf32>
    %112 = vector.shape_cast %111 : vector<4xf32> to vector<4x1xf32>
    %113 = tpu.reciprocal %112 {approx = true} : vector<4x1xf32> -> vector<4x1xf32>
    %114 = vector.broadcast %113 : vector<4x1xf32> to vector<4x4xf32>
    %115 = arith.mulf %110, %114 : vector<4x4xf32>
    %cst_42 = arith.constant dense<0.000000e+00> : vector<4x8xf32>
    %116 = tpu.matmul %115, %102, %cst_42 {dimension_numbers = #tpu.dot_dimension_numbers<[1], [0], [0], [1], [0, 0, 1, 1], [], []>} : vector<4x4xf32>, vector<4x8xf32>, vector<4x8xf32> -> vector<4x8xf32>
    %c4_43 = arith.constant 4 : index
    %c8_44 = arith.constant 8 : index
    %117 = vector.load %arg21[%c4_43, %c8_44] : memref<8x32xf32, #tpu.memory_space<vmem>>, vector<4x8xf32>
    tpu.vector_store %arg21[%c4_43, %c8_44], %116 {strides = array<i32>} : memref<8x32xf32, #tpu.memory_space<vmem>>, vector<4x8xf32>,
    %118 = vector.extract_strided_slice %7 {offsets = [4, 16], sizes = [4, 8], strides = [1, 1]} : vector<8x32xf32> to vector<4x8xf32>
    %119 = vector.extract_strided_slice %8 {offsets = [4, 16], sizes = [4, 8], strides = [1, 1]} : vector<8x32xf32> to vector<4x8xf32>
    %120 = vector.extract_strided_slice %9 {offsets = [4, 16], sizes = [4, 8], strides = [1, 1]} : vector<8x32xf32> to vector<4x8xf32>
    %cst_45 = arith.constant dense<0.000000e+00> : vector<4x4xf32>
    %121 = tpu.matmul %118, %119, %cst_45 {dimension_numbers = #tpu.dot_dimension_numbers<[1], [1], [0], [0], [0, 0, 1, 0], [], []>} : vector<4x8xf32>, vector<4x8xf32>, vector<4x4xf32> -> vector<4x4xf32>
    %cst_46 = arith.constant 0.353553385 : f32
    %122 = vector.broadcast %cst_46 : f32 to vector<4x4xf32>
    %123 = arith.mulf %121, %122 : vector<4x4xf32>
    %cst_47 = arith.constant dense<0xFF800000> : vector<4xf32>
    %124 = vector.multi_reduction <maximumf>, %123, %cst_47 [1] : vector<4x4xf32> to vector<4xf32>
    %125 = vector.shape_cast %124 : vector<4xf32> to vector<4x1xf32>
    %126 = vector.broadcast %125 : vector<4x1xf32> to vector<4x4xf32>
    %127 = arith.subf %123, %126 : vector<4x4xf32>
    %128 = math.exp %127 : vector<4x4xf32>
    %cst_48 = arith.constant dense<0.000000e+00> : vector<4xf32>
    %129 = vector.multi_reduction <add>, %128, %cst_48 [1] : vector<4x4xf32> to vector<4xf32>
    %130 = vector.shape_cast %129 : vector<4xf32> to vector<4x1xf32>
    %131 = tpu.reciprocal %130 {approx = true} : vector<4x1xf32> -> vector<4x1xf32>
    %132 = vector.broadcast %131 : vector<4x1xf32> to vector<4x4xf32>
    %133 = arith.mulf %128, %132 : vector<4x4xf32>
    %cst_49 = arith.constant dense<0.000000e+00> : vector<4x8xf32>
    %134 = tpu.matmul %133, %120, %cst_49 {dimension_numbers = #tpu.dot_dimension_numbers<[1], [0], [0], [1], [0, 0, 1, 1], [], []>} : vector<4x4xf32>, vector<4x8xf32>, vector<4x8xf32> -> vector<4x8xf32>
    %c4_50 = arith.constant 4 : index
    %c16_51 = arith.constant 16 : index
    %135 = vector.load %arg21[%c4_50, %c16_51] : memref<8x32xf32, #tpu.memory_space<vmem>>, vector<4x8xf32>
    tpu.vector_store %arg21[%c4_50, %c16_51], %134 {strides = array<i32>} : memref<8x32xf32, #tpu.memory_space<vmem>>, vector<4x8xf32>,
    %136 = vector.extract_strided_slice %7 {offsets = [4, 24], sizes = [4, 8], strides = [1, 1]} : vector<8x32xf32> to vector<4x8xf32>
    %137 = vector.extract_strided_slice %8 {offsets = [4, 24], sizes = [4, 8], strides = [1, 1]} : vector<8x32xf32> to vector<4x8xf32>
    %138 = vector.extract_strided_slice %9 {offsets = [4, 24], sizes = [4, 8], strides = [1, 1]} : vector<8x32xf32> to vector<4x8xf32>
    %cst_52 = arith.constant dense<0.000000e+00> : vector<4x4xf32>
    %139 = tpu.matmul %136, %137, %cst_52 {dimension_numbers = #tpu.dot_dimension_numbers<[1], [1], [0], [0], [0, 0, 1, 0], [], []>} : vector<4x8xf32>, vector<4x8xf32>, vector<4x4xf32> -> vector<4x4xf32>
    %cst_53 = arith.constant 0.353553385 : f32
    %140 = vector.broadcast %cst_53 : f32 to vector<4x4xf32>
    %141 = arith.mulf %139, %140 : vector<4x4xf32>
    %cst_54 = arith.constant dense<0xFF800000> : vector<4xf32>
    %142 = vector.multi_reduction <maximumf>, %141, %cst_54 [1] : vector<4x4xf32> to vector<4xf32>
    %143 = vector.shape_cast %142 : vector<4xf32> to vector<4x1xf32>
    %144 = vector.broadcast %143 : vector<4x1xf32> to vector<4x4xf32>
    %145 = arith.subf %141, %144 : vector<4x4xf32>
    %146 = math.exp %145 : vector<4x4xf32>
    %cst_55 = arith.constant dense<0.000000e+00> : vector<4xf32>
    %147 = vector.multi_reduction <add>, %146, %cst_55 [1] : vector<4x4xf32> to vector<4xf32>
    %148 = vector.shape_cast %147 : vector<4xf32> to vector<4x1xf32>
    %149 = tpu.reciprocal %148 {approx = true} : vector<4x1xf32> -> vector<4x1xf32>
    %150 = vector.broadcast %149 : vector<4x1xf32> to vector<4x4xf32>
    %151 = arith.mulf %146, %150 : vector<4x4xf32>
    %cst_56 = arith.constant dense<0.000000e+00> : vector<4x8xf32>
    %152 = tpu.matmul %151, %138, %cst_56 {dimension_numbers = #tpu.dot_dimension_numbers<[1], [0], [0], [1], [0, 0, 1, 1], [], []>} : vector<4x4xf32>, vector<4x8xf32>, vector<4x8xf32> -> vector<4x8xf32>
    %c4_57 = arith.constant 4 : index
    %c24_58 = arith.constant 24 : index
    %153 = vector.load %arg21[%c4_57, %c24_58] : memref<8x32xf32, #tpu.memory_space<vmem>>, vector<4x8xf32>
    tpu.vector_store %arg21[%c4_57, %c24_58], %152 {strides = array<i32>} : memref<8x32xf32, #tpu.memory_space<vmem>>, vector<4x8xf32>,
    %c0_59 = arith.constant 0 : index
    %c0_60 = arith.constant 0 : index
    %154 = vector.load %arg21[%c0_59, %c0_60] : memref<8x32xf32, #tpu.memory_space<vmem>>, vector<8x32xf32>
    %c0_61 = arith.constant 0 : index
    %c0_62 = arith.constant 0 : index
    %155 = vector.load %arg4[%c0_61, %c0_62] : memref<32x32xf32, #tpu.memory_space<vmem>>, vector<32x32xf32>
    %cst_63 = arith.constant dense<0.000000e+00> : vector<8x32xf32>
    %156 = tpu.matmul %154, %155, %cst_63 {dimension_numbers = #tpu.dot_dimension_numbers<[1], [0], [0], [1], [0, 0, 1, 1], [], []>} : vector<8x32xf32>, vector<32x32xf32>, vector<8x32xf32> -> vector<8x32xf32>
    %c0_64 = arith.constant 0 : index
    %c0_65 = arith.constant 0 : index
    %157 = vector.load %arg5[%c0_64, %c0_65] : memref<1x32xf32, #tpu.memory_space<vmem>>, vector<1x32xf32>
    %158 = vector.broadcast %157 : vector<1x32xf32> to vector<8x32xf32>
    %159 = arith.addf %156, %158 : vector<8x32xf32>
    %160 = arith.addf %0, %159 : vector<8x32xf32>
    %c0_66 = arith.constant 0 : index
    %c0_67 = arith.constant 0 : index
    %161 = vector.load %arg6[%c0_66, %c0_67] : memref<1x32xf32, #tpu.memory_space<vmem>>, vector<1x32xf32>
    %c0_68 = arith.constant 0 : index
    %c0_69 = arith.constant 0 : index
    %162 = vector.load %arg7[%c0_68, %c0_69] : memref<1x32xf32, #tpu.memory_space<vmem>>, vector<1x32xf32>
    %cst_70 = arith.constant dense<0.000000e+00> : vector<8xf32>
    %163 = vector.multi_reduction <add>, %160, %cst_70 [1] : vector<8x32xf32> to vector<8xf32>
    %164 = vector.shape_cast %163 : vector<8xf32> to vector<8x1xf32>
    %cst_71 = arith.constant 3.200000e+01 : f32
    %165 = vector.broadcast %cst_71 : f32 to vector<8x1xf32>
    %166 = arith.divf %164, %165 : vector<8x1xf32>
    %167 = vector.broadcast %166 : vector<8x1xf32> to vector<8x32xf32>
    %168 = arith.subf %160, %167 : vector<8x32xf32>
    %169 = arith.mulf %168, %168 : vector<8x32xf32>
    %cst_72 = arith.constant dense<0.000000e+00> : vector<8xf32>
    %170 = vector.multi_reduction <add>, %169, %cst_72 [1] : vector<8x32xf32> to vector<8xf32>
    %171 = vector.shape_cast %170 : vector<8xf32> to vector<8x1xf32>
    %cst_73 = arith.constant 3.200000e+01 : f32
    %172 = vector.broadcast %cst_73 : f32 to vector<8x1xf32>
    %173 = arith.divf %171, %172 : vector<8x1xf32>
    %174 = vector.broadcast %166 : vector<8x1xf32> to vector<8x32xf32>
    %175 = arith.subf %160, %174 : vector<8x32xf32>
    %cst_74 = arith.constant 9.99999974E-6 : f32
    %176 = vector.broadcast %cst_74 : f32 to vector<8x1xf32>
    %177 = arith.addf %173, %176 : vector<8x1xf32>
    %178 = math.rsqrt %177 : vector<8x1xf32>
    %179 = vector.broadcast %178 : vector<8x1xf32> to vector<8x32xf32>
    %180 = arith.mulf %175, %179 : vector<8x32xf32>
    %181 = vector.broadcast %161 : vector<1x32xf32> to vector<8x32xf32>
    %182 = arith.mulf %180, %181 : vector<8x32xf32>
    %183 = vector.broadcast %162 : vector<1x32xf32> to vector<8x32xf32>
    %184 = arith.addf %182, %183 : vector<8x32xf32>
    %c0_75 = arith.constant 0 : index
    %c0_76 = arith.constant 0 : index
    %185 = vector.load %arg8[%c0_75, %c0_76] : memref<32x96xf32, #tpu.memory_space<vmem>>, vector<32x96xf32>
    %c0_77 = arith.constant 0 : index
    %c0_78 = arith.constant 0 : index
    %186 = vector.load %arg9[%c0_77, %c0_78] : memref<1x96xf32, #tpu.memory_space<vmem>>, vector<1x96xf32>
    %187 = vector.extract_strided_slice %185 {offsets = [0, 0], sizes = [32, 32], strides = [1, 1]} : vector<32x96xf32> to vector<32x32xf32>
    %cst_79 = arith.constant dense<0.000000e+00> : vector<8x32xf32>
    %188 = tpu.matmul %184, %187, %cst_79 {dimension_numbers = #tpu.dot_dimension_numbers<[1], [0], [0], [1], [0, 0, 1, 1], [], []>} : vector<8x32xf32>, vector<32x32xf32>, vector<8x32xf32> -> vector<8x32xf32>
    %189 = vector.extract_strided_slice %186 {offsets = [0, 0], sizes = [1, 32], strides = [1, 1]} : vector<1x96xf32> to vector<1x32xf32>
    %190 = vector.broadcast %189 : vector<1x32xf32> to vector<8x32xf32>
    %191 = arith.addf %188, %190 : vector<8x32xf32>
    %192 = vector.extract_strided_slice %185 {offsets = [0, 32], sizes = [32, 64], strides = [1, 1]} : vector<32x96xf32> to vector<32x64xf32>
    %cst_80 = arith.constant dense<0.000000e+00> : vector<16x64xf32>
    %193 = tpu.matmul %1, %192, %cst_80 {dimension_numbers = #tpu.dot_dimension_numbers<[1], [0], [0], [1], [0, 0, 1, 1], [], []>} : vector<16x32xf32>, vector<32x64xf32>, vector<16x64xf32> -> vector<16x64xf32>
    %194 = vector.extract_strided_slice %186 {offsets = [0, 32], sizes = [1, 64], strides = [1, 1]} : vector<1x96xf32> to vector<1x64xf32>
    %195 = vector.broadcast %194 : vector<1x64xf32> to vector<16x64xf32>
    %196 = arith.addf %193, %195 : vector<16x64xf32>
    %197 = vector.extract_strided_slice %196 {offsets = [0, 0], sizes = [16, 32], strides = [1, 1]} : vector<16x64xf32> to vector<16x32xf32>
    %198 = vector.extract_strided_slice %196 {offsets = [0, 32], sizes = [16, 32], strides = [1, 1]} : vector<16x64xf32> to vector<16x32xf32>
    %199 = vector.extract_strided_slice %191 {offsets = [0, 0], sizes = [4, 8], strides = [1, 1]} : vector<8x32xf32> to vector<4x8xf32>
    %200 = vector.extract_strided_slice %197 {offsets = [0, 0], sizes = [8, 8], strides = [1, 1]} : vector<16x32xf32> to vector<8x8xf32>
    %201 = vector.extract_strided_slice %198 {offsets = [0, 0], sizes = [8, 8], strides = [1, 1]} : vector<16x32xf32> to vector<8x8xf32>
    %cst_81 = arith.constant dense<0.000000e+00> : vector<4x8xf32>
    %202 = tpu.matmul %199, %200, %cst_81 {dimension_numbers = #tpu.dot_dimension_numbers<[1], [1], [0], [0], [0, 0, 1, 0], [], []>} : vector<4x8xf32>, vector<8x8xf32>, vector<4x8xf32> -> vector<4x8xf32>
    %cst_82 = arith.constant 0.353553385 : f32
    %203 = vector.broadcast %cst_82 : f32 to vector<4x8xf32>
    %204 = arith.mulf %202, %203 : vector<4x8xf32>
    %cst_83 = arith.constant dense<0xFF800000> : vector<4xf32>
    %205 = vector.multi_reduction <maximumf>, %204, %cst_83 [1] : vector<4x8xf32> to vector<4xf32>
    %206 = vector.shape_cast %205 : vector<4xf32> to vector<4x1xf32>
    %207 = vector.broadcast %206 : vector<4x1xf32> to vector<4x8xf32>
    %208 = arith.subf %204, %207 : vector<4x8xf32>
    %209 = math.exp %208 : vector<4x8xf32>
    %cst_84 = arith.constant dense<0.000000e+00> : vector<4xf32>
    %210 = vector.multi_reduction <add>, %209, %cst_84 [1] : vector<4x8xf32> to vector<4xf32>
    %211 = vector.shape_cast %210 : vector<4xf32> to vector<4x1xf32>
    %212 = tpu.reciprocal %211 {approx = true} : vector<4x1xf32> -> vector<4x1xf32>
    %213 = vector.broadcast %212 : vector<4x1xf32> to vector<4x8xf32>
    %214 = arith.mulf %209, %213 : vector<4x8xf32>
    %cst_85 = arith.constant dense<0.000000e+00> : vector<4x8xf32>
    %215 = tpu.matmul %214, %201, %cst_85 {dimension_numbers = #tpu.dot_dimension_numbers<[1], [0], [0], [1], [0, 0, 1, 1], [], []>} : vector<4x8xf32>, vector<8x8xf32>, vector<4x8xf32> -> vector<4x8xf32>
    %c0_86 = arith.constant 0 : index
    %c0_87 = arith.constant 0 : index
    %216 = vector.load %arg21[%c0_86, %c0_87] : memref<8x32xf32, #tpu.memory_space<vmem>>, vector<4x8xf32>
    tpu.vector_store %arg21[%c0_86, %c0_87], %215 {strides = array<i32>} : memref<8x32xf32, #tpu.memory_space<vmem>>, vector<4x8xf32>,
    %217 = vector.extract_strided_slice %191 {offsets = [0, 8], sizes = [4, 8], strides = [1, 1]} : vector<8x32xf32> to vector<4x8xf32>
    %218 = vector.extract_strided_slice %197 {offsets = [0, 8], sizes = [8, 8], strides = [1, 1]} : vector<16x32xf32> to vector<8x8xf32>
    %219 = vector.extract_strided_slice %198 {offsets = [0, 8], sizes = [8, 8], strides = [1, 1]} : vector<16x32xf32> to vector<8x8xf32>
    %cst_88 = arith.constant dense<0.000000e+00> : vector<4x8xf32>
    %220 = tpu.matmul %217, %218, %cst_88 {dimension_numbers = #tpu.dot_dimension_numbers<[1], [1], [0], [0], [0, 0, 1, 0], [], []>} : vector<4x8xf32>, vector<8x8xf32>, vector<4x8xf32> -> vector<4x8xf32>
    %cst_89 = arith.constant 0.353553385 : f32
    %221 = vector.broadcast %cst_89 : f32 to vector<4x8xf32>
    %222 = arith.mulf %220, %221 : vector<4x8xf32>
    %cst_90 = arith.constant dense<0xFF800000> : vector<4xf32>
    %223 = vector.multi_reduction <maximumf>, %222, %cst_90 [1] : vector<4x8xf32> to vector<4xf32>
    %224 = vector.shape_cast %223 : vector<4xf32> to vector<4x1xf32>
    %225 = vector.broadcast %224 : vector<4x1xf32> to vector<4x8xf32>
    %226 = arith.subf %222, %225 : vector<4x8xf32>
    %227 = math.exp %226 : vector<4x8xf32>
    %cst_91 = arith.constant dense<0.000000e+00> : vector<4xf32>
    %228 = vector.multi_reduction <add>, %227, %cst_91 [1] : vector<4x8xf32> to vector<4xf32>
    %229 = vector.shape_cast %228 : vector<4xf32> to vector<4x1xf32>
    %230 = tpu.reciprocal %229 {approx = true} : vector<4x1xf32> -> vector<4x1xf32>
    %231 = vector.broadcast %230 : vector<4x1xf32> to vector<4x8xf32>
    %232 = arith.mulf %227, %231 : vector<4x8xf32>
    %cst_92 = arith.constant dense<0.000000e+00> : vector<4x8xf32>
    %233 = tpu.matmul %232, %219, %cst_92 {dimension_numbers = #tpu.dot_dimension_numbers<[1], [0], [0], [1], [0, 0, 1, 1], [], []>} : vector<4x8xf32>, vector<8x8xf32>, vector<4x8xf32> -> vector<4x8xf32>
    %c0_93 = arith.constant 0 : index
    %c8_94 = arith.constant 8 : index
    %234 = vector.load %arg21[%c0_93, %c8_94] : memref<8x32xf32, #tpu.memory_space<vmem>>, vector<4x8xf32>
    tpu.vector_store %arg21[%c0_93, %c8_94], %233 {strides = array<i32>} : memref<8x32xf32, #tpu.memory_space<vmem>>, vector<4x8xf32>,
    %235 = vector.extract_strided_slice %191 {offsets = [0, 16], sizes = [4, 8], strides = [1, 1]} : vector<8x32xf32> to vector<4x8xf32>
    %236 = vector.extract_strided_slice %197 {offsets = [0, 16], sizes = [8, 8], strides = [1, 1]} : vector<16x32xf32> to vector<8x8xf32>
    %237 = vector.extract_strided_slice %198 {offsets = [0, 16], sizes = [8, 8], strides = [1, 1]} : vector<16x32xf32> to vector<8x8xf32>
    %cst_95 = arith.constant dense<0.000000e+00> : vector<4x8xf32>
    %238 = tpu.matmul %235, %236, %cst_95 {dimension_numbers = #tpu.dot_dimension_numbers<[1], [1], [0], [0], [0, 0, 1, 0], [], []>} : vector<4x8xf32>, vector<8x8xf32>, vector<4x8xf32> -> vector<4x8xf32>
    %cst_96 = arith.constant 0.353553385 : f32
    %239 = vector.broadcast %cst_96 : f32 to vector<4x8xf32>
    %240 = arith.mulf %238, %239 : vector<4x8xf32>
    %cst_97 = arith.constant dense<0xFF800000> : vector<4xf32>
    %241 = vector.multi_reduction <maximumf>, %240, %cst_97 [1] : vector<4x8xf32> to vector<4xf32>
    %242 = vector.shape_cast %241 : vector<4xf32> to vector<4x1xf32>
    %243 = vector.broadcast %242 : vector<4x1xf32> to vector<4x8xf32>
    %244 = arith.subf %240, %243 : vector<4x8xf32>
    %245 = math.exp %244 : vector<4x8xf32>
    %cst_98 = arith.constant dense<0.000000e+00> : vector<4xf32>
    %246 = vector.multi_reduction <add>, %245, %cst_98 [1] : vector<4x8xf32> to vector<4xf32>
    %247 = vector.shape_cast %246 : vector<4xf32> to vector<4x1xf32>
    %248 = tpu.reciprocal %247 {approx = true} : vector<4x1xf32> -> vector<4x1xf32>
    %249 = vector.broadcast %248 : vector<4x1xf32> to vector<4x8xf32>
    %250 = arith.mulf %245, %249 : vector<4x8xf32>
    %cst_99 = arith.constant dense<0.000000e+00> : vector<4x8xf32>
    %251 = tpu.matmul %250, %237, %cst_99 {dimension_numbers = #tpu.dot_dimension_numbers<[1], [0], [0], [1], [0, 0, 1, 1], [], []>} : vector<4x8xf32>, vector<8x8xf32>, vector<4x8xf32> -> vector<4x8xf32>
    %c0_100 = arith.constant 0 : index
    %c16_101 = arith.constant 16 : index
    %252 = vector.load %arg21[%c0_100, %c16_101] : memref<8x32xf32, #tpu.memory_space<vmem>>, vector<4x8xf32>
    tpu.vector_store %arg21[%c0_100, %c16_101], %251 {strides = array<i32>} : memref<8x32xf32, #tpu.memory_space<vmem>>, vector<4x8xf32>,
    %253 = vector.extract_strided_slice %191 {offsets = [0, 24], sizes = [4, 8], strides = [1, 1]} : vector<8x32xf32> to vector<4x8xf32>
    %254 = vector.extract_strided_slice %197 {offsets = [0, 24], sizes = [8, 8], strides = [1, 1]} : vector<16x32xf32> to vector<8x8xf32>
    %255 = vector.extract_strided_slice %198 {offsets = [0, 24], sizes = [8, 8], strides = [1, 1]} : vector<16x32xf32> to vector<8x8xf32>
    %cst_102 = arith.constant dense<0.000000e+00> : vector<4x8xf32>
    %256 = tpu.matmul %253, %254, %cst_102 {dimension_numbers = #tpu.dot_dimension_numbers<[1], [1], [0], [0], [0, 0, 1, 0], [], []>} : vector<4x8xf32>, vector<8x8xf32>, vector<4x8xf32> -> vector<4x8xf32>
    %cst_103 = arith.constant 0.353553385 : f32
    %257 = vector.broadcast %cst_103 : f32 to vector<4x8xf32>
    %258 = arith.mulf %256, %257 : vector<4x8xf32>
    %cst_104 = arith.constant dense<0xFF800000> : vector<4xf32>
    %259 = vector.multi_reduction <maximumf>, %258, %cst_104 [1] : vector<4x8xf32> to vector<4xf32>
    %260 = vector.shape_cast %259 : vector<4xf32> to vector<4x1xf32>
    %261 = vector.broadcast %260 : vector<4x1xf32> to vector<4x8xf32>
    %262 = arith.subf %258, %261 : vector<4x8xf32>
    %263 = math.exp %262 : vector<4x8xf32>
    %cst_105 = arith.constant dense<0.000000e+00> : vector<4xf32>
    %264 = vector.multi_reduction <add>, %263, %cst_105 [1] : vector<4x8xf32> to vector<4xf32>
    %265 = vector.shape_cast %264 : vector<4xf32> to vector<4x1xf32>
    %266 = tpu.reciprocal %265 {approx = true} : vector<4x1xf32> -> vector<4x1xf32>
    %267 = vector.broadcast %266 : vector<4x1xf32> to vector<4x8xf32>
    %268 = arith.mulf %263, %267 : vector<4x8xf32>
    %cst_106 = arith.constant dense<0.000000e+00> : vector<4x8xf32>
    %269 = tpu.matmul %268, %255, %cst_106 {dimension_numbers = #tpu.dot_dimension_numbers<[1], [0], [0], [1], [0, 0, 1, 1], [], []>} : vector<4x8xf32>, vector<8x8xf32>, vector<4x8xf32> -> vector<4x8xf32>
    %c0_107 = arith.constant 0 : index
    %c24_108 = arith.constant 24 : index
    %270 = vector.load %arg21[%c0_107, %c24_108] : memref<8x32xf32, #tpu.memory_space<vmem>>, vector<4x8xf32>
    tpu.vector_store %arg21[%c0_107, %c24_108], %269 {strides = array<i32>} : memref<8x32xf32, #tpu.memory_space<vmem>>, vector<4x8xf32>,
    %271 = vector.extract_strided_slice %191 {offsets = [4, 0], sizes = [4, 8], strides = [1, 1]} : vector<8x32xf32> to vector<4x8xf32>
    %272 = vector.extract_strided_slice %197 {offsets = [8, 0], sizes = [8, 8], strides = [1, 1]} : vector<16x32xf32> to vector<8x8xf32>
    %273 = vector.extract_strided_slice %198 {offsets = [8, 0], sizes = [8, 8], strides = [1, 1]} : vector<16x32xf32> to vector<8x8xf32>
    %cst_109 = arith.constant dense<0.000000e+00> : vector<4x8xf32>
    %274 = tpu.matmul %271, %272, %cst_109 {dimension_numbers = #tpu.dot_dimension_numbers<[1], [1], [0], [0], [0, 0, 1, 0], [], []>} : vector<4x8xf32>, vector<8x8xf32>, vector<4x8xf32> -> vector<4x8xf32>
    %cst_110 = arith.constant 0.353553385 : f32
    %275 = vector.broadcast %cst_110 : f32 to vector<4x8xf32>
    %276 = arith.mulf %274, %275 : vector<4x8xf32>
    %cst_111 = arith.constant dense<0xFF800000> : vector<4xf32>
    %277 = vector.multi_reduction <maximumf>, %276, %cst_111 [1] : vector<4x8xf32> to vector<4xf32>
    %278 = vector.shape_cast %277 : vector<4xf32> to vector<4x1xf32>
    %279 = vector.broadcast %278 : vector<4x1xf32> to vector<4x8xf32>
    %280 = arith.subf %276, %279 : vector<4x8xf32>
    %281 = math.exp %280 : vector<4x8xf32>
    %cst_112 = arith.constant dense<0.000000e+00> : vector<4xf32>
    %282 = vector.multi_reduction <add>, %281, %cst_112 [1] : vector<4x8xf32> to vector<4xf32>
    %283 = vector.shape_cast %282 : vector<4xf32> to vector<4x1xf32>
    %284 = tpu.reciprocal %283 {approx = true} : vector<4x1xf32> -> vector<4x1xf32>
    %285 = vector.broadcast %284 : vector<4x1xf32> to vector<4x8xf32>
    %286 = arith.mulf %281, %285 : vector<4x8xf32>
    %cst_113 = arith.constant dense<0.000000e+00> : vector<4x8xf32>
    %287 = tpu.matmul %286, %273, %cst_113 {dimension_numbers = #tpu.dot_dimension_numbers<[1], [0], [0], [1], [0, 0, 1, 1], [], []>} : vector<4x8xf32>, vector<8x8xf32>, vector<4x8xf32> -> vector<4x8xf32>
    %c4_114 = arith.constant 4 : index
    %c0_115 = arith.constant 0 : index
    %288 = vector.load %arg21[%c4_114, %c0_115] : memref<8x32xf32, #tpu.memory_space<vmem>>, vector<4x8xf32>
    tpu.vector_store %arg21[%c4_114, %c0_115], %287 {strides = array<i32>} : memref<8x32xf32, #tpu.memory_space<vmem>>, vector<4x8xf32>,
    %289 = vector.extract_strided_slice %191 {offsets = [4, 8], sizes = [4, 8], strides = [1, 1]} : vector<8x32xf32> to vector<4x8xf32>
    %290 = vector.extract_strided_slice %197 {offsets = [8, 8], sizes = [8, 8], strides = [1, 1]} : vector<16x32xf32> to vector<8x8xf32>
    %291 = vector.extract_strided_slice %198 {offsets = [8, 8], sizes = [8, 8], strides = [1, 1]} : vector<16x32xf32> to vector<8x8xf32>
    %cst_116 = arith.constant dense<0.000000e+00> : vector<4x8xf32>
    %292 = tpu.matmul %289, %290, %cst_116 {dimension_numbers = #tpu.dot_dimension_numbers<[1], [1], [0], [0], [0, 0, 1, 0], [], []>} : vector<4x8xf32>, vector<8x8xf32>, vector<4x8xf32> -> vector<4x8xf32>
    %cst_117 = arith.constant 0.353553385 : f32
    %293 = vector.broadcast %cst_117 : f32 to vector<4x8xf32>
    %294 = arith.mulf %292, %293 : vector<4x8xf32>
    %cst_118 = arith.constant dense<0xFF800000> : vector<4xf32>
    %295 = vector.multi_reduction <maximumf>, %294, %cst_118 [1] : vector<4x8xf32> to vector<4xf32>
    %296 = vector.shape_cast %295 : vector<4xf32> to vector<4x1xf32>
    %297 = vector.broadcast %296 : vector<4x1xf32> to vector<4x8xf32>
    %298 = arith.subf %294, %297 : vector<4x8xf32>
    %299 = math.exp %298 : vector<4x8xf32>
    %cst_119 = arith.constant dense<0.000000e+00> : vector<4xf32>
    %300 = vector.multi_reduction <add>, %299, %cst_119 [1] : vector<4x8xf32> to vector<4xf32>
    %301 = vector.shape_cast %300 : vector<4xf32> to vector<4x1xf32>
    %302 = tpu.reciprocal %301 {approx = true} : vector<4x1xf32> -> vector<4x1xf32>
    %303 = vector.broadcast %302 : vector<4x1xf32> to vector<4x8xf32>
    %304 = arith.mulf %299, %303 : vector<4x8xf32>
    %cst_120 = arith.constant dense<0.000000e+00> : vector<4x8xf32>
    %305 = tpu.matmul %304, %291, %cst_120 {dimension_numbers = #tpu.dot_dimension_numbers<[1], [0], [0], [1], [0, 0, 1, 1], [], []>} : vector<4x8xf32>, vector<8x8xf32>, vector<4x8xf32> -> vector<4x8xf32>
    %c4_121 = arith.constant 4 : index
    %c8_122 = arith.constant 8 : index
    %306 = vector.load %arg21[%c4_121, %c8_122] : memref<8x32xf32, #tpu.memory_space<vmem>>, vector<4x8xf32>
    tpu.vector_store %arg21[%c4_121, %c8_122], %305 {strides = array<i32>} : memref<8x32xf32, #tpu.memory_space<vmem>>, vector<4x8xf32>,
    %307 = vector.extract_strided_slice %191 {offsets = [4, 16], sizes = [4, 8], strides = [1, 1]} : vector<8x32xf32> to vector<4x8xf32>
    %308 = vector.extract_strided_slice %197 {offsets = [8, 16], sizes = [8, 8], strides = [1, 1]} : vector<16x32xf32> to vector<8x8xf32>
    %309 = vector.extract_strided_slice %198 {offsets = [8, 16], sizes = [8, 8], strides = [1, 1]} : vector<16x32xf32> to vector<8x8xf32>
    %cst_123 = arith.constant dense<0.000000e+00> : vector<4x8xf32>
    %310 = tpu.matmul %307, %308, %cst_123 {dimension_numbers = #tpu.dot_dimension_numbers<[1], [1], [0], [0], [0, 0, 1, 0], [], []>} : vector<4x8xf32>, vector<8x8xf32>, vector<4x8xf32> -> vector<4x8xf32>
    %cst_124 = arith.constant 0.353553385 : f32
    %311 = vector.broadcast %cst_124 : f32 to vector<4x8xf32>
    %312 = arith.mulf %310, %311 : vector<4x8xf32>
    %cst_125 = arith.constant dense<0xFF800000> : vector<4xf32>
    %313 = vector.multi_reduction <maximumf>, %312, %cst_125 [1] : vector<4x8xf32> to vector<4xf32>
    %314 = vector.shape_cast %313 : vector<4xf32> to vector<4x1xf32>
    %315 = vector.broadcast %314 : vector<4x1xf32> to vector<4x8xf32>
    %316 = arith.subf %312, %315 : vector<4x8xf32>
    %317 = math.exp %316 : vector<4x8xf32>
    %cst_126 = arith.constant dense<0.000000e+00> : vector<4xf32>
    %318 = vector.multi_reduction <add>, %317, %cst_126 [1] : vector<4x8xf32> to vector<4xf32>
    %319 = vector.shape_cast %318 : vector<4xf32> to vector<4x1xf32>
    %320 = tpu.reciprocal %319 {approx = true} : vector<4x1xf32> -> vector<4x1xf32>
    %321 = vector.broadcast %320 : vector<4x1xf32> to vector<4x8xf32>
    %322 = arith.mulf %317, %321 : vector<4x8xf32>
    %cst_127 = arith.constant dense<0.000000e+00> : vector<4x8xf32>
    %323 = tpu.matmul %322, %309, %cst_127 {dimension_numbers = #tpu.dot_dimension_numbers<[1], [0], [0], [1], [0, 0, 1, 1], [], []>} : vector<4x8xf32>, vector<8x8xf32>, vector<4x8xf32> -> vector<4x8xf32>
    %c4_128 = arith.constant 4 : index
    %c16_129 = arith.constant 16 : index
    %324 = vector.load %arg21[%c4_128, %c16_129] : memref<8x32xf32, #tpu.memory_space<vmem>>, vector<4x8xf32>
    tpu.vector_store %arg21[%c4_128, %c16_129], %323 {strides = array<i32>} : memref<8x32xf32, #tpu.memory_space<vmem>>, vector<4x8xf32>,
    %325 = vector.extract_strided_slice %191 {offsets = [4, 24], sizes = [4, 8], strides = [1, 1]} : vector<8x32xf32> to vector<4x8xf32>
    %326 = vector.extract_strided_slice %197 {offsets = [8, 24], sizes = [8, 8], strides = [1, 1]} : vector<16x32xf32> to vector<8x8xf32>
    %327 = vector.extract_strided_slice %198 {offsets = [8, 24], sizes = [8, 8], strides = [1, 1]} : vector<16x32xf32> to vector<8x8xf32>
    %cst_130 = arith.constant dense<0.000000e+00> : vector<4x8xf32>
    %328 = tpu.matmul %325, %326, %cst_130 {dimension_numbers = #tpu.dot_dimension_numbers<[1], [1], [0], [0], [0, 0, 1, 0], [], []>} : vector<4x8xf32>, vector<8x8xf32>, vector<4x8xf32> -> vector<4x8xf32>
    %cst_131 = arith.constant 0.353553385 : f32
    %329 = vector.broadcast %cst_131 : f32 to vector<4x8xf32>
    %330 = arith.mulf %328, %329 : vector<4x8xf32>
    %cst_132 = arith.constant dense<0xFF800000> : vector<4xf32>
    %331 = vector.multi_reduction <maximumf>, %330, %cst_132 [1] : vector<4x8xf32> to vector<4xf32>
    %332 = vector.shape_cast %331 : vector<4xf32> to vector<4x1xf32>
    %333 = vector.broadcast %332 : vector<4x1xf32> to vector<4x8xf32>
    %334 = arith.subf %330, %333 : vector<4x8xf32>
    %335 = math.exp %334 : vector<4x8xf32>
    %cst_133 = arith.constant dense<0.000000e+00> : vector<4xf32>
    %336 = vector.multi_reduction <add>, %335, %cst_133 [1] : vector<4x8xf32> to vector<4xf32>
    %337 = vector.shape_cast %336 : vector<4xf32> to vector<4x1xf32>
    %338 = tpu.reciprocal %337 {approx = true} : vector<4x1xf32> -> vector<4x1xf32>
    %339 = vector.broadcast %338 : vector<4x1xf32> to vector<4x8xf32>
    %340 = arith.mulf %335, %339 : vector<4x8xf32>
    %cst_134 = arith.constant dense<0.000000e+00> : vector<4x8xf32>
    %341 = tpu.matmul %340, %327, %cst_134 {dimension_numbers = #tpu.dot_dimension_numbers<[1], [0], [0], [1], [0, 0, 1, 1], [], []>} : vector<4x8xf32>, vector<8x8xf32>, vector<4x8xf32> -> vector<4x8xf32>
    %c4_135 = arith.constant 4 : index
    %c24_136 = arith.constant 24 : index
    %342 = vector.load %arg21[%c4_135, %c24_136] : memref<8x32xf32, #tpu.memory_space<vmem>>, vector<4x8xf32>
    tpu.vector_store %arg21[%c4_135, %c24_136], %341 {strides = array<i32>} : memref<8x32xf32, #tpu.memory_space<vmem>>, vector<4x8xf32>,
    %c0_137 = arith.constant 0 : index
    %c0_138 = arith.constant 0 : index
    %343 = vector.load %arg21[%c0_137, %c0_138] : memref<8x32xf32, #tpu.memory_space<vmem>>, vector<8x32xf32>
    %c0_139 = arith.constant 0 : index
    %c0_140 = arith.constant 0 : index
    %344 = vector.load %arg10[%c0_139, %c0_140] : memref<32x32xf32, #tpu.memory_space<vmem>>, vector<32x32xf32>
    %cst_141 = arith.constant dense<0.000000e+00> : vector<8x32xf32>
    %345 = tpu.matmul %343, %344, %cst_141 {dimension_numbers = #tpu.dot_dimension_numbers<[1], [0], [0], [1], [0, 0, 1, 1], [], []>} : vector<8x32xf32>, vector<32x32xf32>, vector<8x32xf32> -> vector<8x32xf32>
    %c0_142 = arith.constant 0 : index
    %c0_143 = arith.constant 0 : index
    %346 = vector.load %arg11[%c0_142, %c0_143] : memref<1x32xf32, #tpu.memory_space<vmem>>, vector<1x32xf32>
    %347 = vector.broadcast %346 : vector<1x32xf32> to vector<8x32xf32>
    %348 = arith.addf %345, %347 : vector<8x32xf32>
    %349 = arith.addf %184, %348 : vector<8x32xf32>
    %c0_144 = arith.constant 0 : index
    %c0_145 = arith.constant 0 : index
    %350 = vector.load %arg12[%c0_144, %c0_145] : memref<1x32xf32, #tpu.memory_space<vmem>>, vector<1x32xf32>
    %c0_146 = arith.constant 0 : index
    %c0_147 = arith.constant 0 : index
    %351 = vector.load %arg13[%c0_146, %c0_147] : memref<1x32xf32, #tpu.memory_space<vmem>>, vector<1x32xf32>
    %cst_148 = arith.constant dense<0.000000e+00> : vector<8xf32>
    %352 = vector.multi_reduction <add>, %349, %cst_148 [1] : vector<8x32xf32> to vector<8xf32>
    %353 = vector.shape_cast %352 : vector<8xf32> to vector<8x1xf32>
    %cst_149 = arith.constant 3.200000e+01 : f32
    %354 = vector.broadcast %cst_149 : f32 to vector<8x1xf32>
    %355 = arith.divf %353, %354 : vector<8x1xf32>
    %356 = vector.broadcast %355 : vector<8x1xf32> to vector<8x32xf32>
    %357 = arith.subf %349, %356 : vector<8x32xf32>
    %358 = arith.mulf %357, %357 : vector<8x32xf32>
    %cst_150 = arith.constant dense<0.000000e+00> : vector<8xf32>
    %359 = vector.multi_reduction <add>, %358, %cst_150 [1] : vector<8x32xf32> to vector<8xf32>
    %360 = vector.shape_cast %359 : vector<8xf32> to vector<8x1xf32>
    %cst_151 = arith.constant 3.200000e+01 : f32
    %361 = vector.broadcast %cst_151 : f32 to vector<8x1xf32>
    %362 = arith.divf %360, %361 : vector<8x1xf32>
    %363 = vector.broadcast %355 : vector<8x1xf32> to vector<8x32xf32>
    %364 = arith.subf %349, %363 : vector<8x32xf32>
    %cst_152 = arith.constant 9.99999974E-6 : f32
    %365 = vector.broadcast %cst_152 : f32 to vector<8x1xf32>
    %366 = arith.addf %362, %365 : vector<8x1xf32>
    %367 = math.rsqrt %366 : vector<8x1xf32>
    %368 = vector.broadcast %367 : vector<8x1xf32> to vector<8x32xf32>
    %369 = arith.mulf %364, %368 : vector<8x32xf32>
    %370 = vector.broadcast %350 : vector<1x32xf32> to vector<8x32xf32>
    %371 = arith.mulf %369, %370 : vector<8x32xf32>
    %372 = vector.broadcast %351 : vector<1x32xf32> to vector<8x32xf32>
    %373 = arith.addf %371, %372 : vector<8x32xf32>
    %c0_153 = arith.constant 0 : index
    %c0_154 = arith.constant 0 : index
    %374 = vector.load %arg14[%c0_153, %c0_154] : memref<32x64xf32, #tpu.memory_space<vmem>>, vector<32x64xf32>
    %cst_155 = arith.constant dense<0.000000e+00> : vector<8x64xf32>
    %375 = tpu.matmul %373, %374, %cst_155 {dimension_numbers = #tpu.dot_dimension_numbers<[1], [0], [0], [1], [0, 0, 1, 1], [], []>} : vector<8x32xf32>, vector<32x64xf32>, vector<8x64xf32> -> vector<8x64xf32>
    %c0_156 = arith.constant 0 : index
    %c0_157 = arith.constant 0 : index
    %376 = vector.load %arg15[%c0_156, %c0_157] : memref<1x64xf32, #tpu.memory_space<vmem>>, vector<1x64xf32>
    %377 = vector.broadcast %376 : vector<1x64xf32> to vector<8x64xf32>
    %378 = arith.addf %375, %377 : vector<8x64xf32>
    %cst_158 = arith.constant 0.000000e+00 : f32
    %379 = vector.broadcast %cst_158 : f32 to vector<8x64xf32>
    %380 = arith.maximumf %378, %379 : vector<8x64xf32>
    %c0_159 = arith.constant 0 : index
    %c0_160 = arith.constant 0 : index
    %381 = vector.load %arg16[%c0_159, %c0_160] : memref<64x32xf32, #tpu.memory_space<vmem>>, vector<64x32xf32>
    %cst_161 = arith.constant dense<0.000000e+00> : vector<8x32xf32>
    %382 = tpu.matmul %380, %381, %cst_161 {dimension_numbers = #tpu.dot_dimension_numbers<[1], [0], [0], [1], [0, 0, 1, 1], [], []>} : vector<8x64xf32>, vector<64x32xf32>, vector<8x32xf32> -> vector<8x32xf32>
    %c0_162 = arith.constant 0 : index
    %c0_163 = arith.constant 0 : index
    %383 = vector.load %arg17[%c0_162, %c0_163] : memref<1x32xf32, #tpu.memory_space<vmem>>, vector<1x32xf32>
    %384 = vector.broadcast %383 : vector<1x32xf32> to vector<8x32xf32>
    %385 = arith.addf %382, %384 : vector<8x32xf32>
    %386 = arith.addf %373, %385 : vector<8x32xf32>
    %c0_164 = arith.constant 0 : index
    %c0_165 = arith.constant 0 : index
    %387 = vector.load %arg18[%c0_164, %c0_165] : memref<1x32xf32, #tpu.memory_space<vmem>>, vector<1x32xf32>
    %c0_166 = arith.constant 0 : index
    %c0_167 = arith.constant 0 : index
    %388 = vector.load %arg19[%c0_166, %c0_167] : memref<1x32xf32, #tpu.memory_space<vmem>>, vector<1x32xf32>
    %cst_168 = arith.constant dense<0.000000e+00> : vector<8xf32>
    %389 = vector.multi_reduction <add>, %386, %cst_168 [1] : vector<8x32xf32> to vector<8xf32>
    %390 = vector.shape_cast %389 : vector<8xf32> to vector<8x1xf32>
    %cst_169 = arith.constant 3.200000e+01 : f32
    %391 = vector.broadcast %cst_169 : f32 to vector<8x1xf32>
    %392 = arith.divf %390, %391 : vector<8x1xf32>
    %393 = vector.broadcast %392 : vector<8x1xf32> to vector<8x32xf32>
    %394 = arith.subf %386, %393 : vector<8x32xf32>
    %395 = arith.mulf %394, %394 : vector<8x32xf32>
    %cst_170 = arith.constant dense<0.000000e+00> : vector<8xf32>
    %396 = vector.multi_reduction <add>, %395, %cst_170 [1] : vector<8x32xf32> to vector<8xf32>
    %397 = vector.shape_cast %396 : vector<8xf32> to vector<8x1xf32>
    %cst_171 = arith.constant 3.200000e+01 : f32
    %398 = vector.broadcast %cst_171 : f32 to vector<8x1xf32>
    %399 = arith.divf %397, %398 : vector<8x1xf32>
    %400 = vector.broadcast %392 : vector<8x1xf32> to vector<8x32xf32>
    %401 = arith.subf %386, %400 : vector<8x32xf32>
    %cst_172 = arith.constant 9.99999974E-6 : f32
    %402 = vector.broadcast %cst_172 : f32 to vector<8x1xf32>
    %403 = arith.addf %399, %402 : vector<8x1xf32>
    %404 = math.rsqrt %403 : vector<8x1xf32>
    %405 = vector.broadcast %404 : vector<8x1xf32> to vector<8x32xf32>
    %406 = arith.mulf %401, %405 : vector<8x32xf32>
    %407 = vector.broadcast %387 : vector<1x32xf32> to vector<8x32xf32>
    %408 = arith.mulf %406, %407 : vector<8x32xf32>
    %409 = vector.broadcast %388 : vector<1x32xf32> to vector<8x32xf32>
    %410 = arith.addf %408, %409 : vector<8x32xf32>
    %c0_173 = arith.constant 0 : index
    %c0_174 = arith.constant 0 : index
    %411 = vector.load %arg20[%c0_173, %c0_174] : memref<8x32xf32, #tpu.memory_space<vmem>>, vector<8x32xf32>
    tpu.vector_store %arg20[%c0_173, %c0_174], %410 {strides = array<i32>} : memref<8x32xf32, #tpu.memory_space<vmem>>, vector<8x32xf32>,
    return
  }
}

module attributes {stable_mosaic.version = 11 : i64} {
  func.func @_dec_layer_kernel(%arg0: memref<8x32xf32, #tpu.memory_space<vmem>>, %arg1: memref<16x32xf32, #tpu.memory_space<vmem>>, %arg2: memref<32x96xf32, #tpu.memory_space<vmem>>, %arg3: memref<1x96xf32, #tpu.memory_space<vmem>>, %arg4: memref<32x32xf32, #tpu.memory_space<vmem>>, %arg5: memref<1x32xf32, #tpu.memory_space<vmem>>, %arg6: memref<1x32xf32, #tpu.memory_space<vmem>>, %arg7: memref<1x32xf32, #tpu.memory_space<vmem>>, %arg8: memref<32x96xf32, #tpu.memory_space<vmem>>, %arg9: memref<1x96xf32, #tpu.memory_space<vmem>>, %arg10: memref<32x32xf32, #tpu.memory_space<vmem>>, %arg11: memref<1x32xf32, #tpu.memory_space<vmem>>, %arg12: memref<1x32xf32, #tpu.memory_space<vmem>>, %arg13: memref<1x32xf32, #tpu.memory_space<vmem>>, %arg14: memref<32x64xf32, #tpu.memory_space<vmem>>, %arg15: memref<1x64xf32, #tpu.memory_space<vmem>>, %arg16: memref<64x32xf32, #tpu.memory_space<vmem>>, %arg17: memref<1x32xf32, #tpu.memory_space<vmem>>, %arg18: memref<1x32xf32, #tpu.memory_space<vmem>>, %arg19: memref<1x32xf32, #tpu.memory_space<vmem>>, %arg20: memref<8x32xf32, #tpu.memory_space<vmem>>, %arg21: memref<8x32xf32, #tpu.memory_space<vmem>>) attributes {dimension_semantics = [], scalar_prefetch = 0 : i64, scratch_operands = 1 : i64, tpu.core_type = #tpu.core_type<tc>} {
    %c0 = arith.constant 0 : index
    %c0_0 = arith.constant 0 : index
    %0 = vector.load %arg0[%c0, %c0_0] : memref<8x32xf32, #tpu.memory_space<vmem>>, vector<8x32xf32>
    %c0_1 = arith.constant 0 : index
    %c0_2 = arith.constant 0 : index
    %1 = vector.load %arg1[%c0_1, %c0_2] : memref<16x32xf32, #tpu.memory_space<vmem>>, vector<16x32xf32>
    %c0_3 = arith.constant 0 : index
    %c0_4 = arith.constant 0 : index
    %2 = vector.load %arg2[%c0_3, %c0_4] : memref<32x96xf32, #tpu.memory_space<vmem>>, vector<32x96xf32>
    %cst = arith.constant dense<0.000000e+00> : vector<8x96xf32>
    %3 = tpu.matmul %0, %2, %cst {dimension_numbers = #tpu.dot_dimension_numbers<[1], [0], [0], [1], [0, 0, 1, 1], [], []>} : vector<8x32xf32>, vector<32x96xf32>, vector<8x96xf32> -> vector<8x96xf32>
    %c0_5 = arith.constant 0 : index
    %c0_6 = arith.constant 0 : index
    %4 = vector.load %arg3[%c0_5, %c0_6] : memref<1x96xf32, #tpu.memory_space<vmem>>, vector<1x96xf32>
    %5 = vector.broadcast %4 : vector<1x96xf32> to vector<8x96xf32>
    %6 = arith.addf %3, %5 : vector<8x96xf32>
    %7 = vector.extract_strided_slice %6 {offsets = [0, 0], sizes = [8, 32], strides = [1, 1]} : vector<8x96xf32> to vector<8x32xf32>
    %8 = vector.extract_strided_slice %6 {offsets = [0, 32], sizes = [8, 32], strides = [1, 1]} : vector<8x96xf32> to vector<8x32xf32>
    %9 = vector.extract_strided_slice %6 {offsets = [0, 64], sizes = [8, 32], strides = [1, 1]} : vector<8x96xf32> to vector<8x32xf32>
    %10 = vector.extract_strided_slice %7 {offsets = [0, 0], sizes = [4, 8], strides = [1, 1]} : vector<8x32xf32> to vector<4x8xf32>
    %11 = vector.extract_strided_slice %8 {offsets = [0, 0], sizes = [4, 8], strides = [1, 1]} : vector<8x32xf32> to vector<4x8xf32>
    %12 = vector.extract_strided_slice %9 {offsets = [0, 0], sizes = [4, 8], strides = [1, 1]} : vector<8x32xf32> to vector<4x8xf32>
    %cst_7 = arith.constant dense<0.000000e+00> : vector<4x4xf32>
    %13 = tpu.matmul %10, %11, %cst_7 {dimension_numbers = #tpu.dot_dimension_numbers<[1], [1], [0], [0], [0, 0, 1, 0], [], []>} : vector<4x8xf32>, vector<4x8xf32>, vector<4x4xf32> -> vector<4x4xf32>
    %cst_8 = arith.constant 0.353553385 : f32
    %14 = vector.broadcast %cst_8 : f32 to vector<4x4xf32>
    %15 = arith.mulf %13, %14 : vector<4x4xf32>
    %cst_9 = arith.constant dense<0xFF800000> : vector<4xf32>
    %16 = vector.multi_reduction <maximumf>, %15, %cst_9 [1] : vector<4x4xf32> to vector<4xf32>
    %17 = vector.shape_cast %16 : vector<4xf32> to vector<4x1xf32>
    %18 = vector.broadcast %17 : vector<4x1xf32> to vector<4x4xf32>
    %19 = arith.subf %15, %18 : vector<4x4xf32>
    %20 = math.exp %19 : vector<4x4xf32>
    %cst_10 = arith.constant dense<0.000000e+00> : vector<4xf32>
    %21 = vector.multi_reduction <add>, %20, %cst_10 [1] : vector<4x4xf32> to vector<4xf32>
    %22 = vector.shape_cast %21 : vector<4xf32> to vector<4x1xf32>
    %23 = tpu.reciprocal %22 {approx = true} : vector<4x1xf32> -> vector<4x1xf32>
    %24 = vector.broadcast %23 : vector<4x1xf32> to vector<4x4xf32>
    %25 = arith.mulf %20, %24 : vector<4x4xf32>
    %cst_11 = arith.constant dense<0.000000e+00> : vector<4x8xf32>
    %26 = tpu.matmul %25, %12, %cst_11 {dimension_numbers = #tpu.dot_dimension_numbers<[1], [0], [0], [1], [0, 0, 1, 1], [], []>} : vector<4x4xf32>, vector<4x8xf32>, vector<4x8xf32> -> vector<4x8xf32>
    %c0_12 = arith.constant 0 : index
    %c0_13 = arith.constant 0 : index
    %27 = vector.load %arg21[%c0_12, %c0_13] : memref<8x32xf32, #tpu.memory_space<vmem>>, vector<4x8xf32>
    tpu.vector_store %arg21[%c0_12, %c0_13], %26 {strides = array<i32>} : memref<8x32xf32, #tpu.memory_space<vmem>>, vector<4x8xf32>,
    %28 = vector.extract_strided_slice %7 {offsets = [0, 8], sizes = [4, 8], strides = [1, 1]} : vector<8x32xf32> to vector<4x8xf32>
    %29 = vector.extract_strided_slice %8 {offsets = [0, 8], sizes = [4, 8], strides = [1, 1]} : vector<8x32xf32> to vector<4x8xf32>
    %30 = vector.extract_strided_slice %9 {offsets = [0, 8], sizes = [4, 8], strides = [1, 1]} : vector<8x32xf32> to vector<4x8xf32>
    %cst_14 = arith.constant dense<0.000000e+00> : vector<4x4xf32>
    %31 = tpu.matmul %28, %29, %cst_14 {dimension_numbers = #tpu.dot_dimension_numbers<[1], [1], [0], [0], [0, 0, 1, 0], [], []>} : vector<4x8xf32>, vector<4x8xf32>, vector<4x4xf32> -> vector<4x4xf32>
    %cst_15 = arith.constant 0.353553385 : f32
    %32 = vector.broadcast %cst_15 : f32 to vector<4x4xf32>
    %33 = arith.mulf %31, %32 : vector<4x4xf32>
    %cst_16 = arith.constant dense<0xFF800000> : vector<4xf32>
    %34 = vector.multi_reduction <maximumf>, %33, %cst_16 [1] : vector<4x4xf32> to vector<4xf32>
    %35 = vector.shape_cast %34 : vector<4xf32> to vector<4x1xf32>
    %36 = vector.broadcast %35 : vector<4x1xf32> to vector<4x4xf32>
    %37 = arith.subf %33, %36 : vector<4x4xf32>
    %38 = math.exp %37 : vector<4x4xf32>
    %cst_17 = arith.constant dense<0.000000e+00> : vector<4xf32>
    %39 = vector.multi_reduction <add>, %38, %cst_17 [1] : vector<4x4xf32> to vector<4xf32>
    %40 = vector.shape_cast %39 : vector<4xf32> to vector<4x1xf32>
    %41 = tpu.reciprocal %40 {approx = true} : vector<4x1xf32> -> vector<4x1xf32>
    %42 = vector.broadcast %41 : vector<4x1xf32> to vector<4x4xf32>
    %43 = arith.mulf %38, %42 : vector<4x4xf32>
    %cst_18 = arith.constant dense<0.000000e+00> : vector<4x8xf32>
    %44 = tpu.matmul %43, %30, %cst_18 {dimension_numbers = #tpu.dot_dimension_numbers<[1], [0], [0], [1], [0, 0, 1, 1], [], []>} : vector<4x4xf32>, vector<4x8xf32>, vector<4x8xf32> -> vector<4x8xf32>
    %c0_19 = arith.constant 0 : index
    %c8 = arith.constant 8 : index
    %45 = vector.load %arg21[%c0_19, %c8] : memref<8x32xf32, #tpu.memory_space<vmem>>, vector<4x8xf32>
    tpu.vector_store %arg21[%c0_19, %c8], %44 {strides = array<i32>} : memref<8x32xf32, #tpu.memory_space<vmem>>, vector<4x8xf32>,
    %46 = vector.extract_strided_slice %7 {offsets = [0, 16], sizes = [4, 8], strides = [1, 1]} : vector<8x32xf32> to vector<4x8xf32>
    %47 = vector.extract_strided_slice %8 {offsets = [0, 16], sizes = [4, 8], strides = [1, 1]} : vector<8x32xf32> to vector<4x8xf32>
    %48 = vector.extract_strided_slice %9 {offsets = [0, 16], sizes = [4, 8], strides = [1, 1]} : vector<8x32xf32> to vector<4x8xf32>
    %cst_20 = arith.constant dense<0.000000e+00> : vector<4x4xf32>
    %49 = tpu.matmul %46, %47, %cst_20 {dimension_numbers = #tpu.dot_dimension_numbers<[1], [1], [0], [0], [0, 0, 1, 0], [], []>} : vector<4x8xf32>, vector<4x8xf32>, vector<4x4xf32> -> vector<4x4xf32>
    %cst_21 = arith.constant 0.353553385 : f32
    %50 = vector.broadcast %cst_21 : f32 to vector<4x4xf32>
    %51 = arith.mulf %49, %50 : vector<4x4xf32>
    %cst_22 = arith.constant dense<0xFF800000> : vector<4xf32>
    %52 = vector.multi_reduction <maximumf>, %51, %cst_22 [1] : vector<4x4xf32> to vector<4xf32>
    %53 = vector.shape_cast %52 : vector<4xf32> to vector<4x1xf32>
    %54 = vector.broadcast %53 : vector<4x1xf32> to vector<4x4xf32>
    %55 = arith.subf %51, %54 : vector<4x4xf32>
    %56 = math.exp %55 : vector<4x4xf32>
    %cst_23 = arith.constant dense<0.000000e+00> : vector<4xf32>
    %57 = vector.multi_reduction <add>, %56, %cst_23 [1] : vector<4x4xf32> to vector<4xf32>
    %58 = vector.shape_cast %57 : vector<4xf32> to vector<4x1xf32>
    %59 = tpu.reciprocal %58 {approx = true} : vector<4x1xf32> -> vector<4x1xf32>
    %60 = vector.broadcast %59 : vector<4x1xf32> to vector<4x4xf32>
    %61 = arith.mulf %56, %60 : vector<4x4xf32>
    %cst_24 = arith.constant dense<0.000000e+00> : vector<4x8xf32>
    %62 = tpu.matmul %61, %48, %cst_24 {dimension_numbers = #tpu.dot_dimension_numbers<[1], [0], [0], [1], [0, 0, 1, 1], [], []>} : vector<4x4xf32>, vector<4x8xf32>, vector<4x8xf32> -> vector<4x8xf32>
    %c0_25 = arith.constant 0 : index
    %c16 = arith.constant 16 : index
    %63 = vector.load %arg21[%c0_25, %c16] : memref<8x32xf32, #tpu.memory_space<vmem>>, vector<4x8xf32>
    tpu.vector_store %arg21[%c0_25, %c16], %62 {strides = array<i32>} : memref<8x32xf32, #tpu.memory_space<vmem>>, vector<4x8xf32>,
    %64 = vector.extract_strided_slice %7 {offsets = [0, 24], sizes = [4, 8], strides = [1, 1]} : vector<8x32xf32> to vector<4x8xf32>
    %65 = vector.extract_strided_slice %8 {offsets = [0, 24], sizes = [4, 8], strides = [1, 1]} : vector<8x32xf32> to vector<4x8xf32>
    %66 = vector.extract_strided_slice %9 {offsets = [0, 24], sizes = [4, 8], strides = [1, 1]} : vector<8x32xf32> to vector<4x8xf32>
    %cst_26 = arith.constant dense<0.000000e+00> : vector<4x4xf32>
    %67 = tpu.matmul %64, %65, %cst_26 {dimension_numbers = #tpu.dot_dimension_numbers<[1], [1], [0], [0], [0, 0, 1, 0], [], []>} : vector<4x8xf32>, vector<4x8xf32>, vector<4x4xf32> -> vector<4x4xf32>
    %cst_27 = arith.constant 0.353553385 : f32
    %68 = vector.broadcast %cst_27 : f32 to vector<4x4xf32>
    %69 = arith.mulf %67, %68 : vector<4x4xf32>
    %cst_28 = arith.constant dense<0xFF800000> : vector<4xf32>
    %70 = vector.multi_reduction <maximumf>, %69, %cst_28 [1] : vector<4x4xf32> to vector<4xf32>
    %71 = vector.shape_cast %70 : vector<4xf32> to vector<4x1xf32>
    %72 = vector.broadcast %71 : vector<4x1xf32> to vector<4x4xf32>
    %73 = arith.subf %69, %72 : vector<4x4xf32>
    %74 = math.exp %73 : vector<4x4xf32>
    %cst_29 = arith.constant dense<0.000000e+00> : vector<4xf32>
    %75 = vector.multi_reduction <add>, %74, %cst_29 [1] : vector<4x4xf32> to vector<4xf32>
    %76 = vector.shape_cast %75 : vector<4xf32> to vector<4x1xf32>
    %77 = tpu.reciprocal %76 {approx = true} : vector<4x1xf32> -> vector<4x1xf32>
    %78 = vector.broadcast %77 : vector<4x1xf32> to vector<4x4xf32>
    %79 = arith.mulf %74, %78 : vector<4x4xf32>
    %cst_30 = arith.constant dense<0.000000e+00> : vector<4x8xf32>
    %80 = tpu.matmul %79, %66, %cst_30 {dimension_numbers = #tpu.dot_dimension_numbers<[1], [0], [0], [1], [0, 0, 1, 1], [], []>} : vector<4x4xf32>, vector<4x8xf32>, vector<4x8xf32> -> vector<4x8xf32>
    %c0_31 = arith.constant 0 : index
    %c24 = arith.constant 24 : index
    %81 = vector.load %arg21[%c0_31, %c24] : memref<8x32xf32, #tpu.memory_space<vmem>>, vector<4x8xf32>
    tpu.vector_store %arg21[%c0_31, %c24], %80 {strides = array<i32>} : memref<8x32xf32, #tpu.memory_space<vmem>>, vector<4x8xf32>,
    %82 = vector.extract_strided_slice %7 {offsets = [4, 0], sizes = [4, 8], strides = [1, 1]} : vector<8x32xf32> to vector<4x8xf32>
    %83 = vector.extract_strided_slice %8 {offsets = [4, 0], sizes = [4, 8], strides = [1, 1]} : vector<8x32xf32> to vector<4x8xf32>
    %84 = vector.extract_strided_slice %9 {offsets = [4, 0], sizes = [4, 8], strides = [1, 1]} : vector<8x32xf32> to vector<4x8xf32>
    %cst_32 = arith.constant dense<0.000000e+00> : vector<4x4xf32>
    %85 = tpu.matmul %82, %83, %cst_32 {dimension_numbers = #tpu.dot_dimension_numbers<[1], [1], [0], [0], [0, 0, 1, 0], [], []>} : vector<4x8xf32>, vector<4x8xf32>, vector<4x4xf32> -> vector<4x4xf32>
    %cst_33 = arith.constant 0.353553385 : f32
    %86 = vector.broadcast %cst_33 : f32 to vector<4x4xf32>
    %87 = arith.mulf %85, %86 : vector<4x4xf32>
    %cst_34 = arith.constant dense<0xFF800000> : vector<4xf32>
    %88 = vector.multi_reduction <maximumf>, %87, %cst_34 [1] : vector<4x4xf32> to vector<4xf32>
    %89 = vector.shape_cast %88 : vector<4xf32> to vector<4x1xf32>
    %90 = vector.broadcast %89 : vector<4x1xf32> to vector<4x4xf32>
    %91 = arith.subf %87, %90 : vector<4x4xf32>
    %92 = math.exp %91 : vector<4x4xf32>
    %cst_35 = arith.constant dense<0.000000e+00> : vector<4xf32>
    %93 = vector.multi_reduction <add>, %92, %cst_35 [1] : vector<4x4xf32> to vector<4xf32>
    %94 = vector.shape_cast %93 : vector<4xf32> to vector<4x1xf32>
    %95 = tpu.reciprocal %94 {approx = true} : vector<4x1xf32> -> vector<4x1xf32>
    %96 = vector.broadcast %95 : vector<4x1xf32> to vector<4x4xf32>
    %97 = arith.mulf %92, %96 : vector<4x4xf32>
    %cst_36 = arith.constant dense<0.000000e+00> : vector<4x8xf32>
    %98 = tpu.matmul %97, %84, %cst_36 {dimension_numbers = #tpu.dot_dimension_numbers<[1], [0], [0], [1], [0, 0, 1, 1], [], []>} : vector<4x4xf32>, vector<4x8xf32>, vector<4x8xf32> -> vector<4x8xf32>
    %c4 = arith.constant 4 : index
    %c0_37 = arith.constant 0 : index
    %99 = vector.load %arg21[%c4, %c0_37] : memref<8x32xf32, #tpu.memory_space<vmem>>, vector<4x8xf32>
    tpu.vector_store %arg21[%c4, %c0_37], %98 {strides = array<i32>} : memref<8x32xf32, #tpu.memory_space<vmem>>, vector<4x8xf32>,
    %100 = vector.extract_strided_slice %7 {offsets = [4, 8], sizes = [4, 8], strides = [1, 1]} : vector<8x32xf32> to vector<4x8xf32>
    %101 = vector.extract_strided_slice %8 {offsets = [4, 8], sizes = [4, 8], strides = [1, 1]} : vector<8x32xf32> to vector<4x8xf32>
    %102 = vector.extract_strided_slice %9 {offsets = [4, 8], sizes = [4, 8], strides = [1, 1]} : vector<8x32xf32> to vector<4x8xf32>
    %cst_38 = arith.constant dense<0.000000e+00> : vector<4x4xf32>
    %103 = tpu.matmul %100, %101, %cst_38 {dimension_numbers = #tpu.dot_dimension_numbers<[1], [1], [0], [0], [0, 0, 1, 0], [], []>} : vector<4x8xf32>, vector<4x8xf32>, vector<4x4xf32> -> vector<4x4xf32>
    %cst_39 = arith.constant 0.353553385 : f32
    %104 = vector.broadcast %cst_39 : f32 to vector<4x4xf32>
    %105 = arith.mulf %103, %104 : vector<4x4xf32>
    %cst_40 = arith.constant dense<0xFF800000> : vector<4xf32>
    %106 = vector.multi_reduction <maximumf>, %105, %cst_40 [1] : vector<4x4xf32> to vector<4xf32>
    %107 = vector.shape_cast %106 : vector<4xf32> to vector<4x1xf32>
    %108 = vector.broadcast %107 : vector<4x1xf32> to vector<4x4xf32>
    %109 = arith.subf %105, %108 : vector<4x4xf32>
    %110 = math.exp %109 : vector<4x4xf32>
    %cst_41 = arith.constant dense<0.000000e+00> : vector<4xf32>
    %111 = vector.multi_reduction <add>, %110, %cst_41 [1] : vector<4x4xf32> to vector<4xf32>
    %112 = vector.shape_cast %111 : vector<4xf32> to vector<4x1xf32>
    %113 = tpu.reciprocal %112 {approx = true} : vector<4x1xf32> -> vector<4x1xf32>
    %114 = vector.broadcast %113 : vector<4x1xf32> to vector<4x4xf32>
    %115 = arith.mulf %110, %114 : vector<4x4xf32>
    %cst_42 = arith.constant dense<0.000000e+00> : vector<4x8xf32>
    %116 = tpu.matmul %115, %102, %cst_42 {dimension_numbers = #tpu.dot_dimension_numbers<[1], [0], [0], [1], [0, 0, 1, 1], [], []>} : vector<4x4xf32>, vector<4x8xf32>, vector<4x8xf32> -> vector<4x8xf32>
    %c4_43 = arith.constant 4 : index
    %c8_44 = arith.constant 8 : index
    %117 = vector.load %arg21[%c4_43, %c8_44] : memref<8x32xf32, #tpu.memory_space<vmem>>, vector<4x8xf32>
    tpu.vector_store %arg21[%c4_43, %c8_44], %116 {strides = array<i32>} : memref<8x32xf32, #tpu.memory_space<vmem>>, vector<4x8xf32>,
    %118 = vector.extract_strided_slice %7 {offsets = [4, 16], sizes = [4, 8], strides = [1, 1]} : vector<8x32xf32> to vector<4x8xf32>
    %119 = vector.extract_strided_slice %8 {offsets = [4, 16], sizes = [4, 8], strides = [1, 1]} : vector<8x32xf32> to vector<4x8xf32>
    %120 = vector.extract_strided_slice %9 {offsets = [4, 16], sizes = [4, 8], strides = [1, 1]} : vector<8x32xf32> to vector<4x8xf32>
    %cst_45 = arith.constant dense<0.000000e+00> : vector<4x4xf32>
    %121 = tpu.matmul %118, %119, %cst_45 {dimension_numbers = #tpu.dot_dimension_numbers<[1], [1], [0], [0], [0, 0, 1, 0], [], []>} : vector<4x8xf32>, vector<4x8xf32>, vector<4x4xf32> -> vector<4x4xf32>
    %cst_46 = arith.constant 0.353553385 : f32
    %122 = vector.broadcast %cst_46 : f32 to vector<4x4xf32>
    %123 = arith.mulf %121, %122 : vector<4x4xf32>
    %cst_47 = arith.constant dense<0xFF800000> : vector<4xf32>
    %124 = vector.multi_reduction <maximumf>, %123, %cst_47 [1] : vector<4x4xf32> to vector<4xf32>
    %125 = vector.shape_cast %124 : vector<4xf32> to vector<4x1xf32>
    %126 = vector.broadcast %125 : vector<4x1xf32> to vector<4x4xf32>
    %127 = arith.subf %123, %126 : vector<4x4xf32>
    %128 = math.exp %127 : vector<4x4xf32>
    %cst_48 = arith.constant dense<0.000000e+00> : vector<4xf32>
    %129 = vector.multi_reduction <add>, %128, %cst_48 [1] : vector<4x4xf32> to vector<4xf32>
    %130 = vector.shape_cast %129 : vector<4xf32> to vector<4x1xf32>
    %131 = tpu.reciprocal %130 {approx = true} : vector<4x1xf32> -> vector<4x1xf32>
    %132 = vector.broadcast %131 : vector<4x1xf32> to vector<4x4xf32>
    %133 = arith.mulf %128, %132 : vector<4x4xf32>
    %cst_49 = arith.constant dense<0.000000e+00> : vector<4x8xf32>
    %134 = tpu.matmul %133, %120, %cst_49 {dimension_numbers = #tpu.dot_dimension_numbers<[1], [0], [0], [1], [0, 0, 1, 1], [], []>} : vector<4x4xf32>, vector<4x8xf32>, vector<4x8xf32> -> vector<4x8xf32>
    %c4_50 = arith.constant 4 : index
    %c16_51 = arith.constant 16 : index
    %135 = vector.load %arg21[%c4_50, %c16_51] : memref<8x32xf32, #tpu.memory_space<vmem>>, vector<4x8xf32>
    tpu.vector_store %arg21[%c4_50, %c16_51], %134 {strides = array<i32>} : memref<8x32xf32, #tpu.memory_space<vmem>>, vector<4x8xf32>,
    %136 = vector.extract_strided_slice %7 {offsets = [4, 24], sizes = [4, 8], strides = [1, 1]} : vector<8x32xf32> to vector<4x8xf32>
    %137 = vector.extract_strided_slice %8 {offsets = [4, 24], sizes = [4, 8], strides = [1, 1]} : vector<8x32xf32> to vector<4x8xf32>
    %138 = vector.extract_strided_slice %9 {offsets = [4, 24], sizes = [4, 8], strides = [1, 1]} : vector<8x32xf32> to vector<4x8xf32>
    %cst_52 = arith.constant dense<0.000000e+00> : vector<4x4xf32>
    %139 = tpu.matmul %136, %137, %cst_52 {dimension_numbers = #tpu.dot_dimension_numbers<[1], [1], [0], [0], [0, 0, 1, 0], [], []>} : vector<4x8xf32>, vector<4x8xf32>, vector<4x4xf32> -> vector<4x4xf32>
    %cst_53 = arith.constant 0.353553385 : f32
    %140 = vector.broadcast %cst_53 : f32 to vector<4x4xf32>
    %141 = arith.mulf %139, %140 : vector<4x4xf32>
    %cst_54 = arith.constant dense<0xFF800000> : vector<4xf32>
    %142 = vector.multi_reduction <maximumf>, %141, %cst_54 [1] : vector<4x4xf32> to vector<4xf32>
    %143 = vector.shape_cast %142 : vector<4xf32> to vector<4x1xf32>
    %144 = vector.broadcast %143 : vector<4x1xf32> to vector<4x4xf32>
    %145 = arith.subf %141, %144 : vector<4x4xf32>
    %146 = math.exp %145 : vector<4x4xf32>
    %cst_55 = arith.constant dense<0.000000e+00> : vector<4xf32>
    %147 = vector.multi_reduction <add>, %146, %cst_55 [1] : vector<4x4xf32> to vector<4xf32>
    %148 = vector.shape_cast %147 : vector<4xf32> to vector<4x1xf32>
    %149 = tpu.reciprocal %148 {approx = true} : vector<4x1xf32> -> vector<4x1xf32>
    %150 = vector.broadcast %149 : vector<4x1xf32> to vector<4x4xf32>
    %151 = arith.mulf %146, %150 : vector<4x4xf32>
    %cst_56 = arith.constant dense<0.000000e+00> : vector<4x8xf32>
    %152 = tpu.matmul %151, %138, %cst_56 {dimension_numbers = #tpu.dot_dimension_numbers<[1], [0], [0], [1], [0, 0, 1, 1], [], []>} : vector<4x4xf32>, vector<4x8xf32>, vector<4x8xf32> -> vector<4x8xf32>
    %c4_57 = arith.constant 4 : index
    %c24_58 = arith.constant 24 : index
    %153 = vector.load %arg21[%c4_57, %c24_58] : memref<8x32xf32, #tpu.memory_space<vmem>>, vector<4x8xf32>
    tpu.vector_store %arg21[%c4_57, %c24_58], %152 {strides = array<i32>} : memref<8x32xf32, #tpu.memory_space<vmem>>, vector<4x8xf32>,
    %c0_59 = arith.constant 0 : index
    %c0_60 = arith.constant 0 : index
    %154 = vector.load %arg21[%c0_59, %c0_60] : memref<8x32xf32, #tpu.memory_space<vmem>>, vector<8x32xf32>
    %c0_61 = arith.constant 0 : index
    %c0_62 = arith.constant 0 : index
    %155 = vector.load %arg4[%c0_61, %c0_62] : memref<32x32xf32, #tpu.memory_space<vmem>>, vector<32x32xf32>
    %cst_63 = arith.constant dense<0.000000e+00> : vector<8x32xf32>
    %156 = tpu.matmul %154, %155, %cst_63 {dimension_numbers = #tpu.dot_dimension_numbers<[1], [0], [0], [1], [0, 0, 1, 1], [], []>} : vector<8x32xf32>, vector<32x32xf32>, vector<8x32xf32> -> vector<8x32xf32>
    %c0_64 = arith.constant 0 : index
    %c0_65 = arith.constant 0 : index
    %157 = vector.load %arg5[%c0_64, %c0_65] : memref<1x32xf32, #tpu.memory_space<vmem>>, vector<1x32xf32>
    %158 = vector.broadcast %157 : vector<1x32xf32> to vector<8x32xf32>
    %159 = arith.addf %156, %158 : vector<8x32xf32>
    %160 = arith.addf %0, %159 : vector<8x32xf32>
    %c0_66 = arith.constant 0 : index
    %c0_67 = arith.constant 0 : index
    %161 = vector.load %arg6[%c0_66, %c0_67] : memref<1x32xf32, #tpu.memory_space<vmem>>, vector<1x32xf32>
    %c0_68 = arith.constant 0 : index
    %c0_69 = arith.constant 0 : index
    %162 = vector.load %arg7[%c0_68, %c0_69] : memref<1x32xf32, #tpu.memory_space<vmem>>, vector<1x32xf32>
    %cst_70 = arith.constant dense<0.000000e+00> : vector<8xf32>
    %163 = vector.multi_reduction <add>, %160, %cst_70 [1] : vector<8x32xf32> to vector<8xf32>
    %164 = vector.shape_cast %163 : vector<8xf32> to vector<8x1xf32>
    %cst_71 = arith.constant 3.200000e+01 : f32
    %165 = vector.broadcast %cst_71 : f32 to vector<8x1xf32>
    %166 = arith.divf %164, %165 : vector<8x1xf32>
    %167 = vector.broadcast %166 : vector<8x1xf32> to vector<8x32xf32>
    %168 = arith.subf %160, %167 : vector<8x32xf32>
    %169 = arith.mulf %168, %168 : vector<8x32xf32>
    %cst_72 = arith.constant dense<0.000000e+00> : vector<8xf32>
    %170 = vector.multi_reduction <add>, %169, %cst_72 [1] : vector<8x32xf32> to vector<8xf32>
    %171 = vector.shape_cast %170 : vector<8xf32> to vector<8x1xf32>
    %cst_73 = arith.constant 3.200000e+01 : f32
    %172 = vector.broadcast %cst_73 : f32 to vector<8x1xf32>
    %173 = arith.divf %171, %172 : vector<8x1xf32>
    %174 = vector.broadcast %166 : vector<8x1xf32> to vector<8x32xf32>
    %175 = arith.subf %160, %174 : vector<8x32xf32>
    %cst_74 = arith.constant 9.99999974E-6 : f32
    %176 = vector.broadcast %cst_74 : f32 to vector<8x1xf32>
    %177 = arith.addf %173, %176 : vector<8x1xf32>
    %178 = math.rsqrt %177 : vector<8x1xf32>
    %179 = vector.broadcast %178 : vector<8x1xf32> to vector<8x32xf32>
    %180 = arith.mulf %175, %179 : vector<8x32xf32>
    %181 = vector.broadcast %161 : vector<1x32xf32> to vector<8x32xf32>
    %182 = arith.mulf %180, %181 : vector<8x32xf32>
    %183 = vector.broadcast %162 : vector<1x32xf32> to vector<8x32xf32>
    %184 = arith.addf %182, %183 : vector<8x32xf32>
    %c0_75 = arith.constant 0 : index
    %c0_76 = arith.constant 0 : index
    %185 = vector.load %arg8[%c0_75, %c0_76] : memref<32x96xf32, #tpu.memory_space<vmem>>, vector<32x96xf32>
    %c0_77 = arith.constant 0 : index
    %c0_78 = arith.constant 0 : index
    %186 = vector.load %arg9[%c0_77, %c0_78] : memref<1x96xf32, #tpu.memory_space<vmem>>, vector<1x96xf32>
    %187 = vector.extract_strided_slice %185 {offsets = [0, 0], sizes = [32, 32], strides = [1, 1]} : vector<32x96xf32> to vector<32x32xf32>
    %cst_79 = arith.constant dense<0.000000e+00> : vector<8x32xf32>
    %188 = tpu.matmul %184, %187, %cst_79 {dimension_numbers = #tpu.dot_dimension_numbers<[1], [0], [0], [1], [0, 0, 1, 1], [], []>} : vector<8x32xf32>, vector<32x32xf32>, vector<8x32xf32> -> vector<8x32xf32>
    %189 = vector.extract_strided_slice %186 {offsets = [0, 0], sizes = [1, 32], strides = [1, 1]} : vector<1x96xf32> to vector<1x32xf32>
    %190 = vector.broadcast %189 : vector<1x32xf32> to vector<8x32xf32>
    %191 = arith.addf %188, %190 : vector<8x32xf32>
    %192 = vector.extract_strided_slice %185 {offsets = [0, 32], sizes = [32, 64], strides = [1, 1]} : vector<32x96xf32> to vector<32x64xf32>
    %cst_80 = arith.constant dense<0.000000e+00> : vector<16x64xf32>
    %193 = tpu.matmul %1, %192, %cst_80 {dimension_numbers = #tpu.dot_dimension_numbers<[1], [0], [0], [1], [0, 0, 1, 1], [], []>} : vector<16x32xf32>, vector<32x64xf32>, vector<16x64xf32> -> vector<16x64xf32>
    %194 = vector.extract_strided_slice %186 {offsets = [0, 32], sizes = [1, 64], strides = [1, 1]} : vector<1x96xf32> to vector<1x64xf32>
    %195 = vector.broadcast %194 : vector<1x64xf32> to vector<16x64xf32>
    %196 = arith.addf %193, %195 : vector<16x64xf32>
    %197 = vector.extract_strided_slice %196 {offsets = [0, 0], sizes = [16, 32], strides = [1, 1]} : vector<16x64xf32> to vector<16x32xf32>
    %198 = vector.extract_strided_slice %196 {offsets = [0, 32], sizes = [16, 32], strides = [1, 1]} : vector<16x64xf32> to vector<16x32xf32>
    %199 = vector.extract_strided_slice %191 {offsets = [0, 0], sizes = [4, 8], strides = [1, 1]} : vector<8x32xf32> to vector<4x8xf32>
    %200 = vector.extract_strided_slice %197 {offsets = [0, 0], sizes = [8, 8], strides = [1, 1]} : vector<16x32xf32> to vector<8x8xf32>
    %201 = vector.extract_strided_slice %198 {offsets = [0, 0], sizes = [8, 8], strides = [1, 1]} : vector<16x32xf32> to vector<8x8xf32>
    %cst_81 = arith.constant dense<0.000000e+00> : vector<4x8xf32>
    %202 = tpu.matmul %199, %200, %cst_81 {dimension_numbers = #tpu.dot_dimension_numbers<[1], [1], [0], [0], [0, 0, 1, 0], [], []>} : vector<4x8xf32>, vector<8x8xf32>, vector<4x8xf32> -> vector<4x8xf32>
    %cst_82 = arith.constant 0.353553385 : f32
    %203 = vector.broadcast %cst_82 : f32 to vector<4x8xf32>
    %204 = arith.mulf %202, %203 : vector<4x8xf32>
    %cst_83 = arith.constant dense<0xFF800000> : vector<4xf32>
    %205 = vector.multi_reduction <maximumf>, %204, %cst_83 [1] : vector<4x8xf32> to vector<4xf32>
    %206 = vector.shape_cast %205 : vector<4xf32> to vector<4x1xf32>
    %207 = vector.broadcast %206 : vector<4x1xf32> to vector<4x8xf32>
    %208 = arith.subf %204, %207 : vector<4x8xf32>
    %209 = math.exp %208 : vector<4x8xf32>
    %cst_84 = arith.constant dense<0.000000e+00> : vector<4xf32>
    %210 = vector.multi_reduction <add>, %209, %cst_84 [1] : vector<4x8xf32> to vector<4xf32>
    %211 = vector.shape_cast %210 : vector<4xf32> to vector<4x1xf32>
    %212 = tpu.reciprocal %211 {approx = true} : vector<4x1xf32> -> vector<4x1xf32>
    %213 = vector.broadcast %212 : vector<4x1xf32> to vector<4x8xf32>
    %214 = arith.mulf %209, %213 : vector<4x8xf32>
    %cst_85 = arith.constant dense<0.000000e+00> : vector<4x8xf32>
    %215 = tpu.matmul %214, %201, %cst_85 {dimension_numbers = #tpu.dot_dimension_numbers<[1], [0], [0], [1], [0, 0, 1, 1], [], []>} : vector<4x8xf32>, vector<8x8xf32>, vector<4x8xf32> -> vector<4x8xf32>
    %c0_86 = arith.constant 0 : index
    %c0_87 = arith.constant 0 : index
    %216 = vector.load %arg21[%c0_86, %c0_87] : memref<8x32xf32, #tpu.memory_space<vmem>>, vector<4x8xf32>
    tpu.vector_store %arg21[%c0_86, %c0_87], %215 {strides = array<i32>} : memref<8x32xf32, #tpu.memory_space<vmem>>, vector<4x8xf32>,
    %217 = vector.extract_strided_slice %191 {offsets = [0, 8], sizes = [4, 8], strides = [1, 1]} : vector<8x32xf32> to vector<4x8xf32>
    %218 = vector.extract_strided_slice %197 {offsets = [0, 8], sizes = [8, 8], strides = [1, 1]} : vector<16x32xf32> to vector<8x8xf32>
    %219 = vector.extract_strided_slice %198 {offsets = [0, 8], sizes = [8, 8], strides = [1, 1]} : vector<16x32xf32> to vector<8x8xf32>
    %cst_88 = arith.constant dense<0.000000e+00> : vector<4x8xf32>
    %220 = tpu.matmul %217, %218, %cst_88 {dimension_numbers = #tpu.dot_dimension_numbers<[1], [1], [0], [0], [0, 0, 1, 0], [], []>} : vector<4x8xf32>, vector<8x8xf32>, vector<4x8xf32> -> vector<4x8xf32>
    %cst_89 = arith.constant 0.353553385 : f32
    %221 = vector.broadcast %cst_89 : f32 to vector<4x8xf32>
    %222 = arith.mulf %220, %221 : vector<4x8xf32>
    %cst_90 = arith.constant dense<0xFF800000> : vector<4xf32>
    %223 = vector.multi_reduction <maximumf>, %222, %cst_90 [1] : vector<4x8xf32> to vector<4xf32>
    %224 = vector.shape_cast %223 : vector<4xf32> to vector<4x1xf32>
    %225 = vector.broadcast %224 : vector<4x1xf32> to vector<4x8xf32>
    %226 = arith.subf %222, %225 : vector<4x8xf32>
    %227 = math.exp %226 : vector<4x8xf32>
    %cst_91 = arith.constant dense<0.000000e+00> : vector<4xf32>
    %228 = vector.multi_reduction <add>, %227, %cst_91 [1] : vector<4x8xf32> to vector<4xf32>
    %229 = vector.shape_cast %228 : vector<4xf32> to vector<4x1xf32>
    %230 = tpu.reciprocal %229 {approx = true} : vector<4x1xf32> -> vector<4x1xf32>
    %231 = vector.broadcast %230 : vector<4x1xf32> to vector<4x8xf32>
    %232 = arith.mulf %227, %231 : vector<4x8xf32>
    %cst_92 = arith.constant dense<0.000000e+00> : vector<4x8xf32>
    %233 = tpu.matmul %232, %219, %cst_92 {dimension_numbers = #tpu.dot_dimension_numbers<[1], [0], [0], [1], [0, 0, 1, 1], [], []>} : vector<4x8xf32>, vector<8x8xf32>, vector<4x8xf32> -> vector<4x8xf32>
    %c0_93 = arith.constant 0 : index
    %c8_94 = arith.constant 8 : index
    %234 = vector.load %arg21[%c0_93, %c8_94] : memref<8x32xf32, #tpu.memory_space<vmem>>, vector<4x8xf32>
    tpu.vector_store %arg21[%c0_93, %c8_94], %233 {strides = array<i32>} : memref<8x32xf32, #tpu.memory_space<vmem>>, vector<4x8xf32>,
    %235 = vector.extract_strided_slice %191 {offsets = [0, 16], sizes = [4, 8], strides = [1, 1]} : vector<8x32xf32> to vector<4x8xf32>
    %236 = vector.extract_strided_slice %197 {offsets = [0, 16], sizes = [8, 8], strides = [1, 1]} : vector<16x32xf32> to vector<8x8xf32>
    %237 = vector.extract_strided_slice %198 {offsets = [0, 16], sizes = [8, 8], strides = [1, 1]} : vector<16x32xf32> to vector<8x8xf32>
    %cst_95 = arith.constant dense<0.000000e+00> : vector<4x8xf32>
    %238 = tpu.matmul %235, %236, %cst_95 {dimension_numbers = #tpu.dot_dimension_numbers<[1], [1], [0], [0], [0, 0, 1, 0], [], []>} : vector<4x8xf32>, vector<8x8xf32>, vector<4x8xf32> -> vector<4x8xf32>
    %cst_96 = arith.constant 0.353553385 : f32
    %239 = vector.broadcast %cst_96 : f32 to vector<4x8xf32>
    %240 = arith.mulf %238, %239 : vector<4x8xf32>
    %cst_97 = arith.constant dense<0xFF800000> : vector<4xf32>
    %241 = vector.multi_reduction <maximumf>, %240, %cst_97 [1] : vector<4x8xf32> to vector<4xf32>
    %242 = vector.shape_cast %241 : vector<4xf32> to vector<4x1xf32>
    %243 = vector.broadcast %242 : vector<4x1xf32> to vector<4x8xf32>
    %244 = arith.subf %240, %243 : vector<4x8xf32>
    %245 = math.exp %244 : vector<4x8xf32>
    %cst_98 = arith.constant dense<0.000000e+00> : vector<4xf32>
    %246 = vector.multi_reduction <add>, %245, %cst_98 [1] : vector<4x8xf32> to vector<4xf32>
    %247 = vector.shape_cast %246 : vector<4xf32> to vector<4x1xf32>
    %248 = tpu.reciprocal %247 {approx = true} : vector<4x1xf32> -> vector<4x1xf32>
    %249 = vector.broadcast %248 : vector<4x1xf32> to vector<4x8xf32>
    %250 = arith.mulf %245, %249 : vector<4x8xf32>
    %cst_99 = arith.constant dense<0.000000e+00> : vector<4x8xf32>
    %251 = tpu.matmul %250, %237, %cst_99 {dimension_numbers = #tpu.dot_dimension_numbers<[1], [0], [0], [1], [0, 0, 1, 1], [], []>} : vector<4x8xf32>, vector<8x8xf32>, vector<4x8xf32> -> vector<4x8xf32>
    %c0_100 = arith.constant 0 : index
    %c16_101 = arith.constant 16 : index
    %252 = vector.load %arg21[%c0_100, %c16_101] : memref<8x32xf32, #tpu.memory_space<vmem>>, vector<4x8xf32>
    tpu.vector_store %arg21[%c0_100, %c16_101], %251 {strides = array<i32>} : memref<8x32xf32, #tpu.memory_space<vmem>>, vector<4x8xf32>,
    %253 = vector.extract_strided_slice %191 {offsets = [0, 24], sizes = [4, 8], strides = [1, 1]} : vector<8x32xf32> to vector<4x8xf32>
    %254 = vector.extract_strided_slice %197 {offsets = [0, 24], sizes = [8, 8], strides = [1, 1]} : vector<16x32xf32> to vector<8x8xf32>
    %255 = vector.extract_strided_slice %198 {offsets = [0, 24], sizes = [8, 8], strides = [1, 1]} : vector<16x32xf32> to vector<8x8xf32>
    %cst_102 = arith.constant dense<0.000000e+00> : vector<4x8xf32>
    %256 = tpu.matmul %253, %254, %cst_102 {dimension_numbers = #tpu.dot_dimension_numbers<[1], [1], [0], [0], [0, 0, 1, 0], [], []>} : vector<4x8xf32>, vector<8x8xf32>, vector<4x8xf32> -> vector<4x8xf32>
    %cst_103 = arith.constant 0.353553385 : f32
    %257 = vector.broadcast %cst_103 : f32 to vector<4x8xf32>
    %258 = arith.mulf %256, %257 : vector<4x8xf32>
    %cst_104 = arith.constant dense<0xFF800000> : vector<4xf32>
    %259 = vector.multi_reduction <maximumf>, %258, %cst_104 [1] : vector<4x8xf32> to vector<4xf32>
    %260 = vector.shape_cast %259 : vector<4xf32> to vector<4x1xf32>
    %261 = vector.broadcast %260 : vector<4x1xf32> to vector<4x8xf32>
    %262 = arith.subf %258, %261 : vector<4x8xf32>
    %263 = math.exp %262 : vector<4x8xf32>
    %cst_105 = arith.constant dense<0.000000e+00> : vector<4xf32>
    %264 = vector.multi_reduction <add>, %263, %cst_105 [1] : vector<4x8xf32> to vector<4xf32>
    %265 = vector.shape_cast %264 : vector<4xf32> to vector<4x1xf32>
    %266 = tpu.reciprocal %265 {approx = true} : vector<4x1xf32> -> vector<4x1xf32>
    %267 = vector.broadcast %266 : vector<4x1xf32> to vector<4x8xf32>
    %268 = arith.mulf %263, %267 : vector<4x8xf32>
    %cst_106 = arith.constant dense<0.000000e+00> : vector<4x8xf32>
    %269 = tpu.matmul %268, %255, %cst_106 {dimension_numbers = #tpu.dot_dimension_numbers<[1], [0], [0], [1], [0, 0, 1, 1], [], []>} : vector<4x8xf32>, vector<8x8xf32>, vector<4x8xf32> -> vector<4x8xf32>
    %c0_107 = arith.constant 0 : index
    %c24_108 = arith.constant 24 : index
    %270 = vector.load %arg21[%c0_107, %c24_108] : memref<8x32xf32, #tpu.memory_space<vmem>>, vector<4x8xf32>
    tpu.vector_store %arg21[%c0_107, %c24_108], %269 {strides = array<i32>} : memref<8x32xf32, #tpu.memory_space<vmem>>, vector<4x8xf32>,
    %271 = vector.extract_strided_slice %191 {offsets = [4, 0], sizes = [4, 8], strides = [1, 1]} : vector<8x32xf32> to vector<4x8xf32>
    %272 = vector.extract_strided_slice %197 {offsets = [8, 0], sizes = [8, 8], strides = [1, 1]} : vector<16x32xf32> to vector<8x8xf32>
    %273 = vector.extract_strided_slice %198 {offsets = [8, 0], sizes = [8, 8], strides = [1, 1]} : vector<16x32xf32> to vector<8x8xf32>
    %cst_109 = arith.constant dense<0.000000e+00> : vector<4x8xf32>
    %274 = tpu.matmul %271, %272, %cst_109 {dimension_numbers = #tpu.dot_dimension_numbers<[1], [1], [0], [0], [0, 0, 1, 0], [], []>} : vector<4x8xf32>, vector<8x8xf32>, vector<4x8xf32> -> vector<4x8xf32>
    %cst_110 = arith.constant 0.353553385 : f32
    %275 = vector.broadcast %cst_110 : f32 to vector<4x8xf32>
    %276 = arith.mulf %274, %275 : vector<4x8xf32>
    %cst_111 = arith.constant dense<0xFF800000> : vector<4xf32>
    %277 = vector.multi_reduction <maximumf>, %276, %cst_111 [1] : vector<4x8xf32> to vector<4xf32>
    %278 = vector.shape_cast %277 : vector<4xf32> to vector<4x1xf32>
    %279 = vector.broadcast %278 : vector<4x1xf32> to vector<4x8xf32>
    %280 = arith.subf %276, %279 : vector<4x8xf32>
    %281 = math.exp %280 : vector<4x8xf32>
    %cst_112 = arith.constant dense<0.000000e+00> : vector<4xf32>
    %282 = vector.multi_reduction <add>, %281, %cst_112 [1] : vector<4x8xf32> to vector<4xf32>
    %283 = vector.shape_cast %282 : vector<4xf32> to vector<4x1xf32>
    %284 = tpu.reciprocal %283 {approx = true} : vector<4x1xf32> -> vector<4x1xf32>
    %285 = vector.broadcast %284 : vector<4x1xf32> to vector<4x8xf32>
    %286 = arith.mulf %281, %285 : vector<4x8xf32>
    %cst_113 = arith.constant dense<0.000000e+00> : vector<4x8xf32>
    %287 = tpu.matmul %286, %273, %cst_113 {dimension_numbers = #tpu.dot_dimension_numbers<[1], [0], [0], [1], [0, 0, 1, 1], [], []>} : vector<4x8xf32>, vector<8x8xf32>, vector<4x8xf32> -> vector<4x8xf32>
    %c4_114 = arith.constant 4 : index
    %c0_115 = arith.constant 0 : index
    %288 = vector.load %arg21[%c4_114, %c0_115] : memref<8x32xf32, #tpu.memory_space<vmem>>, vector<4x8xf32>
    tpu.vector_store %arg21[%c4_114, %c0_115], %287 {strides = array<i32>} : memref<8x32xf32, #tpu.memory_space<vmem>>, vector<4x8xf32>,
    %289 = vector.extract_strided_slice %191 {offsets = [4, 8], sizes = [4, 8], strides = [1, 1]} : vector<8x32xf32> to vector<4x8xf32>
    %290 = vector.extract_strided_slice %197 {offsets = [8, 8], sizes = [8, 8], strides = [1, 1]} : vector<16x32xf32> to vector<8x8xf32>
    %291 = vector.extract_strided_slice %198 {offsets = [8, 8], sizes = [8, 8], strides = [1, 1]} : vector<16x32xf32> to vector<8x8xf32>
    %cst_116 = arith.constant dense<0.000000e+00> : vector<4x8xf32>
    %292 = tpu.matmul %289, %290, %cst_116 {dimension_numbers = #tpu.dot_dimension_numbers<[1], [1], [0], [0], [0, 0, 1, 0], [], []>} : vector<4x8xf32>, vector<8x8xf32>, vector<4x8xf32> -> vector<4x8xf32>
    %cst_117 = arith.constant 0.353553385 : f32
    %293 = vector.broadcast %cst_117 : f32 to vector<4x8xf32>
    %294 = arith.mulf %292, %293 : vector<4x8xf32>
    %cst_118 = arith.constant dense<0xFF800000> : vector<4xf32>
    %295 = vector.multi_reduction <maximumf>, %294, %cst_118 [1] : vector<4x8xf32> to vector<4xf32>
    %296 = vector.shape_cast %295 : vector<4xf32> to vector<4x1xf32>
    %297 = vector.broadcast %296 : vector<4x1xf32> to vector<4x8xf32>
    %298 = arith.subf %294, %297 : vector<4x8xf32>
    %299 = math.exp %298 : vector<4x8xf32>
    %cst_119 = arith.constant dense<0.000000e+00> : vector<4xf32>
    %300 = vector.multi_reduction <add>, %299, %cst_119 [1] : vector<4x8xf32> to vector<4xf32>
    %301 = vector.shape_cast %300 : vector<4xf32> to vector<4x1xf32>
    %302 = tpu.reciprocal %301 {approx = true} : vector<4x1xf32> -> vector<4x1xf32>
    %303 = vector.broadcast %302 : vector<4x1xf32> to vector<4x8xf32>
    %304 = arith.mulf %299, %303 : vector<4x8xf32>
    %cst_120 = arith.constant dense<0.000000e+00> : vector<4x8xf32>
    %305 = tpu.matmul %304, %291, %cst_120 {dimension_numbers = #tpu.dot_dimension_numbers<[1], [0], [0], [1], [0, 0, 1, 1], [], []>} : vector<4x8xf32>, vector<8x8xf32>, vector<4x8xf32> -> vector<4x8xf32>
    %c4_121 = arith.constant 4 : index
    %c8_122 = arith.constant 8 : index
    %306 = vector.load %arg21[%c4_121, %c8_122] : memref<8x32xf32, #tpu.memory_space<vmem>>, vector<4x8xf32>
    tpu.vector_store %arg21[%c4_121, %c8_122], %305 {strides = array<i32>} : memref<8x32xf32, #tpu.memory_space<vmem>>, vector<4x8xf32>,
    %307 = vector.extract_strided_slice %191 {offsets = [4, 16], sizes = [4, 8], strides = [1, 1]} : vector<8x32xf32> to vector<4x8xf32>
    %308 = vector.extract_strided_slice %197 {offsets = [8, 16], sizes = [8, 8], strides = [1, 1]} : vector<16x32xf32> to vector<8x8xf32>
    %309 = vector.extract_strided_slice %198 {offsets = [8, 16], sizes = [8, 8], strides = [1, 1]} : vector<16x32xf32> to vector<8x8xf32>
    %cst_123 = arith.constant dense<0.000000e+00> : vector<4x8xf32>
    %310 = tpu.matmul %307, %308, %cst_123 {dimension_numbers = #tpu.dot_dimension_numbers<[1], [1], [0], [0], [0, 0, 1, 0], [], []>} : vector<4x8xf32>, vector<8x8xf32>, vector<4x8xf32> -> vector<4x8xf32>
    %cst_124 = arith.constant 0.353553385 : f32
    %311 = vector.broadcast %cst_124 : f32 to vector<4x8xf32>
    %312 = arith.mulf %310, %311 : vector<4x8xf32>
    %cst_125 = arith.constant dense<0xFF800000> : vector<4xf32>
    %313 = vector.multi_reduction <maximumf>, %312, %cst_125 [1] : vector<4x8xf32> to vector<4xf32>
    %314 = vector.shape_cast %313 : vector<4xf32> to vector<4x1xf32>
    %315 = vector.broadcast %314 : vector<4x1xf32> to vector<4x8xf32>
    %316 = arith.subf %312, %315 : vector<4x8xf32>
    %317 = math.exp %316 : vector<4x8xf32>
    %cst_126 = arith.constant dense<0.000000e+00> : vector<4xf32>
    %318 = vector.multi_reduction <add>, %317, %cst_126 [1] : vector<4x8xf32> to vector<4xf32>
    %319 = vector.shape_cast %318 : vector<4xf32> to vector<4x1xf32>
    %320 = tpu.reciprocal %319 {approx = true} : vector<4x1xf32> -> vector<4x1xf32>
    %321 = vector.broadcast %320 : vector<4x1xf32> to vector<4x8xf32>
    %322 = arith.mulf %317, %321 : vector<4x8xf32>
    %cst_127 = arith.constant dense<0.000000e+00> : vector<4x8xf32>
    %323 = tpu.matmul %322, %309, %cst_127 {dimension_numbers = #tpu.dot_dimension_numbers<[1], [0], [0], [1], [0, 0, 1, 1], [], []>} : vector<4x8xf32>, vector<8x8xf32>, vector<4x8xf32> -> vector<4x8xf32>
    %c4_128 = arith.constant 4 : index
    %c16_129 = arith.constant 16 : index
    %324 = vector.load %arg21[%c4_128, %c16_129] : memref<8x32xf32, #tpu.memory_space<vmem>>, vector<4x8xf32>
    tpu.vector_store %arg21[%c4_128, %c16_129], %323 {strides = array<i32>} : memref<8x32xf32, #tpu.memory_space<vmem>>, vector<4x8xf32>,
    %325 = vector.extract_strided_slice %191 {offsets = [4, 24], sizes = [4, 8], strides = [1, 1]} : vector<8x32xf32> to vector<4x8xf32>
    %326 = vector.extract_strided_slice %197 {offsets = [8, 24], sizes = [8, 8], strides = [1, 1]} : vector<16x32xf32> to vector<8x8xf32>
    %327 = vector.extract_strided_slice %198 {offsets = [8, 24], sizes = [8, 8], strides = [1, 1]} : vector<16x32xf32> to vector<8x8xf32>
    %cst_130 = arith.constant dense<0.000000e+00> : vector<4x8xf32>
    %328 = tpu.matmul %325, %326, %cst_130 {dimension_numbers = #tpu.dot_dimension_numbers<[1], [1], [0], [0], [0, 0, 1, 0], [], []>} : vector<4x8xf32>, vector<8x8xf32>, vector<4x8xf32> -> vector<4x8xf32>
    %cst_131 = arith.constant 0.353553385 : f32
    %329 = vector.broadcast %cst_131 : f32 to vector<4x8xf32>
    %330 = arith.mulf %328, %329 : vector<4x8xf32>
    %cst_132 = arith.constant dense<0xFF800000> : vector<4xf32>
    %331 = vector.multi_reduction <maximumf>, %330, %cst_132 [1] : vector<4x8xf32> to vector<4xf32>
    %332 = vector.shape_cast %331 : vector<4xf32> to vector<4x1xf32>
    %333 = vector.broadcast %332 : vector<4x1xf32> to vector<4x8xf32>
    %334 = arith.subf %330, %333 : vector<4x8xf32>
    %335 = math.exp %334 : vector<4x8xf32>
    %cst_133 = arith.constant dense<0.000000e+00> : vector<4xf32>
    %336 = vector.multi_reduction <add>, %335, %cst_133 [1] : vector<4x8xf32> to vector<4xf32>
    %337 = vector.shape_cast %336 : vector<4xf32> to vector<4x1xf32>
    %338 = tpu.reciprocal %337 {approx = true} : vector<4x1xf32> -> vector<4x1xf32>
    %339 = vector.broadcast %338 : vector<4x1xf32> to vector<4x8xf32>
    %340 = arith.mulf %335, %339 : vector<4x8xf32>
    %cst_134 = arith.constant dense<0.000000e+00> : vector<4x8xf32>
    %341 = tpu.matmul %340, %327, %cst_134 {dimension_numbers = #tpu.dot_dimension_numbers<[1], [0], [0], [1], [0, 0, 1, 1], [], []>} : vector<4x8xf32>, vector<8x8xf32>, vector<4x8xf32> -> vector<4x8xf32>
    %c4_135 = arith.constant 4 : index
    %c24_136 = arith.constant 24 : index
    %342 = vector.load %arg21[%c4_135, %c24_136] : memref<8x32xf32, #tpu.memory_space<vmem>>, vector<4x8xf32>
    tpu.vector_store %arg21[%c4_135, %c24_136], %341 {strides = array<i32>} : memref<8x32xf32, #tpu.memory_space<vmem>>, vector<4x8xf32>,
    %c0_137 = arith.constant 0 : index
    %c0_138 = arith.constant 0 : index
    %343 = vector.load %arg21[%c0_137, %c0_138] : memref<8x32xf32, #tpu.memory_space<vmem>>, vector<8x32xf32>
    %c0_139 = arith.constant 0 : index
    %c0_140 = arith.constant 0 : index
    %344 = vector.load %arg10[%c0_139, %c0_140] : memref<32x32xf32, #tpu.memory_space<vmem>>, vector<32x32xf32>
    %cst_141 = arith.constant dense<0.000000e+00> : vector<8x32xf32>
    %345 = tpu.matmul %343, %344, %cst_141 {dimension_numbers = #tpu.dot_dimension_numbers<[1], [0], [0], [1], [0, 0, 1, 1], [], []>} : vector<8x32xf32>, vector<32x32xf32>, vector<8x32xf32> -> vector<8x32xf32>
    %c0_142 = arith.constant 0 : index
    %c0_143 = arith.constant 0 : index
    %346 = vector.load %arg11[%c0_142, %c0_143] : memref<1x32xf32, #tpu.memory_space<vmem>>, vector<1x32xf32>
    %347 = vector.broadcast %346 : vector<1x32xf32> to vector<8x32xf32>
    %348 = arith.addf %345, %347 : vector<8x32xf32>
    %349 = arith.addf %184, %348 : vector<8x32xf32>
    %c0_144 = arith.constant 0 : index
    %c0_145 = arith.constant 0 : index
    %350 = vector.load %arg12[%c0_144, %c0_145] : memref<1x32xf32, #tpu.memory_space<vmem>>, vector<1x32xf32>
    %c0_146 = arith.constant 0 : index
    %c0_147 = arith.constant 0 : index
    %351 = vector.load %arg13[%c0_146, %c0_147] : memref<1x32xf32, #tpu.memory_space<vmem>>, vector<1x32xf32>
    %cst_148 = arith.constant dense<0.000000e+00> : vector<8xf32>
    %352 = vector.multi_reduction <add>, %349, %cst_148 [1] : vector<8x32xf32> to vector<8xf32>
    %353 = vector.shape_cast %352 : vector<8xf32> to vector<8x1xf32>
    %cst_149 = arith.constant 3.200000e+01 : f32
    %354 = vector.broadcast %cst_149 : f32 to vector<8x1xf32>
    %355 = arith.divf %353, %354 : vector<8x1xf32>
    %356 = vector.broadcast %355 : vector<8x1xf32> to vector<8x32xf32>
    %357 = arith.subf %349, %356 : vector<8x32xf32>
    %358 = arith.mulf %357, %357 : vector<8x32xf32>
    %cst_150 = arith.constant dense<0.000000e+00> : vector<8xf32>
    %359 = vector.multi_reduction <add>, %358, %cst_150 [1] : vector<8x32xf32> to vector<8xf32>
    %360 = vector.shape_cast %359 : vector<8xf32> to vector<8x1xf32>
    %cst_151 = arith.constant 3.200000e+01 : f32
    %361 = vector.broadcast %cst_151 : f32 to vector<8x1xf32>
    %362 = arith.divf %360, %361 : vector<8x1xf32>
    %363 = vector.broadcast %355 : vector<8x1xf32> to vector<8x32xf32>
    %364 = arith.subf %349, %363 : vector<8x32xf32>
    %cst_152 = arith.constant 9.99999974E-6 : f32
    %365 = vector.broadcast %cst_152 : f32 to vector<8x1xf32>
    %366 = arith.addf %362, %365 : vector<8x1xf32>
    %367 = math.rsqrt %366 : vector<8x1xf32>
    %368 = vector.broadcast %367 : vector<8x1xf32> to vector<8x32xf32>
    %369 = arith.mulf %364, %368 : vector<8x32xf32>
    %370 = vector.broadcast %350 : vector<1x32xf32> to vector<8x32xf32>
    %371 = arith.mulf %369, %370 : vector<8x32xf32>
    %372 = vector.broadcast %351 : vector<1x32xf32> to vector<8x32xf32>
    %373 = arith.addf %371, %372 : vector<8x32xf32>
    %c0_153 = arith.constant 0 : index
    %c0_154 = arith.constant 0 : index
    %374 = vector.load %arg14[%c0_153, %c0_154] : memref<32x64xf32, #tpu.memory_space<vmem>>, vector<32x64xf32>
    %cst_155 = arith.constant dense<0.000000e+00> : vector<8x64xf32>
    %375 = tpu.matmul %373, %374, %cst_155 {dimension_numbers = #tpu.dot_dimension_numbers<[1], [0], [0], [1], [0, 0, 1, 1], [], []>} : vector<8x32xf32>, vector<32x64xf32>, vector<8x64xf32> -> vector<8x64xf32>
    %c0_156 = arith.constant 0 : index
    %c0_157 = arith.constant 0 : index
    %376 = vector.load %arg15[%c0_156, %c0_157] : memref<1x64xf32, #tpu.memory_space<vmem>>, vector<1x64xf32>
    %377 = vector.broadcast %376 : vector<1x64xf32> to vector<8x64xf32>
    %378 = arith.addf %375, %377 : vector<8x64xf32>
    %cst_158 = arith.constant 0.000000e+00 : f32
    %379 = vector.broadcast %cst_158 : f32 to vector<8x64xf32>
    %380 = arith.maximumf %378, %379 : vector<8x64xf32>
    %c0_159 = arith.constant 0 : index
    %c0_160 = arith.constant 0 : index
    %381 = vector.load %arg16[%c0_159, %c0_160] : memref<64x32xf32, #tpu.memory_space<vmem>>, vector<64x32xf32>
    %cst_161 = arith.constant dense<0.000000e+00> : vector<8x32xf32>
    %382 = tpu.matmul %380, %381, %cst_161 {dimension_numbers = #tpu.dot_dimension_numbers<[1], [0], [0], [1], [0, 0, 1, 1], [], []>} : vector<8x64xf32>, vector<64x32xf32>, vector<8x32xf32> -> vector<8x32xf32>
    %c0_162 = arith.constant 0 : index
    %c0_163 = arith.constant 0 : index
    %383 = vector.load %arg17[%c0_162, %c0_163] : memref<1x32xf32, #tpu.memory_space<vmem>>, vector<1x32xf32>
    %384 = vector.broadcast %383 : vector<1x32xf32> to vector<8x32xf32>
    %385 = arith.addf %382, %384 : vector<8x32xf32>
    %386 = arith.addf %373, %385 : vector<8x32xf32>
    %c0_164 = arith.constant 0 : index
    %c0_165 = arith.constant 0 : index
    %387 = vector.load %arg18[%c0_164, %c0_165] : memref<1x32xf32, #tpu.memory_space<vmem>>, vector<1x32xf32>
    %c0_166 = arith.constant 0 : index
    %c0_167 = arith.constant 0 : index
    %388 = vector.load %arg19[%c0_166, %c0_167] : memref<1x32xf32, #tpu.memory_space<vmem>>, vector<1x32xf32>
    %cst_168 = arith.constant dense<0.000000e+00> : vector<8xf32>
    %389 = vector.multi_reduction <add>, %386, %cst_168 [1] : vector<8x32xf32> to vector<8xf32>
    %390 = vector.shape_cast %389 : vector<8xf32> to vector<8x1xf32>
    %cst_169 = arith.constant 3.200000e+01 : f32
    %391 = vector.broadcast %cst_169 : f32 to vector<8x1xf32>
    %392 = arith.divf %390, %391 : vector<8x1xf32>
    %393 = vector.broadcast %392 : vector<8x1xf32> to vector<8x32xf32>
    %394 = arith.subf %386, %393 : vector<8x32xf32>
    %395 = arith.mulf %394, %394 : vector<8x32xf32>
    %cst_170 = arith.constant dense<0.000000e+00> : vector<8xf32>
    %396 = vector.multi_reduction <add>, %395, %cst_170 [1] : vector<8x32xf32> to vector<8xf32>
    %397 = vector.shape_cast %396 : vector<8xf32> to vector<8x1xf32>
    %cst_171 = arith.constant 3.200000e+01 : f32
    %398 = vector.broadcast %cst_171 : f32 to vector<8x1xf32>
    %399 = arith.divf %397, %398 : vector<8x1xf32>
    %400 = vector.broadcast %392 : vector<8x1xf32> to vector<8x32xf32>
    %401 = arith.subf %386, %400 : vector<8x32xf32>
    %cst_172 = arith.constant 9.99999974E-6 : f32
    %402 = vector.broadcast %cst_172 : f32 to vector<8x1xf32>
    %403 = arith.addf %399, %402 : vector<8x1xf32>
    %404 = math.rsqrt %403 : vector<8x1xf32>
    %405 = vector.broadcast %404 : vector<8x1xf32> to vector<8x32xf32>
    %406 = arith.mulf %401, %405 : vector<8x32xf32>
    %407 = vector.broadcast %387 : vector<1x32xf32> to vector<8x32xf32>
    %408 = arith.mulf %406, %407 : vector<8x32xf32>
    %409 = vector.broadcast %388 : vector<1x32xf32> to vector<8x32xf32>
    %410 = arith.addf %408, %409 : vector<8x32xf32>
    %c0_173 = arith.constant 0 : index
    %c0_174 = arith.constant 0 : index
    %411 = vector.load %arg20[%c0_173, %c0_174] : memref<8x32xf32, #tpu.memory_space<vmem>>, vector<8x32xf32>
    tpu.vector_store %arg20[%c0_173, %c0_174], %410 {strides = array<i32>} : memref<8x32xf32, #tpu.memory_space<vmem>>, vector<8x32xf32>,
    return
  }
}

module attributes {stable_mosaic.version = 11 : i64} {
  func.func @_final_kernel(%arg0: memref<8x32xf32, #tpu.memory_space<vmem>>, %arg1: memref<1x32xf32, #tpu.memory_space<vmem>>, %arg2: memref<1x32xf32, #tpu.memory_space<vmem>>, %arg3: memref<1x32xf32, #tpu.memory_space<vmem>>, %arg4: memref<1x1xf32, #tpu.memory_space<vmem>>, %arg5: memref<8x1xf32, #tpu.memory_space<vmem>>) attributes {dimension_semantics = [], scalar_prefetch = 0 : i64, scratch_operands = 0 : i64, tpu.core_type = #tpu.core_type<tc>} {
    %c0 = arith.constant 0 : index
    %c0_0 = arith.constant 0 : index
    %0 = vector.load %arg0[%c0, %c0_0] : memref<8x32xf32, #tpu.memory_space<vmem>>, vector<8x32xf32>
    %c0_1 = arith.constant 0 : index
    %c0_2 = arith.constant 0 : index
    %1 = vector.load %arg1[%c0_1, %c0_2] : memref<1x32xf32, #tpu.memory_space<vmem>>, vector<1x32xf32>
    %c0_3 = arith.constant 0 : index
    %c0_4 = arith.constant 0 : index
    %2 = vector.load %arg2[%c0_3, %c0_4] : memref<1x32xf32, #tpu.memory_space<vmem>>, vector<1x32xf32>
    %cst = arith.constant dense<0.000000e+00> : vector<8xf32>
    %3 = vector.multi_reduction <add>, %0, %cst [1] : vector<8x32xf32> to vector<8xf32>
    %4 = vector.shape_cast %3 : vector<8xf32> to vector<8x1xf32>
    %cst_5 = arith.constant 3.200000e+01 : f32
    %5 = vector.broadcast %cst_5 : f32 to vector<8x1xf32>
    %6 = arith.divf %4, %5 : vector<8x1xf32>
    %7 = vector.broadcast %6 : vector<8x1xf32> to vector<8x32xf32>
    %8 = arith.subf %0, %7 : vector<8x32xf32>
    %9 = arith.mulf %8, %8 : vector<8x32xf32>
    %cst_6 = arith.constant dense<0.000000e+00> : vector<8xf32>
    %10 = vector.multi_reduction <add>, %9, %cst_6 [1] : vector<8x32xf32> to vector<8xf32>
    %11 = vector.shape_cast %10 : vector<8xf32> to vector<8x1xf32>
    %cst_7 = arith.constant 3.200000e+01 : f32
    %12 = vector.broadcast %cst_7 : f32 to vector<8x1xf32>
    %13 = arith.divf %11, %12 : vector<8x1xf32>
    %14 = vector.broadcast %6 : vector<8x1xf32> to vector<8x32xf32>
    %15 = arith.subf %0, %14 : vector<8x32xf32>
    %cst_8 = arith.constant 9.99999974E-6 : f32
    %16 = vector.broadcast %cst_8 : f32 to vector<8x1xf32>
    %17 = arith.addf %13, %16 : vector<8x1xf32>
    %18 = math.rsqrt %17 : vector<8x1xf32>
    %19 = vector.broadcast %18 : vector<8x1xf32> to vector<8x32xf32>
    %20 = arith.mulf %15, %19 : vector<8x32xf32>
    %21 = vector.broadcast %1 : vector<1x32xf32> to vector<8x32xf32>
    %22 = arith.mulf %20, %21 : vector<8x32xf32>
    %23 = vector.broadcast %2 : vector<1x32xf32> to vector<8x32xf32>
    %24 = arith.addf %22, %23 : vector<8x32xf32>
    %c0_9 = arith.constant 0 : index
    %c0_10 = arith.constant 0 : index
    %25 = vector.load %arg3[%c0_9, %c0_10] : memref<1x32xf32, #tpu.memory_space<vmem>>, vector<1x32xf32>
    %26 = vector.broadcast %25 : vector<1x32xf32> to vector<8x32xf32>
    %27 = arith.mulf %24, %26 : vector<8x32xf32>
    %cst_11 = arith.constant dense<0.000000e+00> : vector<8xf32>
    %28 = vector.multi_reduction <add>, %27, %cst_11 [1] : vector<8x32xf32> to vector<8xf32>
    %29 = vector.shape_cast %28 : vector<8xf32> to vector<8x1xf32>
    %c0_12 = arith.constant 0 : index
    %c0_13 = arith.constant 0 : index
    %30 = vector.load %arg4[%c0_12, %c0_13] : memref<1x1xf32, #tpu.memory_space<vmem>>, vector<1x1xf32>
    %31 = vector.broadcast %30 : vector<1x1xf32> to vector<8x1xf32>
    %32 = arith.addf %29, %31 : vector<8x1xf32>
    %c0_14 = arith.constant 0 : index
    %c0_15 = arith.constant 0 : index
    %33 = vector.load %arg5[%c0_14, %c0_15] : memref<8x1xf32, #tpu.memory_space<vmem>>, vector<8x1xf32>
    tpu.vector_store %arg5[%c0_14, %c0_15], %32 {strides = array<i32>} : memref<8x1xf32, #tpu.memory_space<vmem>>, vector<8x1xf32>,
    return
  }
}

module attributes {stable_mosaic.version = 11 : i64} {
  func.func @_dec_layer_kernel(%arg0: memref<8x32xf32, #tpu.memory_space<vmem>>, %arg1: memref<16x32xf32, #tpu.memory_space<vmem>>, %arg2: memref<32x96xf32, #tpu.memory_space<vmem>>, %arg3: memref<1x96xf32, #tpu.memory_space<vmem>>, %arg4: memref<32x32xf32, #tpu.memory_space<vmem>>, %arg5: memref<1x32xf32, #tpu.memory_space<vmem>>, %arg6: memref<1x32xf32, #tpu.memory_space<vmem>>, %arg7: memref<1x32xf32, #tpu.memory_space<vmem>>, %arg8: memref<32x96xf32, #tpu.memory_space<vmem>>, %arg9: memref<1x96xf32, #tpu.memory_space<vmem>>, %arg10: memref<32x32xf32, #tpu.memory_space<vmem>>, %arg11: memref<1x32xf32, #tpu.memory_space<vmem>>, %arg12: memref<1x32xf32, #tpu.memory_space<vmem>>, %arg13: memref<1x32xf32, #tpu.memory_space<vmem>>, %arg14: memref<32x64xf32, #tpu.memory_space<vmem>>, %arg15: memref<1x64xf32, #tpu.memory_space<vmem>>, %arg16: memref<64x32xf32, #tpu.memory_space<vmem>>, %arg17: memref<1x32xf32, #tpu.memory_space<vmem>>, %arg18: memref<1x32xf32, #tpu.memory_space<vmem>>, %arg19: memref<1x32xf32, #tpu.memory_space<vmem>>, %arg20: memref<8x32xf32, #tpu.memory_space<vmem>>, %arg21: memref<8x32xf32, #tpu.memory_space<vmem>>) attributes {dimension_semantics = [], scalar_prefetch = 0 : i64, scratch_operands = 1 : i64, tpu.core_type = #tpu.core_type<tc>} {
    %c0 = arith.constant 0 : index
    %c0_0 = arith.constant 0 : index
    %0 = vector.load %arg0[%c0, %c0_0] : memref<8x32xf32, #tpu.memory_space<vmem>>, vector<8x32xf32>
    %c0_1 = arith.constant 0 : index
    %c0_2 = arith.constant 0 : index
    %1 = vector.load %arg1[%c0_1, %c0_2] : memref<16x32xf32, #tpu.memory_space<vmem>>, vector<16x32xf32>
    %c0_3 = arith.constant 0 : index
    %c0_4 = arith.constant 0 : index
    %2 = vector.load %arg2[%c0_3, %c0_4] : memref<32x96xf32, #tpu.memory_space<vmem>>, vector<32x96xf32>
    %cst = arith.constant dense<0.000000e+00> : vector<8x96xf32>
    %3 = tpu.matmul %0, %2, %cst {dimension_numbers = #tpu.dot_dimension_numbers<[1], [0], [0], [1], [0, 0, 1, 1], [], []>} : vector<8x32xf32>, vector<32x96xf32>, vector<8x96xf32> -> vector<8x96xf32>
    %c0_5 = arith.constant 0 : index
    %c0_6 = arith.constant 0 : index
    %4 = vector.load %arg3[%c0_5, %c0_6] : memref<1x96xf32, #tpu.memory_space<vmem>>, vector<1x96xf32>
    %5 = vector.broadcast %4 : vector<1x96xf32> to vector<8x96xf32>
    %6 = arith.addf %3, %5 : vector<8x96xf32>
    %7 = vector.extract_strided_slice %6 {offsets = [0, 0], sizes = [8, 32], strides = [1, 1]} : vector<8x96xf32> to vector<8x32xf32>
    %8 = vector.extract_strided_slice %6 {offsets = [0, 32], sizes = [8, 32], strides = [1, 1]} : vector<8x96xf32> to vector<8x32xf32>
    %9 = vector.extract_strided_slice %6 {offsets = [0, 64], sizes = [8, 32], strides = [1, 1]} : vector<8x96xf32> to vector<8x32xf32>
    %10 = vector.extract_strided_slice %7 {offsets = [0, 0], sizes = [4, 8], strides = [1, 1]} : vector<8x32xf32> to vector<4x8xf32>
    %11 = vector.extract_strided_slice %8 {offsets = [0, 0], sizes = [4, 8], strides = [1, 1]} : vector<8x32xf32> to vector<4x8xf32>
    %12 = vector.extract_strided_slice %9 {offsets = [0, 0], sizes = [4, 8], strides = [1, 1]} : vector<8x32xf32> to vector<4x8xf32>
    %cst_7 = arith.constant dense<0.000000e+00> : vector<4x4xf32>
    %13 = tpu.matmul %10, %11, %cst_7 {dimension_numbers = #tpu.dot_dimension_numbers<[1], [1], [0], [0], [0, 0, 1, 0], [], []>} : vector<4x8xf32>, vector<4x8xf32>, vector<4x4xf32> -> vector<4x4xf32>
    %cst_8 = arith.constant 0.353553385 : f32
    %14 = vector.broadcast %cst_8 : f32 to vector<4x4xf32>
    %15 = arith.mulf %13, %14 : vector<4x4xf32>
    %cst_9 = arith.constant dense<0xFF800000> : vector<4xf32>
    %16 = vector.multi_reduction <maximumf>, %15, %cst_9 [1] : vector<4x4xf32> to vector<4xf32>
    %17 = vector.shape_cast %16 : vector<4xf32> to vector<4x1xf32>
    %18 = vector.broadcast %17 : vector<4x1xf32> to vector<4x4xf32>
    %19 = arith.subf %15, %18 : vector<4x4xf32>
    %20 = math.exp %19 : vector<4x4xf32>
    %cst_10 = arith.constant dense<0.000000e+00> : vector<4xf32>
    %21 = vector.multi_reduction <add>, %20, %cst_10 [1] : vector<4x4xf32> to vector<4xf32>
    %22 = vector.shape_cast %21 : vector<4xf32> to vector<4x1xf32>
    %23 = tpu.reciprocal %22 {approx = true} : vector<4x1xf32> -> vector<4x1xf32>
    %24 = vector.broadcast %23 : vector<4x1xf32> to vector<4x4xf32>
    %25 = arith.mulf %20, %24 : vector<4x4xf32>
    %cst_11 = arith.constant dense<0.000000e+00> : vector<4x8xf32>
    %26 = tpu.matmul %25, %12, %cst_11 {dimension_numbers = #tpu.dot_dimension_numbers<[1], [0], [0], [1], [0, 0, 1, 1], [], []>} : vector<4x4xf32>, vector<4x8xf32>, vector<4x8xf32> -> vector<4x8xf32>
    %c0_12 = arith.constant 0 : index
    %c0_13 = arith.constant 0 : index
    %27 = vector.load %arg21[%c0_12, %c0_13] : memref<8x32xf32, #tpu.memory_space<vmem>>, vector<4x8xf32>
    tpu.vector_store %arg21[%c0_12, %c0_13], %26 {strides = array<i32>} : memref<8x32xf32, #tpu.memory_space<vmem>>, vector<4x8xf32>,
    %28 = vector.extract_strided_slice %7 {offsets = [0, 8], sizes = [4, 8], strides = [1, 1]} : vector<8x32xf32> to vector<4x8xf32>
    %29 = vector.extract_strided_slice %8 {offsets = [0, 8], sizes = [4, 8], strides = [1, 1]} : vector<8x32xf32> to vector<4x8xf32>
    %30 = vector.extract_strided_slice %9 {offsets = [0, 8], sizes = [4, 8], strides = [1, 1]} : vector<8x32xf32> to vector<4x8xf32>
    %cst_14 = arith.constant dense<0.000000e+00> : vector<4x4xf32>
    %31 = tpu.matmul %28, %29, %cst_14 {dimension_numbers = #tpu.dot_dimension_numbers<[1], [1], [0], [0], [0, 0, 1, 0], [], []>} : vector<4x8xf32>, vector<4x8xf32>, vector<4x4xf32> -> vector<4x4xf32>
    %cst_15 = arith.constant 0.353553385 : f32
    %32 = vector.broadcast %cst_15 : f32 to vector<4x4xf32>
    %33 = arith.mulf %31, %32 : vector<4x4xf32>
    %cst_16 = arith.constant dense<0xFF800000> : vector<4xf32>
    %34 = vector.multi_reduction <maximumf>, %33, %cst_16 [1] : vector<4x4xf32> to vector<4xf32>
    %35 = vector.shape_cast %34 : vector<4xf32> to vector<4x1xf32>
    %36 = vector.broadcast %35 : vector<4x1xf32> to vector<4x4xf32>
    %37 = arith.subf %33, %36 : vector<4x4xf32>
    %38 = math.exp %37 : vector<4x4xf32>
    %cst_17 = arith.constant dense<0.000000e+00> : vector<4xf32>
    %39 = vector.multi_reduction <add>, %38, %cst_17 [1] : vector<4x4xf32> to vector<4xf32>
    %40 = vector.shape_cast %39 : vector<4xf32> to vector<4x1xf32>
    %41 = tpu.reciprocal %40 {approx = true} : vector<4x1xf32> -> vector<4x1xf32>
    %42 = vector.broadcast %41 : vector<4x1xf32> to vector<4x4xf32>
    %43 = arith.mulf %38, %42 : vector<4x4xf32>
    %cst_18 = arith.constant dense<0.000000e+00> : vector<4x8xf32>
    %44 = tpu.matmul %43, %30, %cst_18 {dimension_numbers = #tpu.dot_dimension_numbers<[1], [0], [0], [1], [0, 0, 1, 1], [], []>} : vector<4x4xf32>, vector<4x8xf32>, vector<4x8xf32> -> vector<4x8xf32>
    %c0_19 = arith.constant 0 : index
    %c8 = arith.constant 8 : index
    %45 = vector.load %arg21[%c0_19, %c8] : memref<8x32xf32, #tpu.memory_space<vmem>>, vector<4x8xf32>
    tpu.vector_store %arg21[%c0_19, %c8], %44 {strides = array<i32>} : memref<8x32xf32, #tpu.memory_space<vmem>>, vector<4x8xf32>,
    %46 = vector.extract_strided_slice %7 {offsets = [0, 16], sizes = [4, 8], strides = [1, 1]} : vector<8x32xf32> to vector<4x8xf32>
    %47 = vector.extract_strided_slice %8 {offsets = [0, 16], sizes = [4, 8], strides = [1, 1]} : vector<8x32xf32> to vector<4x8xf32>
    %48 = vector.extract_strided_slice %9 {offsets = [0, 16], sizes = [4, 8], strides = [1, 1]} : vector<8x32xf32> to vector<4x8xf32>
    %cst_20 = arith.constant dense<0.000000e+00> : vector<4x4xf32>
    %49 = tpu.matmul %46, %47, %cst_20 {dimension_numbers = #tpu.dot_dimension_numbers<[1], [1], [0], [0], [0, 0, 1, 0], [], []>} : vector<4x8xf32>, vector<4x8xf32>, vector<4x4xf32> -> vector<4x4xf32>
    %cst_21 = arith.constant 0.353553385 : f32
    %50 = vector.broadcast %cst_21 : f32 to vector<4x4xf32>
    %51 = arith.mulf %49, %50 : vector<4x4xf32>
    %cst_22 = arith.constant dense<0xFF800000> : vector<4xf32>
    %52 = vector.multi_reduction <maximumf>, %51, %cst_22 [1] : vector<4x4xf32> to vector<4xf32>
    %53 = vector.shape_cast %52 : vector<4xf32> to vector<4x1xf32>
    %54 = vector.broadcast %53 : vector<4x1xf32> to vector<4x4xf32>
    %55 = arith.subf %51, %54 : vector<4x4xf32>
    %56 = math.exp %55 : vector<4x4xf32>
    %cst_23 = arith.constant dense<0.000000e+00> : vector<4xf32>
    %57 = vector.multi_reduction <add>, %56, %cst_23 [1] : vector<4x4xf32> to vector<4xf32>
    %58 = vector.shape_cast %57 : vector<4xf32> to vector<4x1xf32>
    %59 = tpu.reciprocal %58 {approx = true} : vector<4x1xf32> -> vector<4x1xf32>
    %60 = vector.broadcast %59 : vector<4x1xf32> to vector<4x4xf32>
    %61 = arith.mulf %56, %60 : vector<4x4xf32>
    %cst_24 = arith.constant dense<0.000000e+00> : vector<4x8xf32>
    %62 = tpu.matmul %61, %48, %cst_24 {dimension_numbers = #tpu.dot_dimension_numbers<[1], [0], [0], [1], [0, 0, 1, 1], [], []>} : vector<4x4xf32>, vector<4x8xf32>, vector<4x8xf32> -> vector<4x8xf32>
    %c0_25 = arith.constant 0 : index
    %c16 = arith.constant 16 : index
    %63 = vector.load %arg21[%c0_25, %c16] : memref<8x32xf32, #tpu.memory_space<vmem>>, vector<4x8xf32>
    tpu.vector_store %arg21[%c0_25, %c16], %62 {strides = array<i32>} : memref<8x32xf32, #tpu.memory_space<vmem>>, vector<4x8xf32>,
    %64 = vector.extract_strided_slice %7 {offsets = [0, 24], sizes = [4, 8], strides = [1, 1]} : vector<8x32xf32> to vector<4x8xf32>
    %65 = vector.extract_strided_slice %8 {offsets = [0, 24], sizes = [4, 8], strides = [1, 1]} : vector<8x32xf32> to vector<4x8xf32>
    %66 = vector.extract_strided_slice %9 {offsets = [0, 24], sizes = [4, 8], strides = [1, 1]} : vector<8x32xf32> to vector<4x8xf32>
    %cst_26 = arith.constant dense<0.000000e+00> : vector<4x4xf32>
    %67 = tpu.matmul %64, %65, %cst_26 {dimension_numbers = #tpu.dot_dimension_numbers<[1], [1], [0], [0], [0, 0, 1, 0], [], []>} : vector<4x8xf32>, vector<4x8xf32>, vector<4x4xf32> -> vector<4x4xf32>
    %cst_27 = arith.constant 0.353553385 : f32
    %68 = vector.broadcast %cst_27 : f32 to vector<4x4xf32>
    %69 = arith.mulf %67, %68 : vector<4x4xf32>
    %cst_28 = arith.constant dense<0xFF800000> : vector<4xf32>
    %70 = vector.multi_reduction <maximumf>, %69, %cst_28 [1] : vector<4x4xf32> to vector<4xf32>
    %71 = vector.shape_cast %70 : vector<4xf32> to vector<4x1xf32>
    %72 = vector.broadcast %71 : vector<4x1xf32> to vector<4x4xf32>
    %73 = arith.subf %69, %72 : vector<4x4xf32>
    %74 = math.exp %73 : vector<4x4xf32>
    %cst_29 = arith.constant dense<0.000000e+00> : vector<4xf32>
    %75 = vector.multi_reduction <add>, %74, %cst_29 [1] : vector<4x4xf32> to vector<4xf32>
    %76 = vector.shape_cast %75 : vector<4xf32> to vector<4x1xf32>
    %77 = tpu.reciprocal %76 {approx = true} : vector<4x1xf32> -> vector<4x1xf32>
    %78 = vector.broadcast %77 : vector<4x1xf32> to vector<4x4xf32>
    %79 = arith.mulf %74, %78 : vector<4x4xf32>
    %cst_30 = arith.constant dense<0.000000e+00> : vector<4x8xf32>
    %80 = tpu.matmul %79, %66, %cst_30 {dimension_numbers = #tpu.dot_dimension_numbers<[1], [0], [0], [1], [0, 0, 1, 1], [], []>} : vector<4x4xf32>, vector<4x8xf32>, vector<4x8xf32> -> vector<4x8xf32>
    %c0_31 = arith.constant 0 : index
    %c24 = arith.constant 24 : index
    %81 = vector.load %arg21[%c0_31, %c24] : memref<8x32xf32, #tpu.memory_space<vmem>>, vector<4x8xf32>
    tpu.vector_store %arg21[%c0_31, %c24], %80 {strides = array<i32>} : memref<8x32xf32, #tpu.memory_space<vmem>>, vector<4x8xf32>,
    %82 = vector.extract_strided_slice %7 {offsets = [4, 0], sizes = [4, 8], strides = [1, 1]} : vector<8x32xf32> to vector<4x8xf32>
    %83 = vector.extract_strided_slice %8 {offsets = [4, 0], sizes = [4, 8], strides = [1, 1]} : vector<8x32xf32> to vector<4x8xf32>
    %84 = vector.extract_strided_slice %9 {offsets = [4, 0], sizes = [4, 8], strides = [1, 1]} : vector<8x32xf32> to vector<4x8xf32>
    %cst_32 = arith.constant dense<0.000000e+00> : vector<4x4xf32>
    %85 = tpu.matmul %82, %83, %cst_32 {dimension_numbers = #tpu.dot_dimension_numbers<[1], [1], [0], [0], [0, 0, 1, 0], [], []>} : vector<4x8xf32>, vector<4x8xf32>, vector<4x4xf32> -> vector<4x4xf32>
    %cst_33 = arith.constant 0.353553385 : f32
    %86 = vector.broadcast %cst_33 : f32 to vector<4x4xf32>
    %87 = arith.mulf %85, %86 : vector<4x4xf32>
    %cst_34 = arith.constant dense<0xFF800000> : vector<4xf32>
    %88 = vector.multi_reduction <maximumf>, %87, %cst_34 [1] : vector<4x4xf32> to vector<4xf32>
    %89 = vector.shape_cast %88 : vector<4xf32> to vector<4x1xf32>
    %90 = vector.broadcast %89 : vector<4x1xf32> to vector<4x4xf32>
    %91 = arith.subf %87, %90 : vector<4x4xf32>
    %92 = math.exp %91 : vector<4x4xf32>
    %cst_35 = arith.constant dense<0.000000e+00> : vector<4xf32>
    %93 = vector.multi_reduction <add>, %92, %cst_35 [1] : vector<4x4xf32> to vector<4xf32>
    %94 = vector.shape_cast %93 : vector<4xf32> to vector<4x1xf32>
    %95 = tpu.reciprocal %94 {approx = true} : vector<4x1xf32> -> vector<4x1xf32>
    %96 = vector.broadcast %95 : vector<4x1xf32> to vector<4x4xf32>
    %97 = arith.mulf %92, %96 : vector<4x4xf32>
    %cst_36 = arith.constant dense<0.000000e+00> : vector<4x8xf32>
    %98 = tpu.matmul %97, %84, %cst_36 {dimension_numbers = #tpu.dot_dimension_numbers<[1], [0], [0], [1], [0, 0, 1, 1], [], []>} : vector<4x4xf32>, vector<4x8xf32>, vector<4x8xf32> -> vector<4x8xf32>
    %c4 = arith.constant 4 : index
    %c0_37 = arith.constant 0 : index
    %99 = vector.load %arg21[%c4, %c0_37] : memref<8x32xf32, #tpu.memory_space<vmem>>, vector<4x8xf32>
    tpu.vector_store %arg21[%c4, %c0_37], %98 {strides = array<i32>} : memref<8x32xf32, #tpu.memory_space<vmem>>, vector<4x8xf32>,
    %100 = vector.extract_strided_slice %7 {offsets = [4, 8], sizes = [4, 8], strides = [1, 1]} : vector<8x32xf32> to vector<4x8xf32>
    %101 = vector.extract_strided_slice %8 {offsets = [4, 8], sizes = [4, 8], strides = [1, 1]} : vector<8x32xf32> to vector<4x8xf32>
    %102 = vector.extract_strided_slice %9 {offsets = [4, 8], sizes = [4, 8], strides = [1, 1]} : vector<8x32xf32> to vector<4x8xf32>
    %cst_38 = arith.constant dense<0.000000e+00> : vector<4x4xf32>
    %103 = tpu.matmul %100, %101, %cst_38 {dimension_numbers = #tpu.dot_dimension_numbers<[1], [1], [0], [0], [0, 0, 1, 0], [], []>} : vector<4x8xf32>, vector<4x8xf32>, vector<4x4xf32> -> vector<4x4xf32>
    %cst_39 = arith.constant 0.353553385 : f32
    %104 = vector.broadcast %cst_39 : f32 to vector<4x4xf32>
    %105 = arith.mulf %103, %104 : vector<4x4xf32>
    %cst_40 = arith.constant dense<0xFF800000> : vector<4xf32>
    %106 = vector.multi_reduction <maximumf>, %105, %cst_40 [1] : vector<4x4xf32> to vector<4xf32>
    %107 = vector.shape_cast %106 : vector<4xf32> to vector<4x1xf32>
    %108 = vector.broadcast %107 : vector<4x1xf32> to vector<4x4xf32>
    %109 = arith.subf %105, %108 : vector<4x4xf32>
    %110 = math.exp %109 : vector<4x4xf32>
    %cst_41 = arith.constant dense<0.000000e+00> : vector<4xf32>
    %111 = vector.multi_reduction <add>, %110, %cst_41 [1] : vector<4x4xf32> to vector<4xf32>
    %112 = vector.shape_cast %111 : vector<4xf32> to vector<4x1xf32>
    %113 = tpu.reciprocal %112 {approx = true} : vector<4x1xf32> -> vector<4x1xf32>
    %114 = vector.broadcast %113 : vector<4x1xf32> to vector<4x4xf32>
    %115 = arith.mulf %110, %114 : vector<4x4xf32>
    %cst_42 = arith.constant dense<0.000000e+00> : vector<4x8xf32>
    %116 = tpu.matmul %115, %102, %cst_42 {dimension_numbers = #tpu.dot_dimension_numbers<[1], [0], [0], [1], [0, 0, 1, 1], [], []>} : vector<4x4xf32>, vector<4x8xf32>, vector<4x8xf32> -> vector<4x8xf32>
    %c4_43 = arith.constant 4 : index
    %c8_44 = arith.constant 8 : index
    %117 = vector.load %arg21[%c4_43, %c8_44] : memref<8x32xf32, #tpu.memory_space<vmem>>, vector<4x8xf32>
    tpu.vector_store %arg21[%c4_43, %c8_44], %116 {strides = array<i32>} : memref<8x32xf32, #tpu.memory_space<vmem>>, vector<4x8xf32>,
    %118 = vector.extract_strided_slice %7 {offsets = [4, 16], sizes = [4, 8], strides = [1, 1]} : vector<8x32xf32> to vector<4x8xf32>
    %119 = vector.extract_strided_slice %8 {offsets = [4, 16], sizes = [4, 8], strides = [1, 1]} : vector<8x32xf32> to vector<4x8xf32>
    %120 = vector.extract_strided_slice %9 {offsets = [4, 16], sizes = [4, 8], strides = [1, 1]} : vector<8x32xf32> to vector<4x8xf32>
    %cst_45 = arith.constant dense<0.000000e+00> : vector<4x4xf32>
    %121 = tpu.matmul %118, %119, %cst_45 {dimension_numbers = #tpu.dot_dimension_numbers<[1], [1], [0], [0], [0, 0, 1, 0], [], []>} : vector<4x8xf32>, vector<4x8xf32>, vector<4x4xf32> -> vector<4x4xf32>
    %cst_46 = arith.constant 0.353553385 : f32
    %122 = vector.broadcast %cst_46 : f32 to vector<4x4xf32>
    %123 = arith.mulf %121, %122 : vector<4x4xf32>
    %cst_47 = arith.constant dense<0xFF800000> : vector<4xf32>
    %124 = vector.multi_reduction <maximumf>, %123, %cst_47 [1] : vector<4x4xf32> to vector<4xf32>
    %125 = vector.shape_cast %124 : vector<4xf32> to vector<4x1xf32>
    %126 = vector.broadcast %125 : vector<4x1xf32> to vector<4x4xf32>
    %127 = arith.subf %123, %126 : vector<4x4xf32>
    %128 = math.exp %127 : vector<4x4xf32>
    %cst_48 = arith.constant dense<0.000000e+00> : vector<4xf32>
    %129 = vector.multi_reduction <add>, %128, %cst_48 [1] : vector<4x4xf32> to vector<4xf32>
    %130 = vector.shape_cast %129 : vector<4xf32> to vector<4x1xf32>
    %131 = tpu.reciprocal %130 {approx = true} : vector<4x1xf32> -> vector<4x1xf32>
    %132 = vector.broadcast %131 : vector<4x1xf32> to vector<4x4xf32>
    %133 = arith.mulf %128, %132 : vector<4x4xf32>
    %cst_49 = arith.constant dense<0.000000e+00> : vector<4x8xf32>
    %134 = tpu.matmul %133, %120, %cst_49 {dimension_numbers = #tpu.dot_dimension_numbers<[1], [0], [0], [1], [0, 0, 1, 1], [], []>} : vector<4x4xf32>, vector<4x8xf32>, vector<4x8xf32> -> vector<4x8xf32>
    %c4_50 = arith.constant 4 : index
    %c16_51 = arith.constant 16 : index
    %135 = vector.load %arg21[%c4_50, %c16_51] : memref<8x32xf32, #tpu.memory_space<vmem>>, vector<4x8xf32>
    tpu.vector_store %arg21[%c4_50, %c16_51], %134 {strides = array<i32>} : memref<8x32xf32, #tpu.memory_space<vmem>>, vector<4x8xf32>,
    %136 = vector.extract_strided_slice %7 {offsets = [4, 24], sizes = [4, 8], strides = [1, 1]} : vector<8x32xf32> to vector<4x8xf32>
    %137 = vector.extract_strided_slice %8 {offsets = [4, 24], sizes = [4, 8], strides = [1, 1]} : vector<8x32xf32> to vector<4x8xf32>
    %138 = vector.extract_strided_slice %9 {offsets = [4, 24], sizes = [4, 8], strides = [1, 1]} : vector<8x32xf32> to vector<4x8xf32>
    %cst_52 = arith.constant dense<0.000000e+00> : vector<4x4xf32>
    %139 = tpu.matmul %136, %137, %cst_52 {dimension_numbers = #tpu.dot_dimension_numbers<[1], [1], [0], [0], [0, 0, 1, 0], [], []>} : vector<4x8xf32>, vector<4x8xf32>, vector<4x4xf32> -> vector<4x4xf32>
    %cst_53 = arith.constant 0.353553385 : f32
    %140 = vector.broadcast %cst_53 : f32 to vector<4x4xf32>
    %141 = arith.mulf %139, %140 : vector<4x4xf32>
    %cst_54 = arith.constant dense<0xFF800000> : vector<4xf32>
    %142 = vector.multi_reduction <maximumf>, %141, %cst_54 [1] : vector<4x4xf32> to vector<4xf32>
    %143 = vector.shape_cast %142 : vector<4xf32> to vector<4x1xf32>
    %144 = vector.broadcast %143 : vector<4x1xf32> to vector<4x4xf32>
    %145 = arith.subf %141, %144 : vector<4x4xf32>
    %146 = math.exp %145 : vector<4x4xf32>
    %cst_55 = arith.constant dense<0.000000e+00> : vector<4xf32>
    %147 = vector.multi_reduction <add>, %146, %cst_55 [1] : vector<4x4xf32> to vector<4xf32>
    %148 = vector.shape_cast %147 : vector<4xf32> to vector<4x1xf32>
    %149 = tpu.reciprocal %148 {approx = true} : vector<4x1xf32> -> vector<4x1xf32>
    %150 = vector.broadcast %149 : vector<4x1xf32> to vector<4x4xf32>
    %151 = arith.mulf %146, %150 : vector<4x4xf32>
    %cst_56 = arith.constant dense<0.000000e+00> : vector<4x8xf32>
    %152 = tpu.matmul %151, %138, %cst_56 {dimension_numbers = #tpu.dot_dimension_numbers<[1], [0], [0], [1], [0, 0, 1, 1], [], []>} : vector<4x4xf32>, vector<4x8xf32>, vector<4x8xf32> -> vector<4x8xf32>
    %c4_57 = arith.constant 4 : index
    %c24_58 = arith.constant 24 : index
    %153 = vector.load %arg21[%c4_57, %c24_58] : memref<8x32xf32, #tpu.memory_space<vmem>>, vector<4x8xf32>
    tpu.vector_store %arg21[%c4_57, %c24_58], %152 {strides = array<i32>} : memref<8x32xf32, #tpu.memory_space<vmem>>, vector<4x8xf32>,
    %c0_59 = arith.constant 0 : index
    %c0_60 = arith.constant 0 : index
    %154 = vector.load %arg21[%c0_59, %c0_60] : memref<8x32xf32, #tpu.memory_space<vmem>>, vector<8x32xf32>
    %c0_61 = arith.constant 0 : index
    %c0_62 = arith.constant 0 : index
    %155 = vector.load %arg4[%c0_61, %c0_62] : memref<32x32xf32, #tpu.memory_space<vmem>>, vector<32x32xf32>
    %cst_63 = arith.constant dense<0.000000e+00> : vector<8x32xf32>
    %156 = tpu.matmul %154, %155, %cst_63 {dimension_numbers = #tpu.dot_dimension_numbers<[1], [0], [0], [1], [0, 0, 1, 1], [], []>} : vector<8x32xf32>, vector<32x32xf32>, vector<8x32xf32> -> vector<8x32xf32>
    %c0_64 = arith.constant 0 : index
    %c0_65 = arith.constant 0 : index
    %157 = vector.load %arg5[%c0_64, %c0_65] : memref<1x32xf32, #tpu.memory_space<vmem>>, vector<1x32xf32>
    %158 = vector.broadcast %157 : vector<1x32xf32> to vector<8x32xf32>
    %159 = arith.addf %156, %158 : vector<8x32xf32>
    %160 = arith.addf %0, %159 : vector<8x32xf32>
    %c0_66 = arith.constant 0 : index
    %c0_67 = arith.constant 0 : index
    %161 = vector.load %arg6[%c0_66, %c0_67] : memref<1x32xf32, #tpu.memory_space<vmem>>, vector<1x32xf32>
    %c0_68 = arith.constant 0 : index
    %c0_69 = arith.constant 0 : index
    %162 = vector.load %arg7[%c0_68, %c0_69] : memref<1x32xf32, #tpu.memory_space<vmem>>, vector<1x32xf32>
    %cst_70 = arith.constant dense<0.000000e+00> : vector<8xf32>
    %163 = vector.multi_reduction <add>, %160, %cst_70 [1] : vector<8x32xf32> to vector<8xf32>
    %164 = vector.shape_cast %163 : vector<8xf32> to vector<8x1xf32>
    %cst_71 = arith.constant 3.200000e+01 : f32
    %165 = vector.broadcast %cst_71 : f32 to vector<8x1xf32>
    %166 = arith.divf %164, %165 : vector<8x1xf32>
    %167 = vector.broadcast %166 : vector<8x1xf32> to vector<8x32xf32>
    %168 = arith.subf %160, %167 : vector<8x32xf32>
    %169 = arith.mulf %168, %168 : vector<8x32xf32>
    %cst_72 = arith.constant dense<0.000000e+00> : vector<8xf32>
    %170 = vector.multi_reduction <add>, %169, %cst_72 [1] : vector<8x32xf32> to vector<8xf32>
    %171 = vector.shape_cast %170 : vector<8xf32> to vector<8x1xf32>
    %cst_73 = arith.constant 3.200000e+01 : f32
    %172 = vector.broadcast %cst_73 : f32 to vector<8x1xf32>
    %173 = arith.divf %171, %172 : vector<8x1xf32>
    %174 = vector.broadcast %166 : vector<8x1xf32> to vector<8x32xf32>
    %175 = arith.subf %160, %174 : vector<8x32xf32>
    %cst_74 = arith.constant 9.99999974E-6 : f32
    %176 = vector.broadcast %cst_74 : f32 to vector<8x1xf32>
    %177 = arith.addf %173, %176 : vector<8x1xf32>
    %178 = math.rsqrt %177 : vector<8x1xf32>
    %179 = vector.broadcast %178 : vector<8x1xf32> to vector<8x32xf32>
    %180 = arith.mulf %175, %179 : vector<8x32xf32>
    %181 = vector.broadcast %161 : vector<1x32xf32> to vector<8x32xf32>
    %182 = arith.mulf %180, %181 : vector<8x32xf32>
    %183 = vector.broadcast %162 : vector<1x32xf32> to vector<8x32xf32>
    %184 = arith.addf %182, %183 : vector<8x32xf32>
    %c0_75 = arith.constant 0 : index
    %c0_76 = arith.constant 0 : index
    %185 = vector.load %arg8[%c0_75, %c0_76] : memref<32x96xf32, #tpu.memory_space<vmem>>, vector<32x96xf32>
    %c0_77 = arith.constant 0 : index
    %c0_78 = arith.constant 0 : index
    %186 = vector.load %arg9[%c0_77, %c0_78] : memref<1x96xf32, #tpu.memory_space<vmem>>, vector<1x96xf32>
    %187 = vector.extract_strided_slice %185 {offsets = [0, 0], sizes = [32, 32], strides = [1, 1]} : vector<32x96xf32> to vector<32x32xf32>
    %cst_79 = arith.constant dense<0.000000e+00> : vector<8x32xf32>
    %188 = tpu.matmul %184, %187, %cst_79 {dimension_numbers = #tpu.dot_dimension_numbers<[1], [0], [0], [1], [0, 0, 1, 1], [], []>} : vector<8x32xf32>, vector<32x32xf32>, vector<8x32xf32> -> vector<8x32xf32>
    %189 = vector.extract_strided_slice %186 {offsets = [0, 0], sizes = [1, 32], strides = [1, 1]} : vector<1x96xf32> to vector<1x32xf32>
    %190 = vector.broadcast %189 : vector<1x32xf32> to vector<8x32xf32>
    %191 = arith.addf %188, %190 : vector<8x32xf32>
    %192 = vector.extract_strided_slice %185 {offsets = [0, 32], sizes = [32, 64], strides = [1, 1]} : vector<32x96xf32> to vector<32x64xf32>
    %cst_80 = arith.constant dense<0.000000e+00> : vector<16x64xf32>
    %193 = tpu.matmul %1, %192, %cst_80 {dimension_numbers = #tpu.dot_dimension_numbers<[1], [0], [0], [1], [0, 0, 1, 1], [], []>} : vector<16x32xf32>, vector<32x64xf32>, vector<16x64xf32> -> vector<16x64xf32>
    %194 = vector.extract_strided_slice %186 {offsets = [0, 32], sizes = [1, 64], strides = [1, 1]} : vector<1x96xf32> to vector<1x64xf32>
    %195 = vector.broadcast %194 : vector<1x64xf32> to vector<16x64xf32>
    %196 = arith.addf %193, %195 : vector<16x64xf32>
    %197 = vector.extract_strided_slice %196 {offsets = [0, 0], sizes = [16, 32], strides = [1, 1]} : vector<16x64xf32> to vector<16x32xf32>
    %198 = vector.extract_strided_slice %196 {offsets = [0, 32], sizes = [16, 32], strides = [1, 1]} : vector<16x64xf32> to vector<16x32xf32>
    %199 = vector.extract_strided_slice %191 {offsets = [0, 0], sizes = [4, 8], strides = [1, 1]} : vector<8x32xf32> to vector<4x8xf32>
    %200 = vector.extract_strided_slice %197 {offsets = [0, 0], sizes = [8, 8], strides = [1, 1]} : vector<16x32xf32> to vector<8x8xf32>
    %201 = vector.extract_strided_slice %198 {offsets = [0, 0], sizes = [8, 8], strides = [1, 1]} : vector<16x32xf32> to vector<8x8xf32>
    %cst_81 = arith.constant dense<0.000000e+00> : vector<4x8xf32>
    %202 = tpu.matmul %199, %200, %cst_81 {dimension_numbers = #tpu.dot_dimension_numbers<[1], [1], [0], [0], [0, 0, 1, 0], [], []>} : vector<4x8xf32>, vector<8x8xf32>, vector<4x8xf32> -> vector<4x8xf32>
    %cst_82 = arith.constant 0.353553385 : f32
    %203 = vector.broadcast %cst_82 : f32 to vector<4x8xf32>
    %204 = arith.mulf %202, %203 : vector<4x8xf32>
    %cst_83 = arith.constant dense<0xFF800000> : vector<4xf32>
    %205 = vector.multi_reduction <maximumf>, %204, %cst_83 [1] : vector<4x8xf32> to vector<4xf32>
    %206 = vector.shape_cast %205 : vector<4xf32> to vector<4x1xf32>
    %207 = vector.broadcast %206 : vector<4x1xf32> to vector<4x8xf32>
    %208 = arith.subf %204, %207 : vector<4x8xf32>
    %209 = math.exp %208 : vector<4x8xf32>
    %cst_84 = arith.constant dense<0.000000e+00> : vector<4xf32>
    %210 = vector.multi_reduction <add>, %209, %cst_84 [1] : vector<4x8xf32> to vector<4xf32>
    %211 = vector.shape_cast %210 : vector<4xf32> to vector<4x1xf32>
    %212 = tpu.reciprocal %211 {approx = true} : vector<4x1xf32> -> vector<4x1xf32>
    %213 = vector.broadcast %212 : vector<4x1xf32> to vector<4x8xf32>
    %214 = arith.mulf %209, %213 : vector<4x8xf32>
    %cst_85 = arith.constant dense<0.000000e+00> : vector<4x8xf32>
    %215 = tpu.matmul %214, %201, %cst_85 {dimension_numbers = #tpu.dot_dimension_numbers<[1], [0], [0], [1], [0, 0, 1, 1], [], []>} : vector<4x8xf32>, vector<8x8xf32>, vector<4x8xf32> -> vector<4x8xf32>
    %c0_86 = arith.constant 0 : index
    %c0_87 = arith.constant 0 : index
    %216 = vector.load %arg21[%c0_86, %c0_87] : memref<8x32xf32, #tpu.memory_space<vmem>>, vector<4x8xf32>
    tpu.vector_store %arg21[%c0_86, %c0_87], %215 {strides = array<i32>} : memref<8x32xf32, #tpu.memory_space<vmem>>, vector<4x8xf32>,
    %217 = vector.extract_strided_slice %191 {offsets = [0, 8], sizes = [4, 8], strides = [1, 1]} : vector<8x32xf32> to vector<4x8xf32>
    %218 = vector.extract_strided_slice %197 {offsets = [0, 8], sizes = [8, 8], strides = [1, 1]} : vector<16x32xf32> to vector<8x8xf32>
    %219 = vector.extract_strided_slice %198 {offsets = [0, 8], sizes = [8, 8], strides = [1, 1]} : vector<16x32xf32> to vector<8x8xf32>
    %cst_88 = arith.constant dense<0.000000e+00> : vector<4x8xf32>
    %220 = tpu.matmul %217, %218, %cst_88 {dimension_numbers = #tpu.dot_dimension_numbers<[1], [1], [0], [0], [0, 0, 1, 0], [], []>} : vector<4x8xf32>, vector<8x8xf32>, vector<4x8xf32> -> vector<4x8xf32>
    %cst_89 = arith.constant 0.353553385 : f32
    %221 = vector.broadcast %cst_89 : f32 to vector<4x8xf32>
    %222 = arith.mulf %220, %221 : vector<4x8xf32>
    %cst_90 = arith.constant dense<0xFF800000> : vector<4xf32>
    %223 = vector.multi_reduction <maximumf>, %222, %cst_90 [1] : vector<4x8xf32> to vector<4xf32>
    %224 = vector.shape_cast %223 : vector<4xf32> to vector<4x1xf32>
    %225 = vector.broadcast %224 : vector<4x1xf32> to vector<4x8xf32>
    %226 = arith.subf %222, %225 : vector<4x8xf32>
    %227 = math.exp %226 : vector<4x8xf32>
    %cst_91 = arith.constant dense<0.000000e+00> : vector<4xf32>
    %228 = vector.multi_reduction <add>, %227, %cst_91 [1] : vector<4x8xf32> to vector<4xf32>
    %229 = vector.shape_cast %228 : vector<4xf32> to vector<4x1xf32>
    %230 = tpu.reciprocal %229 {approx = true} : vector<4x1xf32> -> vector<4x1xf32>
    %231 = vector.broadcast %230 : vector<4x1xf32> to vector<4x8xf32>
    %232 = arith.mulf %227, %231 : vector<4x8xf32>
    %cst_92 = arith.constant dense<0.000000e+00> : vector<4x8xf32>
    %233 = tpu.matmul %232, %219, %cst_92 {dimension_numbers = #tpu.dot_dimension_numbers<[1], [0], [0], [1], [0, 0, 1, 1], [], []>} : vector<4x8xf32>, vector<8x8xf32>, vector<4x8xf32> -> vector<4x8xf32>
    %c0_93 = arith.constant 0 : index
    %c8_94 = arith.constant 8 : index
    %234 = vector.load %arg21[%c0_93, %c8_94] : memref<8x32xf32, #tpu.memory_space<vmem>>, vector<4x8xf32>
    tpu.vector_store %arg21[%c0_93, %c8_94], %233 {strides = array<i32>} : memref<8x32xf32, #tpu.memory_space<vmem>>, vector<4x8xf32>,
    %235 = vector.extract_strided_slice %191 {offsets = [0, 16], sizes = [4, 8], strides = [1, 1]} : vector<8x32xf32> to vector<4x8xf32>
    %236 = vector.extract_strided_slice %197 {offsets = [0, 16], sizes = [8, 8], strides = [1, 1]} : vector<16x32xf32> to vector<8x8xf32>
    %237 = vector.extract_strided_slice %198 {offsets = [0, 16], sizes = [8, 8], strides = [1, 1]} : vector<16x32xf32> to vector<8x8xf32>
    %cst_95 = arith.constant dense<0.000000e+00> : vector<4x8xf32>
    %238 = tpu.matmul %235, %236, %cst_95 {dimension_numbers = #tpu.dot_dimension_numbers<[1], [1], [0], [0], [0, 0, 1, 0], [], []>} : vector<4x8xf32>, vector<8x8xf32>, vector<4x8xf32> -> vector<4x8xf32>
    %cst_96 = arith.constant 0.353553385 : f32
    %239 = vector.broadcast %cst_96 : f32 to vector<4x8xf32>
    %240 = arith.mulf %238, %239 : vector<4x8xf32>
    %cst_97 = arith.constant dense<0xFF800000> : vector<4xf32>
    %241 = vector.multi_reduction <maximumf>, %240, %cst_97 [1] : vector<4x8xf32> to vector<4xf32>
    %242 = vector.shape_cast %241 : vector<4xf32> to vector<4x1xf32>
    %243 = vector.broadcast %242 : vector<4x1xf32> to vector<4x8xf32>
    %244 = arith.subf %240, %243 : vector<4x8xf32>
    %245 = math.exp %244 : vector<4x8xf32>
    %cst_98 = arith.constant dense<0.000000e+00> : vector<4xf32>
    %246 = vector.multi_reduction <add>, %245, %cst_98 [1] : vector<4x8xf32> to vector<4xf32>
    %247 = vector.shape_cast %246 : vector<4xf32> to vector<4x1xf32>
    %248 = tpu.reciprocal %247 {approx = true} : vector<4x1xf32> -> vector<4x1xf32>
    %249 = vector.broadcast %248 : vector<4x1xf32> to vector<4x8xf32>
    %250 = arith.mulf %245, %249 : vector<4x8xf32>
    %cst_99 = arith.constant dense<0.000000e+00> : vector<4x8xf32>
    %251 = tpu.matmul %250, %237, %cst_99 {dimension_numbers = #tpu.dot_dimension_numbers<[1], [0], [0], [1], [0, 0, 1, 1], [], []>} : vector<4x8xf32>, vector<8x8xf32>, vector<4x8xf32> -> vector<4x8xf32>
    %c0_100 = arith.constant 0 : index
    %c16_101 = arith.constant 16 : index
    %252 = vector.load %arg21[%c0_100, %c16_101] : memref<8x32xf32, #tpu.memory_space<vmem>>, vector<4x8xf32>
    tpu.vector_store %arg21[%c0_100, %c16_101], %251 {strides = array<i32>} : memref<8x32xf32, #tpu.memory_space<vmem>>, vector<4x8xf32>,
    %253 = vector.extract_strided_slice %191 {offsets = [0, 24], sizes = [4, 8], strides = [1, 1]} : vector<8x32xf32> to vector<4x8xf32>
    %254 = vector.extract_strided_slice %197 {offsets = [0, 24], sizes = [8, 8], strides = [1, 1]} : vector<16x32xf32> to vector<8x8xf32>
    %255 = vector.extract_strided_slice %198 {offsets = [0, 24], sizes = [8, 8], strides = [1, 1]} : vector<16x32xf32> to vector<8x8xf32>
    %cst_102 = arith.constant dense<0.000000e+00> : vector<4x8xf32>
    %256 = tpu.matmul %253, %254, %cst_102 {dimension_numbers = #tpu.dot_dimension_numbers<[1], [1], [0], [0], [0, 0, 1, 0], [], []>} : vector<4x8xf32>, vector<8x8xf32>, vector<4x8xf32> -> vector<4x8xf32>
    %cst_103 = arith.constant 0.353553385 : f32
    %257 = vector.broadcast %cst_103 : f32 to vector<4x8xf32>
    %258 = arith.mulf %256, %257 : vector<4x8xf32>
    %cst_104 = arith.constant dense<0xFF800000> : vector<4xf32>
    %259 = vector.multi_reduction <maximumf>, %258, %cst_104 [1] : vector<4x8xf32> to vector<4xf32>
    %260 = vector.shape_cast %259 : vector<4xf32> to vector<4x1xf32>
    %261 = vector.broadcast %260 : vector<4x1xf32> to vector<4x8xf32>
    %262 = arith.subf %258, %261 : vector<4x8xf32>
    %263 = math.exp %262 : vector<4x8xf32>
    %cst_105 = arith.constant dense<0.000000e+00> : vector<4xf32>
    %264 = vector.multi_reduction <add>, %263, %cst_105 [1] : vector<4x8xf32> to vector<4xf32>
    %265 = vector.shape_cast %264 : vector<4xf32> to vector<4x1xf32>
    %266 = tpu.reciprocal %265 {approx = true} : vector<4x1xf32> -> vector<4x1xf32>
    %267 = vector.broadcast %266 : vector<4x1xf32> to vector<4x8xf32>
    %268 = arith.mulf %263, %267 : vector<4x8xf32>
    %cst_106 = arith.constant dense<0.000000e+00> : vector<4x8xf32>
    %269 = tpu.matmul %268, %255, %cst_106 {dimension_numbers = #tpu.dot_dimension_numbers<[1], [0], [0], [1], [0, 0, 1, 1], [], []>} : vector<4x8xf32>, vector<8x8xf32>, vector<4x8xf32> -> vector<4x8xf32>
    %c0_107 = arith.constant 0 : index
    %c24_108 = arith.constant 24 : index
    %270 = vector.load %arg21[%c0_107, %c24_108] : memref<8x32xf32, #tpu.memory_space<vmem>>, vector<4x8xf32>
    tpu.vector_store %arg21[%c0_107, %c24_108], %269 {strides = array<i32>} : memref<8x32xf32, #tpu.memory_space<vmem>>, vector<4x8xf32>,
    %271 = vector.extract_strided_slice %191 {offsets = [4, 0], sizes = [4, 8], strides = [1, 1]} : vector<8x32xf32> to vector<4x8xf32>
    %272 = vector.extract_strided_slice %197 {offsets = [8, 0], sizes = [8, 8], strides = [1, 1]} : vector<16x32xf32> to vector<8x8xf32>
    %273 = vector.extract_strided_slice %198 {offsets = [8, 0], sizes = [8, 8], strides = [1, 1]} : vector<16x32xf32> to vector<8x8xf32>
    %cst_109 = arith.constant dense<0.000000e+00> : vector<4x8xf32>
    %274 = tpu.matmul %271, %272, %cst_109 {dimension_numbers = #tpu.dot_dimension_numbers<[1], [1], [0], [0], [0, 0, 1, 0], [], []>} : vector<4x8xf32>, vector<8x8xf32>, vector<4x8xf32> -> vector<4x8xf32>
    %cst_110 = arith.constant 0.353553385 : f32
    %275 = vector.broadcast %cst_110 : f32 to vector<4x8xf32>
    %276 = arith.mulf %274, %275 : vector<4x8xf32>
    %cst_111 = arith.constant dense<0xFF800000> : vector<4xf32>
    %277 = vector.multi_reduction <maximumf>, %276, %cst_111 [1] : vector<4x8xf32> to vector<4xf32>
    %278 = vector.shape_cast %277 : vector<4xf32> to vector<4x1xf32>
    %279 = vector.broadcast %278 : vector<4x1xf32> to vector<4x8xf32>
    %280 = arith.subf %276, %279 : vector<4x8xf32>
    %281 = math.exp %280 : vector<4x8xf32>
    %cst_112 = arith.constant dense<0.000000e+00> : vector<4xf32>
    %282 = vector.multi_reduction <add>, %281, %cst_112 [1] : vector<4x8xf32> to vector<4xf32>
    %283 = vector.shape_cast %282 : vector<4xf32> to vector<4x1xf32>
    %284 = tpu.reciprocal %283 {approx = true} : vector<4x1xf32> -> vector<4x1xf32>
    %285 = vector.broadcast %284 : vector<4x1xf32> to vector<4x8xf32>
    %286 = arith.mulf %281, %285 : vector<4x8xf32>
    %cst_113 = arith.constant dense<0.000000e+00> : vector<4x8xf32>
    %287 = tpu.matmul %286, %273, %cst_113 {dimension_numbers = #tpu.dot_dimension_numbers<[1], [0], [0], [1], [0, 0, 1, 1], [], []>} : vector<4x8xf32>, vector<8x8xf32>, vector<4x8xf32> -> vector<4x8xf32>
    %c4_114 = arith.constant 4 : index
    %c0_115 = arith.constant 0 : index
    %288 = vector.load %arg21[%c4_114, %c0_115] : memref<8x32xf32, #tpu.memory_space<vmem>>, vector<4x8xf32>
    tpu.vector_store %arg21[%c4_114, %c0_115], %287 {strides = array<i32>} : memref<8x32xf32, #tpu.memory_space<vmem>>, vector<4x8xf32>,
    %289 = vector.extract_strided_slice %191 {offsets = [4, 8], sizes = [4, 8], strides = [1, 1]} : vector<8x32xf32> to vector<4x8xf32>
    %290 = vector.extract_strided_slice %197 {offsets = [8, 8], sizes = [8, 8], strides = [1, 1]} : vector<16x32xf32> to vector<8x8xf32>
    %291 = vector.extract_strided_slice %198 {offsets = [8, 8], sizes = [8, 8], strides = [1, 1]} : vector<16x32xf32> to vector<8x8xf32>
    %cst_116 = arith.constant dense<0.000000e+00> : vector<4x8xf32>
    %292 = tpu.matmul %289, %290, %cst_116 {dimension_numbers = #tpu.dot_dimension_numbers<[1], [1], [0], [0], [0, 0, 1, 0], [], []>} : vector<4x8xf32>, vector<8x8xf32>, vector<4x8xf32> -> vector<4x8xf32>
    %cst_117 = arith.constant 0.353553385 : f32
    %293 = vector.broadcast %cst_117 : f32 to vector<4x8xf32>
    %294 = arith.mulf %292, %293 : vector<4x8xf32>
    %cst_118 = arith.constant dense<0xFF800000> : vector<4xf32>
    %295 = vector.multi_reduction <maximumf>, %294, %cst_118 [1] : vector<4x8xf32> to vector<4xf32>
    %296 = vector.shape_cast %295 : vector<4xf32> to vector<4x1xf32>
    %297 = vector.broadcast %296 : vector<4x1xf32> to vector<4x8xf32>
    %298 = arith.subf %294, %297 : vector<4x8xf32>
    %299 = math.exp %298 : vector<4x8xf32>
    %cst_119 = arith.constant dense<0.000000e+00> : vector<4xf32>
    %300 = vector.multi_reduction <add>, %299, %cst_119 [1] : vector<4x8xf32> to vector<4xf32>
    %301 = vector.shape_cast %300 : vector<4xf32> to vector<4x1xf32>
    %302 = tpu.reciprocal %301 {approx = true} : vector<4x1xf32> -> vector<4x1xf32>
    %303 = vector.broadcast %302 : vector<4x1xf32> to vector<4x8xf32>
    %304 = arith.mulf %299, %303 : vector<4x8xf32>
    %cst_120 = arith.constant dense<0.000000e+00> : vector<4x8xf32>
    %305 = tpu.matmul %304, %291, %cst_120 {dimension_numbers = #tpu.dot_dimension_numbers<[1], [0], [0], [1], [0, 0, 1, 1], [], []>} : vector<4x8xf32>, vector<8x8xf32>, vector<4x8xf32> -> vector<4x8xf32>
    %c4_121 = arith.constant 4 : index
    %c8_122 = arith.constant 8 : index
    %306 = vector.load %arg21[%c4_121, %c8_122] : memref<8x32xf32, #tpu.memory_space<vmem>>, vector<4x8xf32>
    tpu.vector_store %arg21[%c4_121, %c8_122], %305 {strides = array<i32>} : memref<8x32xf32, #tpu.memory_space<vmem>>, vector<4x8xf32>,
    %307 = vector.extract_strided_slice %191 {offsets = [4, 16], sizes = [4, 8], strides = [1, 1]} : vector<8x32xf32> to vector<4x8xf32>
    %308 = vector.extract_strided_slice %197 {offsets = [8, 16], sizes = [8, 8], strides = [1, 1]} : vector<16x32xf32> to vector<8x8xf32>
    %309 = vector.extract_strided_slice %198 {offsets = [8, 16], sizes = [8, 8], strides = [1, 1]} : vector<16x32xf32> to vector<8x8xf32>
    %cst_123 = arith.constant dense<0.000000e+00> : vector<4x8xf32>
    %310 = tpu.matmul %307, %308, %cst_123 {dimension_numbers = #tpu.dot_dimension_numbers<[1], [1], [0], [0], [0, 0, 1, 0], [], []>} : vector<4x8xf32>, vector<8x8xf32>, vector<4x8xf32> -> vector<4x8xf32>
    %cst_124 = arith.constant 0.353553385 : f32
    %311 = vector.broadcast %cst_124 : f32 to vector<4x8xf32>
    %312 = arith.mulf %310, %311 : vector<4x8xf32>
    %cst_125 = arith.constant dense<0xFF800000> : vector<4xf32>
    %313 = vector.multi_reduction <maximumf>, %312, %cst_125 [1] : vector<4x8xf32> to vector<4xf32>
    %314 = vector.shape_cast %313 : vector<4xf32> to vector<4x1xf32>
    %315 = vector.broadcast %314 : vector<4x1xf32> to vector<4x8xf32>
    %316 = arith.subf %312, %315 : vector<4x8xf32>
    %317 = math.exp %316 : vector<4x8xf32>
    %cst_126 = arith.constant dense<0.000000e+00> : vector<4xf32>
    %318 = vector.multi_reduction <add>, %317, %cst_126 [1] : vector<4x8xf32> to vector<4xf32>
    %319 = vector.shape_cast %318 : vector<4xf32> to vector<4x1xf32>
    %320 = tpu.reciprocal %319 {approx = true} : vector<4x1xf32> -> vector<4x1xf32>
    %321 = vector.broadcast %320 : vector<4x1xf32> to vector<4x8xf32>
    %322 = arith.mulf %317, %321 : vector<4x8xf32>
    %cst_127 = arith.constant dense<0.000000e+00> : vector<4x8xf32>
    %323 = tpu.matmul %322, %309, %cst_127 {dimension_numbers = #tpu.dot_dimension_numbers<[1], [0], [0], [1], [0, 0, 1, 1], [], []>} : vector<4x8xf32>, vector<8x8xf32>, vector<4x8xf32> -> vector<4x8xf32>
    %c4_128 = arith.constant 4 : index
    %c16_129 = arith.constant 16 : index
    %324 = vector.load %arg21[%c4_128, %c16_129] : memref<8x32xf32, #tpu.memory_space<vmem>>, vector<4x8xf32>
    tpu.vector_store %arg21[%c4_128, %c16_129], %323 {strides = array<i32>} : memref<8x32xf32, #tpu.memory_space<vmem>>, vector<4x8xf32>,
    %325 = vector.extract_strided_slice %191 {offsets = [4, 24], sizes = [4, 8], strides = [1, 1]} : vector<8x32xf32> to vector<4x8xf32>
    %326 = vector.extract_strided_slice %197 {offsets = [8, 24], sizes = [8, 8], strides = [1, 1]} : vector<16x32xf32> to vector<8x8xf32>
    %327 = vector.extract_strided_slice %198 {offsets = [8, 24], sizes = [8, 8], strides = [1, 1]} : vector<16x32xf32> to vector<8x8xf32>
    %cst_130 = arith.constant dense<0.000000e+00> : vector<4x8xf32>
    %328 = tpu.matmul %325, %326, %cst_130 {dimension_numbers = #tpu.dot_dimension_numbers<[1], [1], [0], [0], [0, 0, 1, 0], [], []>} : vector<4x8xf32>, vector<8x8xf32>, vector<4x8xf32> -> vector<4x8xf32>
    %cst_131 = arith.constant 0.353553385 : f32
    %329 = vector.broadcast %cst_131 : f32 to vector<4x8xf32>
    %330 = arith.mulf %328, %329 : vector<4x8xf32>
    %cst_132 = arith.constant dense<0xFF800000> : vector<4xf32>
    %331 = vector.multi_reduction <maximumf>, %330, %cst_132 [1] : vector<4x8xf32> to vector<4xf32>
    %332 = vector.shape_cast %331 : vector<4xf32> to vector<4x1xf32>
    %333 = vector.broadcast %332 : vector<4x1xf32> to vector<4x8xf32>
    %334 = arith.subf %330, %333 : vector<4x8xf32>
    %335 = math.exp %334 : vector<4x8xf32>
    %cst_133 = arith.constant dense<0.000000e+00> : vector<4xf32>
    %336 = vector.multi_reduction <add>, %335, %cst_133 [1] : vector<4x8xf32> to vector<4xf32>
    %337 = vector.shape_cast %336 : vector<4xf32> to vector<4x1xf32>
    %338 = tpu.reciprocal %337 {approx = true} : vector<4x1xf32> -> vector<4x1xf32>
    %339 = vector.broadcast %338 : vector<4x1xf32> to vector<4x8xf32>
    %340 = arith.mulf %335, %339 : vector<4x8xf32>
    %cst_134 = arith.constant dense<0.000000e+00> : vector<4x8xf32>
    %341 = tpu.matmul %340, %327, %cst_134 {dimension_numbers = #tpu.dot_dimension_numbers<[1], [0], [0], [1], [0, 0, 1, 1], [], []>} : vector<4x8xf32>, vector<8x8xf32>, vector<4x8xf32> -> vector<4x8xf32>
    %c4_135 = arith.constant 4 : index
    %c24_136 = arith.constant 24 : index
    %342 = vector.load %arg21[%c4_135, %c24_136] : memref<8x32xf32, #tpu.memory_space<vmem>>, vector<4x8xf32>
    tpu.vector_store %arg21[%c4_135, %c24_136], %341 {strides = array<i32>} : memref<8x32xf32, #tpu.memory_space<vmem>>, vector<4x8xf32>,
    %c0_137 = arith.constant 0 : index
    %c0_138 = arith.constant 0 : index
    %343 = vector.load %arg21[%c0_137, %c0_138] : memref<8x32xf32, #tpu.memory_space<vmem>>, vector<8x32xf32>
    %c0_139 = arith.constant 0 : index
    %c0_140 = arith.constant 0 : index
    %344 = vector.load %arg10[%c0_139, %c0_140] : memref<32x32xf32, #tpu.memory_space<vmem>>, vector<32x32xf32>
    %cst_141 = arith.constant dense<0.000000e+00> : vector<8x32xf32>
    %345 = tpu.matmul %343, %344, %cst_141 {dimension_numbers = #tpu.dot_dimension_numbers<[1], [0], [0], [1], [0, 0, 1, 1], [], []>} : vector<8x32xf32>, vector<32x32xf32>, vector<8x32xf32> -> vector<8x32xf32>
    %c0_142 = arith.constant 0 : index
    %c0_143 = arith.constant 0 : index
    %346 = vector.load %arg11[%c0_142, %c0_143] : memref<1x32xf32, #tpu.memory_space<vmem>>, vector<1x32xf32>
    %347 = vector.broadcast %346 : vector<1x32xf32> to vector<8x32xf32>
    %348 = arith.addf %345, %347 : vector<8x32xf32>
    %349 = arith.addf %184, %348 : vector<8x32xf32>
    %c0_144 = arith.constant 0 : index
    %c0_145 = arith.constant 0 : index
    %350 = vector.load %arg12[%c0_144, %c0_145] : memref<1x32xf32, #tpu.memory_space<vmem>>, vector<1x32xf32>
    %c0_146 = arith.constant 0 : index
    %c0_147 = arith.constant 0 : index
    %351 = vector.load %arg13[%c0_146, %c0_147] : memref<1x32xf32, #tpu.memory_space<vmem>>, vector<1x32xf32>
    %cst_148 = arith.constant dense<0.000000e+00> : vector<8xf32>
    %352 = vector.multi_reduction <add>, %349, %cst_148 [1] : vector<8x32xf32> to vector<8xf32>
    %353 = vector.shape_cast %352 : vector<8xf32> to vector<8x1xf32>
    %cst_149 = arith.constant 3.200000e+01 : f32
    %354 = vector.broadcast %cst_149 : f32 to vector<8x1xf32>
    %355 = arith.divf %353, %354 : vector<8x1xf32>
    %356 = vector.broadcast %355 : vector<8x1xf32> to vector<8x32xf32>
    %357 = arith.subf %349, %356 : vector<8x32xf32>
    %358 = arith.mulf %357, %357 : vector<8x32xf32>
    %cst_150 = arith.constant dense<0.000000e+00> : vector<8xf32>
    %359 = vector.multi_reduction <add>, %358, %cst_150 [1] : vector<8x32xf32> to vector<8xf32>
    %360 = vector.shape_cast %359 : vector<8xf32> to vector<8x1xf32>
    %cst_151 = arith.constant 3.200000e+01 : f32
    %361 = vector.broadcast %cst_151 : f32 to vector<8x1xf32>
    %362 = arith.divf %360, %361 : vector<8x1xf32>
    %363 = vector.broadcast %355 : vector<8x1xf32> to vector<8x32xf32>
    %364 = arith.subf %349, %363 : vector<8x32xf32>
    %cst_152 = arith.constant 9.99999974E-6 : f32
    %365 = vector.broadcast %cst_152 : f32 to vector<8x1xf32>
    %366 = arith.addf %362, %365 : vector<8x1xf32>
    %367 = math.rsqrt %366 : vector<8x1xf32>
    %368 = vector.broadcast %367 : vector<8x1xf32> to vector<8x32xf32>
    %369 = arith.mulf %364, %368 : vector<8x32xf32>
    %370 = vector.broadcast %350 : vector<1x32xf32> to vector<8x32xf32>
    %371 = arith.mulf %369, %370 : vector<8x32xf32>
    %372 = vector.broadcast %351 : vector<1x32xf32> to vector<8x32xf32>
    %373 = arith.addf %371, %372 : vector<8x32xf32>
    %c0_153 = arith.constant 0 : index
    %c0_154 = arith.constant 0 : index
    %374 = vector.load %arg14[%c0_153, %c0_154] : memref<32x64xf32, #tpu.memory_space<vmem>>, vector<32x64xf32>
    %cst_155 = arith.constant dense<0.000000e+00> : vector<8x64xf32>
    %375 = tpu.matmul %373, %374, %cst_155 {dimension_numbers = #tpu.dot_dimension_numbers<[1], [0], [0], [1], [0, 0, 1, 1], [], []>} : vector<8x32xf32>, vector<32x64xf32>, vector<8x64xf32> -> vector<8x64xf32>
    %c0_156 = arith.constant 0 : index
    %c0_157 = arith.constant 0 : index
    %376 = vector.load %arg15[%c0_156, %c0_157] : memref<1x64xf32, #tpu.memory_space<vmem>>, vector<1x64xf32>
    %377 = vector.broadcast %376 : vector<1x64xf32> to vector<8x64xf32>
    %378 = arith.addf %375, %377 : vector<8x64xf32>
    %cst_158 = arith.constant 0.000000e+00 : f32
    %379 = vector.broadcast %cst_158 : f32 to vector<8x64xf32>
    %380 = arith.maximumf %378, %379 : vector<8x64xf32>
    %c0_159 = arith.constant 0 : index
    %c0_160 = arith.constant 0 : index
    %381 = vector.load %arg16[%c0_159, %c0_160] : memref<64x32xf32, #tpu.memory_space<vmem>>, vector<64x32xf32>
    %cst_161 = arith.constant dense<0.000000e+00> : vector<8x32xf32>
    %382 = tpu.matmul %380, %381, %cst_161 {dimension_numbers = #tpu.dot_dimension_numbers<[1], [0], [0], [1], [0, 0, 1, 1], [], []>} : vector<8x64xf32>, vector<64x32xf32>, vector<8x32xf32> -> vector<8x32xf32>
    %c0_162 = arith.constant 0 : index
    %c0_163 = arith.constant 0 : index
    %383 = vector.load %arg17[%c0_162, %c0_163] : memref<1x32xf32, #tpu.memory_space<vmem>>, vector<1x32xf32>
    %384 = vector.broadcast %383 : vector<1x32xf32> to vector<8x32xf32>
    %385 = arith.addf %382, %384 : vector<8x32xf32>
    %386 = arith.addf %373, %385 : vector<8x32xf32>
    %c0_164 = arith.constant 0 : index
    %c0_165 = arith.constant 0 : index
    %387 = vector.load %arg18[%c0_164, %c0_165] : memref<1x32xf32, #tpu.memory_space<vmem>>, vector<1x32xf32>
    %c0_166 = arith.constant 0 : index
    %c0_167 = arith.constant 0 : index
    %388 = vector.load %arg19[%c0_166, %c0_167] : memref<1x32xf32, #tpu.memory_space<vmem>>, vector<1x32xf32>
    %cst_168 = arith.constant dense<0.000000e+00> : vector<8xf32>
    %389 = vector.multi_reduction <add>, %386, %cst_168 [1] : vector<8x32xf32> to vector<8xf32>
    %390 = vector.shape_cast %389 : vector<8xf32> to vector<8x1xf32>
    %cst_169 = arith.constant 3.200000e+01 : f32
    %391 = vector.broadcast %cst_169 : f32 to vector<8x1xf32>
    %392 = arith.divf %390, %391 : vector<8x1xf32>
    %393 = vector.broadcast %392 : vector<8x1xf32> to vector<8x32xf32>
    %394 = arith.subf %386, %393 : vector<8x32xf32>
    %395 = arith.mulf %394, %394 : vector<8x32xf32>
    %cst_170 = arith.constant dense<0.000000e+00> : vector<8xf32>
    %396 = vector.multi_reduction <add>, %395, %cst_170 [1] : vector<8x32xf32> to vector<8xf32>
    %397 = vector.shape_cast %396 : vector<8xf32> to vector<8x1xf32>
    %cst_171 = arith.constant 3.200000e+01 : f32
    %398 = vector.broadcast %cst_171 : f32 to vector<8x1xf32>
    %399 = arith.divf %397, %398 : vector<8x1xf32>
    %400 = vector.broadcast %392 : vector<8x1xf32> to vector<8x32xf32>
    %401 = arith.subf %386, %400 : vector<8x32xf32>
    %cst_172 = arith.constant 9.99999974E-6 : f32
    %402 = vector.broadcast %cst_172 : f32 to vector<8x1xf32>
    %403 = arith.addf %399, %402 : vector<8x1xf32>
    %404 = math.rsqrt %403 : vector<8x1xf32>
    %405 = vector.broadcast %404 : vector<8x1xf32> to vector<8x32xf32>
    %406 = arith.mulf %401, %405 : vector<8x32xf32>
    %407 = vector.broadcast %387 : vector<1x32xf32> to vector<8x32xf32>
    %408 = arith.mulf %406, %407 : vector<8x32xf32>
    %409 = vector.broadcast %388 : vector<1x32xf32> to vector<8x32xf32>
    %410 = arith.addf %408, %409 : vector<8x32xf32>
    %c0_173 = arith.constant 0 : index
    %c0_174 = arith.constant 0 : index
    %411 = vector.load %arg20[%c0_173, %c0_174] : memref<8x32xf32, #tpu.memory_space<vmem>>, vector<8x32xf32>
    tpu.vector_store %arg20[%c0_173, %c0_174], %410 {strides = array<i32>} : memref<8x32xf32, #tpu.memory_space<vmem>>, vector<8x32xf32>,
    return
  }
}

</mosaic_0001>

<bundles_post_ra>
// kernel: forward.11
= control target key start
LH: loop header
LB: loop body
LE: loop exit
PB: predicated region body
PF: predicated region fallthrough
CT: control target
= control target key end

     0   :  { %vm29_vm0 = vcmask 261120   ;;  %s171_s2 = inlined_call_operand.vmem [shape: f32[32,32], index: 2, kind: input, shape index: {}]   ;;  %s172_s3 = inlined_call_operand.vmem [shape: f32[1,32], index: 3, kind: input, shape index: {}]   ;;  %s173_s0 = inlined_call_operand.vmem [shape: f32[16,32], index: 0, kind: input, shape index: {}]   ;;  %s174_s1 = inlined_call_operand.vmem [shape: f32[8,32], index: 1, kind: input, shape index: {}]   ;;  %s175_s4 = inlined_call_operand.vmem [shape: f32[16,32], index: 4, kind: output, shape index: {0}]   ;;  %s176_s5 = inlined_call_operand.vmem [shape: f32[8,32], index: 5, kind: output, shape index: {1}]  }
   0x1   :  { %v22_v0 = vld [vmem:[%s171_s2 + $0x18] sm:$0xff]  ;;  %v21_v1 = vld [vmem:[%s171_s2 + $0x10] sm:$0xff]  ;;  %v20_v2 = vld [vmem:[%s171_s2 + $0x8] sm:$0xff] }
   0x2   :  { %97 = vmatpush.msra.mxu2 %v22_v0  ;;  %48 = vmatpush.msra.mxu0 %v22_v0  ;;  %v19_v3 = vld [vmem:[%s171_s2] sm:$0xff]  ;;  %v25_v4 = vld [vmem:[%s173_s0 + $0x8] sm:$0xff] }
   0x3   :  { %77 = vmatpush.msra.mxu1 %v22_v0  ;;  %v24_v5 = vld [vmem:[%s173_s0] sm:$0xff] }
   0x4   :  { %98 = vmatpush.msra.mxu2 %v21_v1  ;;  %49 = vmatpush.msra.mxu0 %v21_v1  ;;  %v61_v6 = vld [vmem:[%s174_s1] sm:$0xff] }
   0x5   :  { %78 = vmatpush.msra.mxu1 %v21_v1  ;;  %v101_v7 = vld [vmem:[%s172_s3] ss:$0 sm:$0xff] }
   0x6   :  { %99 = vmatpush.msra.mxu2 %v20_v2  ;;  %50 = vmatpush.msra.mxu0 %v20_v2 }
   0x7   :  { %79 = vmatpush.msra.mxu1 %v20_v2 }
   0x8   :  { %100 = vmatpush.msra.mxu2 %v19_v3  ;;  %51 = vmatpush.msra.mxu0 %v19_v3 }
   0x9   :  { %95 = vmatmul.msk.f32.vlgmr.msra.gmra.mxu2 %vm29_vm0, %v25_v4  ;;  %80 = vmatpush.msra.mxu1 %v19_v3 }
   0xa   :  { %94 = vmatmul.msk.f32.vlgmr.msra.gmra.mxu0 %vm29_vm0, %v24_v5  ;;  %96 = vmatmul.msk.f32.vlgmr.msra.gmra.mxu1 %vm29_vm0, %v61_v6 }
  0x87   :  { %v53_v8 = vpop.f32.mrf.mxu0  ;;  %v82_v9 = vpop.f32.mrf.mxu1 }
  0x88   :  { %v54_v10 = vadd.f32 %v101_v7, %v53_v8  ;;  %v83_v11 = vadd.f32 %v101_v7, %v82_v9 }
  0x8a   :  { %59 = vst.msk [vmem:[%s175_s4] sm:$0xff] %vm29_vm0, %v54_v10 }
  0x8b   :  { %85 = vst.msk [vmem:[%s176_s5] sm:$0xff] %vm29_vm0, %v83_v11 }
  0x8c   :  { %v56_v12 = vpop.f32.mrf.mxu2 }
  0x8d   :  { %v57_v13 = vadd.f32 %v101_v7, %v56_v12 }
  0x8f   :  { %60 = vst.msk [vmem:[%s175_s4 + $0x8] sm:$0xff] %vm29_vm0, %v57_v13 }

// kernel: forward.14
= control target key start
LH: loop header
LB: loop body
LE: loop exit
PB: predicated region body
PF: predicated region fallthrough
CT: control target
= control target key end

     0   :  { %vm18_vm0 = vcmask 261120   ;;  %v95_v4 = vmov 32.0   ;;  %s140_s0 = inlined_call_operand.vmem [shape: f32[16,32], index: 0, kind: input, shape index: {}]   ;;  %s141_s1 = inlined_call_operand.vmem [shape: f32[1,32], index: 1, kind: input, shape index: {}]   ;;  %s142_s2 = inlined_call_operand.vmem [shape: f32[1,32], index: 2, kind: input, shape index: {}]   ;;  %s143_s3 = inlined_call_operand.vmem [shape: f32[16,32], index: 3, kind: output, shape index: {}]  }
   0x1   :  { %v14_v0 = vld [vmem:[%s140_s0] sm:$0xff]  ;;  %v15_v2 = vld [vmem:[%s140_s0 + $0x8] sm:$0xff]  ;;  %89 = vrcp.f32 %v95_v4 }
   0x2   :  { %v19_v1 = vsel %vm18_vm0, %v14_v0, 0.0  ;;  %v22_v3 = vsel %vm18_vm0, %v15_v2, 0.0  ;;  %v87_v35 = vld [vmem:[%s141_s1] ss:$0 sm:$0xff] }
   0x3   :  { %20 = vadd.xlane.f32.xlu0 %v19_v1  ;;  %v88_v38 = vld [vmem:[%s142_s2] ss:$0 sm:$0xff] }
   0x7   :  { %v90_v5 = vpop.eup %89 }
   0x8   :  { %v26_v6 = vmul.f32 32.0, %v90_v5  ;;  %vm30_vm1 = vweird.f32 %v90_v5 }
   0xa   :  { %v27_v7 = vsub.f32 1.0, %v26_v6 }
   0xb   :  { %23 = vadd.xlane.f32.xlu0 %v22_v3 }
   0xc   :  { %v28_v8 = vmul.f32 %v90_v5, %v27_v7 }
   0xe   :  { %v29_v9 = vadd.f32 %v90_v5, %v28_v8 }
  0x10   :  { %v31_v10 = vsel %vm30_vm1, %v90_v5, %v29_v9 }
  0x76   :  { %v21_v11 = vpop.xlane.xlu0 %20 }
  0x77   :  { %v32_v12 = vmul.f32 %v31_v10, %v21_v11 }
  0x79   :  { %v34_v13 = vsub.f32 %v14_v0, %v32_v12 }
  0x7b   :  { %v36_v14 = vmul.f32 %v34_v13, %v34_v13 }
  0x7d   :  { %v38_v15 = vsel %vm18_vm0, %v36_v14, 0.0 }
  0x7e   :  { %39 = vadd.xlane.f32.xlu1 %v38_v15  ;;  %v24_v16 = vpop.xlane.xlu0 %23 }
  0x7f   :  { %v33_v17 = vmul.f32 %v31_v10, %v24_v16 }
  0x81   :  { %v35_v18 = vsub.f32 %v15_v2, %v33_v17 }
  0x83   :  { %v37_v19 = vmul.f32 %v35_v18, %v35_v18 }
  0x85   :  { %v41_v20 = vsel %vm18_vm0, %v37_v19, 0.0 }
  0x86   :  { %42 = vadd.xlane.f32.xlu1 %v41_v20 }
  0xf1   :  { %v40_v21 = vpop.xlane.xlu1 %39 }
  0xf2   :  { %v44_v22 = vmul.f32 %v40_v21, %v31_v10 }
  0xf4   :  { %v46_v23 = vadd.f32 1e-05, %v44_v22 }
  0xf6   :  { %91 = vrsqrt.f32 %v46_v23  ;;  %vm54_vm3 = vweird.f32 %v46_v23 }
  0xf9   :  { %v43_v24 = vpop.xlane.xlu1 %42 }
  0xfa   :  { %v45_v25 = vmul.f32 %v43_v24, %v31_v10 }
  0xfc   :  { %v92_v26 = vpop.eup %91  ;;  %v47_v27 = vadd.f32 1e-05, %v45_v25 }
  0xfd   :  { %v49_v28 = vmul.f32 %v92_v26, %v46_v23  ;;  %vm55_vm2 = vweird.f32 %v92_v26 }
  0xfe   :  { %93 = vrsqrt.f32 %v47_v27  ;;  %vm56_vm4 = vmor %vm54_vm3, %vm55_vm2  ;;  %vm64_vm6 = vweird.f32 %v47_v27 }
  0xff   :  { %v50_v29 = vmul.f32 %v92_v26, %v49_v28 }
 0x101   :  { %v51_v30 = vmul.f32 0.5, %v50_v29 }
 0x103   :  { %v52_v31 = vsub.f32 1.5, %v51_v30 }
 0x104   :  { %v94_v32 = vpop.eup %93 }
 0x105   :  { %v53_v33 = vmul.f32 %v92_v26, %v52_v31  ;;  %v59_v34 = vmul.f32 %v94_v32, %v47_v27  ;;  %vm65_vm5 = vweird.f32 %v94_v32 }
 0x106   :  { %vm66_vm7 = vmor %vm64_vm6, %vm65_vm5 }
 0x107   :  { %v57_v36 = vsel %vm56_vm4, %v92_v26, %v53_v33  ;;  %v60_v37 = vmul.f32 %v94_v32, %v59_v34 }
 0x108   :  { %v68_v39 = vmul.f32 %v57_v36, %v34_v13 }
 0x109   :  { %v61_v40 = vmul.f32 0.5, %v60_v37 }
 0x10a   :  { %v73_v41 = vmul.f32 %v87_v35, %v68_v39 }
 0x10b   :  { %v62_v42 = vsub.f32 1.5, %v61_v40 }
 0x10c   :  { %v78_v43 = vadd.f32 %v88_v38, %v73_v41 }
 0x10d   :  { %v63_v44 = vmul.f32 %v94_v32, %v62_v42 }
 0x10e   :  { %80 = vst.msk [vmem:[%s143_s3] sm:$0xff] %vm18_vm0, %v78_v43 }
 0x10f   :  { %v67_v45 = vsel %vm66_vm7, %v94_v32, %v63_v44 }
 0x110   :  { %v69_v46 = vmul.f32 %v67_v45, %v35_v18 }
 0x112   :  { %v74_v47 = vmul.f32 %v87_v35, %v69_v46 }
 0x114   :  { %v79_v48 = vadd.f32 %v88_v38, %v74_v47 }
 0x116   :  { %81 = vst.msk [vmem:[%s143_s3 + $0x8] sm:$0xff] %vm18_vm0, %v79_v48 }

// kernel: forward.12
= control target key start
LH: loop header
LB: loop body
LE: loop exit
PB: predicated region body
PF: predicated region fallthrough
CT: control target
= control target key end

     0   :  { %vm54_vm0 = vcmask 261120   ;;  %s993_s20 = smov 96   ;;  %s994_s21 = smov 64   ;;  %vm87_vm1 = vcmask 64512   ;;  %vm221_vm2 = vcmask 130112   ;;  %vm293_vm3 = vcmask 195712   ;;  %s1319_s1 = inlined_call_operand.vmem [shape: f32[32,96], index: 1, kind: input, shape index: {}]   ;;  %s1320_s2 = inlined_call_operand.vmem [shape: f32[1,96], index: 2, kind: input, shape index: {}]   ;;  %s1321_s0 = inlined_call_operand.vmem [shape: f32[16,32], index: 0, kind: input, shape index: {}]   ;;  %s1322_s3 = inlined_call_operand.vmem [shape: f32[32,32], index: 3, kind: input, shape index: {}]   ;;  %s1323_s4 = inlined_call_operand.vmem [shape: f32[1,32], index: 4, kind: input, shape index: {}]   ;;  %s1324_s5 = inlined_call_operand.vmem [shape: f32[1,32], index: 5, kind: input, shape index: {}]   ;;  %s1325_s6 = inlined_call_operand.vmem [shape: f32[1,32], index: 6, kind: input, shape index: {}]   ;;  %s1326_s8 = inlined_call_operand.vmem [shape: f32[1,64], index: 8, kind: input, shape index: {}]   ;;  %s1327_s7 = inlined_call_operand.vmem [shape: f32[32,64], index: 7, kind: input, shape index: {}]   ;;  %s1328_s9 = inlined_call_operand.vmem [shape: f32[64,32], index: 9, kind: input, shape index: {}]   ;;  %s1329_s10 = inlined_call_operand.vmem [shape: f32[1,32], index: 10, kind: input, shape index: {}]   ;;  %s1330_s11 = inlined_call_operand.vmem [shape: f32[1,32], index: 11, kind: input, shape index: {}]   ;;  %s1331_s12 = inlined_call_operand.vmem [shape: f32[1,32], index: 12, kind: input, shape index: {}]   ;;  %s1332_s13 = inlined_call_operand.vmem [shape: f32[16,32], index: 13, kind: output, shape index: {}]  }
   0x1   :  { %v49_v0 = vld [vmem:[%s1319_s1 + $0x18] sm:$0xff]  ;;  %v48_v1 = vld [vmem:[%s1319_s1 + $0x10] sm:$0xff]  ;;  %v47_v2 = vld [vmem:[%s1319_s1 + $0x8] sm:$0xff]  ;;  %s995_s22 = smov 80   ;;  %s997_s23 = smov 88   ;;  %vm365_vm4 = vcmask 261312  }
   0x2   :  { %73 = vmatpush.msra.mxu0 %v49_v0  ;;  %v46_v3 = vld [vmem:[%s1319_s1] sm:$0xff]  ;;  %s992_s1 = smov 120   ;;  %v1131_v29 = vld [vmem:[%s1321_s0 + $0x8] sm:$0xff]  ;;  %s998_s26 = smov 48   ;;  %vm801_vm9 = vcmask 523264  }
   0x3   :  { %v1092_v4 = vld [vmem:[%s1321_s0] sm:$0xff]  ;;  %s999_s27 = smov 72   ;;  %s1000_s0 = smov 56  }
   0x4   :  { %74 = vmatpush.msra.mxu0 %v48_v1  ;;  %v1099_v5 = vld [vmem:[%s1320_s2] ss:$0 sm:$0xff]  ;;  %s996_s2 = smov 112   ;;  %s1001_s28 = smov 104  }
   0x5   :  { %s1002_s29 = smov 40   ;;  %s1003_s30 = smov 8  }
   0x6   :  { %75 = vmatpush.msra.mxu0 %v47_v2  ;;  %s1004_s14 = smov 16   ;;  %s1005_s15 = smov 24  }
   0x8   :  { %76 = vmatpush.msra.mxu0 %v46_v3 }
   0x9   :  { %895 = vmatmul.msk.f32.vlgmr.msra.gmra.mxu0 %vm54_vm0, %v1092_v4 }
  0x11   :  { %896 = vmatmul.msk.f32.gmra.mxu0 %vm54_vm0, %v1131_v29 }
  0x86   :  { %v78_v6 = vpop.f32.mrf.mxu0 }
  0x87   :  { %v1102_v7 = vadd.f32 %v1099_v5, %v78_v6 }
  0x89   :  { %151 = vrot.lane.b32.xlu2 %v1102_v7, %s992_s1  ;;  %85 = vrot.lane.b32.xlu0 %v1102_v7, %s993_s20 }
  0x8e   :  { %v81_v37 = vpop.f32.mrf.mxu0 }
  0x8f   :  { %v1140_v38 = vadd.f32 %v1099_v5, %v81_v37 }
  0x91   :  { %124 = vrot.lane.b32.xlu2 %v1102_v7, %s994_s21 }
  0x99   :  { %225 = vrot.lane.b32.xlu2 %v1102_v7, %s995_s22 }
  0xa1   :  { %223 = vrot.lane.b32.xlu2 %v1102_v7, %s996_s2 }
  0xe3   :  { %v152_v8 = vpop.permute.xlu2 %151 }
  0xeb   :  { %v125_v9 = vpop.permute.xlu2 %124 }
  0xf3   :  { %v226_v11 = vpop.permute.xlu2 %225 }
  0xfb   :  { %v86_v10 = vpop.permute.xlu0 %85  ;;  %v224_v23 = vpop.permute.xlu2 %223 }
  0xfc   :  { %897 = vmatpush.xpose.msk.msra.mxu1 %vm87_vm1, %v86_v10 }
  0xff   :  { %898 = vmatmul.msk.f32.vlgmr.msra.gmra.mxu1 %vm87_vm1, %v1102_v7 }
 0x100   :  { %145 = vmatpush.msrb.mxu1 %v125_v9 }
 0x102   :  { %903 = vmatpush.xpose.msk.msra.mxu1 %vm87_vm1, %v226_v11 }
 0x17c   :  { %v109_v12 = vpop.f32.mrf.mxu1 }
 0x17d   :  { %v112_v13 = vmul.f32 0.35355338, %v109_v12 }
 0x17f   :  { %v113_v14 = vsel %vm87_vm1, %v112_v13, -inf }
 0x180   :  { %114 = vmax.xlane.f32.xlu0 %v113_v14 }
 0x1f3   :  { %v115_v15 = vpop.xlane.xlu0 %114 }
 0x1f4   :  { %v116_v16 = vsub.f32 %v112_v13, %v115_v15 }
 0x1f6   :  { %v117_v17 = vmul.f32 1.442695, %v116_v16 }
 0x1f8   :  { %950 = vpow2.f32 %v117_v17 }
 0x1fe   :  { %v951_v18 = vpop.eup %950 }
 0x1ff   :  { %v119_v19 = vsel %vm87_vm1, %v951_v18, 0.0 }
 0x200   :  { %120 = vadd.xlane.f32.xlu1 %v119_v19 }
 0x219   :  { %153 = vrot.lane.b32.xlu1 %v1102_v7, %s997_s23 }
 0x273   :  { %v121_v20 = vpop.xlane.xlu1 %120 }
 0x274   :  { %952 = vrcp.f32 %v121_v20 }
 0x27a   :  { %v953_v21 = vpop.eup %952 }
 0x27b   :  { %v123_v22 = vmul.f32 %v953_v21, %v951_v18 }
 0x27d   :  { %899 = vmatmul.msk.f32.vlgmr.msrb.gmra.mxu1 %vm87_vm1, %v123_v22 }
 0x285   :  { %904 = vmatmul.msk.f32.vlgmr.msra.gmra.mxu1 %vm87_vm1, %v224_v23 }
 0x28b   :  { %v154_v24 = vpop.permute.xlu1 %153 }
 0x28c   :  { %900 = vmatpush.xpose.msk.msra.mxu3 %vm87_vm1, %v154_v24 }
 0x28f   :  { %901 = vmatmul.msk.f32.vlgmr.msra.gmra.mxu3 %vm87_vm1, %v152_v8 }
 0x2fa   :  { %v147_v25 = vpop.f32.mrf.mxu1 }
 0x2fb   :  { %150 = vst.msk [vmem:[#allocation2] sm:$0xff] %vm87_vm1, %v147_v25 }
 0x302   :  { %v248_v26 = vpop.f32.mrf.mxu1 }
 0x303   :  { %v251_v27 = vmul.f32 0.35355338, %v248_v26 }
 0x305   :  { %v252_v28 = vsel %vm87_vm1, %v251_v27, -inf }
 0x306   :  { %253 = vmax.xlane.f32.xlu1 %v252_v28 }
 0x312   :  { %v176_v30 = vpop.f32.mrf.mxu3 }
 0x313   :  { %v179_v31 = vmul.f32 0.35355338, %v176_v30 }
 0x315   :  { %v180_v32 = vsel %vm87_vm1, %v179_v31, -inf }
 0x316   :  { %181 = vmax.xlane.f32.xlu2 %v180_v32 }
 0x31f   :  { %263 = vrot.lane.b32.xlu1 %v1102_v7, %s998_s26 }
 0x327   :  { %433 = vrot.lane.b32.xlu1 %v1140_v38, %s992_s1 }
 0x32e   :  { %297 = vrot.lane.b32.xlu2 %v1102_v7, %s999_s27 }
 0x32f   :  { %504 = vrot.lane.b32.xlu1 %v1140_v38, %s996_s2 }
 0x336   :  { %435 = vrot.lane.b32.xlu2 %v1140_v38, %s997_s23 }
 0x33e   :  { %577 = vrot.lane.b32.xlu2 %v1140_v38, %s999_s27 }
 0x379   :  { %v254_v33 = vpop.xlane.xlu1 %253 }
 0x37a   :  { %v255_v42 = vsub.f32 %v251_v27, %v254_v33 }
 0x37c   :  { %v256_v43 = vmul.f32 1.442695, %v255_v42 }
 0x389   :  { %v182_v34 = vpop.xlane.xlu2 %181 }
 0x38a   :  { %v183_v35 = vsub.f32 %v179_v31, %v182_v34 }
 0x38c   :  { %v184_v36 = vmul.f32 1.442695, %v183_v35 }
 0x38e   :  { %954 = vpow2.f32 %v184_v36 }
 0x38f   :  { %956 = vpow2.f32 %v256_v43 }
 0x391   :  { %v264_v39 = vpop.permute.xlu1 %263  ;;  %v298_v47 = vpop.permute.xlu2 %297 }
 0x392   :  { %284 = vmatpush.msrb.mxu3 %v264_v39 }
 0x394   :  { %v955_v40 = vpop.eup %954 }
 0x395   :  { %v186_v41 = vsel %vm87_vm1, %v955_v40, 0.0  ;;  %v957_v44 = vpop.eup %956 }
 0x396   :  { %187 = vadd.xlane.f32.xlu0 %v186_v41  ;;  %v258_v45 = vsel %vm87_vm1, %v957_v44, 0.0 }
 0x399   :  { %v436_v49 = vpop.permute.xlu2 %435  ;;  %v434_v55 = vpop.permute.xlu1 %433 }
 0x3a1   :  { %v578_v53 = vpop.permute.xlu2 %577  ;;  %v505_v61 = vpop.permute.xlu1 %504 }
 0x3aa   :  { %191 = vrot.lane.b32.xlu0 %v1102_v7, %s1000_s0 }
 0x3b2   :  { %295 = vrot.lane.b32.xlu0 %v1102_v7, %s1001_s28 }
 0x3ba   :  { %368 = vrot.lane.b32.xlu0 %v1140_v38, %s993_s20 }
 0x3c2   :  { %506 = vrot.lane.b32.xlu0 %v1140_v38, %s995_s22 }
 0x3ec   :  { %259 = vadd.xlane.f32.xlu0 %v258_v45 }
 0x400   :  { %575 = vrot.lane.b32.xlu0 %v1140_v38, %s1001_s28 }
 0x409   :  { %v188_v46 = vpop.xlane.xlu0 %187 }
 0x40a   :  { %958 = vrcp.f32 %v188_v46 }
 0x410   :  { %v959_v48 = vpop.eup %958 }
 0x411   :  { %v190_v51 = vmul.f32 %v959_v48, %v955_v40 }
 0x41c   :  { %v192_v50 = vpop.permute.xlu0 %191 }
 0x41d   :  { %212 = vmatpush.msra.mxu2 %v192_v50 }
 0x41e   :  { %902 = vmatmul.msk.f32.vlgmr.msra.gmra.mxu2 %vm87_vm1, %v190_v51 }
 0x41f   :  { %906 = vmatpush.xpose.msk.msrb.mxu2 %vm87_vm1, %v298_v47 }
 0x423   :  { %912 = vmatpush.xpose.msk.msra.mxu2 %vm87_vm1, %v436_v49 }
 0x424   :  { %v296_v52 = vpop.permute.xlu0 %295 }
 0x426   :  { %907 = vmatmul.msk.f32.vlgmr.msrb.gmra.mxu2 %vm87_vm1, %v296_v52 }
 0x427   :  { %918 = vmatpush.xpose.msk.msrb.mxu2 %vm87_vm1, %v578_v53 }
 0x42c   :  { %v369_v54 = vpop.permute.xlu0 %368 }
 0x42d   :  { %909 = vmatpush.xpose.msk.msra.mxu3 %vm87_vm1, %v369_v54 }
 0x42e   :  { %913 = vmatmul.msk.f32.vlgmr.msra.gmra.mxu2 %vm87_vm1, %v434_v55 }
 0x434   :  { %v507_v56 = vpop.permute.xlu0 %506 }
 0x45f   :  { %v260_v57 = vpop.xlane.xlu0 %259 }
 0x460   :  { %960 = vrcp.f32 %v260_v57 }
 0x466   :  { %v961_v58 = vpop.eup %960 }
 0x467   :  { %v262_v59 = vmul.f32 %v961_v58, %v957_v44 }
 0x469   :  { %905 = vmatmul.msk.f32.vlgmr.msrb.gmra.mxu3 %vm87_vm1, %v262_v59 }
 0x46a   :  { %915 = vmatpush.xpose.msk.msrb.mxu3 %vm87_vm1, %v507_v56 }
 0x471   :  { %910 = vmatmul.msk.f32.vlgmr.msra.gmra.mxu3 %vm87_vm1, %v1140_v38 }
 0x472   :  { %v576_v60 = vpop.permute.xlu0 %575 }
 0x473   :  { %919 = vmatmul.msk.f32.vlgmr.msrb.gmra.mxu2 %vm87_vm1, %v576_v60 }
 0x479   :  { %916 = vmatmul.msk.f32.vlgmr.msrb.gmra.mxu3 %vm87_vm1, %v505_v61 }
 0x4a1   :  { %v214_v62 = vpop.f32.mrf.mxu2 }
 0x4a9   :  { %v320_v63 = vpop.f32.mrf.mxu2 }
 0x4aa   :  { %v323_v0 = vmul.f32 0.35355338, %v320_v63 }
 0x4ac   :  { %v324_v1 = vsel %vm87_vm1, %v323_v0, -inf }
 0x4ad   :  { %325 = vmax.xlane.f32.xlu2 %v324_v1 }
 0x4b1   :  { %v458_v2 = vpop.f32.mrf.mxu2 }
 0x4b2   :  { %v461_v3 = vmul.f32 0.35355338, %v458_v2  ;;  %v649_v2 = vld [vmem:[%s1322_s3 + $0x8] sm:$0xff] }
 0x4b4   :  { %v462_v5 = vsel %vm87_vm1, %v461_v3, -inf }
 0x4b5   :  { %463 = vmax.xlane.f32.xlu0 %v462_v5  ;;  %v648_v5 = vld [vmem:[%s1322_s3] sm:$0xff] }
 0x4ec   :  { %v286_v6 = vpop.f32.mrf.mxu3 }
 0x4f4   :  { %v391_v8 = vpop.f32.mrf.mxu3 }
 0x4f5   :  { %v394_v9 = vmul.f32 0.35355338, %v391_v8 }
 0x4f6   :  { %v600_v11 = vpop.f32.mrf.mxu2 }
 0x4f7   :  { %v395_v10 = vsel %vm87_vm1, %v394_v9, -inf  ;;  %v603_v12 = vmul.f32 0.35355338, %v600_v11 }
 0x4f8   :  { %396 = vmax.xlane.f32.xlu1 %v395_v10 }
 0x4f9   :  { %v604_v13 = vsel %vm87_vm1, %v603_v12, -inf }
 0x4fc   :  { %v529_v31 = vpop.f32.mrf.mxu3 }
 0x4fd   :  { %v532_v33 = vmul.f32 0.35355338, %v529_v31 }
 0x4ff   :  { %v533_v34 = vsel %vm87_vm1, %v532_v33, -inf }
 0x500   :  { %605 = vmax.xlane.f32.xlu1 %v604_v13  ;;  %v943_v13 = vld [vmem:[%s1323_s4] ss:$0 sm:$0xff] }
 0x520   :  { %v326_v14 = vpop.xlane.xlu2 %325 }
 0x521   :  { %v327_v15 = vsub.f32 %v323_v0, %v326_v14  ;;  %v650_v0 = vld [vmem:[%s1322_s3 + $0x10] sm:$0xff] }
 0x523   :  { %v328_v16 = vmul.f32 1.442695, %v327_v15 }
 0x525   :  { %962 = vpow2.f32 %v328_v16 }
 0x528   :  { %v464_v17 = vpop.xlane.xlu0 %463 }
 0x529   :  { %v465_v18 = vsub.f32 %v461_v3, %v464_v17 }
 0x52b   :  { %v963_v19 = vpop.eup %962  ;;  %v466_v20 = vmul.f32 1.442695, %v465_v18 }
 0x52c   :  { %v330_v21 = vsel %vm87_vm1, %v963_v19, 0.0 }
 0x52d   :  { %964 = vpow2.f32 %v466_v20  ;;  %331 = vadd.xlane.f32.xlu0 %v330_v21 }
 0x533   :  { %v1177_v22 = vpop.eup %964 }
 0x534   :  { %v468_v23 = vsel %vm87_vm1, %v1177_v22, 0.0 }
 0x535   :  { %469 = vadd.xlane.f32.xlu1 %v468_v23 }
 0x541   :  { %335 = vrot.lane.b32.xlu0 %v1102_v7, %s1002_s29 }
 0x549   :  { %544 = vrot.lane.b32.xlu0 %v1140_v38, %s998_s26 }
 0x54e   :  { %406 = vrot.lane.b32.xlu1 %v1140_v38, %s994_s21 }
 0x551   :  { %615 = vrot.lane.b32.xlu0 %v1140_v38, %s1002_s29 }
 0x556   :  { %218 = vrot.lane.b32.xlu1 %v214_v62, %s1003_s30 }
 0x559   :  { %290 = vrot.lane.b32.xlu0 %v286_v6, %s1004_s14 }
 0x56b   :  { %v397_v24 = vpop.xlane.xlu1 %396 }
 0x56c   :  { %v398_v28 = vsub.f32 %v394_v9, %v397_v24 }
 0x56e   :  { %v399_v32 = vmul.f32 1.442695, %v398_v28 }
 0x573   :  { %v606_v25 = vpop.xlane.xlu1 %605 }
 0x574   :  { %v607_v26 = vsub.f32 %v603_v12, %v606_v25 }
 0x576   :  { %v608_v27 = vmul.f32 1.442695, %v607_v26 }
 0x578   :  { %966 = vpow2.f32 %v608_v27 }
 0x579   :  { %968 = vpow2.f32 %v399_v32 }
 0x57e   :  { %v1189_v7 = vpop.eup %966 }
 0x57f   :  { %v610_v30 = vsel %vm87_vm1, %v1189_v7, 0.0  ;;  %v969_v35 = vpop.eup %968 }
 0x580   :  { %611 = vadd.xlane.f32.xlu2 %v610_v30  ;;  %v401_v36 = vsel %vm87_vm1, %v969_v35, 0.0 }
 0x588   :  { %534 = vmax.xlane.f32.xlu2 %v533_v34 }
 0x590   :  { %402 = vadd.xlane.f32.xlu2 %v401_v36 }
 0x5a0   :  { %v332_v37 = vpop.xlane.xlu0 %331 }
 0x5a1   :  { %970 = vrcp.f32 %v332_v37  ;;  %v753_v37 = vld [vmem:[%s1327_s7 + $0x18] sm:$0xff] }
 0x5a7   :  { %v971_v39 = vpop.eup %970 }
 0x5a8   :  { %v334_v40 = vmul.f32 %v971_v39, %v963_v19  ;;  %v470_v42 = vpop.xlane.xlu1 %469  ;;  %v752_v39 = vld [vmem:[%s1327_s7 + $0x10] sm:$0xff] }
 0x5b3   :  { %v336_v41 = vpop.permute.xlu0 %335 }
 0x5b4   :  { %356 = vmatpush.msrb.mxu1 %v336_v41 }
 0x5b5   :  { %908 = vmatmul.msk.f32.vlgmr.msrb.gmra.mxu1 %vm87_vm1, %v334_v40  ;;  %v751_v40 = vld [vmem:[%s1327_s7 + $0x8] sm:$0xff] }
 0x5bb   :  { %v545_v43 = vpop.permute.xlu0 %544 }
 0x5c0   :  { %v407_v44 = vpop.permute.xlu1 %406 }
 0x5c1   :  { %427 = vmatpush.msrb.mxu0 %v407_v44 }
 0x5c3   :  { %565 = vmatpush.msra.mxu0 %v545_v43  ;;  %v616_v45 = vpop.permute.xlu0 %615 }
 0x5c8   :  { %v219_v46 = vpop.permute.xlu1 %218 }
 0x5c9   :  { %222 = vst.msk [vmem:[#allocation2] sm:$0xff] %vm221_vm2, %v219_v46 }
 0x5cb   :  { %v291_v47 = vpop.permute.xlu0 %290 }
 0x5cc   :  { %294 = vst.msk [vmem:[#allocation2] sm:$0xff] %vm293_vm3, %v291_v47 }
 0x5f3   :  { %v612_v48 = vpop.xlane.xlu2 %611 }
 0x5fb   :  { %v535_v49 = vpop.xlane.xlu2 %534 }
 0x5fc   :  { %v536_v50 = vsub.f32 %v532_v33, %v535_v49 }
 0x5fe   :  { %v537_v51 = vmul.f32 1.442695, %v536_v50  ;;  %v944_v50 = vld [vmem:[%s1324_s5] ss:$0 sm:$0xff] }
 0x600   :  { %972 = vpow2.f32 %v537_v51 }
 0x603   :  { %v403_v52 = vpop.xlane.xlu2 %402 }
 0x604   :  { %974 = vrcp.f32 %v403_v52 }
 0x605   :  { %976 = vrcp.f32 %v470_v42 }
 0x606   :  { %v973_v53 = vpop.eup %972 }
 0x607   :  { %v539_v54 = vsel %vm87_vm1, %v973_v53, 0.0 }
 0x608   :  { %540 = vadd.xlane.f32.xlu2 %v539_v54 }
 0x60a   :  { %v975_v55 = vpop.eup %974 }
 0x60b   :  { %v405_v56 = vmul.f32 %v975_v55, %v969_v35  ;;  %v977_v59 = vpop.eup %976 }
 0x60c   :  { %v472_v61 = vmul.f32 %v977_v59, %v1177_v22  ;;  %v1006_v22 = vmov 32.0   ;;  %v793_v59 = vld [vmem:[%s1328_s9 + $0x20] sm:$0xff] }
 0x60d   :  { %911 = vmatmul.msk.f32.vlgmr.msrb.gmra.mxu0 %vm87_vm1, %v405_v56  ;;  %v796_v56 = vld [vmem:[%s1328_s9 + $0x38] sm:$0xff] }
 0x60e   :  { %776 = vmatpush.msrb.mxu0 %v753_v37  ;;  %816 = vmatpush.msra.mxu2 %v796_v56 }
 0x610   :  { %777 = vmatpush.msrb.mxu0 %v752_v39 }
 0x612   :  { %778 = vmatpush.msrb.mxu0 %v751_v40 }
 0x620   :  { %473 = vrot.lane.b32.xlu2 %v1140_v38, %s1000_s0  ;;  %v651_v38 = vld [vmem:[%s1322_s3 + $0x18] sm:$0xff] }
 0x621   :  { %674 = vmatpush.msra.mxu3 %v651_v38 }
 0x623   :  { %675 = vmatpush.msra.mxu3 %v650_v0 }
 0x625   :  { %676 = vmatpush.msra.mxu3 %v649_v2  ;;  %v790_v2 = vld [vmem:[%s1328_s9 + $0x8] sm:$0xff] }
 0x627   :  { %677 = vmatpush.msra.mxu3 %v648_v5  ;;  %v946_v5 = vld [vmem:[%s1326_s8] ss:$0 sm:$0xff] }
 0x632   :  { %v358_v57 = vpop.f32.mrf.mxu1 }
 0x633   :  { %362 = vrot.lane.b32.xlu1 %v358_v57, %s1005_s15  ;;  %v795_v57 = vld [vmem:[%s1328_s9 + $0x30] sm:$0xff] }
 0x634   :  { %817 = vmatpush.msra.mxu2 %v795_v57 }
 0x67b   :  { %v541_v58 = vpop.xlane.xlu2 %540 }
 0x67c   :  { %978 = vrcp.f32 %v541_v58  ;;  %v794_v58 = vld [vmem:[%s1328_s9 + $0x28] sm:$0xff] }
 0x67d   :  { %980 = vrcp.f32 %v612_v48  ;;  %818 = vmatpush.msra.mxu2 %v794_v58 }
 0x67e   :  { %982 = vrcp.f32 %v1006_v22 }
 0x67f   :  { %819 = vmatpush.msra.mxu2 %v793_v59 }
 0x682   :  { %v979_v60 = vpop.eup %978 }
 0x683   :  { %v543_v62 = vmul.f32 %v979_v60, %v973_v53  ;;  %v474_v63 = vpop.permute.xlu2 %473  ;;  %v981_v1 = vpop.eup %980  ;;  %v945_v53 = vld [vmem:[%s1325_s6] ss:$0 sm:$0xff]  ;;  %v792_v60 = vld [vmem:[%s1328_s9 + $0x18] sm:$0xff] }
 0x684   :  { %494 = vmatpush.msra.mxu1 %v474_v63  ;;  %v614_v6 = vmul.f32 %v981_v1, %v1189_v7  ;;  %v983_v23 = vpop.eup %982  ;;  %820 = vmatpush.msra.mxu2 %v792_v60  ;;  %v791_v1 = vld [vmem:[%s1328_s9 + $0x10] sm:$0xff] }
 0x685   :  { %914 = vmatmul.msk.f32.vlgmr.msra.gmra.mxu1 %vm87_vm1, %v472_v61  ;;  %917 = vmatmul.msk.f32.vlgmr.msra.gmra.mxu0 %vm87_vm1, %v543_v62  ;;  %v696_v24 = vmul.f32 32.0, %v983_v23  ;;  %vm700_vm5 = vweird.f32 %v983_v23 }
 0x686   :  { %636 = vmatpush.msrb.mxu1 %v616_v45  ;;  %821 = vmatpush.msra.mxu2 %v791_v1 }
 0x688   :  { %822 = vmatpush.msra.mxu2 %v790_v2 }
 0x68a   :  { %v429_v3 = vpop.f32.mrf.mxu0 }
 0x68b   :  { %432 = vst.msk [vmem:[#allocation2 + $0x8] sm:$0xff] %vm87_vm1, %v429_v3  ;;  %v789_v3 = vld [vmem:[%s1328_s9] sm:$0xff] }
 0x68c   :  { %823 = vmatpush.msra.mxu2 %v789_v3 }
 0x68d   :  { %920 = vmatmul.msk.f32.vlgmr.msrb.gmra.mxu1 %vm87_vm1, %v614_v6 }
 0x6a5   :  { %v363_v8 = vpop.permute.xlu1 %362 }
 0x6a6   :  { %366 = vst.msk [vmem:[#allocation2] sm:$0xff] %vm365_vm4, %v363_v8 }
 0x6ad   :  { %v646_v9 = vld [vmem:[#allocation2] sm:$0xff] }
 0x6ae   :  { %921 = vmatmul.msk.f32.vlgmr.msra.gmra.mxu3 %vm54_vm0, %v646_v9 }
 0x702   :  { %v496_v10 = vpop.f32.mrf.mxu1  ;;  %v567_v11 = vpop.f32.mrf.mxu0 }
 0x703   :  { %500 = vrot.lane.b32.xlu2 %v496_v10, %s1003_s30  ;;  %571 = vrot.lane.b32.xlu0 %v567_v11, %s1004_s14 }
 0x70a   :  { %v638_v12 = vpop.f32.mrf.mxu1 }
 0x70b   :  { %642 = vrot.lane.b32.xlu1 %v638_v12, %s1005_s15 }
 0x731   :  { %v679_v14 = vpop.f32.mrf.mxu3 }
 0x732   :  { %v680_v15 = vadd.f32 %v943_v13, %v679_v14 }
 0x734   :  { %v685_v16 = vadd.f32 %v680_v15, %v1092_v4  ;;  %v697_v4 = vsub.f32 1.0, %v696_v24 }
 0x736   :  { %v689_v17 = vsel %vm54_vm0, %v685_v16, 0.0  ;;  %v698_v25 = vmul.f32 %v983_v23, %v697_v4 }
 0x737   :  { %690 = vadd.xlane.f32.xlu2 %v689_v17 }
 0x738   :  { %v699_v26 = vadd.f32 %v983_v23, %v698_v25 }
 0x73a   :  { %v1235_v27 = vsel %vm700_vm5, %v983_v23, %v699_v26  ;;  %v947_v23 = vld [vmem:[%s1329_s10] ss:$0 sm:$0xff] }
 0x75d   :  { %v501_v18 = vpop.permute.xlu2 %500 }
 0x75e   :  { %503 = vst.msk [vmem:[#allocation2 + $0x8] sm:$0xff] %vm221_vm2, %v501_v18 }
 0x775   :  { %v572_v19 = vpop.permute.xlu0 %571 }
 0x776   :  { %574 = vst.msk [vmem:[#allocation2 + $0x8] sm:$0xff] %vm293_vm3, %v572_v19 }
 0x77d   :  { %v643_v20 = vpop.permute.xlu1 %642 }
 0x77e   :  { %645 = vst.msk [vmem:[#allocation2 + $0x8] sm:$0xff] %vm365_vm4, %v643_v20 }
 0x785   :  { %v647_v21 = vld [vmem:[#allocation2 + $0x8] sm:$0xff] }
 0x786   :  { %922 = vmatmul.msk.f32.gmra.mxu3 %vm54_vm0, %v647_v21 }
 0x7aa   :  { %v691_v7 = vpop.xlane.xlu2 %690 }
 0x7ab   :  { %v702_v28 = vmul.f32 %v1235_v27, %v691_v7 }
 0x7ad   :  { %v704_v30 = vsub.f32 %v685_v16, %v702_v28 }
 0x7af   :  { %v706_v31 = vmul.f32 %v704_v30, %v704_v30 }
 0x7b1   :  { %v708_v32 = vsel %vm54_vm0, %v706_v31, 0.0 }
 0x7b2   :  { %709 = vadd.xlane.f32.xlu1 %v708_v32 }
 0x809   :  { %v682_v33 = vpop.f32.mrf.mxu3 }
 0x80a   :  { %v683_v34 = vadd.f32 %v943_v13, %v682_v33 }
 0x80c   :  { %v686_v35 = vadd.f32 %v683_v34, %v1131_v29  ;;  %v750_v29 = vld [vmem:[%s1327_s7] sm:$0xff] }
 0x80d   :  { %779 = vmatpush.msrb.mxu0 %v750_v29 }
 0x80e   :  { %v692_v36 = vsel %vm54_vm0, %v686_v35, 0.0 }
 0x80f   :  { %693 = vadd.xlane.f32.xlu0 %v692_v36 }
 0x825   :  { %v710_v41 = vpop.xlane.xlu1 %709 }
 0x826   :  { %v714_v42 = vmul.f32 %v710_v41, %v1235_v27 }
 0x828   :  { %v716_v43 = vadd.f32 1e-05, %v714_v42 }
 0x82a   :  { %984 = vrsqrt.f32 %v716_v43  ;;  %vm724_vm7 = vweird.f32 %v716_v43 }
 0x830   :  { %v985_v44 = vpop.eup %984 }
 0x831   :  { %v719_v45 = vmul.f32 %v985_v44, %v716_v43  ;;  %vm725_vm6 = vweird.f32 %v985_v44 }
 0x832   :  { %vm726_vm8 = vmor %vm724_vm7, %vm725_vm6 }
 0x833   :  { %v720_v46 = vmul.f32 %v985_v44, %v719_v45 }
 0x835   :  { %v721_v47 = vmul.f32 0.5, %v720_v46 }
 0x837   :  { %v722_v48 = vsub.f32 1.5, %v721_v47 }
 0x839   :  { %v723_v49 = vmul.f32 %v985_v44, %v722_v48 }
 0x83b   :  { %v727_v51 = vsel %vm726_vm8, %v985_v44, %v723_v49  ;;  %v948_v49 = vld [vmem:[%s1330_s11] ss:$0 sm:$0xff] }
 0x83c   :  { %v738_v52 = vmul.f32 %v727_v51, %v704_v30  ;;  %v949_v51 = vld [vmem:[%s1331_s12] ss:$0 sm:$0xff] }
 0x83e   :  { %v743_v54 = vmul.f32 %v944_v50, %v738_v52 }
 0x840   :  { %v748_v55 = vadd.f32 %v945_v53, %v743_v54 }
 0x842   :  { %923 = vmatmul.msk.f32.vlgmr.msrb.gmra.mxu0 %vm54_vm0, %v748_v55 }
 0x882   :  { %v694_v61 = vpop.xlane.xlu0 %693 }
 0x883   :  { %v703_v62 = vmul.f32 %v1235_v27, %v694_v61 }
 0x885   :  { %v705_v63 = vsub.f32 %v686_v35, %v703_v62 }
 0x887   :  { %v707_v38 = vmul.f32 %v705_v63, %v705_v63 }
 0x889   :  { %v711_v0 = vsel %vm54_vm0, %v707_v38, 0.0 }
 0x88a   :  { %712 = vadd.xlane.f32.xlu2 %v711_v0 }
 0x8bf   :  { %v781_v6 = vpop.f32.mrf.mxu0 }
 0x8c0   :  { %v782_v8 = vadd.f32 %v946_v5, %v781_v6 }
 0x8c2   :  { %v787_v9 = vmax.f32 %v782_v8, 0.0 }
 0x8c4   :  { %925 = vmatmul.msk.f32.vlgmr.msra.gmra.mxu2 %vm801_vm9, %v787_v9 }
 0x8fd   :  { %v713_v10 = vpop.xlane.xlu2 %712 }
 0x8fe   :  { %v715_v11 = vmul.f32 %v713_v10, %v1235_v27 }
 0x900   :  { %v717_v12 = vadd.f32 1e-05, %v715_v11 }
 0x902   :  { %986 = vrsqrt.f32 %v717_v12  ;;  %vm734_vm11 = vweird.f32 %v717_v12 }
 0x908   :  { %v987_v13 = vpop.eup %986 }
 0x909   :  { %v729_v14 = vmul.f32 %v987_v13, %v717_v12  ;;  %vm735_vm10 = vweird.f32 %v987_v13 }
 0x90a   :  { %vm736_vm12 = vmor %vm734_vm11, %vm735_vm10 }
 0x90b   :  { %v730_v15 = vmul.f32 %v987_v13, %v729_v14 }
 0x90d   :  { %v731_v16 = vmul.f32 0.5, %v730_v15 }
 0x90f   :  { %v732_v17 = vsub.f32 1.5, %v731_v16 }
 0x911   :  { %v733_v18 = vmul.f32 %v987_v13, %v732_v17 }
 0x913   :  { %v737_v19 = vsel %vm736_vm12, %v987_v13, %v733_v18 }
 0x914   :  { %v739_v20 = vmul.f32 %v737_v19, %v705_v63 }
 0x916   :  { %v744_v21 = vmul.f32 %v944_v50, %v739_v20 }
 0x918   :  { %v749_v22 = vadd.f32 %v945_v53, %v744_v21 }
 0x91a   :  { %924 = vmatmul.msk.f32.gmra.mxu0 %vm54_vm0, %v749_v22 }
 0x947   :  { %v825_v24 = vpop.f32.mrf.mxu2 }
 0x948   :  { %v826_v4 = vadd.f32 %v947_v23, %v825_v24 }
 0x94a   :  { %v831_v25 = vadd.f32 %v826_v4, %v748_v55 }
 0x94c   :  { %v835_v26 = vsel %vm54_vm0, %v831_v25, 0.0 }
 0x94d   :  { %836 = vadd.xlane.f32.xlu0 %v835_v26 }
 0x997   :  { %v784_v7 = vpop.f32.mrf.mxu0 }
 0x998   :  { %v785_v28 = vadd.f32 %v946_v5, %v784_v7 }
 0x99a   :  { %v788_v30 = vmax.f32 %v785_v28, 0.0 }
 0x99c   :  { %926 = vmatmul.msk.f32.gmra.mxu2 %vm801_vm9, %v788_v30 }
 0x9c0   :  { %v837_v31 = vpop.xlane.xlu0 %836 }
 0x9c1   :  { %v841_v32 = vmul.f32 %v837_v31, %v1235_v27 }
 0x9c3   :  { %v843_v33 = vsub.f32 %v831_v25, %v841_v32 }
 0x9c5   :  { %v845_v34 = vmul.f32 %v843_v33, %v843_v33 }
 0x9c7   :  { %v847_v35 = vsel %vm54_vm0, %v845_v34, 0.0 }
 0x9c8   :  { %848 = vadd.xlane.f32.xlu2 %v847_v35 }
 0xa1f   :  { %v828_v36 = vpop.f32.mrf.mxu2 }
 0xa20   :  { %v829_v37 = vadd.f32 %v947_v23, %v828_v36 }
 0xa22   :  { %v832_v39 = vadd.f32 %v829_v37, %v749_v22 }
 0xa24   :  { %v838_v40 = vsel %vm54_vm0, %v832_v39, 0.0 }
 0xa25   :  { %839 = vadd.xlane.f32.xlu1 %v838_v40 }
 0xa3b   :  { %v849_v29 = vpop.xlane.xlu2 %848 }
 0xa3c   :  { %v853_v41 = vmul.f32 %v849_v29, %v1235_v27 }
 0xa3e   :  { %v855_v42 = vadd.f32 1e-05, %v853_v41 }
 0xa40   :  { %988 = vrsqrt.f32 %v855_v42  ;;  %vm863_vm14 = vweird.f32 %v855_v42 }
 0xa46   :  { %v989_v43 = vpop.eup %988 }
 0xa47   :  { %v858_v44 = vmul.f32 %v989_v43, %v855_v42  ;;  %vm864_vm13 = vweird.f32 %v989_v43 }
 0xa48   :  { %vm865_vm15 = vmor %vm863_vm14, %vm864_vm13 }
 0xa49   :  { %v859_v45 = vmul.f32 %v989_v43, %v858_v44 }
 0xa4b   :  { %v860_v46 = vmul.f32 0.5, %v859_v45 }
 0xa4d   :  { %v861_v47 = vsub.f32 1.5, %v860_v46 }
 0xa4f   :  { %v862_v48 = vmul.f32 %v989_v43, %v861_v47 }
 0xa51   :  { %v866_v50 = vsel %vm865_vm15, %v989_v43, %v862_v48 }
 0xa52   :  { %v877_v52 = vmul.f32 %v866_v50, %v843_v33 }
 0xa54   :  { %v882_v53 = vmul.f32 %v948_v49, %v877_v52 }
 0xa56   :  { %v887_v54 = vadd.f32 %v949_v51, %v882_v53 }
 0xa58   :  { %889 = vst.msk [vmem:[%s1332_s13] sm:$0xff] %vm54_vm0, %v887_v54 }
 0xa98   :  { %v840_v55 = vpop.xlane.xlu1 %839 }
 0xa99   :  { %v842_v56 = vmul.f32 %v840_v55, %v1235_v27 }
 0xa9b   :  { %v844_v57 = vsub.f32 %v832_v39, %v842_v56 }
 0xa9d   :  { %v846_v58 = vmul.f32 %v844_v57, %v844_v57 }
 0xa9f   :  { %v850_v59 = vsel %vm54_vm0, %v846_v58, 0.0 }
 0xaa0   :  { %851 = vadd.xlane.f32.xlu0 %v850_v59 }
 0xb13   :  { %v852_v60 = vpop.xlane.xlu0 %851 }
 0xb14   :  { %v854_v61 = vmul.f32 %v852_v60, %v1235_v27 }
 0xb16   :  { %v856_v62 = vadd.f32 1e-05, %v854_v61 }
 0xb18   :  { %990 = vrsqrt.f32 %v856_v62  ;;  %vm873_vm2 = vweird.f32 %v856_v62 }
 0xb1e   :  { %v991_v63 = vpop.eup %990 }
 0xb1f   :  { %v868_v38 = vmul.f32 %v991_v63, %v856_v62  ;;  %vm874_vm1 = vweird.f32 %v991_v63 }
 0xb20   :  { %vm875_vm3 = vmor %vm873_vm2, %vm874_vm1 }
 0xb21   :  { %v869_v0 = vmul.f32 %v991_v63, %v868_v38 }
 0xb23   :  { %v870_v1 = vmul.f32 0.5, %v869_v0 }
 0xb25   :  { %v871_v2 = vsub.f32 1.5, %v870_v1 }
 0xb27   :  { %v872_v3 = vmul.f32 %v991_v63, %v871_v2 }
 0xb29   :  { %v876_v5 = vsel %vm875_vm3, %v991_v63, %v872_v3 }
 0xb2a   :  { %v878_v6 = vmul.f32 %v876_v5, %v844_v57 }
 0xb2c   :  { %v883_v8 = vmul.f32 %v948_v49, %v878_v6 }
 0xb2e   :  { %v888_v9 = vadd.f32 %v949_v51, %v883_v8 }
 0xb30   :  { %890 = vst.msk [vmem:[%s1332_s13 + $0x8] sm:$0xff] %vm54_vm0, %v888_v9 }

// kernel: forward.13
= control target key start
LH: loop header
LB: loop body
LE: loop exit
PB: predicated region body
PF: predicated region fallthrough
CT: control target
= control target key end

     0   :  { %18 = vsyncpa [#allocation4], 0  ;;  %s1037_s28 = smov [#allocation3]   ;;  %s1038_s30 = smov 128   ;;  %s1358_s0 = inlined_call_operand.vmem [shape: f32[16,32], index: 0, kind: input, shape index: {}]   ;;  %s1359_s1 = inlined_call_operand.vmem [shape: f32[32,96], index: 1, kind: input, shape index: {}]   ;;  %s1360_s2 = inlined_call_operand.vmem [shape: f32[1,96], index: 2, kind: input, shape index: {}]   ;;  %s1361_s3 = inlined_call_operand.vmem [shape: f32[32,32], index: 3, kind: input, shape index: {}]   ;;  %s1362_s4 = inlined_call_operand.vmem [shape: f32[1,32], index: 4, kind: input, shape index: {}]   ;;  %s1363_s5 = inlined_call_operand.vmem [shape: f32[1,32], index: 5, kind: input, shape index: {}]   ;;  %s1364_s6 = inlined_call_operand.vmem [shape: f32[1,32], index: 6, kind: input, shape index: {}]   ;;  %s1365_s7 = inlined_call_operand.hbm [shape: f32[32,64], index: 7, kind: input, shape index: {}]   ;;  %s1366_s8 = inlined_call_operand.vmem [shape: f32[1,64], index: 8, kind: input, shape index: {}]   ;;  %s1367_s9 = inlined_call_operand.vmem [shape: f32[64,32], index: 9, kind: input, shape index: {}]   ;;  %s1368_s10 = inlined_call_operand.vmem [shape: f32[1,32], index: 10, kind: input, shape index: {}]   ;;  %s1369_s11 = inlined_call_operand.vmem [shape: f32[1,32], index: 11, kind: input, shape index: {}]   ;;  %s1370_s12 = inlined_call_operand.vmem [shape: f32[1,32], index: 12, kind: input, shape index: {}]   ;;  %s1371_s13 = inlined_call_operand.vmem [shape: f32[16,32], index: 13, kind: output, shape index: {}]  }
   0x1   :  { %s37_s27 = sshll.u32 %s1365_s7, 4  ;;  %s39_s29 = sshll.u32 %s1037_s28, 4  ;;  %s38_s27 = int_to_ptr.hbm [resolvable:$true] %s37_s27  ;;  %s40_s29 = int_to_ptr.vmem [resolvable:$true] %s39_s29 }
   0x2   :  { %s1039_s14 = smov 8  }
   0x3   :  { %45 = dma.hbm_to_vmem [thread:$0]  %s38_s27, 512, %s40_s29, [#allocation4], %s1038_s30, %s1038_s30, %s1039_s14  }
   0x4   :  { %1035 = dma.done.wait [#allocation4], 512  }
   0x5   :  { %1036 = vsyncadd [#allocation4], 4294966784  ;;  %v65_v0 = vld [vmem:[%s1359_s1 + $0x18] sm:$0xff]  ;;  %v64_v1 = vld [vmem:[%s1359_s1 + $0x10] sm:$0xff]  ;;  %vm70_vm0 = vcmask 261120   ;;  %s1041_s26 = smov 96  }
   0x6   :  { %89 = vmatpush.msra.mxu0 %v65_v0  ;;  %v63_v2 = vld [vmem:[%s1359_s1 + $0x8] sm:$0xff]  ;;  %v62_v3 = vld [vmem:[%s1359_s1] sm:$0xff]  ;;  %s1040_s1 = smov 120   ;;  %s1042_s27 = smov 64   ;;  %vm103_vm1 = vcmask 64512   ;;  %vm237_vm2 = vcmask 130112  }
   0x7   :  { %v1143_v4 = vld [vmem:[%s1358_s0] sm:$0xff]  ;;  %s1043_s28 = smov 80   ;;  %s1045_s29 = smov 88   ;;  %v1182_v29 = vld [vmem:[%s1358_s0 + $0x8] sm:$0xff]  ;;  %vm309_vm3 = vcmask 195712   ;;  %vm381_vm4 = vcmask 261312  }
   0x8   :  { %90 = vmatpush.msra.mxu0 %v64_v1  ;;  %v1150_v5 = vld [vmem:[%s1360_s2] ss:$0 sm:$0xff]  ;;  %s1044_s2 = smov 112   ;;  %s1046_s16 = smov 48   ;;  %vm817_vm9 = vcmask 523264  }
   0x9   :  { %s1047_s17 = smov 72   ;;  %s1048_s0 = smov 56  }
   0xa   :  { %91 = vmatpush.msra.mxu0 %v63_v2  ;;  %s1049_s18 = smov 104   ;;  %s1050_s7 = smov 40  }
   0xb   :  { %s1051_s19 = smov 16   ;;  %s1052_s20 = smov 24  }
   0xc   :  { %92 = vmatpush.msra.mxu0 %v62_v3 }
   0xd   :  { %912 = vmatmul.msk.f32.vlgmr.msra.gmra.mxu0 %vm70_vm0, %v1143_v4 }
  0x15   :  { %913 = vmatmul.msk.f32.gmra.mxu0 %vm70_vm0, %v1182_v29 }
  0x8a   :  { %v94_v6 = vpop.f32.mrf.mxu0 }
  0x8b   :  { %v1153_v7 = vadd.f32 %v1150_v5, %v94_v6 }
  0x8d   :  { %167 = vrot.lane.b32.xlu2 %v1153_v7, %s1040_s1  ;;  %101 = vrot.lane.b32.xlu0 %v1153_v7, %s1041_s26 }
  0x92   :  { %v97_v37 = vpop.f32.mrf.mxu0 }
  0x93   :  { %v1191_v38 = vadd.f32 %v1150_v5, %v97_v37 }
  0x95   :  { %140 = vrot.lane.b32.xlu2 %v1153_v7, %s1042_s27 }
  0x9d   :  { %241 = vrot.lane.b32.xlu2 %v1153_v7, %s1043_s28 }
  0xa5   :  { %239 = vrot.lane.b32.xlu2 %v1153_v7, %s1044_s2 }
  0xe7   :  { %v168_v8 = vpop.permute.xlu2 %167 }
  0xef   :  { %v141_v9 = vpop.permute.xlu2 %140 }
  0xf7   :  { %v242_v11 = vpop.permute.xlu2 %241 }
  0xff   :  { %v102_v10 = vpop.permute.xlu0 %101  ;;  %v240_v23 = vpop.permute.xlu2 %239 }
 0x100   :  { %914 = vmatpush.xpose.msk.msra.mxu1 %vm103_vm1, %v102_v10 }
 0x103   :  { %915 = vmatmul.msk.f32.vlgmr.msra.gmra.mxu1 %vm103_vm1, %v1153_v7 }
 0x104   :  { %161 = vmatpush.msrb.mxu1 %v141_v9 }
 0x106   :  { %920 = vmatpush.xpose.msk.msra.mxu1 %vm103_vm1, %v242_v11 }
 0x180   :  { %v125_v12 = vpop.f32.mrf.mxu1 }
 0x181   :  { %v128_v13 = vmul.f32 0.35355338, %v125_v12 }
 0x183   :  { %v129_v14 = vsel %vm103_vm1, %v128_v13, -inf }
 0x184   :  { %130 = vmax.xlane.f32.xlu0 %v129_v14 }
 0x1f7   :  { %v131_v15 = vpop.xlane.xlu0 %130 }
 0x1f8   :  { %v132_v16 = vsub.f32 %v128_v13, %v131_v15 }
 0x1fa   :  { %v133_v17 = vmul.f32 1.442695, %v132_v16 }
 0x1fc   :  { %969 = vpow2.f32 %v133_v17 }
 0x202   :  { %v970_v18 = vpop.eup %969 }
 0x203   :  { %v135_v19 = vsel %vm103_vm1, %v970_v18, 0.0 }
 0x204   :  { %136 = vadd.xlane.f32.xlu1 %v135_v19 }
 0x21d   :  { %169 = vrot.lane.b32.xlu1 %v1153_v7, %s1045_s29 }
 0x277   :  { %v137_v20 = vpop.xlane.xlu1 %136 }
 0x278   :  { %971 = vrcp.f32 %v137_v20 }
 0x27e   :  { %v972_v21 = vpop.eup %971 }
 0x27f   :  { %v139_v22 = vmul.f32 %v972_v21, %v970_v18 }
 0x281   :  { %916 = vmatmul.msk.f32.vlgmr.msrb.gmra.mxu1 %vm103_vm1, %v139_v22 }
 0x289   :  { %921 = vmatmul.msk.f32.vlgmr.msra.gmra.mxu1 %vm103_vm1, %v240_v23 }
 0x28f   :  { %v170_v24 = vpop.permute.xlu1 %169 }
 0x290   :  { %917 = vmatpush.xpose.msk.msra.mxu3 %vm103_vm1, %v170_v24 }
 0x293   :  { %918 = vmatmul.msk.f32.vlgmr.msra.gmra.mxu3 %vm103_vm1, %v168_v8 }
 0x2fe   :  { %v163_v25 = vpop.f32.mrf.mxu1 }
 0x2ff   :  { %166 = vst.msk [vmem:[#allocation2] sm:$0xff] %vm103_vm1, %v163_v25 }
 0x306   :  { %v264_v26 = vpop.f32.mrf.mxu1 }
 0x307   :  { %v267_v27 = vmul.f32 0.35355338, %v264_v26 }
 0x309   :  { %v268_v28 = vsel %vm103_vm1, %v267_v27, -inf }
 0x30a   :  { %269 = vmax.xlane.f32.xlu1 %v268_v28 }
 0x316   :  { %v192_v30 = vpop.f32.mrf.mxu3 }
 0x317   :  { %v195_v31 = vmul.f32 0.35355338, %v192_v30 }
 0x319   :  { %v196_v32 = vsel %vm103_vm1, %v195_v31, -inf }
 0x31a   :  { %197 = vmax.xlane.f32.xlu2 %v196_v32 }
 0x323   :  { %279 = vrot.lane.b32.xlu1 %v1153_v7, %s1046_s16 }
 0x32b   :  { %449 = vrot.lane.b32.xlu1 %v1191_v38, %s1040_s1 }
 0x332   :  { %313 = vrot.lane.b32.xlu2 %v1153_v7, %s1047_s17 }
 0x333   :  { %520 = vrot.lane.b32.xlu1 %v1191_v38, %s1044_s2 }
 0x33a   :  { %451 = vrot.lane.b32.xlu2 %v1191_v38, %s1045_s29 }
 0x342   :  { %593 = vrot.lane.b32.xlu2 %v1191_v38, %s1047_s17 }
 0x37d   :  { %v270_v33 = vpop.xlane.xlu1 %269 }
 0x37e   :  { %v271_v42 = vsub.f32 %v267_v27, %v270_v33 }
 0x380   :  { %v272_v43 = vmul.f32 1.442695, %v271_v42 }
 0x38d   :  { %v198_v34 = vpop.xlane.xlu2 %197 }
 0x38e   :  { %v199_v35 = vsub.f32 %v195_v31, %v198_v34 }
 0x390   :  { %v200_v36 = vmul.f32 1.442695, %v199_v35 }
 0x392   :  { %973 = vpow2.f32 %v200_v36 }
 0x393   :  { %975 = vpow2.f32 %v272_v43 }
 0x395   :  { %v280_v39 = vpop.permute.xlu1 %279  ;;  %v314_v47 = vpop.permute.xlu2 %313 }
 0x396   :  { %300 = vmatpush.msrb.mxu3 %v280_v39 }
 0x398   :  { %v974_v40 = vpop.eup %973 }
 0x399   :  { %v202_v41 = vsel %vm103_vm1, %v974_v40, 0.0  ;;  %v976_v44 = vpop.eup %975 }
 0x39a   :  { %203 = vadd.xlane.f32.xlu0 %v202_v41  ;;  %v274_v45 = vsel %vm103_vm1, %v976_v44, 0.0 }
 0x39d   :  { %v452_v49 = vpop.permute.xlu2 %451  ;;  %v450_v55 = vpop.permute.xlu1 %449 }
 0x3a5   :  { %v594_v53 = vpop.permute.xlu2 %593  ;;  %v521_v61 = vpop.permute.xlu1 %520 }
 0x3ae   :  { %207 = vrot.lane.b32.xlu0 %v1153_v7, %s1048_s0 }
 0x3b6   :  { %311 = vrot.lane.b32.xlu0 %v1153_v7, %s1049_s18 }
 0x3be   :  { %384 = vrot.lane.b32.xlu0 %v1191_v38, %s1041_s26 }
 0x3c6   :  { %522 = vrot.lane.b32.xlu0 %v1191_v38, %s1043_s28 }
 0x3f0   :  { %275 = vadd.xlane.f32.xlu0 %v274_v45 }
 0x404   :  { %591 = vrot.lane.b32.xlu0 %v1191_v38, %s1049_s18 }
 0x40d   :  { %v204_v46 = vpop.xlane.xlu0 %203 }
 0x40e   :  { %977 = vrcp.f32 %v204_v46 }
 0x414   :  { %v978_v48 = vpop.eup %977 }
 0x415   :  { %v206_v51 = vmul.f32 %v978_v48, %v974_v40 }
 0x420   :  { %v208_v50 = vpop.permute.xlu0 %207 }
 0x421   :  { %228 = vmatpush.msra.mxu2 %v208_v50 }
 0x422   :  { %919 = vmatmul.msk.f32.vlgmr.msra.gmra.mxu2 %vm103_vm1, %v206_v51 }
 0x423   :  { %923 = vmatpush.xpose.msk.msrb.mxu2 %vm103_vm1, %v314_v47 }
 0x427   :  { %929 = vmatpush.xpose.msk.msra.mxu2 %vm103_vm1, %v452_v49 }
 0x428   :  { %v312_v52 = vpop.permute.xlu0 %311 }
 0x42a   :  { %924 = vmatmul.msk.f32.vlgmr.msrb.gmra.mxu2 %vm103_vm1, %v312_v52 }
 0x42b   :  { %935 = vmatpush.xpose.msk.msrb.mxu2 %vm103_vm1, %v594_v53 }
 0x430   :  { %v385_v54 = vpop.permute.xlu0 %384 }
 0x431   :  { %926 = vmatpush.xpose.msk.msra.mxu3 %vm103_vm1, %v385_v54 }
 0x432   :  { %930 = vmatmul.msk.f32.vlgmr.msra.gmra.mxu2 %vm103_vm1, %v450_v55 }
 0x438   :  { %v523_v56 = vpop.permute.xlu0 %522 }
 0x463   :  { %v276_v57 = vpop.xlane.xlu0 %275 }
 0x464   :  { %979 = vrcp.f32 %v276_v57 }
 0x46a   :  { %v980_v58 = vpop.eup %979 }
 0x46b   :  { %v278_v59 = vmul.f32 %v980_v58, %v976_v44 }
 0x46d   :  { %922 = vmatmul.msk.f32.vlgmr.msrb.gmra.mxu3 %vm103_vm1, %v278_v59 }
 0x46e   :  { %932 = vmatpush.xpose.msk.msrb.mxu3 %vm103_vm1, %v523_v56 }
 0x475   :  { %927 = vmatmul.msk.f32.vlgmr.msra.gmra.mxu3 %vm103_vm1, %v1191_v38 }
 0x476   :  { %v592_v60 = vpop.permute.xlu0 %591 }
 0x477   :  { %936 = vmatmul.msk.f32.vlgmr.msrb.gmra.mxu2 %vm103_vm1, %v592_v60 }
 0x47d   :  { %933 = vmatmul.msk.f32.vlgmr.msrb.gmra.mxu3 %vm103_vm1, %v521_v61 }
 0x4a5   :  { %v230_v62 = vpop.f32.mrf.mxu2 }
 0x4ad   :  { %v336_v63 = vpop.f32.mrf.mxu2 }
 0x4ae   :  { %v339_v0 = vmul.f32 0.35355338, %v336_v63 }
 0x4b0   :  { %v340_v1 = vsel %vm103_vm1, %v339_v0, -inf }
 0x4b1   :  { %341 = vmax.xlane.f32.xlu2 %v340_v1 }
 0x4b5   :  { %v474_v2 = vpop.f32.mrf.mxu2 }
 0x4b6   :  { %v477_v3 = vmul.f32 0.35355338, %v474_v2  ;;  %v665_v2 = vld [vmem:[%s1361_s3 + $0x8] sm:$0xff] }
 0x4b8   :  { %v478_v5 = vsel %vm103_vm1, %v477_v3, -inf }
 0x4b9   :  { %479 = vmax.xlane.f32.xlu0 %v478_v5  ;;  %v664_v5 = vld [vmem:[%s1361_s3] sm:$0xff] }
 0x4f0   :  { %v302_v6 = vpop.f32.mrf.mxu3 }
 0x4f8   :  { %v407_v8 = vpop.f32.mrf.mxu3 }
 0x4f9   :  { %v410_v9 = vmul.f32 0.35355338, %v407_v8 }
 0x4fa   :  { %v616_v11 = vpop.f32.mrf.mxu2 }
 0x4fb   :  { %v411_v10 = vsel %vm103_vm1, %v410_v9, -inf  ;;  %v619_v12 = vmul.f32 0.35355338, %v616_v11 }
 0x4fc   :  { %412 = vmax.xlane.f32.xlu1 %v411_v10 }
 0x4fd   :  { %v620_v13 = vsel %vm103_vm1, %v619_v12, -inf }
 0x500   :  { %v545_v31 = vpop.f32.mrf.mxu3 }
 0x501   :  { %v548_v33 = vmul.f32 0.35355338, %v545_v31 }
 0x503   :  { %v549_v34 = vsel %vm103_vm1, %v548_v33, -inf }
 0x504   :  { %621 = vmax.xlane.f32.xlu1 %v620_v13  ;;  %v962_v13 = vld [vmem:[%s1362_s4] ss:$0 sm:$0xff] }
 0x524   :  { %v342_v14 = vpop.xlane.xlu2 %341 }
 0x525   :  { %v343_v15 = vsub.f32 %v339_v0, %v342_v14  ;;  %v666_v0 = vld [vmem:[%s1361_s3 + $0x10] sm:$0xff] }
 0x527   :  { %v344_v16 = vmul.f32 1.442695, %v343_v15 }
 0x529   :  { %981 = vpow2.f32 %v344_v16 }
 0x52c   :  { %v480_v17 = vpop.xlane.xlu0 %479 }
 0x52d   :  { %v481_v18 = vsub.f32 %v477_v3, %v480_v17 }
 0x52f   :  { %v982_v19 = vpop.eup %981  ;;  %v482_v20 = vmul.f32 1.442695, %v481_v18 }
 0x530   :  { %v346_v21 = vsel %vm103_vm1, %v982_v19, 0.0 }
 0x531   :  { %983 = vpow2.f32 %v482_v20  ;;  %347 = vadd.xlane.f32.xlu0 %v346_v21 }
 0x537   :  { %v1228_v22 = vpop.eup %983 }
 0x538   :  { %v484_v23 = vsel %vm103_vm1, %v1228_v22, 0.0 }
 0x539   :  { %485 = vadd.xlane.f32.xlu1 %v484_v23 }
 0x545   :  { %351 = vrot.lane.b32.xlu0 %v1153_v7, %s1050_s7 }
 0x54d   :  { %560 = vrot.lane.b32.xlu0 %v1191_v38, %s1046_s16 }
 0x552   :  { %422 = vrot.lane.b32.xlu1 %v1191_v38, %s1042_s27 }
 0x555   :  { %631 = vrot.lane.b32.xlu0 %v1191_v38, %s1050_s7 }
 0x55a   :  { %234 = vrot.lane.b32.xlu1 %v230_v62, %s1039_s14 }
 0x55d   :  { %306 = vrot.lane.b32.xlu0 %v302_v6, %s1051_s19 }
 0x56f   :  { %v413_v24 = vpop.xlane.xlu1 %412 }
 0x570   :  { %v414_v7 = vsub.f32 %v410_v9, %v413_v24 }
 0x572   :  { %v415_v32 = vmul.f32 1.442695, %v414_v7 }
 0x577   :  { %v622_v25 = vpop.xlane.xlu1 %621 }
 0x578   :  { %v623_v26 = vsub.f32 %v619_v12, %v622_v25 }
 0x57a   :  { %v624_v27 = vmul.f32 1.442695, %v623_v26 }
 0x57c   :  { %985 = vpow2.f32 %v624_v27 }
 0x57d   :  { %987 = vpow2.f32 %v415_v32 }
 0x582   :  { %v1240_v28 = vpop.eup %985 }
 0x583   :  { %v626_v30 = vsel %vm103_vm1, %v1240_v28, 0.0  ;;  %v988_v35 = vpop.eup %987 }
 0x584   :  { %627 = vadd.xlane.f32.xlu2 %v626_v30  ;;  %v417_v36 = vsel %vm103_vm1, %v988_v35, 0.0 }
 0x58c   :  { %550 = vmax.xlane.f32.xlu2 %v549_v34 }
 0x594   :  { %418 = vadd.xlane.f32.xlu2 %v417_v36 }
 0x5a4   :  { %v348_v37 = vpop.xlane.xlu0 %347 }
 0x5a5   :  { %989 = vrcp.f32 %v348_v37  ;;  %v769_v37 = vld [vmem:[#allocation3 + $0x18] sm:$0xff] }
 0x5ab   :  { %v990_v39 = vpop.eup %989 }
 0x5ac   :  { %v350_v40 = vmul.f32 %v990_v39, %v982_v19  ;;  %v486_v42 = vpop.xlane.xlu1 %485  ;;  %v768_v39 = vld [vmem:[#allocation3 + $0x10] sm:$0xff] }
 0x5b7   :  { %v352_v41 = vpop.permute.xlu0 %351 }
 0x5b8   :  { %372 = vmatpush.msrb.mxu1 %v352_v41  ;;  %v766_v41 = vld [vmem:[#allocation3] sm:$0xff] }
 0x5b9   :  { %925 = vmatmul.msk.f32.vlgmr.msrb.gmra.mxu1 %vm103_vm1, %v350_v40  ;;  %v767_v40 = vld [vmem:[#allocation3 + $0x8] sm:$0xff] }
 0x5bf   :  { %v561_v43 = vpop.permute.xlu0 %560 }
 0x5c4   :  { %v423_v44 = vpop.permute.xlu1 %422 }
 0x5c5   :  { %443 = vmatpush.msrb.mxu0 %v423_v44 }
 0x5c7   :  { %581 = vmatpush.msra.mxu0 %v561_v43  ;;  %v632_v45 = vpop.permute.xlu0 %631 }
 0x5cc   :  { %v235_v46 = vpop.permute.xlu1 %234 }
 0x5cd   :  { %238 = vst.msk [vmem:[#allocation2] sm:$0xff] %vm237_vm2, %v235_v46 }
 0x5cf   :  { %v307_v47 = vpop.permute.xlu0 %306 }
 0x5d0   :  { %310 = vst.msk [vmem:[#allocation2] sm:$0xff] %vm309_vm3, %v307_v47 }
 0x5f7   :  { %v628_v48 = vpop.xlane.xlu2 %627 }
 0x5ff   :  { %v551_v49 = vpop.xlane.xlu2 %550 }
 0x600   :  { %v552_v50 = vsub.f32 %v548_v33, %v551_v49 }
 0x602   :  { %v553_v51 = vmul.f32 1.442695, %v552_v50  ;;  %v963_v50 = vld [vmem:[%s1363_s5] ss:$0 sm:$0xff] }
 0x604   :  { %991 = vpow2.f32 %v553_v51 }
 0x607   :  { %v419_v52 = vpop.xlane.xlu2 %418 }
 0x608   :  { %993 = vrcp.f32 %v419_v52 }
 0x609   :  { %995 = vrcp.f32 %v486_v42 }
 0x60a   :  { %v992_v53 = vpop.eup %991 }
 0x60b   :  { %v555_v54 = vsel %vm103_vm1, %v992_v53, 0.0 }
 0x60c   :  { %556 = vadd.xlane.f32.xlu2 %v555_v54 }
 0x60e   :  { %v994_v55 = vpop.eup %993 }
 0x60f   :  { %v421_v56 = vmul.f32 %v994_v55, %v988_v35  ;;  %v996_v59 = vpop.eup %995 }
 0x610   :  { %v488_v61 = vmul.f32 %v996_v59, %v1228_v22  ;;  %v1053_v22 = vmov 32.0   ;;  %v809_v59 = vld [vmem:[%s1367_s9 + $0x20] sm:$0xff] }
 0x611   :  { %928 = vmatmul.msk.f32.vlgmr.msrb.gmra.mxu0 %vm103_vm1, %v421_v56  ;;  %v812_v56 = vld [vmem:[%s1367_s9 + $0x38] sm:$0xff] }
 0x612   :  { %792 = vmatpush.msrb.mxu0 %v769_v37  ;;  %832 = vmatpush.msra.mxu2 %v812_v56 }
 0x614   :  { %793 = vmatpush.msrb.mxu0 %v768_v39 }
 0x616   :  { %794 = vmatpush.msrb.mxu0 %v767_v40 }
 0x618   :  { %795 = vmatpush.msrb.mxu0 %v766_v41 }
 0x624   :  { %489 = vrot.lane.b32.xlu2 %v1191_v38, %s1048_s0  ;;  %v667_v38 = vld [vmem:[%s1361_s3 + $0x18] sm:$0xff] }
 0x625   :  { %690 = vmatpush.msra.mxu3 %v667_v38 }
 0x627   :  { %691 = vmatpush.msra.mxu3 %v666_v0 }
 0x629   :  { %692 = vmatpush.msra.mxu3 %v665_v2  ;;  %v806_v2 = vld [vmem:[%s1367_s9 + $0x8] sm:$0xff] }
 0x62b   :  { %693 = vmatpush.msra.mxu3 %v664_v5  ;;  %v965_v5 = vld [vmem:[%s1366_s8] ss:$0 sm:$0xff] }
 0x636   :  { %v374_v57 = vpop.f32.mrf.mxu1 }
 0x637   :  { %378 = vrot.lane.b32.xlu1 %v374_v57, %s1052_s20  ;;  %v811_v57 = vld [vmem:[%s1367_s9 + $0x30] sm:$0xff] }
 0x638   :  { %833 = vmatpush.msra.mxu2 %v811_v57 }
 0x67f   :  { %v557_v58 = vpop.xlane.xlu2 %556 }
 0x680   :  { %997 = vrcp.f32 %v557_v58  ;;  %v810_v58 = vld [vmem:[%s1367_s9 + $0x28] sm:$0xff] }
 0x681   :  { %999 = vrcp.f32 %v628_v48  ;;  %834 = vmatpush.msra.mxu2 %v810_v58 }
 0x682   :  { %1001 = vrcp.f32 %v1053_v22 }
 0x683   :  { %835 = vmatpush.msra.mxu2 %v809_v59 }
 0x686   :  { %v998_v60 = vpop.eup %997 }
 0x687   :  { %v559_v62 = vmul.f32 %v998_v60, %v992_v53  ;;  %v490_v63 = vpop.permute.xlu2 %489  ;;  %v1000_v1 = vpop.eup %999  ;;  %v964_v53 = vld [vmem:[%s1364_s6] ss:$0 sm:$0xff]  ;;  %v808_v60 = vld [vmem:[%s1367_s9 + $0x18] sm:$0xff] }
 0x688   :  { %510 = vmatpush.msra.mxu1 %v490_v63  ;;  %v630_v6 = vmul.f32 %v1000_v1, %v1240_v28  ;;  %v1002_v23 = vpop.eup %1001  ;;  %836 = vmatpush.msra.mxu2 %v808_v60  ;;  %v807_v1 = vld [vmem:[%s1367_s9 + $0x10] sm:$0xff] }
 0x689   :  { %931 = vmatmul.msk.f32.vlgmr.msra.gmra.mxu1 %vm103_vm1, %v488_v61  ;;  %934 = vmatmul.msk.f32.vlgmr.msra.gmra.mxu0 %vm103_vm1, %v559_v62  ;;  %v712_v24 = vmul.f32 32.0, %v1002_v23  ;;  %vm716_vm5 = vweird.f32 %v1002_v23 }
 0x68a   :  { %652 = vmatpush.msrb.mxu1 %v632_v45  ;;  %837 = vmatpush.msra.mxu2 %v807_v1 }
 0x68c   :  { %838 = vmatpush.msra.mxu2 %v806_v2 }
 0x68e   :  { %v445_v3 = vpop.f32.mrf.mxu0 }
 0x68f   :  { %448 = vst.msk [vmem:[#allocation2 + $0x8] sm:$0xff] %vm103_vm1, %v445_v3  ;;  %v805_v3 = vld [vmem:[%s1367_s9] sm:$0xff] }
 0x690   :  { %839 = vmatpush.msra.mxu2 %v805_v3 }
 0x691   :  { %937 = vmatmul.msk.f32.vlgmr.msrb.gmra.mxu1 %vm103_vm1, %v630_v6 }
 0x6a9   :  { %v379_v8 = vpop.permute.xlu1 %378 }
 0x6aa   :  { %382 = vst.msk [vmem:[#allocation2] sm:$0xff] %vm381_vm4, %v379_v8 }
 0x6b1   :  { %v662_v9 = vld [vmem:[#allocation2] sm:$0xff] }
 0x6b2   :  { %938 = vmatmul.msk.f32.vlgmr.msra.gmra.mxu3 %vm70_vm0, %v662_v9 }
 0x706   :  { %v512_v10 = vpop.f32.mrf.mxu1  ;;  %v583_v11 = vpop.f32.mrf.mxu0 }
 0x707   :  { %516 = vrot.lane.b32.xlu2 %v512_v10, %s1039_s14  ;;  %587 = vrot.lane.b32.xlu0 %v583_v11, %s1051_s19 }
 0x70e   :  { %v654_v12 = vpop.f32.mrf.mxu1 }
 0x70f   :  { %658 = vrot.lane.b32.xlu1 %v654_v12, %s1052_s20 }
 0x735   :  { %v695_v14 = vpop.f32.mrf.mxu3 }
 0x736   :  { %v696_v15 = vadd.f32 %v962_v13, %v695_v14 }
 0x738   :  { %v701_v16 = vadd.f32 %v696_v15, %v1143_v4  ;;  %v713_v4 = vsub.f32 1.0, %v712_v24 }
 0x73a   :  { %v705_v17 = vsel %vm70_vm0, %v701_v16, 0.0  ;;  %v714_v25 = vmul.f32 %v1002_v23, %v713_v4 }
 0x73b   :  { %706 = vadd.xlane.f32.xlu2 %v705_v17 }
 0x73c   :  { %v715_v26 = vadd.f32 %v1002_v23, %v714_v25 }
 0x73e   :  { %v1286_v27 = vsel %vm716_vm5, %v1002_v23, %v715_v26  ;;  %v966_v23 = vld [vmem:[%s1368_s10] ss:$0 sm:$0xff] }
 0x761   :  { %v517_v18 = vpop.permute.xlu2 %516 }
 0x762   :  { %519 = vst.msk [vmem:[#allocation2 + $0x8] sm:$0xff] %vm237_vm2, %v517_v18 }
 0x779   :  { %v588_v19 = vpop.permute.xlu0 %587 }
 0x77a   :  { %590 = vst.msk [vmem:[#allocation2 + $0x8] sm:$0xff] %vm309_vm3, %v588_v19 }
 0x781   :  { %v659_v20 = vpop.permute.xlu1 %658 }
 0x782   :  { %661 = vst.msk [vmem:[#allocation2 + $0x8] sm:$0xff] %vm381_vm4, %v659_v20 }
 0x789   :  { %v663_v21 = vld [vmem:[#allocation2 + $0x8] sm:$0xff] }
 0x78a   :  { %939 = vmatmul.msk.f32.gmra.mxu3 %vm70_vm0, %v663_v21 }
 0x7ae   :  { %v707_v28 = vpop.xlane.xlu2 %706 }
 0x7af   :  { %v718_v7 = vmul.f32 %v1286_v27, %v707_v28 }
 0x7b1   :  { %v720_v30 = vsub.f32 %v701_v16, %v718_v7 }
 0x7b3   :  { %v722_v31 = vmul.f32 %v720_v30, %v720_v30 }
 0x7b5   :  { %v724_v32 = vsel %vm70_vm0, %v722_v31, 0.0 }
 0x7b6   :  { %725 = vadd.xlane.f32.xlu1 %v724_v32 }
 0x80d   :  { %v698_v33 = vpop.f32.mrf.mxu3 }
 0x80e   :  { %v699_v34 = vadd.f32 %v962_v13, %v698_v33 }
 0x810   :  { %v702_v35 = vadd.f32 %v699_v34, %v1182_v29 }
 0x812   :  { %v708_v36 = vsel %vm70_vm0, %v702_v35, 0.0 }
 0x813   :  { %709 = vadd.xlane.f32.xlu0 %v708_v36 }
 0x829   :  { %v726_v42 = vpop.xlane.xlu1 %725 }
 0x82a   :  { %v730_v43 = vmul.f32 %v726_v42, %v1286_v27 }
 0x82c   :  { %v732_v44 = vadd.f32 1e-05, %v730_v43 }
 0x82e   :  { %1003 = vrsqrt.f32 %v732_v44  ;;  %vm740_vm7 = vweird.f32 %v732_v44 }
 0x834   :  { %v1004_v45 = vpop.eup %1003 }
 0x835   :  { %v735_v46 = vmul.f32 %v1004_v45, %v732_v44  ;;  %vm741_vm6 = vweird.f32 %v1004_v45 }
 0x836   :  { %vm742_vm8 = vmor %vm740_vm7, %vm741_vm6 }
 0x837   :  { %v736_v47 = vmul.f32 %v1004_v45, %v735_v46 }
 0x839   :  { %v737_v29 = vmul.f32 0.5, %v736_v47 }
 0x83b   :  { %v738_v48 = vsub.f32 1.5, %v737_v29 }
 0x83d   :  { %v739_v49 = vmul.f32 %v1004_v45, %v738_v48 }
 0x83f   :  { %v743_v51 = vsel %vm742_vm8, %v1004_v45, %v739_v49  ;;  %v967_v49 = vld [vmem:[%s1369_s11] ss:$0 sm:$0xff] }
 0x840   :  { %v754_v52 = vmul.f32 %v743_v51, %v720_v30  ;;  %v968_v51 = vld [vmem:[%s1370_s12] ss:$0 sm:$0xff] }
 0x842   :  { %v759_v54 = vmul.f32 %v963_v50, %v754_v52 }
 0x844   :  { %v764_v55 = vadd.f32 %v964_v53, %v759_v54 }
 0x846   :  { %940 = vmatmul.msk.f32.vlgmr.msrb.gmra.mxu0 %vm70_vm0, %v764_v55 }
 0x886   :  { %v710_v61 = vpop.xlane.xlu0 %709 }
 0x887   :  { %v719_v62 = vmul.f32 %v1286_v27, %v710_v61 }
 0x889   :  { %v721_v63 = vsub.f32 %v702_v35, %v719_v62 }
 0x88b   :  { %v723_v38 = vmul.f32 %v721_v63, %v721_v63 }
 0x88d   :  { %v727_v0 = vsel %vm70_vm0, %v723_v38, 0.0 }
 0x88e   :  { %728 = vadd.xlane.f32.xlu2 %v727_v0 }
 0x8c3   :  { %v797_v6 = vpop.f32.mrf.mxu0 }
 0x8c4   :  { %v798_v8 = vadd.f32 %v965_v5, %v797_v6 }
 0x8c6   :  { %v803_v9 = vmax.f32 %v798_v8, 0.0 }
 0x8c8   :  { %942 = vmatmul.msk.f32.vlgmr.msra.gmra.mxu2 %vm817_vm9, %v803_v9 }
 0x901   :  { %v729_v10 = vpop.xlane.xlu2 %728 }
 0x902   :  { %v731_v11 = vmul.f32 %v729_v10, %v1286_v27 }
 0x904   :  { %v733_v12 = vadd.f32 1e-05, %v731_v11 }
 0x906   :  { %1005 = vrsqrt.f32 %v733_v12  ;;  %vm750_vm11 = vweird.f32 %v733_v12 }
 0x90c   :  { %v1006_v13 = vpop.eup %1005 }
 0x90d   :  { %v745_v14 = vmul.f32 %v1006_v13, %v733_v12  ;;  %vm751_vm10 = vweird.f32 %v1006_v13 }
 0x90e   :  { %vm752_vm12 = vmor %vm750_vm11, %vm751_vm10 }
 0x90f   :  { %v746_v15 = vmul.f32 %v1006_v13, %v745_v14 }
 0x911   :  { %v747_v16 = vmul.f32 0.5, %v746_v15 }
 0x913   :  { %v748_v17 = vsub.f32 1.5, %v747_v16 }
 0x915   :  { %v749_v18 = vmul.f32 %v1006_v13, %v748_v17 }
 0x917   :  { %v753_v19 = vsel %vm752_vm12, %v1006_v13, %v749_v18 }
 0x918   :  { %v755_v20 = vmul.f32 %v753_v19, %v721_v63 }
 0x91a   :  { %v760_v21 = vmul.f32 %v963_v50, %v755_v20 }
 0x91c   :  { %v765_v22 = vadd.f32 %v964_v53, %v760_v21 }
 0x91e   :  { %941 = vmatmul.msk.f32.gmra.mxu0 %vm70_vm0, %v765_v22 }
 0x94b   :  { %v841_v24 = vpop.f32.mrf.mxu2 }
 0x94c   :  { %v842_v4 = vadd.f32 %v966_v23, %v841_v24 }
 0x94e   :  { %v847_v25 = vadd.f32 %v842_v4, %v764_v55 }
 0x950   :  { %v851_v26 = vsel %vm70_vm0, %v847_v25, 0.0 }
 0x951   :  { %852 = vadd.xlane.f32.xlu0 %v851_v26 }
 0x99b   :  { %v800_v28 = vpop.f32.mrf.mxu0 }
 0x99c   :  { %v801_v7 = vadd.f32 %v965_v5, %v800_v28 }
 0x99e   :  { %v804_v30 = vmax.f32 %v801_v7, 0.0 }
 0x9a0   :  { %943 = vmatmul.msk.f32.gmra.mxu2 %vm817_vm9, %v804_v30 }
 0x9c4   :  { %v853_v31 = vpop.xlane.xlu0 %852 }
 0x9c5   :  { %v857_v32 = vmul.f32 %v853_v31, %v1286_v27 }
 0x9c7   :  { %v859_v33 = vsub.f32 %v847_v25, %v857_v32 }
 0x9c9   :  { %v861_v34 = vmul.f32 %v859_v33, %v859_v33 }
 0x9cb   :  { %v863_v35 = vsel %vm70_vm0, %v861_v34, 0.0 }
 0x9cc   :  { %864 = vadd.xlane.f32.xlu2 %v863_v35 }
 0xa23   :  { %v844_v36 = vpop.f32.mrf.mxu2 }
 0xa24   :  { %v845_v37 = vadd.f32 %v966_v23, %v844_v36 }
 0xa26   :  { %v848_v39 = vadd.f32 %v845_v37, %v765_v22 }
 0xa28   :  { %v854_v40 = vsel %vm70_vm0, %v848_v39, 0.0 }
 0xa29   :  { %855 = vadd.xlane.f32.xlu1 %v854_v40 }
 0xa3f   :  { %v865_v41 = vpop.xlane.xlu2 %864 }
 0xa40   :  { %v869_v42 = vmul.f32 %v865_v41, %v1286_v27 }
 0xa42   :  { %v871_v43 = vadd.f32 1e-05, %v869_v42 }
 0xa44   :  { %1007 = vrsqrt.f32 %v871_v43  ;;  %vm879_vm14 = vweird.f32 %v871_v43 }
 0xa4a   :  { %v1008_v44 = vpop.eup %1007 }
 0xa4b   :  { %v874_v45 = vmul.f32 %v1008_v44, %v871_v43  ;;  %vm880_vm13 = vweird.f32 %v1008_v44 }
 0xa4c   :  { %vm881_vm15 = vmor %vm879_vm14, %vm880_vm13 }
 0xa4d   :  { %v875_v46 = vmul.f32 %v1008_v44, %v874_v45 }
 0xa4f   :  { %v876_v47 = vmul.f32 0.5, %v875_v46 }
 0xa51   :  { %v877_v29 = vsub.f32 1.5, %v876_v47 }
 0xa53   :  { %v878_v48 = vmul.f32 %v1008_v44, %v877_v29 }
 0xa55   :  { %v882_v50 = vsel %vm881_vm15, %v1008_v44, %v878_v48 }
 0xa56   :  { %v893_v52 = vmul.f32 %v882_v50, %v859_v33 }
 0xa58   :  { %v898_v53 = vmul.f32 %v967_v49, %v893_v52 }
 0xa5a   :  { %v903_v54 = vadd.f32 %v968_v51, %v898_v53 }
 0xa5c   :  { %905 = vst.msk [vmem:[%s1371_s13] sm:$0xff] %vm70_vm0, %v903_v54 }
 0xa9c   :  { %v856_v55 = vpop.xlane.xlu1 %855 }
 0xa9d   :  { %v858_v56 = vmul.f32 %v856_v55, %v1286_v27 }
 0xa9f   :  { %v860_v57 = vsub.f32 %v848_v39, %v858_v56 }
 0xaa1   :  { %v862_v58 = vmul.f32 %v860_v57, %v860_v57 }
 0xaa3   :  { %v866_v59 = vsel %vm70_vm0, %v862_v58, 0.0 }
 0xaa4   :  { %867 = vadd.xlane.f32.xlu0 %v866_v59 }
 0xb17   :  { %v868_v60 = vpop.xlane.xlu0 %867 }
 0xb18   :  { %v870_v61 = vmul.f32 %v868_v60, %v1286_v27 }
 0xb1a   :  { %v872_v62 = vadd.f32 1e-05, %v870_v61 }
 0xb1c   :  { %1009 = vrsqrt.f32 %v872_v62  ;;  %vm889_vm2 = vweird.f32 %v872_v62 }
 0xb22   :  { %v1010_v63 = vpop.eup %1009 }
 0xb23   :  { %v884_v38 = vmul.f32 %v1010_v63, %v872_v62  ;;  %vm890_vm1 = vweird.f32 %v1010_v63 }
 0xb24   :  { %vm891_vm3 = vmor %vm889_vm2, %vm890_vm1 }
 0xb25   :  { %v885_v0 = vmul.f32 %v1010_v63, %v884_v38 }
 0xb27   :  { %v886_v1 = vmul.f32 0.5, %v885_v0 }
 0xb29   :  { %v887_v2 = vsub.f32 1.5, %v886_v1 }
 0xb2b   :  { %v888_v3 = vmul.f32 %v1010_v63, %v887_v2 }
 0xb2d   :  { %v892_v5 = vsel %vm891_vm3, %v1010_v63, %v888_v3 }
 0xb2e   :  { %v894_v6 = vmul.f32 %v892_v5, %v860_v57 }
 0xb30   :  { %v899_v8 = vmul.f32 %v967_v49, %v894_v6 }
 0xb32   :  { %v904_v9 = vadd.f32 %v968_v51, %v899_v8 }
 0xb34   :  { %906 = vst.msk [vmem:[%s1371_s13 + $0x8] sm:$0xff] %vm70_vm0, %v904_v9 }
 0xb35   :  { %911 = vsyncpa [#allocation4], 1 }

// kernel: forward.21
= control target key start
LH: loop header
LB: loop body
LE: loop exit
PB: predicated region body
PF: predicated region fallthrough
CT: control target
= control target key end

     0   :  { %s186_s0 = inlined_call_operand.vmem [shape: f32[8,32], index: 0, kind: input, shape index: {}]   ;;  %s187_s1 = inlined_call_operand.vmem [shape: f32[1,32], index: 1, kind: input, shape index: {}]   ;;  %s188_s2 = inlined_call_operand.vmem [shape: f32[1,32], index: 2, kind: input, shape index: {}]   ;;  %s189_s3 = inlined_call_operand.hbm [shape: f32[1,32], index: 3, kind: input, shape index: {}]   ;;  %s190_s4 = inlined_call_operand.<no memory space> [shape: f32[1,1], index: 4, kind: input, shape index: {}]   ;;  %s191_s5 = inlined_call_operand.vmem [shape: f32[8,1], index: 5, kind: output, shape index: {}]  }
   0x1   :  { %v10_v0 = vstv %s190_s4 }
   0x2   :  { %11 = vst [vmem:[#allocation2] sm:$0x1] %v10_v0 }
   0x3   :  { %12 = vsyncpa [#allocation4], 0  ;;  %s24_s22 = sshll.u32 %s189_s3, 4  ;;  %s133_s23 = smov [#allocation3]   ;;  %s25_s22 = int_to_ptr.hbm [resolvable:$true] %s24_s22 }
   0x4   :  { %s26_s24 = sshll.u32 %s133_s23, 4  ;;  %s27_s24 = int_to_ptr.vmem [resolvable:$true] %s26_s24 }
   0x5   :  { %29 = dma.hbm_to_vmem [thread:$0]  %s25_s22, 16, %s27_s24, [#allocation4]  }
   0x6   :  { %131 = dma.done.wait [#allocation4], 16  }
   0x7   :  { %132 = vsyncadd [#allocation4], 4294967280  ;;  %vm39_vm0 = vcmask 261120   ;;  %v36_v1 = vld [vmem:[%s186_s0] sm:$0xff]  ;;  %v134_v3 = vmov 32.0   ;;  %vm90_vm5 = vcmask 7168  }
   0x8   :  { %v40_v2 = vsel %vm39_vm0, %v36_v1, 0.0  ;;  %103 = vrcp.f32 %v134_v3  ;;  %v99_v24 = vld [vmem:[%s187_s1] ss:$0 sm:$0xff]  ;;  %v101_v29 = vld [vmem:[#allocation3] ss:$0 sm:$0xff] }
   0x9   :  { %41 = vadd.xlane.f32.xlu0 %v40_v2  ;;  %v100_v27 = vld [vmem:[%s188_s2] ss:$0 sm:$0xff] }
   0xa   :  { %v102_v33 = vld [vmem:[#allocation2] ss:$0 sm:$0xff] }
   0xe   :  { %v104_v4 = vpop.eup %103 }
   0xf   :  { %v44_v5 = vmul.f32 32.0, %v104_v4  ;;  %vm48_vm1 = vweird.f32 %v104_v4 }
  0x11   :  { %v45_v6 = vsub.f32 1.0, %v44_v5 }
  0x13   :  { %v46_v7 = vmul.f32 %v104_v4, %v45_v6 }
  0x15   :  { %v47_v8 = vadd.f32 %v104_v4, %v46_v7 }
  0x17   :  { %v49_v9 = vsel %vm48_vm1, %v104_v4, %v47_v8 }
  0x7c   :  { %v42_v10 = vpop.xlane.xlu0 %41 }
  0x7d   :  { %v50_v11 = vmul.f32 %v49_v9, %v42_v10 }
  0x7f   :  { %v51_v12 = vsub.f32 %v36_v1, %v50_v11 }
  0x81   :  { %v52_v13 = vmul.f32 %v51_v12, %v51_v12 }
  0x83   :  { %v53_v14 = vsel %vm39_vm0, %v52_v13, 0.0 }
  0x84   :  { %54 = vadd.xlane.f32.xlu0 %v53_v14 }
  0xf7   :  { %v55_v15 = vpop.xlane.xlu0 %54 }
  0xf8   :  { %v56_v16 = vmul.f32 %v55_v15, %v49_v9 }
  0xfa   :  { %v57_v17 = vadd.f32 1e-05, %v56_v16 }
  0xfc   :  { %105 = vrsqrt.f32 %v57_v17  ;;  %vm64_vm3 = vweird.f32 %v57_v17 }
 0x102   :  { %v106_v18 = vpop.eup %105 }
 0x103   :  { %v59_v19 = vmul.f32 %v106_v18, %v57_v17  ;;  %vm65_vm2 = vweird.f32 %v106_v18 }
 0x104   :  { %vm66_vm4 = vmor %vm64_vm3, %vm65_vm2 }
 0x105   :  { %v60_v20 = vmul.f32 %v106_v18, %v59_v19 }
 0x107   :  { %v61_v21 = vmul.f32 0.5, %v60_v20 }
 0x109   :  { %v62_v22 = vsub.f32 1.5, %v61_v21 }
 0x10b   :  { %v63_v23 = vmul.f32 %v106_v18, %v62_v22 }
 0x10d   :  { %v67_v25 = vsel %vm66_vm4, %v106_v18, %v63_v23 }
 0x10e   :  { %v68_v26 = vmul.f32 %v67_v25, %v51_v12 }
 0x110   :  { %v72_v28 = vmul.f32 %v99_v24, %v68_v26 }
 0x112   :  { %v76_v30 = vadd.f32 %v100_v27, %v72_v28 }
 0x114   :  { %v81_v31 = vmul.f32 %v101_v29, %v76_v30 }
 0x116   :  { %v82_v32 = vsel %vm39_vm0, %v81_v31, 0.0 }
 0x117   :  { %83 = vadd.xlane.f32.xlu1 %v82_v32 }
 0x18a   :  { %v84_v34 = vpop.xlane.xlu1 %83 }
 0x18b   :  { %v89_v35 = vadd.f32 %v102_v33, %v84_v34 }
 0x18d   :  { %91 = vst.msk [vmem:[%s191_s5] sm:$0xff] %vm90_vm5, %v89_v35 }
 0x18e   :  { %96 = vsyncpa [#allocation4], 1 }

// kernel: forward.15
= control target key start
LH: loop header
LB: loop body
LE: loop exit
PB: predicated region body
PF: predicated region fallthrough
CT: control target
= control target key end

     0   :  { %s2551_s0 = inlined_call_operand.vmem [shape: f32[8,32], index: 0, kind: input, shape index: {}]   ;;  %s2552_s1 = inlined_call_operand.vmem [shape: f32[16,32], index: 1, kind: input, shape index: {}]   ;;  %s2553_s2 = inlined_call_operand.vmem [shape: f32[32,96], index: 2, kind: input, shape index: {}]   ;;  %s2554_s3 = inlined_call_operand.vmem [shape: f32[1,96], index: 3, kind: input, shape index: {}]   ;;  %s2555_s4 = inlined_call_operand.vmem [shape: f32[32,32], index: 4, kind: input, shape index: {}]   ;;  %s2556_s5 = inlined_call_operand.vmem [shape: f32[1,32], index: 5, kind: input, shape index: {}]   ;;  %s2557_s6 = inlined_call_operand.vmem [shape: f32[1,32], index: 6, kind: input, shape index: {}]   ;;  %s2558_s7 = inlined_call_operand.vmem [shape: f32[1,32], index: 7, kind: input, shape index: {}]   ;;  %s2559_s8 = inlined_call_operand.hbm [shape: f32[32,96], index: 8, kind: input, shape index: {}]   ;;  %s2560_s9 = inlined_call_operand.vmem [shape: f32[1,96], index: 9, kind: input, shape index: {}]   ;;  %s2561_s10 = inlined_call_operand.hbm [shape: f32[32,32], index: 10, kind: input, shape index: {}]   ;;  %s2562_s11 = inlined_call_operand.vmem [shape: f32[1,32], index: 11, kind: input, shape index: {}]   ;;  %s2563_s12 = inlined_call_operand.vmem [shape: f32[1,32], index: 12, kind: input, shape index: {}]   ;;  %s2564_s13 = inlined_call_operand.hbm [shape: f32[1,32], index: 13, kind: input, shape index: {}]   ;;  %s2565_s14 = inlined_call_operand.hbm [shape: f32[32,64], index: 14, kind: input, shape index: {}]   ;;  %s2566_s15 = inlined_call_operand.hbm [shape: f32[1,64], index: 15, kind: input, shape index: {}]   ;;  %s2567_s16 = inlined_call_operand.vmem [shape: f32[64,32], index: 16, kind: input, shape index: {}]   ;;  %s2568_s17 = inlined_call_operand.hbm [shape: f32[1,32], index: 17, kind: input, shape index: {}]   ;;  %s2569_s18 = inlined_call_operand.hbm [shape: f32[1,32], index: 18, kind: input, shape index: {}]   ;;  %s2570_s19 = inlined_call_operand.hbm [shape: f32[1,32], index: 19, kind: input, shape index: {}]   ;;  %s2571_s20 = inlined_call_operand.vmem [shape: f32[8,32], index: 20, kind: output, shape index: {}]  }
   0x1   :  { %2575 = sst [smem:[#allocation21_spill]] %s2551_s0 }
   0x2   :  { %2576 = sst [smem:[#allocation22_spill]] %s2552_s1 }
   0x3   :  { %2577 = sst [smem:[#allocation23_spill]] %s2553_s2 }
   0x4   :  { %2578 = sst [smem:[#allocation24_spill]] %s2554_s3 }
   0x5   :  { %2579 = sst [smem:[#allocation25_spill]] %s2555_s4 }
   0x6   :  { %25 = vsyncpa [#allocation4], 0 }
   0x7   :  { %26 = vsyncpa [#allocation6], 0 }
   0x8   :  { %27 = vsyncpa [#allocation9], 0 }
   0x9   :  { %28 = vsyncpa [#allocation12], 0 }
   0xa   :  { %29 = vsyncpa [#allocation15], 0  ;;  %s65_s23 = sshll.u32 %s2561_s10, 4  ;;  %s2056_s24 = smov [#allocation5]   ;;  %s66_s23 = int_to_ptr.hbm [resolvable:$true] %s65_s23 }
   0xb   :  { %s67_s2 = sshll.u32 %s2056_s24, 4  ;;  %s93_s26 = sshll.u32 %s2565_s14, 4  ;;  %s68_s2 = int_to_ptr.vmem [resolvable:$true] %s67_s2  ;;  %s94_s26 = int_to_ptr.hbm [resolvable:$true] %s93_s26 }
   0xc   :  { %s2057_s27 = smov 128   ;;  %s2058_s28 = smov 8  }
   0xd   :  { %73 = dma.hbm_to_vmem [thread:$0]  %s66_s23, 512, %s68_s2, [#allocation6], %s2057_s27, %s2057_s27, %s2058_s28  }
   0xe   :  { %s2059_s4 = smov [#allocation8]   ;;  %s120_s21 = sshll.u32 %s2568_s17, 4  ;;  %s121_s21 = int_to_ptr.hbm [resolvable:$true] %s120_s21 }
   0xf   :  { %s95_s29 = sshll.u32 %s2059_s4, 4  ;;  %s50_s22 = sshll.u32 %s2559_s8, 4  ;;  %s96_s29 = int_to_ptr.vmem [resolvable:$true] %s95_s29  ;;  %s51_s22 = int_to_ptr.hbm [resolvable:$true] %s50_s22 }
  0x10   :  { %101 = dma.hbm_to_vmem [thread:$0]  %s94_s26, 512, %s96_s29, [#allocation9], %s2057_s27, %s2057_s27, %s2058_s28  }
  0x11   :  { %s2060_s14 = smov [#allocation11]   ;;  %s2061_s23 = smov [#allocation3]  }
  0x12   :  { %s122_s24 = sshll.u32 %s2060_s14, 4  ;;  %s52_s2 = sshll.u32 %s2061_s23, 4  ;;  %s123_s24 = int_to_ptr.vmem [resolvable:$true] %s122_s24  ;;  %s53_s2 = int_to_ptr.vmem [resolvable:$true] %s52_s2 }
  0x13   :  { %125 = dma.hbm_to_vmem [thread:$0]  %s121_s21, 16, %s123_s24, [#allocation12]  }
  0x14   :  { %s83_s4 = sshll.u32 %s2564_s13, 4  ;;  %s107_s29 = sshll.u32 %s2566_s15, 4  ;;  %s84_s4 = int_to_ptr.hbm [resolvable:$true] %s83_s4  ;;  %s108_s29 = int_to_ptr.hbm [resolvable:$true] %s107_s29 }
  0x15   :  { %58 = dma.hbm_to_vmem [thread:$0]  %s51_s22, 512, %s53_s2, [#allocation4], %s2057_s27, %s2057_s27, %s2058_s28  }
  0x16   :  { %s2062_s8 = smov [#allocation7]   ;;  %s2063_s0 = smov [#allocation10]  }
  0x17   :  { %s85_s30 = sshll.u32 %s2062_s8, 4  ;;  %s109_s21 = sshll.u32 %s2063_s0, 4  ;;  %s86_s30 = int_to_ptr.vmem [resolvable:$true] %s85_s30  ;;  %s110_s21 = int_to_ptr.vmem [resolvable:$true] %s109_s21 }
  0x18   :  { %88 = dma.hbm_to_vmem [thread:$0]  %s84_s4, 16, %s86_s30, [#allocation6]  }
  0x19   :  { %s131_s14 = sshll.u32 %s2569_s18, 4  ;;  %s142_s22 = sshll.u32 %s2570_s19, 4  ;;  %s132_s14 = int_to_ptr.hbm [resolvable:$true] %s131_s14  ;;  %s143_s22 = int_to_ptr.hbm [resolvable:$true] %s142_s22 }
  0x1a   :  { %112 = dma.hbm_to_vmem [thread:$0]  %s108_s29, 16, %s110_s21, [#allocation9]  }
  0x1b   :  { %s2064_s24 = smov [#allocation13]   ;;  %s2065_s23 = smov [#allocation14]  }
  0x1c   :  { %s133_s15 = sshll.u32 %s2064_s24, 4  ;;  %s144_s2 = sshll.u32 %s2065_s23, 4  ;;  %s134_s15 = int_to_ptr.vmem [resolvable:$true] %s133_s15  ;;  %s145_s2 = int_to_ptr.vmem [resolvable:$true] %s144_s2 }
  0x1d   :  { %136 = dma.hbm_to_vmem [thread:$0]  %s132_s14, 16, %s134_s15, [#allocation12]  }
  0x1e   :  { %147 = dma.hbm_to_vmem [thread:$0]  %s143_s22, 16, %s145_s2, [#allocation15]  }
  0x1f   :  { %2046 = dma.done.wait [#allocation4], 512  }
  0x20   :  { %2047 = vsyncadd [#allocation4], 4294966784 }
  0x21   :  { %2048 = dma.done.wait [#allocation6], 528  }
  0x22   :  { %2049 = vsyncadd [#allocation6], 4294966768 }
  0x23   :  { %2050 = dma.done.wait [#allocation9], 528  }
  0x24   :  { %2051 = vsyncadd [#allocation9], 4294966768 }
  0x25   :  { %2052 = dma.done.wait [#allocation12], 32  }
  0x26   :  { %2053 = vsyncadd [#allocation12], 4294967264 }
  0x27   :  { %2054 = dma.done.wait [#allocation15], 16  }
  0x28   :  { %2055 = vsyncadd [#allocation15], 4294967280  ;;  %s2580_s25 = sld [smem:[#allocation23_spill]]  ;;  %vm191_vm0 = vcmask 261120   ;;  %s2066_s13 = smov 64   ;;  %vm262_vm1 = vcmask 1043456  }
  0x29   :  { %s2581_s21 = sld [smem:[#allocation21_spill]]  ;;  %s2067_s27 = smov 120   ;;  %vm218_vm2 = vcmask 64512   ;;  %vm244_vm3 = vcmask 27648   ;;  %vm258_vm4 = vcmask 31744   ;;  %vm285_vm5 = vcmask 60416  }
  0x2a   :  { %s2582_s14 = sld [smem:[#allocation24_spill]]  ;;  %s2068_s22 = smov 96   ;;  %vm358_vm6 = vcmask 126016   ;;  %vm431_vm7 = vcmask 191616   ;;  %vm504_vm8 = vcmask 257216  }
  0x2b   :  { %s2069_s24 = smov 56   ;;  %s2070_s15 = smov 88  }
  0x2c   :  { %s2071_s23 = smov 72   ;;  %s2072_s2 = smov 112  }
  0x2d   :  { %s2073_s18 = smov 80   ;;  %s2074_s19 = smov 104  }
  0x2e   :  { %v186_v0 = vld [vmem:[%s2580_s25 + $0x18] sm:$0xff]  ;;  %v185_v1 = vld [vmem:[%s2580_s25 + $0x10] sm:$0xff]  ;;  %v184_v2 = vld [vmem:[%s2580_s25 + $0x8] sm:$0xff]  ;;  %s2076_s3 = smov 40   ;;  %s2077_s4 = smov 16  }
  0x2f   :  { %207 = vmatpush.msra.mxu0 %v186_v0  ;;  %v183_v3 = vld [vmem:[%s2580_s25] sm:$0xff]  ;;  %s2075_s25 = smov 48   ;;  %s2078_s17 = smov 24  }
  0x30   :  { %v2227_v4 = vld [vmem:[%s2581_s21] sm:$0xff]  ;;  %s2583_s8 = sld [smem:[#allocation25_spill]] }
  0x31   :  { %208 = vmatpush.msra.mxu0 %v185_v1  ;;  %v1770_v5 = vld [vmem:[%s2582_s14] ss:$0 sm:$0xff] }
  0x33   :  { %209 = vmatpush.msra.mxu0 %v184_v2 }
  0x35   :  { %210 = vmatpush.msra.mxu0 %v183_v3 }
  0x36   :  { %1672 = vmatmul.msk.f32.vlgmr.msra.gmra.mxu0 %vm191_vm0, %v2227_v4 }
  0xb3   :  { %v212_v6 = vpop.f32.mrf.mxu0 }
  0xb4   :  { %v2234_v7 = vadd.f32 %v1770_v5, %v212_v6 }
  0xb6   :  { %256 = vrot.lane.b32.xlu2 %v2234_v7, %s2066_s13  ;;  %287 = vrot.lane.b32.xlu1 %v2234_v7, %s2067_s27  ;;  %v2251_v8 = vrot.slane %v2234_v7, 4 }
  0xb7   :  { %216 = vrot.lane.b32.xlu0 %v2234_v7, %s2068_s22 }
  0xbe   :  { %327 = vrot.lane.b32.xlu2 %v2234_v7, %s2069_s24 }
  0xbf   :  { %289 = vrot.lane.b32.xlu0 %v2234_v7, %s2070_s15 }
  0xc6   :  { %435 = vrot.lane.b32.xlu2 %v2234_v7, %s2071_s23 }
  0xc7   :  { %360 = vrot.lane.b32.xlu0 %v2234_v7, %s2072_s2 }
  0xce   :  { %362 = vrot.lane.b32.xlu2 %v2234_v7, %s2073_s18 }
  0xcf   :  { %647 = vrot.lane.b32.xlu0 %v2251_v8, %s2073_s18 }
 0x110   :  { %v257_v9 = vpop.permute.xlu2 %256 }
 0x111   :  { %1675 = vmatpush.msk.msra.mxu2 %vm262_vm1, %v257_v9 }
 0x118   :  { %v328_v10 = vpop.permute.xlu2 %327 }
 0x119   :  { %1679 = vmatpush.msk.msrb.mxu2 %vm262_vm1, %v328_v10 }
 0x120   :  { %v2259_v11 = vpop.permute.xlu2 %435 }
 0x128   :  { %v363_v12 = vpop.permute.xlu2 %362  ;;  %v288_v15 = vpop.permute.xlu1 %287 }
 0x129   :  { %v217_v13 = vpop.permute.xlu0 %216 }
 0x12a   :  { %1673 = vmatpush.xpose.msk.msra.mxu1 %vm218_vm2, %v217_v13 }
 0x12d   :  { %1674 = vmatmul.msk.f32.vlgmr.msra.gmra.mxu1 %vm218_vm2, %v2234_v7 }
 0x12e   :  { %1681 = vmatpush.xpose.msk.msrb.mxu1 %vm218_vm2, %v363_v12 }
 0x131   :  { %v290_v14 = vpop.permute.xlu0 %289 }
 0x132   :  { %1677 = vmatpush.xpose.msk.msra.mxu3 %vm218_vm2, %v290_v14 }
 0x135   :  { %1678 = vmatmul.msk.f32.vlgmr.msra.gmra.mxu3 %vm218_vm2, %v288_v15 }
 0x139   :  { %v361_v16 = vpop.permute.xlu0 %360 }
 0x13a   :  { %1682 = vmatmul.msk.f32.vlgmr.msrb.gmra.mxu1 %vm218_vm2, %v361_v16 }
 0x141   :  { %v648_v32 = vpop.permute.xlu0 %647 }
 0x1aa   :  { %v240_v17 = vpop.f32.mrf.mxu1 }
 0x1ab   :  { %v243_v18 = vmul.f32 0.35355338, %v240_v17 }
 0x1ad   :  { %v245_v19 = vsel %vm244_vm3, %v243_v18, -inf }
 0x1ae   :  { %246 = vmax.xlane.f32.xlu1 %v245_v19 }
 0x1b7   :  { %v385_v38 = vpop.f32.mrf.mxu1 }
 0x1b8   :  { %v312_v20 = vpop.f32.mrf.mxu3  ;;  %v388_v39 = vmul.f32 0.35355338, %v385_v38 }
 0x1b9   :  { %v315_v21 = vmul.f32 0.35355338, %v312_v20 }
 0x1ba   :  { %v389_v40 = vsel %vm244_vm3, %v388_v39, -inf }
 0x1bb   :  { %v316_v22 = vsel %vm244_vm3, %v315_v21, -inf }
 0x1bc   :  { %317 = vmax.xlane.f32.xlu2 %v316_v22 }
 0x1c7   :  { %433 = vrot.lane.b32.xlu1 %v2234_v7, %s2074_s19 }
 0x1cf   :  { %573 = vrot.lane.b32.xlu1 %v2251_v8, %s2067_s27 }
 0x1d4   :  { %507 = vrot.lane.b32.xlu2 %v2251_v8, %s2068_s22 }
 0x1d7   :  { %645 = vrot.lane.b32.xlu1 %v2251_v8, %s2072_s2 }
 0x221   :  { %v247_v23 = vpop.xlane.xlu1 %246 }
 0x222   :  { %v248_v24 = vsub.f32 %v243_v18, %v247_v23 }
 0x224   :  { %v249_v25 = vmul.f32 1.442695, %v248_v24 }
 0x226   :  { %1782 = vpow2.f32 %v249_v25 }
 0x22c   :  { %v1783_v26 = vpop.eup %1782 }
 0x22d   :  { %v251_v27 = vsel %vm244_vm3, %v1783_v26, 0.0 }
 0x22e   :  { %252 = vadd.xlane.f32.xlu2 %v251_v27 }
 0x22f   :  { %v318_v28 = vpop.xlane.xlu2 %317 }
 0x230   :  { %v319_v29 = vsub.f32 %v315_v21, %v318_v28 }
 0x232   :  { %v320_v30 = vmul.f32 1.442695, %v319_v29 }
 0x234   :  { %1784 = vpow2.f32 %v320_v30 }
 0x237   :  { %v508_v31 = vpop.permute.xlu2 %507 }
 0x238   :  { %1689 = vmatpush.xpose.msk.msra.mxu1 %vm218_vm2, %v508_v31 }
 0x239   :  { %v434_v33 = vpop.permute.xlu1 %433 }
 0x23a   :  { %v1785_v34 = vpop.eup %1784 }
 0x23b   :  { %1690 = vmatmul.msk.f32.vlgmr.msra.gmra.mxu1 %vm218_vm2, %v2251_v8  ;;  %v322_v35 = vsel %vm244_vm3, %v1785_v34, 0.0 }
 0x23c   :  { %1697 = vmatpush.xpose.msk.msrb.mxu1 %vm218_vm2, %v648_v32  ;;  %323 = vadd.xlane.f32.xlu0 %v322_v35 }
 0x241   :  { %v574_v36 = vpop.permute.xlu1 %573 }
 0x246   :  { %575 = vrot.lane.b32.xlu2 %v2251_v8, %s2070_s15 }
 0x249   :  { %v646_v37 = vpop.permute.xlu1 %645 }
 0x24a   :  { %1698 = vmatmul.msk.f32.vlgmr.msrb.gmra.mxu1 %vm218_vm2, %v646_v37 }
 0x24e   :  { %719 = vrot.lane.b32.xlu2 %v2251_v8, %s2071_s23 }
 0x250   :  { %717 = vrot.lane.b32.xlu0 %v2251_v8, %s2074_s19 }
 0x277   :  { %390 = vmax.xlane.f32.xlu2 %v389_v40 }
 0x2a1   :  { %v253_v41 = vpop.xlane.xlu2 %252 }
 0x2a2   :  { %1786 = vrcp.f32 %v253_v41 }
 0x2a8   :  { %v1787_v42 = vpop.eup %1786 }
 0x2a9   :  { %v576_v43 = vpop.permute.xlu2 %575  ;;  %v255_v44 = vmul.f32 %v1787_v42, %v1783_v26 }
 0x2aa   :  { %1693 = vmatpush.xpose.msk.msrb.mxu0 %vm218_vm2, %v576_v43 }
 0x2ab   :  { %1676 = vmatmul.msk.f32.vlgmr.msra.gmra.mxu2 %vm258_vm4, %v255_v44 }
 0x2ac   :  { %1685 = vmatpush.xpose.msk.msra.mxu2 %vm218_vm2, %v2259_v11 }
 0x2ad   :  { %1694 = vmatmul.msk.f32.vlgmr.msrb.gmra.mxu0 %vm218_vm2, %v574_v36 }
 0x2af   :  { %v324_v45 = vpop.xlane.xlu0 %323 }
 0x2b0   :  { %1788 = vrcp.f32 %v324_v45 }
 0x2b1   :  { %v720_v46 = vpop.permute.xlu2 %719 }
 0x2b2   :  { %1701 = vmatpush.xpose.msk.msra.mxu0 %vm218_vm2, %v720_v46 }
 0x2b6   :  { %v1789_v47 = vpop.eup %1788 }
 0x2b7   :  { %v326_v48 = vmul.f32 %v1789_v47, %v1785_v34 }
 0x2b8   :  { %v530_v49 = vpop.f32.mrf.mxu1 }
 0x2b9   :  { %v533_v50 = vmul.f32 0.35355338, %v530_v49  ;;  %1680 = vmatmul.msk.f32.vlgmr.msrb.gmra.mxu2 %vm258_vm4, %v326_v48 }
 0x2bb   :  { %v534_v51 = vsel %vm244_vm3, %v533_v50, -inf }
 0x2bc   :  { %535 = vmax.xlane.f32.xlu0 %v534_v51 }
 0x2c1   :  { %1686 = vmatmul.msk.f32.vlgmr.msra.gmra.mxu2 %vm218_vm2, %v434_v33 }
 0x2c2   :  { %v718_v52 = vpop.permute.xlu0 %717 }
 0x2c3   :  { %1702 = vmatmul.msk.f32.vlgmr.msra.gmra.mxu0 %vm218_vm2, %v718_v52 }
 0x2c7   :  { %v670_v12 = vpop.f32.mrf.mxu1 }
 0x2c8   :  { %v673_v13 = vmul.f32 0.35355338, %v670_v12 }
 0x2ca   :  { %v674_v15 = vsel %vm244_vm3, %v673_v13, -inf }
 0x2ea   :  { %v391_v53 = vpop.xlane.xlu2 %390 }
 0x2eb   :  { %v392_v54 = vsub.f32 %v388_v39, %v391_v53 }
 0x2ed   :  { %v393_v55 = vmul.f32 1.442695, %v392_v54 }
 0x2ef   :  { %1790 = vpow2.f32 %v393_v55 }
 0x2f5   :  { %v1791_v60 = vpop.eup %1790 }
 0x2f6   :  { %v395_v61 = vsel %vm244_vm3, %v1791_v60, 0.0 }
 0x32a   :  { %v598_v56 = vpop.f32.mrf.mxu0 }
 0x32b   :  { %v601_v57 = vmul.f32 0.35355338, %v598_v56 }
 0x32d   :  { %v602_v58 = vsel %vm244_vm3, %v601_v57, -inf }
 0x32e   :  { %v282_v59 = vpop.f32.mrf.mxu2  ;;  %603 = vmax.xlane.f32.xlu2 %v602_v58 }
 0x32f   :  { %286 = vst.msk [vmem:[#allocation2] sm:$0xf] %vm285_vm5, %v282_v59  ;;  %v536_v62 = vpop.xlane.xlu0 %535 }
 0x330   :  { %v537_v63 = vsub.f32 %v533_v50, %v536_v62 }
 0x332   :  { %v538_v1 = vmul.f32 1.442695, %v537_v63 }
 0x334   :  { %1792 = vpow2.f32 %v538_v1 }
 0x336   :  { %396 = vadd.xlane.f32.xlu2 %v395_v61 }
 0x33a   :  { %v2309_v11 = vpop.eup %1792 }
 0x33b   :  { %v540_v14 = vsel %vm244_vm3, %v2309_v11, 0.0 }
 0x33c   :  { %v2305_v0 = vpop.f32.mrf.mxu2 }
 0x340   :  { %v742_v2 = vpop.f32.mrf.mxu0 }
 0x341   :  { %v745_v3 = vmul.f32 0.35355338, %v742_v2  ;;  %v793_v2 = vld [vmem:[%s2583_s8 + $0x18] sm:$0xff] }
 0x342   :  { %813 = vmatpush.msra.mxu1 %v793_v2 }
 0x343   :  { %v746_v5 = vsel %vm244_vm3, %v745_v3, -inf }
 0x344   :  { %v458_v6 = vpop.f32.mrf.mxu2  ;;  %747 = vmax.xlane.f32.xlu0 %v746_v5  ;;  %v791_v5 = vld [vmem:[%s2583_s8 + $0x8] sm:$0xff] }
 0x345   :  { %v461_v9 = vmul.f32 0.35355338, %v458_v6  ;;  %v790_v6 = vld [vmem:[%s2583_s8] sm:$0xff] }
 0x347   :  { %v462_v10 = vsel %vm244_vm3, %v461_v9, -inf }
 0x348   :  { %463 = vmax.xlane.f32.xlu1 %v462_v10 }
 0x34c   :  { %541 = vadd.xlane.f32.xlu0 %v540_v14  ;;  %v1771_v14 = vld [vmem:[%s2556_s5] ss:$0 sm:$0xff] }
 0x34e   :  { %400 = vrot.lane.b32.xlu2 %v2234_v7, %s2075_s25 }
 0x350   :  { %675 = vmax.xlane.f32.xlu1 %v674_v15 }
 0x360   :  { %473 = vrot.lane.b32.xlu0 %v2234_v7, %s2076_s3 }
 0x368   :  { %613 = vrot.lane.b32.xlu0 %v2251_v8, %s2069_s24 }
 0x370   :  { %685 = vrot.lane.b32.xlu0 %v2251_v8, %s2075_s25 }
 0x378   :  { %757 = vrot.lane.b32.xlu0 %v2251_v8, %s2076_s3  ;;  %s2584_s3 = sld [smem:[#allocation22_spill]] }
 0x3a1   :  { %v604_v16 = vpop.xlane.xlu2 %603 }
 0x3a2   :  { %v605_v17 = vsub.f32 %v601_v57, %v604_v16 }
 0x3a4   :  { %v606_v18 = vmul.f32 1.442695, %v605_v17 }
 0x3a6   :  { %1794 = vpow2.f32 %v606_v18 }
 0x3a9   :  { %v397_v19 = vpop.xlane.xlu2 %396 }
 0x3aa   :  { %1796 = vrcp.f32 %v397_v19  ;;  %v2079_v19 = vmov 32.0  }
 0x3ac   :  { %v1795_v20 = vpop.eup %1794 }
 0x3ad   :  { %v608_v21 = vsel %vm244_vm3, %v1795_v20, 0.0 }
 0x3ae   :  { %609 = vadd.xlane.f32.xlu1 %v608_v21  ;;  %v864_v21 = vld [vmem:[#allocation3 + $0x18] sm:$0xff] }
 0x3b0   :  { %v1797_v22 = vpop.eup %1796 }
 0x3b1   :  { %v401_v23 = vpop.permute.xlu2 %400  ;;  %v399_v7 = vmul.f32 %v1797_v22, %v1791_v60 }
 0x3b2   :  { %1683 = vmatpush.msk.msrb.mxu3 %vm262_vm1, %v401_v23 }
 0x3b3   :  { %1684 = vmatmul.msk.f32.vlgmr.msrb.gmra.mxu3 %vm258_vm4, %v399_v7  ;;  %v861_v7 = vld [vmem:[#allocation3] sm:$0xff] }
 0x3b7   :  { %v748_v24 = vpop.xlane.xlu0 %747 }
 0x3b8   :  { %v749_v25 = vsub.f32 %v745_v3, %v748_v24  ;;  %v792_v3 = vld [vmem:[%s2583_s8 + $0x10] sm:$0xff] }
 0x3b9   :  { %814 = vmatpush.msra.mxu1 %v792_v3  ;;  %v862_v24 = vld [vmem:[#allocation3 + $0x8] sm:$0xff] }
 0x3ba   :  { %v750_v26 = vmul.f32 1.442695, %v749_v25 }
 0x3bb   :  { %v464_v27 = vpop.xlane.xlu1 %463  ;;  %815 = vmatpush.msra.mxu1 %v791_v5 }
 0x3bc   :  { %1798 = vpow2.f32 %v750_v26  ;;  %v465_v32 = vsub.f32 %v461_v9, %v464_v27  ;;  %v1765_v26 = vpack.i.bf16 %v861_v7, %v862_v24 }
 0x3bd   :  { %816 = vmatpush.msra.mxu1 %v790_v6 }
 0x3be   :  { %v466_v34 = vmul.f32 1.442695, %v465_v32 }
 0x3bf   :  { %v542_v35 = vpop.xlane.xlu0 %541 }
 0x3c2   :  { %v1799_v28 = vpop.eup %1798 }
 0x3c3   :  { %v676_v29 = vpop.xlane.xlu1 %675  ;;  %v752_v30 = vsel %vm244_vm3, %v1799_v28, 0.0 }
 0x3c4   :  { %v677_v31 = vsub.f32 %v673_v13, %v676_v29  ;;  %753 = vadd.xlane.f32.xlu2 %v752_v30 }
 0x3c6   :  { %v678_v33 = vmul.f32 1.442695, %v677_v31 }
 0x3c8   :  { %1800 = vpow2.f32 %v678_v33 }
 0x3c9   :  { %1802 = vpow2.f32 %v466_v34 }
 0x3ce   :  { %v1801_v36 = vpop.eup %1800 }
 0x3cf   :  { %v680_v37 = vsel %vm244_vm3, %v1801_v36, 0.0  ;;  %v1803_v39 = vpop.eup %1802 }
 0x3d0   :  { %681 = vadd.xlane.f32.xlu1 %v680_v37  ;;  %v468_v40 = vsel %vm244_vm3, %v1803_v39, 0.0 }
 0x3d2   :  { %v474_v38 = vpop.permute.xlu0 %473 }
 0x3d3   :  { %1687 = vmatpush.msk.msrb.mxu2 %vm262_vm1, %v474_v38 }
 0x3d8   :  { %469 = vadd.xlane.f32.xlu1 %v468_v40 }
 0x3da   :  { %v614_v41 = vpop.permute.xlu0 %613 }
 0x3db   :  { %1695 = vmatpush.msk.msra.mxu2 %vm262_vm1, %v614_v41  ;;  %v181_v41 = vld [vmem:[%s2584_s3] sm:$0xff] }
 0x3e2   :  { %v686_v45 = vpop.permute.xlu0 %685 }
 0x3ea   :  { %v758_v49 = vpop.permute.xlu0 %757 }
 0x3f1   :  { %545 = vrot.lane.b32.xlu1 %v2251_v8, %s2066_s13 }
 0x3f9   :  { %355 = vrot.lane.b32.xlu1 %v2305_v0, %s2058_s28 }
 0x421   :  { %v610_v43 = vpop.xlane.xlu1 %609 }
 0x436   :  { %v424_v42 = vpop.f32.mrf.mxu3 }
 0x437   :  { %428 = vrot.lane.b32.xlu1 %v424_v42, %s2077_s4  ;;  %v754_v8 = vpop.xlane.xlu2 %753  ;;  %v182_v42 = vld [vmem:[%s2584_s3 + $0x8] sm:$0xff] }
 0x443   :  { %v682_v44 = vpop.xlane.xlu1 %681 }
 0x44b   :  { %v470_v46 = vpop.xlane.xlu1 %469 }
 0x44c   :  { %1804 = vrcp.f32 %v470_v46 }
 0x44d   :  { %1806 = vrcp.f32 %v610_v43  ;;  %v1774_v43 = vld [vmem:[%s2560_s9] ss:$0 sm:$0xff] }
 0x44e   :  { %1808 = vrcp.f32 %v542_v35 }
 0x44f   :  { %1810 = vrcp.f32 %v754_v8 }
 0x450   :  { %1812 = vrcp.f32 %v682_v44 }
 0x451   :  { %1814 = vrcp.f32 %v2079_v19 }
 0x452   :  { %v1805_v47 = vpop.eup %1804 }
 0x453   :  { %v472_v48 = vmul.f32 %v1805_v47, %v1803_v39  ;;  %v1807_v50 = vpop.eup %1806 }
 0x454   :  { %v612_v51 = vmul.f32 %v1807_v50, %v1795_v20  ;;  %v1809_v52 = vpop.eup %1808  ;;  %v863_v20 = vld [vmem:[#allocation3 + $0x10] sm:$0xff] }
 0x455   :  { %1688 = vmatmul.msk.f32.vlgmr.msrb.gmra.mxu2 %vm258_vm4, %v472_v48  ;;  %v1811_v53 = vpop.eup %1810  ;;  %v544_v54 = vmul.f32 %v1809_v52, %v2309_v11  ;;  %v1760_v22 = vpack.i.bf16 %v863_v20, %v864_v21  ;;  %v1772_v52 = vld [vmem:[%s2557_s6] ss:$0 sm:$0xff] }
 0x456   :  { %1703 = vmatpush.msk.msrb.mxu2 %vm262_vm1, %v758_v49  ;;  %v756_v55 = vmul.f32 %v1811_v53, %v1799_v28  ;;  %v1813_v57 = vpop.eup %1812 }
 0x457   :  { %v684_v58 = vmul.f32 %v1813_v57, %v1801_v36  ;;  %v1815_v23 = vpop.eup %1814 }
 0x458   :  { %v828_v25 = vmul.f32 32.0, %v1815_v23  ;;  %vm832_vm9 = vweird.f32 %v1815_v23 }
 0x45d   :  { %1696 = vmatmul.msk.f32.vlgmr.msra.gmra.mxu2 %vm258_vm4, %v612_v51 }
 0x463   :  { %v546_v56 = vpop.permute.xlu1 %545 }
 0x464   :  { %1691 = vmatpush.msk.msra.mxu3 %vm262_vm1, %v546_v56 }
 0x465   :  { %1692 = vmatmul.msk.f32.vlgmr.msra.gmra.mxu3 %vm258_vm4, %v544_v54  ;;  %1704 = vmatmul.msk.f32.vlgmr.msrb.gmra.mxu2 %vm258_vm4, %v756_v55  ;;  %v1773_v55 = vld [vmem:[%s2558_s7] ss:$0 sm:$0xff] }
 0x466   :  { %1699 = vmatpush.msk.msrb.mxu3 %vm262_vm1, %v686_v45  ;;  %vm1605_vm1 = vcmask 523264  }
 0x468   :  { %884 = vmatpush.msra.mxu3 %v864_v21 }
 0x46a   :  { %885 = vmatpush.msra.mxu3 %v863_v20 }
 0x46b   :  { %v356_v59 = vpop.permute.xlu1 %355 }
 0x46c   :  { %359 = vst.msk [vmem:[#allocation2] sm:$0xf] %vm358_vm6, %v356_v59  ;;  %886 = vmatpush.msra.mxu3 %v862_v24 }
 0x46d   :  { %1700 = vmatmul.msk.f32.vlgmr.msrb.gmra.mxu3 %vm258_vm4, %v684_v58 }
 0x46e   :  { %887 = vmatpush.msra.mxu3 %v861_v7 }
 0x4a9   :  { %v429_v60 = vpop.permute.xlu1 %428 }
 0x4aa   :  { %432 = vst.msk [vmem:[#allocation2] sm:$0xf] %vm431_vm7, %v429_v60 }
 0x4d8   :  { %v497_v61 = vpop.f32.mrf.mxu2 }
 0x4d9   :  { %501 = vrot.lane.b32.xlu1 %v497_v61, %s2078_s17 }
 0x4e0   :  { %v637_v62 = vpop.f32.mrf.mxu2 }
 0x4e1   :  { %641 = vrot.lane.b32.xlu0 %v637_v62, %s2058_s28 }
 0x4e8   :  { %v569_v63 = vpop.f32.mrf.mxu3  ;;  %v781_v0 = vpop.f32.mrf.mxu2 }
 0x4e9   :  { %572 = vst.msk [vmem:[#allocation2 + $0x4] sm:$0xf] %vm285_vm5, %v569_v63  ;;  %785 = vrot.lane.b32.xlu2 %v781_v0, %s2078_s17 }
 0x4f0   :  { %v709_v1 = vpop.f32.mrf.mxu3 }
 0x4f1   :  { %713 = vrot.lane.b32.xlu0 %v709_v1, %s2077_s4  ;;  %1761 = vrot.lane.b32.xlu2 %v1760_v22, %s2068_s22 }
 0x4f9   :  { %1766 = vrot.lane.b32.xlu2 %v1765_v26, %s2068_s22 }
 0x501   :  { %908 = vrot.lane.b32.xlu2 %v1774_v43, %s2068_s22 }
 0x543   :  { %v786_v12 = vpop.permute.xlu2 %785 }
 0x54b   :  { %v502_v9 = vpop.permute.xlu1 %501  ;;  %v1762_v35 = vpop.permute.xlu2 %1761 }
 0x54c   :  { %505 = vst.msk [vmem:[#allocation2] sm:$0xf] %vm504_vm8, %v502_v9  ;;  %v1764_v36 = vunpack.i.h.bf16 %v1762_v35  ;;  %v1763_v37 = vunpack.i.l.bf16 %v1762_v35 }
 0x54e   :  { %929 = vmatpush.msrb.mxu0 %v1763_v37 }
 0x550   :  { %930 = vmatpush.msrb.mxu0 %v1764_v36 }
 0x553   :  { %v642_v10 = vpop.permute.xlu0 %641  ;;  %v1767_v38 = vpop.permute.xlu2 %1766 }
 0x554   :  { %644 = vst.msk [vmem:[#allocation2 + $0x4] sm:$0xf] %vm358_vm6, %v642_v10  ;;  %v1768_v39 = vunpack.i.l.bf16 %v1767_v38  ;;  %v1769_v40 = vunpack.i.h.bf16 %v1767_v38 }
 0x556   :  { %931 = vmatpush.msrb.mxu0 %v1768_v39 }
 0x558   :  { %932 = vmatpush.msrb.mxu0 %v1769_v40 }
 0x559   :  { %1707 = vmatmul.msk.f32.vlgmr.msrb.gmra.mxu0 %vm191_vm0, %v181_v41 }
 0x55b   :  { %v909_v58 = vpop.permute.xlu2 %908 }
 0x561   :  { %1708 = vmatmul.msk.f32.gmra.mxu0 %vm191_vm0, %v182_v42 }
 0x563   :  { %v714_v11 = vpop.permute.xlu0 %713 }
 0x564   :  { %716 = vst.msk [vmem:[#allocation2 + $0x4] sm:$0xf] %vm431_vm7, %v714_v11 }
 0x565   :  { %788 = vst.msk [vmem:[#allocation2 + $0x4] sm:$0xf] %vm504_vm8, %v786_v12 }
 0x56c   :  { %v789_v13 = vld [vmem:[#allocation2] sm:$0xff] }
 0x56d   :  { %1705 = vmatmul.msk.f32.vlgmr.msra.gmra.mxu1 %vm191_vm0, %v789_v13 }
 0x5d6   :  { %v934_v59 = vpop.f32.mrf.mxu0 }
 0x5d7   :  { %v2400_v60 = vadd.f32 %v934_v59, %v909_v58 }
 0x5d9   :  { %1007 = vrot.lane.b32.xlu2 %v2400_v60, %s2067_s27  ;;  %1709 = vmatpush.xpose.msk.msra.mxu2 %vm218_vm2, %v2400_v60 }
 0x5de   :  { %v937_v61 = vpop.f32.mrf.mxu0 }
 0x5df   :  { %v2412_v62 = vadd.f32 %v937_v61, %v909_v58 }
 0x5e1   :  { %1078 = vrot.lane.b32.xlu2 %v2400_v60, %s2072_s2 }
 0x5e9   :  { %1149 = vrot.lane.b32.xlu2 %v2400_v60, %s2074_s19 }
 0x5ea   :  { %v818_v15 = vpop.f32.mrf.mxu1 }
 0x5eb   :  { %v819_v16 = vadd.f32 %v1771_v14, %v818_v15 }
 0x5ed   :  { %v821_v17 = vadd.f32 %v819_v16, %v2227_v4  ;;  %v829_v4 = vsub.f32 1.0, %v828_v25 }
 0x5ef   :  { %v824_v18 = vsel %vm191_vm0, %v821_v17, 0.0  ;;  %v830_v27 = vmul.f32 %v1815_v23, %v829_v4 }
 0x5f0   :  { %825 = vadd.xlane.f32.xlu0 %v824_v18 }
 0x5f1   :  { %v831_v28 = vadd.f32 %v1815_v23, %v830_v27 }
 0x5f3   :  { %v2373_v29 = vsel %vm832_vm9, %v1815_v23, %v831_v28 }
 0x633   :  { %v1008_v2 = vpop.permute.xlu2 %1007 }
 0x634   :  { %1712 = vmatpush.xpose.msk.msrb.mxu3 %vm218_vm2, %v1008_v2 }
 0x63b   :  { %v1079_v3 = vpop.permute.xlu2 %1078 }
 0x643   :  { %v1150_v5 = vpop.permute.xlu2 %1149 }
 0x644   :  { %1718 = vmatpush.xpose.msk.msra.mxu0 %vm218_vm2, %v1150_v5 }
 0x663   :  { %v826_v30 = vpop.xlane.xlu0 %825 }
 0x664   :  { %v834_v31 = vmul.f32 %v2373_v29, %v826_v30 }
 0x666   :  { %v835_v32 = vsub.f32 %v821_v17, %v834_v31 }
 0x668   :  { %v836_v33 = vmul.f32 %v835_v32, %v835_v32 }
 0x66a   :  { %v837_v34 = vsel %vm191_vm0, %v836_v33, 0.0 }
 0x66b   :  { %838 = vadd.xlane.f32.xlu1 %v837_v34 }
 0x684   :  { %978 = vrot.lane.b32.xlu1 %v2400_v60, %s2068_s22 }
 0x68c   :  { %1285 = vrot.lane.b32.xlu1 %v2412_v62, %s2067_s27 }
 0x6de   :  { %v839_v44 = vpop.xlane.xlu1 %838 }
 0x6df   :  { %v840_v45 = vmul.f32 %v839_v44, %v2373_v29 }
 0x6e1   :  { %v841_v46 = vadd.f32 1e-05, %v840_v45 }
 0x6e3   :  { %1816 = vrsqrt.f32 %v841_v46  ;;  %vm848_vm11 = vweird.f32 %v841_v46 }
 0x6e9   :  { %v1817_v47 = vpop.eup %1816 }
 0x6ea   :  { %v843_v48 = vmul.f32 %v1817_v47, %v841_v46  ;;  %vm849_vm10 = vweird.f32 %v1817_v47 }
 0x6eb   :  { %vm850_vm12 = vmor %vm848_vm11, %vm849_vm10 }
 0x6ec   :  { %v844_v49 = vmul.f32 %v1817_v47, %v843_v48 }
 0x6ee   :  { %v845_v8 = vmul.f32 0.5, %v844_v49 }
 0x6f0   :  { %v846_v50 = vsub.f32 1.5, %v845_v8 }
 0x6f2   :  { %v847_v51 = vmul.f32 %v1817_v47, %v846_v50 }
 0x6f4   :  { %v851_v53 = vsel %vm850_vm12, %v1817_v47, %v847_v51 }
 0x6f5   :  { %v852_v54 = vmul.f32 %v851_v53, %v835_v32 }
 0x6f6   :  { %v979_v6 = vpop.permute.xlu1 %978 }
 0x6f7   :  { %v856_v56 = vmul.f32 %v1772_v52, %v852_v54  ;;  %999 = vmatpush.msrb.mxu1 %v979_v6 }
 0x6f9   :  { %v2396_v57 = vadd.f32 %v1773_v55, %v856_v56  ;;  %1715 = vmatpush.xpose.msk.msra.mxu1 %vm218_vm2, %v1079_v3 }
 0x6fb   :  { %1706 = vmatmul.msk.f32.vlgmr.msra.gmra.mxu3 %vm191_vm0, %v2396_v57 }
 0x6fe   :  { %v1286_v9 = vpop.permute.xlu1 %1285 }
 0x6ff   :  { %1724 = vmatpush.xpose.msk.msrb.mxu0 %vm218_vm2, %v1286_v9 }
 0x77e   :  { %v889_v63 = vpop.f32.mrf.mxu3 }
 0x77f   :  { %v890_v0 = vadd.f32 %v1774_v43, %v889_v63 }
 0x781   :  { %1147 = vrot.lane.b32.xlu2 %v890_v0, %s2074_s19  ;;  %1710 = vmatmul.msk.f32.vlgmr.msra.gmra.mxu2 %vm218_vm2, %v890_v0  ;;  %v1218_v1 = vrot.slane %v890_v0, 4 }
 0x789   :  { %1356 = vrot.lane.b32.xlu2 %v2412_v62, %s2072_s2 }
 0x791   :  { %1425 = vrot.lane.b32.xlu2 %v1218_v1, %s2074_s19 }
 0x7db   :  { %v1148_v10 = vpop.permute.xlu2 %1147 }
 0x7dc   :  { %1719 = vmatmul.msk.f32.vlgmr.msra.gmra.mxu0 %vm218_vm2, %v1148_v10 }
 0x7e3   :  { %v1357_v4 = vpop.permute.xlu2 %1356 }
 0x7eb   :  { %v1426_v32 = vpop.permute.xlu2 %1425 }
 0x804   :  { %v963_v11 = vpop.f32.mrf.mxu2 }
 0x805   :  { %v966_v12 = vmul.f32 0.35355338, %v963_v11 }
 0x807   :  { %v967_v13 = vsel %vm285_vm5, %v966_v12, -inf }
 0x808   :  { %968 = vmax.xlane.f32.xlu0 %v967_v13 }
 0x81c   :  { %1005 = vrot.lane.b32.xlu0 %v890_v0, %s2067_s27 }
 0x824   :  { %1076 = vrot.lane.b32.xlu0 %v890_v0, %s2072_s2 }
 0x82c   :  { %1283 = vrot.lane.b32.xlu0 %v1218_v1, %s2067_s27 }
 0x834   :  { %1354 = vrot.lane.b32.xlu0 %v1218_v1, %s2072_s2 }
 0x859   :  { %v1172_v14 = vpop.f32.mrf.mxu0 }
 0x85a   :  { %v1175_v15 = vmul.f32 0.35355338, %v1172_v14 }
 0x85c   :  { %v1176_v16 = vsel %vm285_vm5, %v1175_v15, -inf }
 0x85d   :  { %1177 = vmax.xlane.f32.xlu2 %v1176_v16 }
 0x87b   :  { %v969_v17 = vpop.xlane.xlu0 %968 }
 0x87c   :  { %v970_v18 = vsub.f32 %v966_v12, %v969_v17 }
 0x87e   :  { %v971_v19 = vmul.f32 1.442695, %v970_v18 }
 0x880   :  { %1818 = vpow2.f32 %v971_v19 }
 0x886   :  { %v1819_v20 = vpop.eup %1818 }
 0x887   :  { %v973_v21 = vsel %vm285_vm5, %v1819_v20, 0.0 }
 0x888   :  { %974 = vadd.xlane.f32.xlu1 %v973_v21 }
 0x88e   :  { %v1006_v22 = vpop.permute.xlu0 %1005 }
 0x88f   :  { %1713 = vmatmul.msk.f32.vlgmr.msrb.gmra.mxu3 %vm218_vm2, %v1006_v22 }
 0x896   :  { %v1077_v23 = vpop.permute.xlu0 %1076 }
 0x89e   :  { %v1284_v7 = vpop.permute.xlu0 %1283 }
 0x89f   :  { %1725 = vmatmul.msk.f32.vlgmr.msrb.gmra.mxu0 %vm218_vm2, %v1284_v7 }
 0x8a1   :  { %1427 = vrot.lane.b32.xlu1 %v2412_v62, %s2074_s19 }
 0x8a6   :  { %v1355_v33 = vpop.permute.xlu0 %1354 }
 0x8d0   :  { %v1178_v41 = vpop.xlane.xlu2 %1177 }
 0x8d1   :  { %v1179_v45 = vsub.f32 %v1175_v15, %v1178_v41 }
 0x8d3   :  { %v1180_v46 = vmul.f32 1.442695, %v1179_v45 }
 0x8fb   :  { %v975_v24 = vpop.xlane.xlu1 %974 }
 0x8fc   :  { %1820 = vrcp.f32 %v975_v24 }
 0x902   :  { %v1821_v25 = vpop.eup %1820 }
 0x903   :  { %v977_v26 = vmul.f32 %v1821_v25, %v1819_v20 }
 0x905   :  { %1711 = vmatmul.msk.f32.vlgmr.msrb.gmra.mxu1 %vm218_vm2, %v977_v26 }
 0x906   :  { %1721 = vmatpush.xpose.msk.msrb.mxu1 %vm218_vm2, %v2412_v62 }
 0x90d   :  { %1716 = vmatmul.msk.f32.vlgmr.msra.gmra.mxu1 %vm218_vm2, %v1077_v23 }
 0x90e   :  { %1727 = vmatpush.xpose.msk.msra.mxu1 %vm218_vm2, %v1357_v4 }
 0x912   :  { %v1030_v27 = vpop.f32.mrf.mxu3 }
 0x913   :  { %v1033_v28 = vmul.f32 0.35355338, %v1030_v27  ;;  %v1428_v30 = vpop.permute.xlu1 %1427 }
 0x914   :  { %1730 = vmatpush.xpose.msk.msra.mxu0 %vm218_vm2, %v1428_v30 }
 0x915   :  { %1722 = vmatmul.msk.f32.vlgmr.msrb.gmra.mxu1 %vm218_vm2, %v1218_v1  ;;  %v1034_v31 = vsel %vm285_vm5, %v1033_v28, -inf }
 0x916   :  { %1035 = vmax.xlane.f32.xlu1 %v1034_v31 }
 0x917   :  { %1731 = vmatmul.msk.f32.vlgmr.msra.gmra.mxu0 %vm218_vm2, %v1426_v32 }
 0x91c   :  { %v1308_v34 = vpop.f32.mrf.mxu0 }
 0x91d   :  { %v1311_v35 = vmul.f32 0.35355338, %v1308_v34  ;;  %1728 = vmatmul.msk.f32.vlgmr.msra.gmra.mxu1 %vm218_vm2, %v1355_v33 }
 0x91f   :  { %v1312_v36 = vsel %vm285_vm5, %v1311_v35, -inf }
 0x920   :  { %1313 = vmax.xlane.f32.xlu2 %v1312_v36 }
 0x982   :  { %v1001_v37 = vpop.f32.mrf.mxu1 }
 0x983   :  { %1004 = vst.msk [vmem:[#allocation2] sm:$0xf] %vm285_vm5, %v1001_v37 }
 0x989   :  { %v1036_v38 = vpop.xlane.xlu1 %1035 }
 0x98a   :  { %v1037_v39 = vsub.f32 %v1033_v28, %v1036_v38  ;;  %v1101_v40 = vpop.f32.mrf.mxu1 }
 0x98b   :  { %v1104_v42 = vmul.f32 0.35355338, %v1101_v40 }
 0x98c   :  { %v1038_v43 = vmul.f32 1.442695, %v1037_v39 }
 0x98d   :  { %v1105_v44 = vsel %vm285_vm5, %v1104_v42, -inf }
 0x98e   :  { %1822 = vpow2.f32 %v1038_v43  ;;  %1106 = vmax.xlane.f32.xlu0 %v1105_v44 }
 0x98f   :  { %1824 = vpow2.f32 %v1180_v46 }
 0x992   :  { %v1241_v52 = vpop.f32.mrf.mxu1 }
 0x993   :  { %v1314_v47 = vpop.xlane.xlu2 %1313  ;;  %v1244_v63 = vmul.f32 0.35355338, %v1241_v52 }
 0x994   :  { %v1823_v48 = vpop.eup %1822  ;;  %v1315_v49 = vsub.f32 %v1311_v35, %v1314_v47  ;;  %v1450_v8 = vpop.f32.mrf.mxu0 }
 0x995   :  { %v2450_v50 = vmul.f32 0.35355338, %v1450_v8  ;;  %v1040_v51 = vsel %vm285_vm5, %v1823_v48, 0.0  ;;  %v2455_v55 = vpop.eup %1824  ;;  %v1245_v1 = vsel %vm285_vm5, %v1244_v63, -inf }
 0x996   :  { %v1316_v53 = vmul.f32 1.442695, %v1315_v49  ;;  %1041 = vadd.xlane.f32.xlu2 %v1040_v51  ;;  %v1182_v58 = vsel %vm285_vm5, %v2455_v55, 0.0 }
 0x997   :  { %v1454_v54 = vsel %vm285_vm5, %v2450_v50, -inf }
 0x998   :  { %1826 = vpow2.f32 %v1316_v53  ;;  %1455 = vmax.xlane.f32.xlu1 %v1454_v54 }
 0x99a   :  { %v1379_v61 = vpop.f32.mrf.mxu1 }
 0x99b   :  { %v1382_v0 = vmul.f32 0.35355338, %v1379_v61 }
 0x99d   :  { %v1383_v2 = vsel %vm285_vm5, %v1382_v0, -inf }
 0x99e   :  { %v2457_v56 = vpop.eup %1826 }
 0x99f   :  { %v1318_v59 = vsel %vm285_vm5, %v2457_v56, 0.0 }
 0x9a0   :  { %1183 = vadd.xlane.f32.xlu1 %v1182_v58  ;;  %1319 = vadd.xlane.f32.xlu0 %v1318_v59 }
 0x9a8   :  { %1246 = vmax.xlane.f32.xlu1 %v1245_v1  ;;  %1384 = vmax.xlane.f32.xlu0 %v1383_v2  ;;  %v1500_v1 = vld [vmem:[#allocation5 + $0x18] sm:$0xff]  ;;  %v1499_v2 = vld [vmem:[#allocation5 + $0x10] sm:$0xff] }
 0x9a9   :  { %1520 = vmatpush.msrb.mxu1 %v1500_v1 }
 0x9ab   :  { %1521 = vmatpush.msrb.mxu1 %v1499_v2 }
 0x9ae   :  { %1045 = vrot.lane.b32.xlu2 %v2400_v60, %s2070_s15 }
 0x9c1   :  { %1116 = vrot.lane.b32.xlu1 %v2400_v60, %s2073_s18 }
 0x9c9   :  { %1256 = vrot.lane.b32.xlu1 %v2412_v62, %s2068_s22 }
 0x9d1   :  { %1323 = vrot.lane.b32.xlu1 %v2412_v62, %s2070_s15 }
 0x9d9   :  { %1394 = vrot.lane.b32.xlu1 %v2412_v62, %s2073_s18 }
 0x9e1   :  { %1465 = vrot.lane.b32.xlu1 %v2412_v62, %s2071_s23 }
 0xa01   :  { %v1107_v3 = vpop.xlane.xlu0 %1106 }
 0xa02   :  { %v1108_v5 = vsub.f32 %v1104_v42, %v1107_v3  ;;  %v1498_v3 = vld [vmem:[#allocation5 + $0x8] sm:$0xff] }
 0xa03   :  { %1522 = vmatpush.msrb.mxu1 %v1498_v3 }
 0xa04   :  { %v1109_v6 = vmul.f32 1.442695, %v1108_v5  ;;  %v1497_v5 = vld [vmem:[#allocation5] sm:$0xff] }
 0xa05   :  { %1523 = vmatpush.msrb.mxu1 %v1497_v5  ;;  %v1780_v5 = vld [vmem:[#allocation13] ss:$0 sm:$0xff] }
 0xa06   :  { %1828 = vpow2.f32 %v1109_v6 }
 0xa09   :  { %v1042_v9 = vpop.xlane.xlu2 %1041 }
 0xa0a   :  { %1830 = vrcp.f32 %v1042_v9 }
 0xa0b   :  { %v1456_v10 = vpop.xlane.xlu1 %1455 }
 0xa0c   :  { %v1829_v11 = vpop.eup %1828  ;;  %v1457_v27 = vsub.f32 %v2450_v50, %v1456_v10  ;;  %v1775_v10 = vld [vmem:[%s2562_s11] ss:$0 sm:$0xff] }
 0xa0d   :  { %v1111_v12 = vsel %vm285_vm5, %v1829_v11, 0.0 }
 0xa0e   :  { %1112 = vadd.xlane.f32.xlu0 %v1111_v12  ;;  %v1458_v28 = vmul.f32 1.442695, %v1457_v27  ;;  %v1596_v27 = vld [vmem:[%s2567_s16 + $0x18] sm:$0xff] }
 0xa10   :  { %v1831_v13 = vpop.eup %1830 }
 0xa11   :  { %v1044_v14 = vmul.f32 %v1831_v13, %v1823_v48  ;;  %v1046_v15 = vpop.permute.xlu2 %1045 }
 0xa12   :  { %1066 = vmatpush.msrb.mxu2 %v1046_v15 }
 0xa13   :  { %v1184_v16 = vpop.xlane.xlu1 %1183  ;;  %1714 = vmatmul.msk.f32.vlgmr.msrb.gmra.mxu2 %vm218_vm2, %v1044_v14  ;;  %v1320_v17 = vpop.xlane.xlu0 %1319 }
 0xa1b   :  { %v1247_v62 = vpop.xlane.xlu1 %1246  ;;  %v1385_v18 = vpop.xlane.xlu0 %1384 }
 0xa1c   :  { %v1248_v19 = vsub.f32 %v1244_v63, %v1247_v62  ;;  %v1386_v20 = vsub.f32 %v1382_v0, %v1385_v18 }
 0xa1e   :  { %v1249_v21 = vmul.f32 1.442695, %v1248_v19  ;;  %v1387_v22 = vmul.f32 1.442695, %v1386_v20  ;;  %v1564_v19 = vld [vmem:[#allocation8 + $0x18] sm:$0xff]  ;;  %v1563_v20 = vld [vmem:[#allocation8 + $0x10] sm:$0xff] }
 0xa20   :  { %1832 = vpow2.f32 %v1249_v21  ;;  %v1562_v21 = vld [vmem:[#allocation8 + $0x8] sm:$0xff] }
 0xa21   :  { %1834 = vpow2.f32 %v1387_v22  ;;  %v1561_v22 = vld [vmem:[#allocation8] sm:$0xff] }
 0xa22   :  { %1836 = vpow2.f32 %v1458_v28 }
 0xa26   :  { %v1833_v23 = vpop.eup %1832 }
 0xa27   :  { %v1835_v7 = vpop.eup %1834  ;;  %v1251_v24 = vsel %vm285_vm5, %v1833_v23, 0.0 }
 0xa28   :  { %1252 = vadd.xlane.f32.xlu0 %v1251_v24  ;;  %v1389_v25 = vsel %vm285_vm5, %v1835_v7, 0.0  ;;  %v1837_v30 = vpop.eup %1836 }
 0xa29   :  { %1390 = vadd.xlane.f32.xlu2 %v1389_v25  ;;  %v1460_v31 = vsel %vm285_vm5, %v1837_v30, 0.0 }
 0xa33   :  { %v1117_v26 = vpop.permute.xlu1 %1116 }
 0xa34   :  { %1137 = vmatpush.msra.mxu3 %v1117_v26  ;;  %v1597_v26 = vld [vmem:[%s2567_s16 + $0x20] sm:$0xff] }
 0xa3b   :  { %v1257_v4 = vpop.permute.xlu1 %1256 }
 0xa3c   :  { %1277 = vmatpush.msrb.mxu3 %v1257_v4  ;;  %1187 = vrot.lane.b32.xlu0 %v2400_v60, %s2071_s23 }
 0xa43   :  { %v1324_v32 = vpop.permute.xlu1 %1323 }
 0xa4b   :  { %v1395_v36 = vpop.permute.xlu1 %1394 }
 0xa53   :  { %v1466_v46 = vpop.permute.xlu1 %1465 }
 0xa66   :  { %1461 = vadd.xlane.f32.xlu0 %v1460_v31 }
 0xa81   :  { %v1113_v33 = vpop.xlane.xlu0 %1112 }
 0xa82   :  { %1838 = vrcp.f32 %v1113_v33 }
 0xa88   :  { %v1839_v34 = vpop.eup %1838 }
 0xa89   :  { %v1115_v35 = vmul.f32 %v1839_v34, %v1829_v11 }
 0xa8b   :  { %1717 = vmatmul.msk.f32.vlgmr.msra.gmra.mxu3 %vm218_vm2, %v1115_v35  ;;  %v1776_v35 = vld [vmem:[%s2563_s12] ss:$0 sm:$0xff] }
 0xa8c   :  { %1415 = vmatpush.msra.mxu3 %v1395_v36 }
 0xa96   :  { %v1068_v37 = vpop.f32.mrf.mxu2 }
 0xa97   :  { %1072 = vrot.lane.b32.xlu1 %v1068_v37, %s2058_s28 }
 0xa9b   :  { %v1253_v60 = vpop.xlane.xlu0 %1252 }
 0xa9c   :  { %1840 = vrcp.f32 %v1253_v60  ;;  %v1391_v38 = vpop.xlane.xlu2 %1390  ;;  %v1777_v60 = vld [vmem:[#allocation7] ss:$0 sm:$0xff] }
 0xa9d   :  { %1842 = vrcp.f32 %v1391_v38 }
 0xa9e   :  { %1844 = vrcp.f32 %v1184_v16 }
 0xa9f   :  { %1846 = vrcp.f32 %v1320_v17 }
 0xaa2   :  { %v1841_v39 = vpop.eup %1840 }
 0xaa3   :  { %v1255_v40 = vmul.f32 %v1841_v39, %v1833_v23  ;;  %v1843_v41 = vpop.eup %1842  ;;  %v1599_v23 = vld [vmem:[%s2567_s16 + $0x30] sm:$0xff] }
 0xaa4   :  { %v1845_v42 = vpop.eup %1844  ;;  %v1393_v43 = vmul.f32 %v1843_v41, %v1835_v7  ;;  %v1598_v7 = vld [vmem:[%s2567_s16 + $0x28] sm:$0xff] }
 0xaa5   :  { %1723 = vmatmul.msk.f32.vlgmr.msrb.gmra.mxu3 %vm218_vm2, %v1255_v40  ;;  %v1186_v44 = vmul.f32 %v1845_v42, %v2455_v55  ;;  %v1847_v47 = vpop.eup %1846  ;;  %v1595_v40 = vld [vmem:[%s2567_s16 + $0x10] sm:$0xff]  ;;  %v1594_v41 = vld [vmem:[%s2567_s16 + $0x8] sm:$0xff]  ;;  %v1593_v42 = vld [vmem:[%s2567_s16] sm:$0xff] }
 0xaa6   :  { %v1322_v48 = vmul.f32 %v1847_v47, %v2457_v56  ;;  %1584 = vmatpush.msrb.mxu3 %v1564_v19  ;;  %v1779_v47 = vld [vmem:[#allocation11] ss:$0 sm:$0xff] }
 0xaa8   :  { %1585 = vmatpush.msrb.mxu3 %v1563_v20 }
 0xaaa   :  { %1586 = vmatpush.msrb.mxu3 %v1562_v21 }
 0xaac   :  { %1587 = vmatpush.msrb.mxu3 %v1561_v22 }
 0xaad   :  { %1729 = vmatmul.msk.f32.vlgmr.msra.gmra.mxu3 %vm218_vm2, %v1393_v43  ;;  %v1778_v43 = vld [vmem:[#allocation10] ss:$0 sm:$0xff] }
 0xaae   :  { %v1188_v45 = vpop.permute.xlu0 %1187 }
 0xaaf   :  { %1208 = vmatpush.msra.mxu2 %v1188_v45 }
 0xab0   :  { %1720 = vmatmul.msk.f32.vlgmr.msra.gmra.mxu2 %vm218_vm2, %v1186_v44 }
 0xab1   :  { %1344 = vmatpush.msrb.mxu2 %v1324_v32 }
 0xab3   :  { %1486 = vmatpush.msra.mxu2 %v1466_v46 }
 0xab8   :  { %1726 = vmatmul.msk.f32.vlgmr.msrb.gmra.mxu2 %vm218_vm2, %v1322_v48 }
 0xad9   :  { %v1462_v49 = vpop.xlane.xlu0 %1461 }
 0xada   :  { %1848 = vrcp.f32 %v1462_v49 }
 0xae0   :  { %v1849_v8 = vpop.eup %1848 }
 0xae1   :  { %v1464_v50 = vmul.f32 %v1849_v8, %v1837_v30 }
 0xae3   :  { %1732 = vmatmul.msk.f32.vlgmr.msra.gmra.mxu2 %vm218_vm2, %v1464_v50 }
 0xb09   :  { %v1073_v51 = vpop.permute.xlu1 %1072 }
 0xb0a   :  { %1075 = vst.msk [vmem:[#allocation2] sm:$0xf] %vm358_vm6, %v1073_v51 }
 0xb0e   :  { %v1139_v52 = vpop.f32.mrf.mxu3 }
 0xb0f   :  { %1143 = vrot.lane.b32.xlu1 %v1139_v52, %s2077_s4 }
 0xb28   :  { %v1279_v53 = vpop.f32.mrf.mxu3 }
 0xb29   :  { %1282 = vst.msk [vmem:[#allocation2 + $0x4] sm:$0xf] %vm285_vm5, %v1279_v53 }
 0xb30   :  { %v1417_v54 = vpop.f32.mrf.mxu3 }
 0xb31   :  { %1421 = vrot.lane.b32.xlu0 %v1417_v54, %s2077_s4 }
 0xb33   :  { %v1210_v55 = vpop.f32.mrf.mxu2 }
 0xb34   :  { %1214 = vrot.lane.b32.xlu1 %v1210_v55, %s2078_s17 }
 0xb3b   :  { %v1346_v56 = vpop.f32.mrf.mxu2 }
 0xb3c   :  { %1350 = vrot.lane.b32.xlu2 %v1346_v56, %s2058_s28 }
 0xb66   :  { %v1488_v58 = vpop.f32.mrf.mxu2 }
 0xb67   :  { %1492 = vrot.lane.b32.xlu1 %v1488_v58, %s2078_s17 }
 0xb81   :  { %v1144_v59 = vpop.permute.xlu1 %1143 }
 0xb82   :  { %1146 = vst.msk [vmem:[#allocation2] sm:$0xf] %vm431_vm7, %v1144_v59 }
 0xb96   :  { %v1351_v61 = vpop.permute.xlu2 %1350 }
 0xb97   :  { %1353 = vst.msk [vmem:[#allocation2 + $0x4] sm:$0xf] %vm358_vm6, %v1351_v61 }
 0xba3   :  { %v1422_v63 = vpop.permute.xlu0 %1421 }
 0xba4   :  { %1424 = vst.msk [vmem:[#allocation2 + $0x4] sm:$0xf] %vm431_vm7, %v1422_v63 }
 0xba6   :  { %v1215_v0 = vpop.permute.xlu1 %1214 }
 0xba7   :  { %1217 = vst.msk [vmem:[#allocation2] sm:$0xf] %vm504_vm8, %v1215_v0 }
 0xbd9   :  { %v1493_v6 = vpop.permute.xlu1 %1492 }
 0xbda   :  { %1495 = vst.msk [vmem:[#allocation2 + $0x4] sm:$0xf] %vm504_vm8, %v1493_v6 }
 0xbe1   :  { %v1496_v9 = vld [vmem:[#allocation2] sm:$0xff] }
 0xbe2   :  { %1733 = vmatmul.msk.f32.vlgmr.msrb.gmra.mxu1 %vm191_vm0, %v1496_v9  ;;  %v1781_v9 = vld [vmem:[#allocation14] ss:$0 sm:$0xff] }
 0xc5f   :  { %v1525_v11 = vpop.f32.mrf.mxu1 }
 0xc60   :  { %v1526_v12 = vadd.f32 %v1775_v10, %v1525_v11 }
 0xc62   :  { %v1528_v13 = vadd.f32 %v1526_v12, %v2396_v57  ;;  %v1600_v57 = vld [vmem:[%s2567_s16 + $0x38] sm:$0xff] }
 0xc63   :  { %1617 = vmatpush.msrb.mxu0 %v1600_v57 }
 0xc64   :  { %v1531_v14 = vsel %vm191_vm0, %v1528_v13, 0.0 }
 0xc65   :  { %1532 = vadd.xlane.f32.xlu2 %v1531_v14  ;;  %1618 = vmatpush.msrb.mxu0 %v1599_v23 }
 0xc67   :  { %1619 = vmatpush.msrb.mxu0 %v1598_v7 }
 0xc69   :  { %1620 = vmatpush.msrb.mxu0 %v1597_v26 }
 0xc6b   :  { %1621 = vmatpush.msrb.mxu0 %v1596_v27 }
 0xc6d   :  { %1622 = vmatpush.msrb.mxu0 %v1595_v40 }
 0xc6f   :  { %1623 = vmatpush.msrb.mxu0 %v1594_v41 }
 0xc71   :  { %1624 = vmatpush.msrb.mxu0 %v1593_v42 }
 0xcd8   :  { %v1533_v15 = vpop.xlane.xlu2 %1532 }
 0xcd9   :  { %v1534_v16 = vmul.f32 %v1533_v15, %v2373_v29 }
 0xcdb   :  { %v1535_v17 = vsub.f32 %v1528_v13, %v1534_v16 }
 0xcdd   :  { %v1536_v62 = vmul.f32 %v1535_v17, %v1535_v17 }
 0xcdf   :  { %v1537_v18 = vsel %vm191_vm0, %v1536_v62, 0.0 }
 0xce0   :  { %1538 = vadd.xlane.f32.xlu1 %v1537_v18 }
 0xd53   :  { %v1539_v24 = vpop.xlane.xlu1 %1538 }
 0xd54   :  { %v1540_v25 = vmul.f32 %v1539_v24, %v2373_v29 }
 0xd56   :  { %v1541_v4 = vadd.f32 1e-05, %v1540_v25 }
 0xd58   :  { %1850 = vrsqrt.f32 %v1541_v4  ;;  %vm1548_vm14 = vweird.f32 %v1541_v4 }
 0xd5e   :  { %v1851_v28 = vpop.eup %1850 }
 0xd5f   :  { %v1543_v30 = vmul.f32 %v1851_v28, %v1541_v4  ;;  %vm1549_vm13 = vweird.f32 %v1851_v28 }
 0xd60   :  { %vm1550_vm15 = vmor %vm1548_vm14, %vm1549_vm13 }
 0xd61   :  { %v1544_v31 = vmul.f32 %v1851_v28, %v1543_v30 }
 0xd63   :  { %v1545_v32 = vmul.f32 0.5, %v1544_v31 }
 0xd65   :  { %v1546_v33 = vsub.f32 1.5, %v1545_v32 }
 0xd67   :  { %v1547_v34 = vmul.f32 %v1851_v28, %v1546_v33 }
 0xd69   :  { %v1551_v36 = vsel %vm1550_vm15, %v1851_v28, %v1547_v34 }
 0xd6a   :  { %v1552_v37 = vmul.f32 %v1551_v36, %v1535_v17 }
 0xd6c   :  { %v1556_v38 = vmul.f32 %v1776_v35, %v1552_v37 }
 0xd6e   :  { %v1560_v39 = vadd.f32 %v1777_v60, %v1556_v38 }
 0xd70   :  { %1734 = vmatmul.msk.f32.vlgmr.msrb.gmra.mxu3 %vm191_vm0, %v1560_v39 }
 0xdf3   :  { %v1589_v44 = vpop.f32.mrf.mxu3 }
 0xdf4   :  { %v1590_v45 = vadd.f32 %v1778_v43, %v1589_v44 }
 0xdf6   :  { %v1592_v46 = vmax.f32 %v1590_v45, 0.0 }
 0xdf8   :  { %1735 = vmatmul.msk.f32.vlgmr.msrb.gmra.mxu0 %vm1605_vm1, %v1592_v46 }
 0xe75   :  { %v1626_v48 = vpop.f32.mrf.mxu0 }
 0xe76   :  { %v1627_v49 = vadd.f32 %v1779_v47, %v1626_v48 }
 0xe78   :  { %v1629_v8 = vadd.f32 %v1627_v49, %v1560_v39 }
 0xe7a   :  { %v1632_v50 = vsel %vm191_vm0, %v1629_v8, 0.0 }
 0xe7b   :  { %1633 = vadd.xlane.f32.xlu0 %v1632_v50 }
 0xeee   :  { %v1634_v51 = vpop.xlane.xlu0 %1633 }
 0xeef   :  { %v1635_v52 = vmul.f32 %v1634_v51, %v2373_v29 }
 0xef1   :  { %v1636_v53 = vsub.f32 %v1629_v8, %v1635_v52 }
 0xef3   :  { %v1637_v54 = vmul.f32 %v1636_v53, %v1636_v53 }
 0xef5   :  { %v1638_v55 = vsel %vm191_vm0, %v1637_v54, 0.0 }
 0xef6   :  { %1639 = vadd.xlane.f32.xlu2 %v1638_v55 }
 0xf69   :  { %v1640_v56 = vpop.xlane.xlu2 %1639 }
 0xf6a   :  { %v1641_v58 = vmul.f32 %v1640_v56, %v2373_v29 }
 0xf6c   :  { %v1642_v59 = vadd.f32 1e-05, %v1641_v58 }
 0xf6e   :  { %1852 = vrsqrt.f32 %v1642_v59  ;;  %vm1649_vm3 = vweird.f32 %v1642_v59 }
 0xf74   :  { %v1853_v61 = vpop.eup %1852 }
 0xf75   :  { %v1644_v63 = vmul.f32 %v1853_v61, %v1642_v59  ;;  %vm1650_vm2 = vweird.f32 %v1853_v61 }
 0xf76   :  { %vm1651_vm4 = vmor %vm1649_vm3, %vm1650_vm2 }
 0xf77   :  { %v1645_v0 = vmul.f32 %v1853_v61, %v1644_v63 }
 0xf79   :  { %v1646_v1 = vmul.f32 0.5, %v1645_v0 }
 0xf7b   :  { %v1647_v2 = vsub.f32 1.5, %v1646_v1 }
 0xf7d   :  { %v1648_v3 = vmul.f32 %v1853_v61, %v1647_v2 }
 0xf7f   :  { %v1652_v6 = vsel %vm1651_vm4, %v1853_v61, %v1648_v3 }
 0xf80   :  { %v1653_v10 = vmul.f32 %v1652_v6, %v1636_v53 }
 0xf82   :  { %v1657_v11 = vmul.f32 %v1780_v5, %v1653_v10 }
 0xf84   :  { %v1661_v12 = vadd.f32 %v1781_v9, %v1657_v11 }
 0xf86   :  { %1662 = vst.msk [vmem:[%s2571_s20] sm:$0xff] %vm191_vm0, %v1661_v12 }
 0xf87   :  { %1667 = vsyncpa [#allocation4], 1 }
 0xf88   :  { %1668 = vsyncpa [#allocation6], 1 }
 0xf89   :  { %1669 = vsyncpa [#allocation9], 1 }
 0xf8a   :  { %1670 = vsyncpa [#allocation12], 1 }
 0xf8b   :  { %1671 = vsyncpa [#allocation15], 1 }

// kernel: forward.16
= control target key start
LH: loop header
LB: loop body
LE: loop exit
PB: predicated region body
PF: predicated region fallthrough
CT: control target
= control target key end

     0   :  { %s2836_s0 = inlined_call_operand.vmem [shape: f32[8,32], index: 0, kind: input, shape index: {}]   ;;  %s2837_s1 = inlined_call_operand.vmem [shape: f32[16,32], index: 1, kind: input, shape index: {}]   ;;  %s2838_s2 = inlined_call_operand.vmem [shape: f32[32,96], index: 2, kind: input, shape index: {}]   ;;  %s2839_s3 = inlined_call_operand.hbm [shape: f32[1,96], index: 3, kind: input, shape index: {}]   ;;  %s2840_s4 = inlined_call_operand.vmem [shape: f32[32,32], index: 4, kind: input, shape index: {}]   ;;  %s2841_s5 = inlined_call_operand.hbm [shape: f32[1,32], index: 5, kind: input, shape index: {}]   ;;  %s2842_s6 = inlined_call_operand.hbm [shape: f32[1,32], index: 6, kind: input, shape index: {}]   ;;  %s2843_s7 = inlined_call_operand.hbm [shape: f32[1,32], index: 7, kind: input, shape index: {}]   ;;  %s2844_s8 = inlined_call_operand.hbm [shape: f32[32,96], index: 8, kind: input, shape index: {}]   ;;  %s2845_s9 = inlined_call_operand.hbm [shape: f32[1,96], index: 9, kind: input, shape index: {}]   ;;  %s2846_s10 = inlined_call_operand.hbm [shape: f32[32,32], index: 10, kind: input, shape index: {}]   ;;  %s2847_s11 = inlined_call_operand.hbm [shape: f32[1,32], index: 11, kind: input, shape index: {}]   ;;  %s2848_s12 = inlined_call_operand.hbm [shape: f32[1,32], index: 12, kind: input, shape index: {}]   ;;  %s2849_s13 = inlined_call_operand.hbm [shape: f32[1,32], index: 13, kind: input, shape index: {}]   ;;  %s2850_s14 = inlined_call_operand.hbm [shape: f32[32,64], index: 14, kind: input, shape index: {}]   ;;  %s2851_s15 = inlined_call_operand.hbm [shape: f32[1,64], index: 15, kind: input, shape index: {}]   ;;  %s2852_s16 = inlined_call_operand.vmem [shape: f32[64,32], index: 16, kind: input, shape index: {}]   ;;  %s2853_s17 = inlined_call_operand.hbm [shape: f32[1,32], index: 17, kind: input, shape index: {}]   ;;  %s2854_s18 = inlined_call_operand.hbm [shape: f32[1,32], index: 18, kind: input, shape index: {}]   ;;  %s2855_s19 = inlined_call_operand.hbm [shape: f32[1,32], index: 19, kind: input, shape index: {}]   ;;  %s2856_s20 = inlined_call_operand.vmem [shape: f32[8,32], index: 20, kind: output, shape index: {}]  }
   0x1   :  { %2860 = sst [smem:[#allocation34_spill]] %s2836_s0 }
   0x2   :  { %2861 = sst [smem:[#allocation35_spill]] %s2837_s1 }
   0x3   :  { %2862 = sst [smem:[#allocation36_spill]] %s2838_s2 }
   0x4   :  { %2863 = sst [smem:[#allocation37_spill]] %s2839_s3 }
   0x5   :  { %2864 = sst [smem:[#allocation38_spill]] %s2840_s4 }
   0x6   :  { %25 = vsyncpa [#allocation4], 0 }
   0x7   :  { %26 = vsyncpa [#allocation6], 0 }
   0x8   :  { %27 = vsyncpa [#allocation9], 0 }
   0x9   :  { %28 = vsyncpa [#allocation12], 0 }
   0xa   :  { %29 = vsyncpa [#allocation15], 0 }
   0xb   :  { %30 = vsyncpa [#allocation18], 0 }
   0xc   :  { %31 = vsyncpa [#allocation21], 0  ;;  %s57_s23 = sshll.u32 %s2841_s5, 4  ;;  %s58_s23 = int_to_ptr.hbm [resolvable:$true] %s57_s23 }
   0xd   :  { %32 = vsyncpa [#allocation24], 0  ;;  %s2334_s24 = smov [#allocation5]   ;;  %s79_s26 = sshll.u32 %s2843_s7, 4  ;;  %s80_s26 = int_to_ptr.hbm [resolvable:$true] %s79_s26 }
   0xe   :  { %s59_s2 = sshll.u32 %s2334_s24, 4  ;;  %s2335_s27 = smov [#allocation8]   ;;  %s60_s2 = int_to_ptr.vmem [resolvable:$true] %s59_s2 }
   0xf   :  { %62 = dma.hbm_to_vmem [thread:$0]  %s58_s23, 16, %s60_s2, [#allocation6]  }
  0x10   :  { %s81_s28 = sshll.u32 %s2335_s27, 4  ;;  %s103_s30 = sshll.u32 %s2845_s9, 4  ;;  %s82_s28 = int_to_ptr.vmem [resolvable:$true] %s81_s28  ;;  %s104_s30 = int_to_ptr.hbm [resolvable:$true] %s103_s30 }
  0x11   :  { %84 = dma.hbm_to_vmem [thread:$0]  %s80_s26, 16, %s82_s28, [#allocation9]  }
  0x12   :  { %s127_s21 = sshll.u32 %s2847_s11, 4  ;;  %s2336_s1 = smov [#allocation11]   ;;  %s128_s21 = int_to_ptr.hbm [resolvable:$true] %s127_s21 }
  0x13   :  { %s105_s22 = sshll.u32 %s2336_s1, 4  ;;  %s2337_s7 = smov [#allocation14]   ;;  %s106_s22 = int_to_ptr.vmem [resolvable:$true] %s105_s22 }
  0x14   :  { %108 = dma.hbm_to_vmem [thread:$0]  %s104_s30, 16, %s106_s22, [#allocation12]  }
  0x15   :  { %s129_s23 = sshll.u32 %s2337_s7, 4  ;;  %s149_s25 = sshll.u32 %s2849_s13, 4  ;;  %s130_s23 = int_to_ptr.vmem [resolvable:$true] %s129_s23  ;;  %s150_s25 = int_to_ptr.hbm [resolvable:$true] %s149_s25 }
  0x16   :  { %132 = dma.hbm_to_vmem [thread:$0]  %s128_s21, 16, %s130_s23, [#allocation15]  }
  0x17   :  { %s173_s26 = sshll.u32 %s2851_s15, 4  ;;  %s2338_s27 = smov [#allocation17]   ;;  %s174_s26 = int_to_ptr.hbm [resolvable:$true] %s173_s26 }
  0x18   :  { %s151_s11 = sshll.u32 %s2338_s27, 4  ;;  %s2339_s28 = smov [#allocation20]   ;;  %s152_s11 = int_to_ptr.vmem [resolvable:$true] %s151_s11 }
  0x19   :  { %154 = dma.hbm_to_vmem [thread:$0]  %s150_s25, 16, %s152_s11, [#allocation18]  }
  0x1a   :  { %s175_s4 = sshll.u32 %s2339_s28, 4  ;;  %s197_s5 = sshll.u32 %s2854_s18, 4  ;;  %s176_s4 = int_to_ptr.vmem [resolvable:$true] %s175_s4  ;;  %s198_s5 = int_to_ptr.hbm [resolvable:$true] %s197_s5 }
  0x1b   :  { %178 = dma.hbm_to_vmem [thread:$0]  %s174_s26, 16, %s176_s4, [#allocation21]  }
  0x1c   :  { %s2865_s21 = sld [smem:[#allocation37_spill]]  ;;  %s2340_s22 = smov [#allocation23]  }
  0x1d   :  { %s199_s15 = sshll.u32 %s2340_s22, 4  ;;  %s2341_s7 = smov [#allocation3]   ;;  %s200_s15 = int_to_ptr.vmem [resolvable:$true] %s199_s15 }
  0x1e   :  { %202 = dma.hbm_to_vmem [thread:$0]  %s198_s5, 16, %s200_s15, [#allocation24]  }
  0x1f   :  { %s46_s23 = sshll.u32 %s2341_s7, 4  ;;  %s68_s25 = sshll.u32 %s2842_s6, 4  ;;  %s47_s23 = int_to_ptr.vmem [resolvable:$true] %s46_s23  ;;  %s69_s25 = int_to_ptr.hbm [resolvable:$true] %s68_s25 }
  0x20   :  { %s89_s3 = sshll.u32 %s2844_s8, 4  ;;  %s2342_s26 = smov [#allocation7]   ;;  %s90_s3 = int_to_ptr.hbm [resolvable:$true] %s89_s3 }
  0x21   :  { %s70_s27 = sshll.u32 %s2342_s26, 4  ;;  %s2343_s11 = smov [#allocation10]   ;;  %s71_s27 = int_to_ptr.vmem [resolvable:$true] %s70_s27 }
  0x22   :  { %s44_s1 = sshll.u32 %s2865_s21, 4  ;;  %s91_s28 = sshll.u32 %s2343_s11, 4  ;;  %s45_s1 = int_to_ptr.hbm [resolvable:$true] %s44_s1  ;;  %s92_s28 = int_to_ptr.vmem [resolvable:$true] %s91_s28 }
  0x23   :  { %49 = dma.hbm_to_vmem [thread:$0]  %s45_s1, 16, %s47_s23, [#allocation4]  }
  0x24   :  { %73 = dma.hbm_to_vmem [thread:$0]  %s69_s25, 16, %s71_s27, [#allocation6]  }
  0x25   :  { %s2344_s4 = smov 128   ;;  %s2345_s29 = smov 8  }
  0x26   :  { %97 = dma.hbm_to_vmem [thread:$0]  %s90_s3, 512, %s92_s28, [#allocation9], %s2344_s4, %s2344_s4, %s2345_s29  }
  0x27   :  { %s113_s5 = sshll.u32 %s2846_s10, 4  ;;  %s2346_s13 = smov [#allocation13]   ;;  %s114_s5 = int_to_ptr.hbm [resolvable:$true] %s113_s5 }
  0x28   :  { %s115_s0 = sshll.u32 %s2346_s13, 4  ;;  %s138_s1 = sshll.u32 %s2848_s12, 4  ;;  %s116_s0 = int_to_ptr.vmem [resolvable:$true] %s115_s0  ;;  %s139_s1 = int_to_ptr.hbm [resolvable:$true] %s138_s1 }
  0x29   :  { %121 = dma.hbm_to_vmem [thread:$0]  %s114_s5, 512, %s116_s0, [#allocation12], %s2344_s4, %s2344_s4, %s2345_s29  }
  0x2a   :  { %s2347_s22 = smov [#allocation16]   ;;  %s159_s24 = sshll.u32 %s2850_s14, 4  ;;  %s160_s24 = int_to_ptr.hbm [resolvable:$true] %s159_s24 }
  0x2b   :  { %s140_s15 = sshll.u32 %s2347_s22, 4  ;;  %s186_s25 = sshll.u32 %s2853_s17, 4  ;;  %s141_s15 = int_to_ptr.vmem [resolvable:$true] %s140_s15  ;;  %s187_s25 = int_to_ptr.hbm [resolvable:$true] %s186_s25 }
  0x2c   :  { %143 = dma.hbm_to_vmem [thread:$0]  %s139_s1, 16, %s141_s15, [#allocation15]  }
  0x2d   :  { %s2348_s18 = smov [#allocation19]   ;;  %s2349_s12 = smov [#allocation22]  }
  0x2e   :  { %s161_s9 = sshll.u32 %s2348_s18, 4  ;;  %s188_s3 = sshll.u32 %s2349_s12, 4  ;;  %s162_s9 = int_to_ptr.vmem [resolvable:$true] %s161_s9  ;;  %s189_s3 = int_to_ptr.vmem [resolvable:$true] %s188_s3 }
  0x2f   :  { %167 = dma.hbm_to_vmem [thread:$0]  %s160_s24, 512, %s162_s9, [#allocation18], %s2344_s4, %s2344_s4, %s2345_s29  }
  0x30   :  { %s208_s11 = sshll.u32 %s2855_s19, 4  ;;  %s2350_s14 = smov [#allocation25]   ;;  %s209_s11 = int_to_ptr.hbm [resolvable:$true] %s208_s11 }
  0x31   :  { %191 = dma.hbm_to_vmem [thread:$0]  %s187_s25, 16, %s189_s3, [#allocation21]  }
  0x32   :  { %s210_s28 = sshll.u32 %s2350_s14, 4  ;;  %s211_s28 = int_to_ptr.vmem [resolvable:$true] %s210_s28 }
  0x33   :  { %213 = dma.hbm_to_vmem [thread:$0]  %s209_s11, 16, %s211_s28, [#allocation24]  }
  0x34   :  { %2318 = dma.done.wait [#allocation4], 16  }
  0x35   :  { %2319 = vsyncadd [#allocation4], 4294967280 }
  0x36   :  { %2320 = dma.done.wait [#allocation6], 32  }
  0x37   :  { %2321 = vsyncadd [#allocation6], 4294967264 }
  0x38   :  { %2322 = dma.done.wait [#allocation9], 528  }
  0x39   :  { %2323 = vsyncadd [#allocation9], 4294966768 }
  0x3a   :  { %2324 = dma.done.wait [#allocation12], 528  }
  0x3b   :  { %2325 = vsyncadd [#allocation12], 4294966768 }
  0x3c   :  { %2326 = dma.done.wait [#allocation15], 32  }
  0x3d   :  { %2327 = vsyncadd [#allocation15], 4294967264 }
  0x3e   :  { %2328 = dma.done.wait [#allocation18], 528  }
  0x3f   :  { %2329 = vsyncadd [#allocation18], 4294966768 }
  0x40   :  { %2330 = dma.done.wait [#allocation21], 32  }
  0x41   :  { %2331 = vsyncadd [#allocation21], 4294967264 }
  0x42   :  { %2332 = dma.done.wait [#allocation24], 32  }
  0x43   :  { %2333 = vsyncadd [#allocation24], 4294967264  ;;  %s2866_s4 = sld [smem:[#allocation36_spill]]  ;;  %vm285_vm0 = vcmask 261120   ;;  %v1874_v5 = vld [vmem:[#allocation3] ss:$0 sm:$0xff] }
  0x44   :  { %s2867_s22 = sld [smem:[#allocation34_spill]]  ;;  %s2351_s15 = smov 64   ;;  %vm356_vm1 = vcmask 1043456   ;;  %vm312_vm2 = vcmask 64512   ;;  %vm338_vm3 = vcmask 27648   ;;  %vm352_vm4 = vcmask 31744  }
  0x45   :  { %s2352_s7 = smov 120   ;;  %s2353_s23 = smov 96   ;;  %vm379_vm5 = vcmask 60416   ;;  %vm452_vm6 = vcmask 126016   ;;  %vm525_vm7 = vcmask 191616   ;;  %vm598_vm8 = vcmask 257216  }
  0x46   :  { %s2354_s24 = smov 56   ;;  %s2355_s10 = smov 88  }
  0x47   :  { %s2356_s2 = smov 72   ;;  %s2357_s25 = smov 112  }
  0x48   :  { %s2358_s18 = smov 80   ;;  %s2359_s9 = smov 104  }
  0x49   :  { %v280_v0 = vld [vmem:[%s2866_s4 + $0x18] sm:$0xff]  ;;  %v279_v1 = vld [vmem:[%s2866_s4 + $0x10] sm:$0xff]  ;;  %v278_v2 = vld [vmem:[%s2866_s4 + $0x8] sm:$0xff]  ;;  %s2360_s12 = smov 48   ;;  %s2361_s3 = smov 40  }
  0x4a   :  { %301 = vmatpush.msra.mxu0 %v280_v0  ;;  %v277_v3 = vld [vmem:[%s2866_s4] sm:$0xff]  ;;  %s2362_s26 = smov 16   ;;  %s2363_s27 = smov 24  }
  0x4b   :  { %v2533_v4 = vld [vmem:[%s2867_s22] sm:$0xff]  ;;  %s2868_s28 = sld [smem:[#allocation38_spill]] }
  0x4c   :  { %302 = vmatpush.msra.mxu0 %v279_v1  ;;  %s2869_s8 = sld [smem:[#allocation35_spill]] }
  0x4e   :  { %303 = vmatpush.msra.mxu0 %v278_v2 }
  0x50   :  { %304 = vmatpush.msra.mxu0 %v277_v3 }
  0x51   :  { %1769 = vmatmul.msk.f32.vlgmr.msra.gmra.mxu0 %vm285_vm0, %v2533_v4 }
  0xce   :  { %v306_v6 = vpop.f32.mrf.mxu0 }
  0xcf   :  { %v2537_v7 = vadd.f32 %v1874_v5, %v306_v6 }
  0xd1   :  { %350 = vrot.lane.b32.xlu2 %v2537_v7, %s2351_s15  ;;  %381 = vrot.lane.b32.xlu1 %v2537_v7, %s2352_s7  ;;  %v2554_v8 = vrot.slane %v2537_v7, 4 }
  0xd2   :  { %310 = vrot.lane.b32.xlu0 %v2537_v7, %s2353_s23 }
  0xd9   :  { %421 = vrot.lane.b32.xlu2 %v2537_v7, %s2354_s24 }
  0xda   :  { %383 = vrot.lane.b32.xlu0 %v2537_v7, %s2355_s10 }
  0xe1   :  { %529 = vrot.lane.b32.xlu2 %v2537_v7, %s2356_s2 }
  0xe2   :  { %454 = vrot.lane.b32.xlu0 %v2537_v7, %s2357_s25 }
  0xe9   :  { %456 = vrot.lane.b32.xlu2 %v2537_v7, %s2358_s18 }
  0xea   :  { %741 = vrot.lane.b32.xlu0 %v2554_v8, %s2358_s18 }
 0x12b   :  { %v351_v9 = vpop.permute.xlu2 %350 }
 0x12c   :  { %1772 = vmatpush.msk.msra.mxu2 %vm356_vm1, %v351_v9 }
 0x133   :  { %v422_v10 = vpop.permute.xlu2 %421 }
 0x134   :  { %1776 = vmatpush.msk.msrb.mxu2 %vm356_vm1, %v422_v10 }
 0x13b   :  { %v2562_v11 = vpop.permute.xlu2 %529 }
 0x143   :  { %v457_v12 = vpop.permute.xlu2 %456  ;;  %v382_v15 = vpop.permute.xlu1 %381 }
 0x144   :  { %v311_v13 = vpop.permute.xlu0 %310 }
 0x145   :  { %1770 = vmatpush.xpose.msk.msra.mxu1 %vm312_vm2, %v311_v13 }
 0x148   :  { %1771 = vmatmul.msk.f32.vlgmr.msra.gmra.mxu1 %vm312_vm2, %v2537_v7 }
 0x149   :  { %1778 = vmatpush.xpose.msk.msrb.mxu1 %vm312_vm2, %v457_v12 }
 0x14c   :  { %v384_v14 = vpop.permute.xlu0 %383 }
 0x14d   :  { %1774 = vmatpush.xpose.msk.msra.mxu3 %vm312_vm2, %v384_v14 }
 0x150   :  { %1775 = vmatmul.msk.f32.vlgmr.msra.gmra.mxu3 %vm312_vm2, %v382_v15 }
 0x154   :  { %v455_v16 = vpop.permute.xlu0 %454 }
 0x155   :  { %1779 = vmatmul.msk.f32.vlgmr.msrb.gmra.mxu1 %vm312_vm2, %v455_v16 }
 0x15c   :  { %v742_v32 = vpop.permute.xlu0 %741 }
 0x1c5   :  { %v334_v17 = vpop.f32.mrf.mxu1 }
 0x1c6   :  { %v337_v18 = vmul.f32 0.35355338, %v334_v17 }
 0x1c8   :  { %v339_v19 = vsel %vm338_vm3, %v337_v18, -inf }
 0x1c9   :  { %340 = vmax.xlane.f32.xlu1 %v339_v19 }
 0x1d2   :  { %v479_v38 = vpop.f32.mrf.mxu1 }
 0x1d3   :  { %v406_v20 = vpop.f32.mrf.mxu3  ;;  %v482_v39 = vmul.f32 0.35355338, %v479_v38 }
 0x1d4   :  { %v409_v21 = vmul.f32 0.35355338, %v406_v20 }
 0x1d5   :  { %v483_v40 = vsel %vm338_vm3, %v482_v39, -inf }
 0x1d6   :  { %v410_v22 = vsel %vm338_vm3, %v409_v21, -inf }
 0x1d7   :  { %411 = vmax.xlane.f32.xlu2 %v410_v22 }
 0x1e2   :  { %527 = vrot.lane.b32.xlu1 %v2537_v7, %s2359_s9 }
 0x1ea   :  { %667 = vrot.lane.b32.xlu1 %v2554_v8, %s2352_s7 }
 0x1ef   :  { %601 = vrot.lane.b32.xlu2 %v2554_v8, %s2353_s23 }
 0x1f2   :  { %739 = vrot.lane.b32.xlu1 %v2554_v8, %s2357_s25 }
 0x23c   :  { %v341_v23 = vpop.xlane.xlu1 %340 }
 0x23d   :  { %v342_v24 = vsub.f32 %v337_v18, %v341_v23 }
 0x23f   :  { %v343_v25 = vmul.f32 1.442695, %v342_v24 }
 0x241   :  { %1886 = vpow2.f32 %v343_v25 }
 0x247   :  { %v1887_v26 = vpop.eup %1886 }
 0x248   :  { %v345_v27 = vsel %vm338_vm3, %v1887_v26, 0.0 }
 0x249   :  { %346 = vadd.xlane.f32.xlu2 %v345_v27 }
 0x24a   :  { %v412_v28 = vpop.xlane.xlu2 %411 }
 0x24b   :  { %v413_v29 = vsub.f32 %v409_v21, %v412_v28 }
 0x24d   :  { %v414_v30 = vmul.f32 1.442695, %v413_v29 }
 0x24f   :  { %1888 = vpow2.f32 %v414_v30 }
 0x252   :  { %v602_v31 = vpop.permute.xlu2 %601 }
 0x253   :  { %1786 = vmatpush.xpose.msk.msra.mxu1 %vm312_vm2, %v602_v31 }
 0x254   :  { %v528_v33 = vpop.permute.xlu1 %527 }
 0x255   :  { %v1889_v34 = vpop.eup %1888 }
 0x256   :  { %1787 = vmatmul.msk.f32.vlgmr.msra.gmra.mxu1 %vm312_vm2, %v2554_v8  ;;  %v416_v35 = vsel %vm338_vm3, %v1889_v34, 0.0 }
 0x257   :  { %1794 = vmatpush.xpose.msk.msrb.mxu1 %vm312_vm2, %v742_v32  ;;  %417 = vadd.xlane.f32.xlu0 %v416_v35 }
 0x25c   :  { %v668_v36 = vpop.permute.xlu1 %667 }
 0x261   :  { %669 = vrot.lane.b32.xlu2 %v2554_v8, %s2355_s10 }
 0x264   :  { %v740_v37 = vpop.permute.xlu1 %739 }
 0x265   :  { %1795 = vmatmul.msk.f32.vlgmr.msrb.gmra.mxu1 %vm312_vm2, %v740_v37 }
 0x269   :  { %813 = vrot.lane.b32.xlu2 %v2554_v8, %s2356_s2 }
 0x26b   :  { %811 = vrot.lane.b32.xlu0 %v2554_v8, %s2359_s9 }
 0x292   :  { %484 = vmax.xlane.f32.xlu2 %v483_v40 }
 0x2bc   :  { %v347_v41 = vpop.xlane.xlu2 %346 }
 0x2bd   :  { %1890 = vrcp.f32 %v347_v41 }
 0x2c3   :  { %v1891_v42 = vpop.eup %1890 }
 0x2c4   :  { %v670_v43 = vpop.permute.xlu2 %669  ;;  %v349_v44 = vmul.f32 %v1891_v42, %v1887_v26 }
 0x2c5   :  { %1790 = vmatpush.xpose.msk.msrb.mxu0 %vm312_vm2, %v670_v43 }
 0x2c6   :  { %1773 = vmatmul.msk.f32.vlgmr.msra.gmra.mxu2 %vm352_vm4, %v349_v44 }
 0x2c7   :  { %1782 = vmatpush.xpose.msk.msra.mxu2 %vm312_vm2, %v2562_v11 }
 0x2c8   :  { %1791 = vmatmul.msk.f32.vlgmr.msrb.gmra.mxu0 %vm312_vm2, %v668_v36 }
 0x2ca   :  { %v418_v45 = vpop.xlane.xlu0 %417 }
 0x2cb   :  { %1892 = vrcp.f32 %v418_v45 }
 0x2cc   :  { %v814_v46 = vpop.permute.xlu2 %813 }
 0x2cd   :  { %1798 = vmatpush.xpose.msk.msra.mxu0 %vm312_vm2, %v814_v46 }
 0x2d1   :  { %v1893_v47 = vpop.eup %1892 }
 0x2d2   :  { %v420_v48 = vmul.f32 %v1893_v47, %v1889_v34 }
 0x2d3   :  { %v624_v49 = vpop.f32.mrf.mxu1 }
 0x2d4   :  { %v627_v50 = vmul.f32 0.35355338, %v624_v49  ;;  %1777 = vmatmul.msk.f32.vlgmr.msrb.gmra.mxu2 %vm352_vm4, %v420_v48 }
 0x2d6   :  { %v628_v51 = vsel %vm338_vm3, %v627_v50, -inf }
 0x2d7   :  { %629 = vmax.xlane.f32.xlu0 %v628_v51 }
 0x2dc   :  { %1783 = vmatmul.msk.f32.vlgmr.msra.gmra.mxu2 %vm312_vm2, %v528_v33 }
 0x2dd   :  { %v812_v52 = vpop.permute.xlu0 %811 }
 0x2de   :  { %1799 = vmatmul.msk.f32.vlgmr.msra.gmra.mxu0 %vm312_vm2, %v812_v52 }
 0x2e2   :  { %v764_v12 = vpop.f32.mrf.mxu1 }
 0x2e3   :  { %v767_v13 = vmul.f32 0.35355338, %v764_v12 }
 0x2e5   :  { %v768_v15 = vsel %vm338_vm3, %v767_v13, -inf }
 0x305   :  { %v485_v53 = vpop.xlane.xlu2 %484 }
 0x306   :  { %v486_v54 = vsub.f32 %v482_v39, %v485_v53 }
 0x308   :  { %v487_v55 = vmul.f32 1.442695, %v486_v54 }
 0x30a   :  { %1894 = vpow2.f32 %v487_v55 }
 0x310   :  { %v1895_v60 = vpop.eup %1894 }
 0x311   :  { %v489_v61 = vsel %vm338_vm3, %v1895_v60, 0.0 }
 0x345   :  { %v692_v56 = vpop.f32.mrf.mxu0 }
 0x346   :  { %v695_v57 = vmul.f32 0.35355338, %v692_v56 }
 0x348   :  { %v696_v58 = vsel %vm338_vm3, %v695_v57, -inf }
 0x349   :  { %v376_v59 = vpop.f32.mrf.mxu2  ;;  %697 = vmax.xlane.f32.xlu2 %v696_v58 }
 0x34a   :  { %380 = vst.msk [vmem:[#allocation2] sm:$0xf] %vm379_vm5, %v376_v59  ;;  %v630_v62 = vpop.xlane.xlu0 %629 }
 0x34b   :  { %v631_v63 = vsub.f32 %v627_v50, %v630_v62 }
 0x34d   :  { %v632_v1 = vmul.f32 1.442695, %v631_v63 }
 0x34f   :  { %1896 = vpow2.f32 %v632_v1 }
 0x351   :  { %490 = vadd.xlane.f32.xlu2 %v489_v61 }
 0x355   :  { %v2612_v11 = vpop.eup %1896 }
 0x356   :  { %v634_v14 = vsel %vm338_vm3, %v2612_v11, 0.0 }
 0x357   :  { %v2608_v0 = vpop.f32.mrf.mxu2 }
 0x35b   :  { %v836_v2 = vpop.f32.mrf.mxu0 }
 0x35c   :  { %v839_v3 = vmul.f32 0.35355338, %v836_v2  ;;  %v887_v2 = vld [vmem:[%s2868_s28 + $0x18] sm:$0xff] }
 0x35d   :  { %907 = vmatpush.msra.mxu1 %v887_v2 }
 0x35e   :  { %v840_v5 = vsel %vm338_vm3, %v839_v3, -inf }
 0x35f   :  { %v552_v6 = vpop.f32.mrf.mxu2  ;;  %841 = vmax.xlane.f32.xlu0 %v840_v5  ;;  %v885_v5 = vld [vmem:[%s2868_s28 + $0x8] sm:$0xff] }
 0x360   :  { %v555_v9 = vmul.f32 0.35355338, %v552_v6  ;;  %v884_v6 = vld [vmem:[%s2868_s28] sm:$0xff] }
 0x362   :  { %v556_v10 = vsel %vm338_vm3, %v555_v9, -inf }
 0x363   :  { %557 = vmax.xlane.f32.xlu1 %v556_v10 }
 0x367   :  { %635 = vadd.xlane.f32.xlu0 %v634_v14  ;;  %v1875_v14 = vld [vmem:[#allocation5] ss:$0 sm:$0xff] }
 0x369   :  { %494 = vrot.lane.b32.xlu2 %v2537_v7, %s2360_s12 }
 0x36b   :  { %769 = vmax.xlane.f32.xlu1 %v768_v15 }
 0x37b   :  { %567 = vrot.lane.b32.xlu0 %v2537_v7, %s2361_s3 }
 0x383   :  { %707 = vrot.lane.b32.xlu0 %v2554_v8, %s2354_s24 }
 0x38b   :  { %779 = vrot.lane.b32.xlu0 %v2554_v8, %s2360_s12 }
 0x393   :  { %851 = vrot.lane.b32.xlu0 %v2554_v8, %s2361_s3 }
 0x3bc   :  { %v698_v16 = vpop.xlane.xlu2 %697 }
 0x3bd   :  { %v699_v17 = vsub.f32 %v695_v57, %v698_v16 }
 0x3bf   :  { %v700_v18 = vmul.f32 1.442695, %v699_v17 }
 0x3c1   :  { %1898 = vpow2.f32 %v700_v18 }
 0x3c4   :  { %v491_v19 = vpop.xlane.xlu2 %490 }
 0x3c5   :  { %1900 = vrcp.f32 %v491_v19  ;;  %v2364_v19 = vmov 32.0  }
 0x3c7   :  { %v1899_v20 = vpop.eup %1898 }
 0x3c8   :  { %v702_v21 = vsel %vm338_vm3, %v1899_v20, 0.0 }
 0x3c9   :  { %703 = vadd.xlane.f32.xlu1 %v702_v21  ;;  %v958_v21 = vld [vmem:[#allocation10 + $0x18] sm:$0xff] }
 0x3cb   :  { %v1901_v22 = vpop.eup %1900 }
 0x3cc   :  { %v495_v23 = vpop.permute.xlu2 %494  ;;  %v493_v7 = vmul.f32 %v1901_v22, %v1895_v60 }
 0x3cd   :  { %1780 = vmatpush.msk.msrb.mxu3 %vm356_vm1, %v495_v23 }
 0x3ce   :  { %1781 = vmatmul.msk.f32.vlgmr.msrb.gmra.mxu3 %vm352_vm4, %v493_v7  ;;  %v955_v7 = vld [vmem:[#allocation10] sm:$0xff] }
 0x3d2   :  { %v842_v24 = vpop.xlane.xlu0 %841 }
 0x3d3   :  { %v843_v25 = vsub.f32 %v839_v3, %v842_v24  ;;  %v886_v3 = vld [vmem:[%s2868_s28 + $0x10] sm:$0xff]  ;;  %v956_v24 = vld [vmem:[#allocation10 + $0x8] sm:$0xff] }
 0x3d4   :  { %908 = vmatpush.msra.mxu1 %v886_v3 }
 0x3d5   :  { %v844_v26 = vmul.f32 1.442695, %v843_v25 }
 0x3d6   :  { %v558_v27 = vpop.xlane.xlu1 %557  ;;  %909 = vmatpush.msra.mxu1 %v885_v5 }
 0x3d7   :  { %1902 = vpow2.f32 %v844_v26  ;;  %v559_v32 = vsub.f32 %v555_v9, %v558_v27  ;;  %v1869_v26 = vpack.i.bf16 %v955_v7, %v956_v24 }
 0x3d8   :  { %910 = vmatpush.msra.mxu1 %v884_v6 }
 0x3d9   :  { %v560_v34 = vmul.f32 1.442695, %v559_v32 }
 0x3da   :  { %v636_v35 = vpop.xlane.xlu0 %635 }
 0x3dd   :  { %v1903_v28 = vpop.eup %1902 }
 0x3de   :  { %v770_v29 = vpop.xlane.xlu1 %769  ;;  %v846_v30 = vsel %vm338_vm3, %v1903_v28, 0.0 }
 0x3df   :  { %v771_v31 = vsub.f32 %v767_v13, %v770_v29  ;;  %847 = vadd.xlane.f32.xlu2 %v846_v30 }
 0x3e1   :  { %v772_v33 = vmul.f32 1.442695, %v771_v31 }
 0x3e3   :  { %1904 = vpow2.f32 %v772_v33 }
 0x3e4   :  { %1906 = vpow2.f32 %v560_v34 }
 0x3e9   :  { %v1905_v36 = vpop.eup %1904 }
 0x3ea   :  { %v774_v37 = vsel %vm338_vm3, %v1905_v36, 0.0  ;;  %v1907_v39 = vpop.eup %1906 }
 0x3eb   :  { %775 = vadd.xlane.f32.xlu1 %v774_v37  ;;  %v562_v40 = vsel %vm338_vm3, %v1907_v39, 0.0 }
 0x3ed   :  { %v568_v38 = vpop.permute.xlu0 %567 }
 0x3ee   :  { %1784 = vmatpush.msk.msrb.mxu2 %vm356_vm1, %v568_v38 }
 0x3f3   :  { %563 = vadd.xlane.f32.xlu1 %v562_v40 }
 0x3f5   :  { %v708_v41 = vpop.permute.xlu0 %707 }
 0x3f6   :  { %1792 = vmatpush.msk.msra.mxu2 %vm356_vm1, %v708_v41  ;;  %v275_v41 = vld [vmem:[%s2869_s8] sm:$0xff] }
 0x3fd   :  { %v780_v45 = vpop.permute.xlu0 %779 }
 0x405   :  { %v852_v49 = vpop.permute.xlu0 %851 }
 0x40c   :  { %639 = vrot.lane.b32.xlu1 %v2554_v8, %s2351_s15 }
 0x414   :  { %449 = vrot.lane.b32.xlu1 %v2608_v0, %s2345_s29 }
 0x43c   :  { %v704_v43 = vpop.xlane.xlu1 %703 }
 0x451   :  { %v518_v42 = vpop.f32.mrf.mxu3 }
 0x452   :  { %522 = vrot.lane.b32.xlu1 %v518_v42, %s2362_s26  ;;  %v848_v8 = vpop.xlane.xlu2 %847  ;;  %v276_v42 = vld [vmem:[%s2869_s8 + $0x8] sm:$0xff] }
 0x45e   :  { %v776_v44 = vpop.xlane.xlu1 %775 }
 0x466   :  { %v564_v46 = vpop.xlane.xlu1 %563 }
 0x467   :  { %1908 = vrcp.f32 %v564_v46 }
 0x468   :  { %1910 = vrcp.f32 %v704_v43  ;;  %v1878_v43 = vld [vmem:[#allocation11] ss:$0 sm:$0xff] }
 0x469   :  { %1912 = vrcp.f32 %v636_v35 }
 0x46a   :  { %1914 = vrcp.f32 %v848_v8 }
 0x46b   :  { %1916 = vrcp.f32 %v776_v44 }
 0x46c   :  { %1918 = vrcp.f32 %v2364_v19 }
 0x46d   :  { %v1909_v47 = vpop.eup %1908 }
 0x46e   :  { %v566_v48 = vmul.f32 %v1909_v47, %v1907_v39  ;;  %v1911_v50 = vpop.eup %1910 }
 0x46f   :  { %v706_v51 = vmul.f32 %v1911_v50, %v1899_v20  ;;  %v1913_v52 = vpop.eup %1912  ;;  %v957_v20 = vld [vmem:[#allocation10 + $0x10] sm:$0xff] }
 0x470   :  { %1785 = vmatmul.msk.f32.vlgmr.msrb.gmra.mxu2 %vm352_vm4, %v566_v48  ;;  %v1915_v53 = vpop.eup %1914  ;;  %v638_v54 = vmul.f32 %v1913_v52, %v2612_v11  ;;  %v1864_v22 = vpack.i.bf16 %v957_v20, %v958_v21  ;;  %v1876_v52 = vld [vmem:[#allocation7] ss:$0 sm:$0xff] }
 0x471   :  { %1800 = vmatpush.msk.msrb.mxu2 %vm356_vm1, %v852_v49  ;;  %v850_v55 = vmul.f32 %v1915_v53, %v1903_v28  ;;  %v1917_v57 = vpop.eup %1916 }
 0x472   :  { %v778_v58 = vmul.f32 %v1917_v57, %v1905_v36  ;;  %v1919_v23 = vpop.eup %1918 }
 0x473   :  { %v922_v25 = vmul.f32 32.0, %v1919_v23  ;;  %vm926_vm9 = vweird.f32 %v1919_v23 }
 0x478   :  { %1793 = vmatmul.msk.f32.vlgmr.msra.gmra.mxu2 %vm352_vm4, %v706_v51 }
 0x47e   :  { %v640_v56 = vpop.permute.xlu1 %639 }
 0x47f   :  { %1788 = vmatpush.msk.msra.mxu3 %vm356_vm1, %v640_v56 }
 0x480   :  { %1789 = vmatmul.msk.f32.vlgmr.msra.gmra.mxu3 %vm352_vm4, %v638_v54  ;;  %1801 = vmatmul.msk.f32.vlgmr.msrb.gmra.mxu2 %vm352_vm4, %v850_v55  ;;  %v1877_v55 = vld [vmem:[#allocation8] ss:$0 sm:$0xff] }
 0x481   :  { %1796 = vmatpush.msk.msrb.mxu3 %vm356_vm1, %v780_v45  ;;  %vm1699_vm1 = vcmask 523264  }
 0x483   :  { %978 = vmatpush.msra.mxu3 %v958_v21 }
 0x485   :  { %979 = vmatpush.msra.mxu3 %v957_v20 }
 0x486   :  { %v450_v59 = vpop.permute.xlu1 %449 }
 0x487   :  { %453 = vst.msk [vmem:[#allocation2] sm:$0xf] %vm452_vm6, %v450_v59  ;;  %980 = vmatpush.msra.mxu3 %v956_v24 }
 0x488   :  { %1797 = vmatmul.msk.f32.vlgmr.msrb.gmra.mxu3 %vm352_vm4, %v778_v58 }
 0x489   :  { %981 = vmatpush.msra.mxu3 %v955_v7 }
 0x4c4   :  { %v523_v60 = vpop.permute.xlu1 %522 }
 0x4c5   :  { %526 = vst.msk [vmem:[#allocation2] sm:$0xf] %vm525_vm7, %v523_v60 }
 0x4f3   :  { %v591_v61 = vpop.f32.mrf.mxu2 }
 0x4f4   :  { %595 = vrot.lane.b32.xlu1 %v591_v61, %s2363_s27 }
 0x4fb   :  { %v731_v62 = vpop.f32.mrf.mxu2 }
 0x4fc   :  { %735 = vrot.lane.b32.xlu0 %v731_v62, %s2345_s29 }
 0x503   :  { %v663_v63 = vpop.f32.mrf.mxu3  ;;  %v875_v0 = vpop.f32.mrf.mxu2 }
 0x504   :  { %666 = vst.msk [vmem:[#allocation2 + $0x4] sm:$0xf] %vm379_vm5, %v663_v63  ;;  %879 = vrot.lane.b32.xlu2 %v875_v0, %s2363_s27 }
 0x50b   :  { %v803_v1 = vpop.f32.mrf.mxu3 }
 0x50c   :  { %807 = vrot.lane.b32.xlu0 %v803_v1, %s2362_s26  ;;  %1865 = vrot.lane.b32.xlu2 %v1864_v22, %s2353_s23 }
 0x514   :  { %1870 = vrot.lane.b32.xlu2 %v1869_v26, %s2353_s23 }
 0x51c   :  { %1002 = vrot.lane.b32.xlu2 %v1878_v43, %s2353_s23 }
 0x55e   :  { %v880_v12 = vpop.permute.xlu2 %879 }
 0x566   :  { %v596_v9 = vpop.permute.xlu1 %595  ;;  %v1866_v35 = vpop.permute.xlu2 %1865 }
 0x567   :  { %599 = vst.msk [vmem:[#allocation2] sm:$0xf] %vm598_vm8, %v596_v9  ;;  %v1868_v36 = vunpack.i.h.bf16 %v1866_v35  ;;  %v1867_v37 = vunpack.i.l.bf16 %v1866_v35 }
 0x569   :  { %1023 = vmatpush.msrb.mxu0 %v1867_v37 }
 0x56b   :  { %1024 = vmatpush.msrb.mxu0 %v1868_v36 }
 0x56e   :  { %v736_v10 = vpop.permute.xlu0 %735  ;;  %v1871_v38 = vpop.permute.xlu2 %1870 }
 0x56f   :  { %738 = vst.msk [vmem:[#allocation2 + $0x4] sm:$0xf] %vm452_vm6, %v736_v10  ;;  %v1872_v39 = vunpack.i.l.bf16 %v1871_v38  ;;  %v1873_v40 = vunpack.i.h.bf16 %v1871_v38 }
 0x571   :  { %1025 = vmatpush.msrb.mxu0 %v1872_v39 }
 0x573   :  { %1026 = vmatpush.msrb.mxu0 %v1873_v40 }
 0x574   :  { %1804 = vmatmul.msk.f32.vlgmr.msrb.gmra.mxu0 %vm285_vm0, %v275_v41 }
 0x576   :  { %v1003_v58 = vpop.permute.xlu2 %1002 }
 0x57c   :  { %1805 = vmatmul.msk.f32.gmra.mxu0 %vm285_vm0, %v276_v42 }
 0x57e   :  { %v808_v11 = vpop.permute.xlu0 %807 }
 0x57f   :  { %810 = vst.msk [vmem:[#allocation2 + $0x4] sm:$0xf] %vm525_vm7, %v808_v11 }
 0x580   :  { %882 = vst.msk [vmem:[#allocation2 + $0x4] sm:$0xf] %vm598_vm8, %v880_v12 }
 0x587   :  { %v883_v13 = vld [vmem:[#allocation2] sm:$0xff] }
 0x588   :  { %1802 = vmatmul.msk.f32.vlgmr.msra.gmra.mxu1 %vm285_vm0, %v883_v13 }
 0x5f1   :  { %v1028_v59 = vpop.f32.mrf.mxu0 }
 0x5f2   :  { %v2691_v60 = vadd.f32 %v1028_v59, %v1003_v58 }
 0x5f4   :  { %1101 = vrot.lane.b32.xlu2 %v2691_v60, %s2352_s7  ;;  %1806 = vmatpush.xpose.msk.msra.mxu2 %vm312_vm2, %v2691_v60 }
 0x5f9   :  { %v1031_v61 = vpop.f32.mrf.mxu0 }
 0x5fa   :  { %v2703_v62 = vadd.f32 %v1031_v61, %v1003_v58 }
 0x5fc   :  { %1172 = vrot.lane.b32.xlu2 %v2691_v60, %s2357_s25 }
 0x604   :  { %1243 = vrot.lane.b32.xlu2 %v2691_v60, %s2359_s9 }
 0x605   :  { %v912_v15 = vpop.f32.mrf.mxu1 }
 0x606   :  { %v913_v16 = vadd.f32 %v1875_v14, %v912_v15 }
 0x608   :  { %v915_v17 = vadd.f32 %v913_v16, %v2533_v4  ;;  %v923_v4 = vsub.f32 1.0, %v922_v25 }
 0x60a   :  { %v918_v18 = vsel %vm285_vm0, %v915_v17, 0.0  ;;  %v924_v27 = vmul.f32 %v1919_v23, %v923_v4 }
 0x60b   :  { %919 = vadd.xlane.f32.xlu0 %v918_v18 }
 0x60c   :  { %v925_v28 = vadd.f32 %v1919_v23, %v924_v27 }
 0x60e   :  { %v2673_v29 = vsel %vm926_vm9, %v1919_v23, %v925_v28 }
 0x64e   :  { %v1102_v2 = vpop.permute.xlu2 %1101 }
 0x64f   :  { %1809 = vmatpush.xpose.msk.msrb.mxu3 %vm312_vm2, %v1102_v2 }
 0x656   :  { %v1173_v3 = vpop.permute.xlu2 %1172 }
 0x65e   :  { %v1244_v5 = vpop.permute.xlu2 %1243 }
 0x65f   :  { %1815 = vmatpush.xpose.msk.msra.mxu0 %vm312_vm2, %v1244_v5 }
 0x67e   :  { %v920_v30 = vpop.xlane.xlu0 %919 }
 0x67f   :  { %v928_v31 = vmul.f32 %v2673_v29, %v920_v30 }
 0x681   :  { %v929_v32 = vsub.f32 %v915_v17, %v928_v31 }
 0x683   :  { %v930_v33 = vmul.f32 %v929_v32, %v929_v32 }
 0x685   :  { %v931_v34 = vsel %vm285_vm0, %v930_v33, 0.0 }
 0x686   :  { %932 = vadd.xlane.f32.xlu1 %v931_v34 }
 0x69f   :  { %1072 = vrot.lane.b32.xlu1 %v2691_v60, %s2353_s23 }
 0x6a7   :  { %1379 = vrot.lane.b32.xlu1 %v2703_v62, %s2352_s7 }
 0x6f9   :  { %v933_v44 = vpop.xlane.xlu1 %932 }
 0x6fa   :  { %v934_v45 = vmul.f32 %v933_v44, %v2673_v29 }
 0x6fc   :  { %v935_v46 = vadd.f32 1e-05, %v934_v45 }
 0x6fe   :  { %1920 = vrsqrt.f32 %v935_v46  ;;  %vm942_vm11 = vweird.f32 %v935_v46 }
 0x704   :  { %v1921_v47 = vpop.eup %1920 }
 0x705   :  { %v937_v48 = vmul.f32 %v1921_v47, %v935_v46  ;;  %vm943_vm10 = vweird.f32 %v1921_v47 }
 0x706   :  { %vm944_vm12 = vmor %vm942_vm11, %vm943_vm10 }
 0x707   :  { %v938_v49 = vmul.f32 %v1921_v47, %v937_v48 }
 0x709   :  { %v939_v8 = vmul.f32 0.5, %v938_v49 }
 0x70b   :  { %v940_v50 = vsub.f32 1.5, %v939_v8 }
 0x70d   :  { %v941_v51 = vmul.f32 %v1921_v47, %v940_v50 }
 0x70f   :  { %v945_v53 = vsel %vm944_vm12, %v1921_v47, %v941_v51 }
 0x710   :  { %v946_v54 = vmul.f32 %v945_v53, %v929_v32 }
 0x711   :  { %v1073_v6 = vpop.permute.xlu1 %1072 }
 0x712   :  { %v950_v56 = vmul.f32 %v1876_v52, %v946_v54  ;;  %1093 = vmatpush.msrb.mxu1 %v1073_v6 }
 0x714   :  { %v2687_v57 = vadd.f32 %v1877_v55, %v950_v56  ;;  %1812 = vmatpush.xpose.msk.msra.mxu1 %vm312_vm2, %v1173_v3 }
 0x716   :  { %1803 = vmatmul.msk.f32.vlgmr.msra.gmra.mxu3 %vm285_vm0, %v2687_v57 }
 0x719   :  { %v1380_v9 = vpop.permute.xlu1 %1379 }
 0x71a   :  { %1821 = vmatpush.xpose.msk.msrb.mxu0 %vm312_vm2, %v1380_v9 }
 0x799   :  { %v983_v63 = vpop.f32.mrf.mxu3 }
 0x79a   :  { %v984_v0 = vadd.f32 %v1878_v43, %v983_v63 }
 0x79c   :  { %1241 = vrot.lane.b32.xlu2 %v984_v0, %s2359_s9  ;;  %1807 = vmatmul.msk.f32.vlgmr.msra.gmra.mxu2 %vm312_vm2, %v984_v0  ;;  %v1312_v1 = vrot.slane %v984_v0, 4 }
 0x7a4   :  { %1450 = vrot.lane.b32.xlu2 %v2703_v62, %s2357_s25 }
 0x7ac   :  { %1519 = vrot.lane.b32.xlu2 %v1312_v1, %s2359_s9 }
 0x7f6   :  { %v1242_v10 = vpop.permute.xlu2 %1241 }
 0x7f7   :  { %1816 = vmatmul.msk.f32.vlgmr.msra.gmra.mxu0 %vm312_vm2, %v1242_v10 }
 0x7fe   :  { %v1451_v4 = vpop.permute.xlu2 %1450 }
 0x806   :  { %v1520_v32 = vpop.permute.xlu2 %1519 }
 0x81f   :  { %v1057_v11 = vpop.f32.mrf.mxu2 }
 0x820   :  { %v1060_v12 = vmul.f32 0.35355338, %v1057_v11 }
 0x822   :  { %v1061_v13 = vsel %vm379_vm5, %v1060_v12, -inf }
 0x823   :  { %1062 = vmax.xlane.f32.xlu0 %v1061_v13 }
 0x837   :  { %1099 = vrot.lane.b32.xlu0 %v984_v0, %s2352_s7 }
 0x83f   :  { %1170 = vrot.lane.b32.xlu0 %v984_v0, %s2357_s25 }
 0x847   :  { %1377 = vrot.lane.b32.xlu0 %v1312_v1, %s2352_s7 }
 0x84f   :  { %1448 = vrot.lane.b32.xlu0 %v1312_v1, %s2357_s25 }
 0x874   :  { %v1266_v14 = vpop.f32.mrf.mxu0 }
 0x875   :  { %v1269_v15 = vmul.f32 0.35355338, %v1266_v14 }
 0x877   :  { %v1270_v16 = vsel %vm379_vm5, %v1269_v15, -inf }
 0x878   :  { %1271 = vmax.xlane.f32.xlu2 %v1270_v16 }
 0x896   :  { %v1063_v17 = vpop.xlane.xlu0 %1062 }
 0x897   :  { %v1064_v18 = vsub.f32 %v1060_v12, %v1063_v17 }
 0x899   :  { %v1065_v19 = vmul.f32 1.442695, %v1064_v18 }
 0x89b   :  { %1922 = vpow2.f32 %v1065_v19 }
 0x8a1   :  { %v1923_v20 = vpop.eup %1922 }
 0x8a2   :  { %v1067_v21 = vsel %vm379_vm5, %v1923_v20, 0.0 }
 0x8a3   :  { %1068 = vadd.xlane.f32.xlu1 %v1067_v21 }
 0x8a9   :  { %v1100_v22 = vpop.permute.xlu0 %1099 }
 0x8aa   :  { %1810 = vmatmul.msk.f32.vlgmr.msrb.gmra.mxu3 %vm312_vm2, %v1100_v22 }
 0x8b1   :  { %v1171_v23 = vpop.permute.xlu0 %1170 }
 0x8b9   :  { %v1378_v7 = vpop.permute.xlu0 %1377 }
 0x8ba   :  { %1822 = vmatmul.msk.f32.vlgmr.msrb.gmra.mxu0 %vm312_vm2, %v1378_v7 }
 0x8bc   :  { %1521 = vrot.lane.b32.xlu1 %v2703_v62, %s2359_s9 }
 0x8c1   :  { %v1449_v33 = vpop.permute.xlu0 %1448 }
 0x8eb   :  { %v1272_v41 = vpop.xlane.xlu2 %1271 }
 0x8ec   :  { %v1273_v45 = vsub.f32 %v1269_v15, %v1272_v41 }
 0x8ee   :  { %v1274_v46 = vmul.f32 1.442695, %v1273_v45 }
 0x916   :  { %v1069_v24 = vpop.xlane.xlu1 %1068 }
 0x917   :  { %1924 = vrcp.f32 %v1069_v24 }
 0x91d   :  { %v1925_v25 = vpop.eup %1924 }
 0x91e   :  { %v1071_v26 = vmul.f32 %v1925_v25, %v1923_v20 }
 0x920   :  { %1808 = vmatmul.msk.f32.vlgmr.msrb.gmra.mxu1 %vm312_vm2, %v1071_v26 }
 0x921   :  { %1818 = vmatpush.xpose.msk.msrb.mxu1 %vm312_vm2, %v2703_v62 }
 0x928   :  { %1813 = vmatmul.msk.f32.vlgmr.msra.gmra.mxu1 %vm312_vm2, %v1171_v23 }
 0x929   :  { %1824 = vmatpush.xpose.msk.msra.mxu1 %vm312_vm2, %v1451_v4 }
 0x92d   :  { %v1124_v27 = vpop.f32.mrf.mxu3 }
 0x92e   :  { %v1127_v28 = vmul.f32 0.35355338, %v1124_v27  ;;  %v1522_v30 = vpop.permute.xlu1 %1521 }
 0x92f   :  { %1827 = vmatpush.xpose.msk.msra.mxu0 %vm312_vm2, %v1522_v30 }
 0x930   :  { %1819 = vmatmul.msk.f32.vlgmr.msrb.gmra.mxu1 %vm312_vm2, %v1312_v1  ;;  %v1128_v31 = vsel %vm379_vm5, %v1127_v28, -inf }
 0x931   :  { %1129 = vmax.xlane.f32.xlu1 %v1128_v31 }
 0x932   :  { %1828 = vmatmul.msk.f32.vlgmr.msra.gmra.mxu0 %vm312_vm2, %v1520_v32 }
 0x937   :  { %v1402_v34 = vpop.f32.mrf.mxu0 }
 0x938   :  { %v1405_v35 = vmul.f32 0.35355338, %v1402_v34  ;;  %1825 = vmatmul.msk.f32.vlgmr.msra.gmra.mxu1 %vm312_vm2, %v1449_v33 }
 0x93a   :  { %v1406_v36 = vsel %vm379_vm5, %v1405_v35, -inf }
 0x93b   :  { %1407 = vmax.xlane.f32.xlu2 %v1406_v36 }
 0x99d   :  { %v1095_v37 = vpop.f32.mrf.mxu1 }
 0x99e   :  { %1098 = vst.msk [vmem:[#allocation2] sm:$0xf] %vm379_vm5, %v1095_v37 }
 0x9a4   :  { %v1130_v38 = vpop.xlane.xlu1 %1129 }
 0x9a5   :  { %v1131_v39 = vsub.f32 %v1127_v28, %v1130_v38  ;;  %v1195_v40 = vpop.f32.mrf.mxu1 }
 0x9a6   :  { %v1198_v42 = vmul.f32 0.35355338, %v1195_v40 }
 0x9a7   :  { %v1132_v43 = vmul.f32 1.442695, %v1131_v39 }
 0x9a8   :  { %v1199_v44 = vsel %vm379_vm5, %v1198_v42, -inf }
 0x9a9   :  { %1926 = vpow2.f32 %v1132_v43  ;;  %1200 = vmax.xlane.f32.xlu0 %v1199_v44 }
 0x9aa   :  { %1928 = vpow2.f32 %v1274_v46 }
 0x9ad   :  { %v1335_v52 = vpop.f32.mrf.mxu1 }
 0x9ae   :  { %v1408_v47 = vpop.xlane.xlu2 %1407  ;;  %v1338_v63 = vmul.f32 0.35355338, %v1335_v52 }
 0x9af   :  { %v1927_v48 = vpop.eup %1926  ;;  %v1409_v49 = vsub.f32 %v1405_v35, %v1408_v47  ;;  %v1544_v8 = vpop.f32.mrf.mxu0 }
 0x9b0   :  { %v2741_v50 = vmul.f32 0.35355338, %v1544_v8  ;;  %v1134_v51 = vsel %vm379_vm5, %v1927_v48, 0.0  ;;  %v2746_v55 = vpop.eup %1928  ;;  %v1339_v1 = vsel %vm379_vm5, %v1338_v63, -inf }
 0x9b1   :  { %v1410_v53 = vmul.f32 1.442695, %v1409_v49  ;;  %1135 = vadd.xlane.f32.xlu2 %v1134_v51  ;;  %v1276_v58 = vsel %vm379_vm5, %v2746_v55, 0.0 }
 0x9b2   :  { %v1548_v54 = vsel %vm379_vm5, %v2741_v50, -inf }
 0x9b3   :  { %1930 = vpow2.f32 %v1410_v53  ;;  %1549 = vmax.xlane.f32.xlu1 %v1548_v54 }
 0x9b5   :  { %v1473_v61 = vpop.f32.mrf.mxu1 }
 0x9b6   :  { %v1476_v0 = vmul.f32 0.35355338, %v1473_v61 }
 0x9b8   :  { %v1477_v2 = vsel %vm379_vm5, %v1476_v0, -inf }
 0x9b9   :  { %v2748_v56 = vpop.eup %1930 }
 0x9ba   :  { %v1412_v59 = vsel %vm379_vm5, %v2748_v56, 0.0 }
 0x9bb   :  { %1277 = vadd.xlane.f32.xlu1 %v1276_v58  ;;  %1413 = vadd.xlane.f32.xlu0 %v1412_v59 }
 0x9c3   :  { %1340 = vmax.xlane.f32.xlu1 %v1339_v1  ;;  %1478 = vmax.xlane.f32.xlu0 %v1477_v2  ;;  %v1594_v1 = vld [vmem:[#allocation13 + $0x18] sm:$0xff]  ;;  %v1593_v2 = vld [vmem:[#allocation13 + $0x10] sm:$0xff] }
 0x9c4   :  { %1614 = vmatpush.msrb.mxu1 %v1594_v1 }
 0x9c6   :  { %1615 = vmatpush.msrb.mxu1 %v1593_v2 }
 0x9c9   :  { %1139 = vrot.lane.b32.xlu2 %v2691_v60, %s2355_s10 }
 0x9dc   :  { %1210 = vrot.lane.b32.xlu1 %v2691_v60, %s2358_s18 }
 0x9e4   :  { %1350 = vrot.lane.b32.xlu1 %v2703_v62, %s2353_s23 }
 0x9ec   :  { %1417 = vrot.lane.b32.xlu1 %v2703_v62, %s2355_s10 }
 0x9f4   :  { %1488 = vrot.lane.b32.xlu1 %v2703_v62, %s2358_s18 }
 0x9fc   :  { %1559 = vrot.lane.b32.xlu1 %v2703_v62, %s2356_s2 }
 0xa1c   :  { %v1201_v3 = vpop.xlane.xlu0 %1200 }
 0xa1d   :  { %v1202_v5 = vsub.f32 %v1198_v42, %v1201_v3  ;;  %v1592_v3 = vld [vmem:[#allocation13 + $0x8] sm:$0xff] }
 0xa1e   :  { %1616 = vmatpush.msrb.mxu1 %v1592_v3 }
 0xa1f   :  { %v1203_v6 = vmul.f32 1.442695, %v1202_v5  ;;  %v1591_v5 = vld [vmem:[#allocation13] sm:$0xff] }
 0xa20   :  { %1617 = vmatpush.msrb.mxu1 %v1591_v5  ;;  %v1884_v5 = vld [vmem:[#allocation23] ss:$0 sm:$0xff] }
 0xa21   :  { %1932 = vpow2.f32 %v1203_v6 }
 0xa24   :  { %v1136_v9 = vpop.xlane.xlu2 %1135 }
 0xa25   :  { %1934 = vrcp.f32 %v1136_v9 }
 0xa26   :  { %v1550_v10 = vpop.xlane.xlu1 %1549 }
 0xa27   :  { %v1933_v11 = vpop.eup %1932  ;;  %v1551_v27 = vsub.f32 %v2741_v50, %v1550_v10  ;;  %v1879_v10 = vld [vmem:[#allocation14] ss:$0 sm:$0xff] }
 0xa28   :  { %v1205_v12 = vsel %vm379_vm5, %v1933_v11, 0.0 }
 0xa29   :  { %1206 = vadd.xlane.f32.xlu0 %v1205_v12  ;;  %v1552_v28 = vmul.f32 1.442695, %v1551_v27  ;;  %v1690_v27 = vld [vmem:[%s2852_s16 + $0x18] sm:$0xff] }
 0xa2b   :  { %v1935_v13 = vpop.eup %1934 }
 0xa2c   :  { %v1138_v14 = vmul.f32 %v1935_v13, %v1927_v48  ;;  %v1140_v15 = vpop.permute.xlu2 %1139 }
 0xa2d   :  { %1160 = vmatpush.msrb.mxu2 %v1140_v15 }
 0xa2e   :  { %v1278_v16 = vpop.xlane.xlu1 %1277  ;;  %1811 = vmatmul.msk.f32.vlgmr.msrb.gmra.mxu2 %vm312_vm2, %v1138_v14  ;;  %v1414_v17 = vpop.xlane.xlu0 %1413 }
 0xa36   :  { %v1341_v62 = vpop.xlane.xlu1 %1340  ;;  %v1479_v18 = vpop.xlane.xlu0 %1478 }
 0xa37   :  { %v1342_v19 = vsub.f32 %v1338_v63, %v1341_v62  ;;  %v1480_v20 = vsub.f32 %v1476_v0, %v1479_v18 }
 0xa39   :  { %v1343_v21 = vmul.f32 1.442695, %v1342_v19  ;;  %v1481_v22 = vmul.f32 1.442695, %v1480_v20  ;;  %v1658_v19 = vld [vmem:[#allocation19 + $0x18] sm:$0xff]  ;;  %v1657_v20 = vld [vmem:[#allocation19 + $0x10] sm:$0xff] }
 0xa3b   :  { %1936 = vpow2.f32 %v1343_v21  ;;  %v1656_v21 = vld [vmem:[#allocation19 + $0x8] sm:$0xff] }
 0xa3c   :  { %1938 = vpow2.f32 %v1481_v22  ;;  %v1655_v22 = vld [vmem:[#allocation19] sm:$0xff] }
 0xa3d   :  { %1940 = vpow2.f32 %v1552_v28 }
 0xa41   :  { %v1937_v23 = vpop.eup %1936 }
 0xa42   :  { %v1939_v7 = vpop.eup %1938  ;;  %v1345_v24 = vsel %vm379_vm5, %v1937_v23, 0.0 }
 0xa43   :  { %1346 = vadd.xlane.f32.xlu0 %v1345_v24  ;;  %v1483_v25 = vsel %vm379_vm5, %v1939_v7, 0.0  ;;  %v1941_v30 = vpop.eup %1940 }
 0xa44   :  { %1484 = vadd.xlane.f32.xlu2 %v1483_v25  ;;  %v1554_v31 = vsel %vm379_vm5, %v1941_v30, 0.0 }
 0xa4e   :  { %v1211_v26 = vpop.permute.xlu1 %1210 }
 0xa4f   :  { %1231 = vmatpush.msra.mxu3 %v1211_v26  ;;  %v1691_v26 = vld [vmem:[%s2852_s16 + $0x20] sm:$0xff] }
 0xa56   :  { %v1351_v4 = vpop.permute.xlu1 %1350 }
 0xa57   :  { %1371 = vmatpush.msrb.mxu3 %v1351_v4  ;;  %1281 = vrot.lane.b32.xlu0 %v2691_v60, %s2356_s2 }
 0xa5e   :  { %v1418_v32 = vpop.permute.xlu1 %1417 }
 0xa66   :  { %v1489_v36 = vpop.permute.xlu1 %1488 }
 0xa6e   :  { %v1560_v46 = vpop.permute.xlu1 %1559 }
 0xa81   :  { %1555 = vadd.xlane.f32.xlu0 %v1554_v31 }
 0xa9c   :  { %v1207_v33 = vpop.xlane.xlu0 %1206 }
 0xa9d   :  { %1942 = vrcp.f32 %v1207_v33 }
 0xaa3   :  { %v1943_v34 = vpop.eup %1942 }
 0xaa4   :  { %v1209_v35 = vmul.f32 %v1943_v34, %v1933_v11 }
 0xaa6   :  { %1814 = vmatmul.msk.f32.vlgmr.msra.gmra.mxu3 %vm312_vm2, %v1209_v35  ;;  %v1880_v35 = vld [vmem:[#allocation16] ss:$0 sm:$0xff] }
 0xaa7   :  { %1509 = vmatpush.msra.mxu3 %v1489_v36 }
 0xab1   :  { %v1162_v37 = vpop.f32.mrf.mxu2 }
 0xab2   :  { %1166 = vrot.lane.b32.xlu1 %v1162_v37, %s2345_s29 }
 0xab6   :  { %v1347_v60 = vpop.xlane.xlu0 %1346 }
 0xab7   :  { %1944 = vrcp.f32 %v1347_v60  ;;  %v1485_v38 = vpop.xlane.xlu2 %1484  ;;  %v1881_v60 = vld [vmem:[#allocation17] ss:$0 sm:$0xff] }
 0xab8   :  { %1946 = vrcp.f32 %v1485_v38 }
 0xab9   :  { %1948 = vrcp.f32 %v1278_v16 }
 0xaba   :  { %1950 = vrcp.f32 %v1414_v17 }
 0xabd   :  { %v1945_v39 = vpop.eup %1944 }
 0xabe   :  { %v1349_v40 = vmul.f32 %v1945_v39, %v1937_v23  ;;  %v1947_v41 = vpop.eup %1946  ;;  %v1693_v23 = vld [vmem:[%s2852_s16 + $0x30] sm:$0xff] }
 0xabf   :  { %v1949_v42 = vpop.eup %1948  ;;  %v1487_v43 = vmul.f32 %v1947_v41, %v1939_v7  ;;  %v1692_v7 = vld [vmem:[%s2852_s16 + $0x28] sm:$0xff] }
 0xac0   :  { %1820 = vmatmul.msk.f32.vlgmr.msrb.gmra.mxu3 %vm312_vm2, %v1349_v40  ;;  %v1280_v44 = vmul.f32 %v1949_v42, %v2746_v55  ;;  %v1951_v47 = vpop.eup %1950  ;;  %v1689_v40 = vld [vmem:[%s2852_s16 + $0x10] sm:$0xff]  ;;  %v1688_v41 = vld [vmem:[%s2852_s16 + $0x8] sm:$0xff]  ;;  %v1687_v42 = vld [vmem:[%s2852_s16] sm:$0xff] }
 0xac1   :  { %v1416_v48 = vmul.f32 %v1951_v47, %v2748_v56  ;;  %1678 = vmatpush.msrb.mxu3 %v1658_v19  ;;  %v1883_v47 = vld [vmem:[#allocation22] ss:$0 sm:$0xff] }
 0xac3   :  { %1679 = vmatpush.msrb.mxu3 %v1657_v20 }
 0xac5   :  { %1680 = vmatpush.msrb.mxu3 %v1656_v21 }
 0xac7   :  { %1681 = vmatpush.msrb.mxu3 %v1655_v22 }
 0xac8   :  { %1826 = vmatmul.msk.f32.vlgmr.msra.gmra.mxu3 %vm312_vm2, %v1487_v43  ;;  %v1882_v43 = vld [vmem:[#allocation20] ss:$0 sm:$0xff] }
 0xac9   :  { %v1282_v45 = vpop.permute.xlu0 %1281 }
 0xaca   :  { %1302 = vmatpush.msra.mxu2 %v1282_v45 }
 0xacb   :  { %1817 = vmatmul.msk.f32.vlgmr.msra.gmra.mxu2 %vm312_vm2, %v1280_v44 }
 0xacc   :  { %1438 = vmatpush.msrb.mxu2 %v1418_v32 }
 0xace   :  { %1580 = vmatpush.msra.mxu2 %v1560_v46 }
 0xad3   :  { %1823 = vmatmul.msk.f32.vlgmr.msrb.gmra.mxu2 %vm312_vm2, %v1416_v48 }
 0xaf4   :  { %v1556_v49 = vpop.xlane.xlu0 %1555 }
 0xaf5   :  { %1952 = vrcp.f32 %v1556_v49 }
 0xafb   :  { %v1953_v8 = vpop.eup %1952 }
 0xafc   :  { %v1558_v50 = vmul.f32 %v1953_v8, %v1941_v30 }
 0xafe   :  { %1829 = vmatmul.msk.f32.vlgmr.msra.gmra.mxu2 %vm312_vm2, %v1558_v50 }
 0xb24   :  { %v1167_v51 = vpop.permute.xlu1 %1166 }
 0xb25   :  { %1169 = vst.msk [vmem:[#allocation2] sm:$0xf] %vm452_vm6, %v1167_v51 }
 0xb29   :  { %v1233_v52 = vpop.f32.mrf.mxu3 }
 0xb2a   :  { %1237 = vrot.lane.b32.xlu1 %v1233_v52, %s2362_s26 }
 0xb43   :  { %v1373_v53 = vpop.f32.mrf.mxu3 }
 0xb44   :  { %1376 = vst.msk [vmem:[#allocation2 + $0x4] sm:$0xf] %vm379_vm5, %v1373_v53 }
 0xb4b   :  { %v1511_v54 = vpop.f32.mrf.mxu3 }
 0xb4c   :  { %1515 = vrot.lane.b32.xlu0 %v1511_v54, %s2362_s26 }
 0xb4e   :  { %v1304_v55 = vpop.f32.mrf.mxu2 }
 0xb4f   :  { %1308 = vrot.lane.b32.xlu1 %v1304_v55, %s2363_s27 }
 0xb56   :  { %v1440_v56 = vpop.f32.mrf.mxu2 }
 0xb57   :  { %1444 = vrot.lane.b32.xlu2 %v1440_v56, %s2345_s29 }
 0xb81   :  { %v1582_v58 = vpop.f32.mrf.mxu2 }
 0xb82   :  { %1586 = vrot.lane.b32.xlu1 %v1582_v58, %s2363_s27 }
 0xb9c   :  { %v1238_v59 = vpop.permute.xlu1 %1237 }
 0xb9d   :  { %1240 = vst.msk [vmem:[#allocation2] sm:$0xf] %vm525_vm7, %v1238_v59 }
 0xbb1   :  { %v1445_v61 = vpop.permute.xlu2 %1444 }
 0xbb2   :  { %1447 = vst.msk [vmem:[#allocation2 + $0x4] sm:$0xf] %vm452_vm6, %v1445_v61 }
 0xbbe   :  { %v1516_v63 = vpop.permute.xlu0 %1515 }
 0xbbf   :  { %1518 = vst.msk [vmem:[#allocation2 + $0x4] sm:$0xf] %vm525_vm7, %v1516_v63 }
 0xbc1   :  { %v1309_v0 = vpop.permute.xlu1 %1308 }
 0xbc2   :  { %1311 = vst.msk [vmem:[#allocation2] sm:$0xf] %vm598_vm8, %v1309_v0 }
 0xbf4   :  { %v1587_v6 = vpop.permute.xlu1 %1586 }
 0xbf5   :  { %1589 = vst.msk [vmem:[#allocation2 + $0x4] sm:$0xf] %vm598_vm8, %v1587_v6 }
 0xbfc   :  { %v1590_v9 = vld [vmem:[#allocation2] sm:$0xff] }
 0xbfd   :  { %1830 = vmatmul.msk.f32.vlgmr.msrb.gmra.mxu1 %vm285_vm0, %v1590_v9  ;;  %v1885_v9 = vld [vmem:[#allocation25] ss:$0 sm:$0xff] }
 0xc7a   :  { %v1619_v11 = vpop.f32.mrf.mxu1 }
 0xc7b   :  { %v1620_v12 = vadd.f32 %v1879_v10, %v1619_v11 }
 0xc7d   :  { %v1622_v13 = vadd.f32 %v1620_v12, %v2687_v57  ;;  %v1694_v57 = vld [vmem:[%s2852_s16 + $0x38] sm:$0xff] }
 0xc7e   :  { %1711 = vmatpush.msrb.mxu0 %v1694_v57 }
 0xc7f   :  { %v1625_v14 = vsel %vm285_vm0, %v1622_v13, 0.0 }
 0xc80   :  { %1626 = vadd.xlane.f32.xlu2 %v1625_v14  ;;  %1712 = vmatpush.msrb.mxu0 %v1693_v23 }
 0xc82   :  { %1713 = vmatpush.msrb.mxu0 %v1692_v7 }
 0xc84   :  { %1714 = vmatpush.msrb.mxu0 %v1691_v26 }
 0xc86   :  { %1715 = vmatpush.msrb.mxu0 %v1690_v27 }
 0xc88   :  { %1716 = vmatpush.msrb.mxu0 %v1689_v40 }
 0xc8a   :  { %1717 = vmatpush.msrb.mxu0 %v1688_v41 }
 0xc8c   :  { %1718 = vmatpush.msrb.mxu0 %v1687_v42 }
 0xcf3   :  { %v1627_v15 = vpop.xlane.xlu2 %1626 }
 0xcf4   :  { %v1628_v16 = vmul.f32 %v1627_v15, %v2673_v29 }
 0xcf6   :  { %v1629_v17 = vsub.f32 %v1622_v13, %v1628_v16 }
 0xcf8   :  { %v1630_v62 = vmul.f32 %v1629_v17, %v1629_v17 }
 0xcfa   :  { %v1631_v18 = vsel %vm285_vm0, %v1630_v62, 0.0 }
 0xcfb   :  { %1632 = vadd.xlane.f32.xlu1 %v1631_v18 }
 0xd6e   :  { %v1633_v24 = vpop.xlane.xlu1 %1632 }
 0xd6f   :  { %v1634_v25 = vmul.f32 %v1633_v24, %v2673_v29 }
 0xd71   :  { %v1635_v4 = vadd.f32 1e-05, %v1634_v25 }
 0xd73   :  { %1954 = vrsqrt.f32 %v1635_v4  ;;  %vm1642_vm14 = vweird.f32 %v1635_v4 }
 0xd79   :  { %v1955_v28 = vpop.eup %1954 }
 0xd7a   :  { %v1637_v30 = vmul.f32 %v1955_v28, %v1635_v4  ;;  %vm1643_vm13 = vweird.f32 %v1955_v28 }
 0xd7b   :  { %vm1644_vm15 = vmor %vm1642_vm14, %vm1643_vm13 }
 0xd7c   :  { %v1638_v31 = vmul.f32 %v1955_v28, %v1637_v30 }
 0xd7e   :  { %v1639_v32 = vmul.f32 0.5, %v1638_v31 }
 0xd80   :  { %v1640_v33 = vsub.f32 1.5, %v1639_v32 }
 0xd82   :  { %v1641_v34 = vmul.f32 %v1955_v28, %v1640_v33 }
 0xd84   :  { %v1645_v36 = vsel %vm1644_vm15, %v1955_v28, %v1641_v34 }
 0xd85   :  { %v1646_v37 = vmul.f32 %v1645_v36, %v1629_v17 }
 0xd87   :  { %v1650_v38 = vmul.f32 %v1880_v35, %v1646_v37 }
 0xd89   :  { %v1654_v39 = vadd.f32 %v1881_v60, %v1650_v38 }
 0xd8b   :  { %1831 = vmatmul.msk.f32.vlgmr.msrb.gmra.mxu3 %vm285_vm0, %v1654_v39 }
 0xe0e   :  { %v1683_v44 = vpop.f32.mrf.mxu3 }
 0xe0f   :  { %v1684_v45 = vadd.f32 %v1882_v43, %v1683_v44 }
 0xe11   :  { %v1686_v46 = vmax.f32 %v1684_v45, 0.0 }
 0xe13   :  { %1832 = vmatmul.msk.f32.vlgmr.msrb.gmra.mxu0 %vm1699_vm1, %v1686_v46 }
 0xe90   :  { %v1720_v48 = vpop.f32.mrf.mxu0 }
 0xe91   :  { %v1721_v49 = vadd.f32 %v1883_v47, %v1720_v48 }
 0xe93   :  { %v1723_v8 = vadd.f32 %v1721_v49, %v1654_v39 }
 0xe95   :  { %v1726_v50 = vsel %vm285_vm0, %v1723_v8, 0.0 }
 0xe96   :  { %1727 = vadd.xlane.f32.xlu0 %v1726_v50 }
 0xf09   :  { %v1728_v51 = vpop.xlane.xlu0 %1727 }
 0xf0a   :  { %v1729_v52 = vmul.f32 %v1728_v51, %v2673_v29 }
 0xf0c   :  { %v1730_v53 = vsub.f32 %v1723_v8, %v1729_v52 }
 0xf0e   :  { %v1731_v54 = vmul.f32 %v1730_v53, %v1730_v53 }
 0xf10   :  { %v1732_v55 = vsel %vm285_vm0, %v1731_v54, 0.0 }
 0xf11   :  { %1733 = vadd.xlane.f32.xlu2 %v1732_v55 }
 0xf84   :  { %v1734_v56 = vpop.xlane.xlu2 %1733 }
 0xf85   :  { %v1735_v58 = vmul.f32 %v1734_v56, %v2673_v29 }
 0xf87   :  { %v1736_v59 = vadd.f32 1e-05, %v1735_v58 }
 0xf89   :  { %1956 = vrsqrt.f32 %v1736_v59  ;;  %vm1743_vm3 = vweird.f32 %v1736_v59 }
 0xf8f   :  { %v1957_v61 = vpop.eup %1956 }
 0xf90   :  { %v1738_v63 = vmul.f32 %v1957_v61, %v1736_v59  ;;  %vm1744_vm2 = vweird.f32 %v1957_v61 }
 0xf91   :  { %vm1745_vm4 = vmor %vm1743_vm3, %vm1744_vm2 }
 0xf92   :  { %v1739_v0 = vmul.f32 %v1957_v61, %v1738_v63 }
 0xf94   :  { %v1740_v1 = vmul.f32 0.5, %v1739_v0 }
 0xf96   :  { %v1741_v2 = vsub.f32 1.5, %v1740_v1 }
 0xf98   :  { %v1742_v3 = vmul.f32 %v1957_v61, %v1741_v2 }
 0xf9a   :  { %v1746_v6 = vsel %vm1745_vm4, %v1957_v61, %v1742_v3 }
 0xf9b   :  { %v1747_v10 = vmul.f32 %v1746_v6, %v1730_v53 }
 0xf9d   :  { %v1751_v11 = vmul.f32 %v1884_v5, %v1747_v10 }
 0xf9f   :  { %v1755_v12 = vadd.f32 %v1885_v9, %v1751_v11 }
 0xfa1   :  { %1756 = vst.msk [vmem:[%s2856_s20] sm:$0xff] %vm285_vm0, %v1755_v12 }
 0xfa2   :  { %1761 = vsyncpa [#allocation4], 1 }
 0xfa3   :  { %1762 = vsyncpa [#allocation6], 1 }
 0xfa4   :  { %1763 = vsyncpa [#allocation9], 1 }
 0xfa5   :  { %1764 = vsyncpa [#allocation12], 1 }
 0xfa6   :  { %1765 = vsyncpa [#allocation15], 1 }
 0xfa7   :  { %1766 = vsyncpa [#allocation18], 1 }
 0xfa8   :  { %1767 = vsyncpa [#allocation21], 1 }
 0xfa9   :  { %1768 = vsyncpa [#allocation24], 1 }

// kernel: forward.20
= control target key start
LH: loop header
LB: loop body
LE: loop exit
PB: predicated region body
PF: predicated region fallthrough
CT: control target
= control target key end

     0   :  { %s2803_s0 = inlined_call_operand.vmem [shape: f32[8,32], index: 0, kind: input, shape index: {}]   ;;  %s2804_s1 = inlined_call_operand.vmem [shape: f32[16,32], index: 1, kind: input, shape index: {}]   ;;  %s2805_s2 = inlined_call_operand.vmem [shape: f32[32,96], index: 2, kind: input, shape index: {}]   ;;  %s2806_s3 = inlined_call_operand.hbm [shape: f32[1,96], index: 3, kind: input, shape index: {}]   ;;  %s2807_s4 = inlined_call_operand.vmem [shape: f32[32,32], index: 4, kind: input, shape index: {}]   ;;  %s2808_s5 = inlined_call_operand.hbm [shape: f32[1,32], index: 5, kind: input, shape index: {}]   ;;  %s2809_s6 = inlined_call_operand.hbm [shape: f32[1,32], index: 6, kind: input, shape index: {}]   ;;  %s2810_s7 = inlined_call_operand.hbm [shape: f32[1,32], index: 7, kind: input, shape index: {}]   ;;  %s2811_s8 = inlined_call_operand.vmem [shape: f32[32,96], index: 8, kind: input, shape index: {}]   ;;  %s2812_s9 = inlined_call_operand.hbm [shape: f32[1,96], index: 9, kind: input, shape index: {}]   ;;  %s2813_s10 = inlined_call_operand.hbm [shape: f32[32,32], index: 10, kind: input, shape index: {}]   ;;  %s2814_s11 = inlined_call_operand.hbm [shape: f32[1,32], index: 11, kind: input, shape index: {}]   ;;  %s2815_s12 = inlined_call_operand.hbm [shape: f32[1,32], index: 12, kind: input, shape index: {}]   ;;  %s2816_s13 = inlined_call_operand.hbm [shape: f32[1,32], index: 13, kind: input, shape index: {}]   ;;  %s2817_s14 = inlined_call_operand.hbm [shape: f32[32,64], index: 14, kind: input, shape index: {}]   ;;  %s2818_s15 = inlined_call_operand.hbm [shape: f32[1,64], index: 15, kind: input, shape index: {}]   ;;  %s2819_s16 = inlined_call_operand.vmem [shape: f32[64,32], index: 16, kind: input, shape index: {}]   ;;  %s2820_s17 = inlined_call_operand.hbm [shape: f32[1,32], index: 17, kind: input, shape index: {}]   ;;  %s2821_s18 = inlined_call_operand.hbm [shape: f32[1,32], index: 18, kind: input, shape index: {}]   ;;  %s2822_s19 = inlined_call_operand.hbm [shape: f32[1,32], index: 19, kind: input, shape index: {}]   ;;  %s2823_s20 = inlined_call_operand.vmem [shape: f32[8,32], index: 20, kind: output, shape index: {}]  }
   0x1   :  { %2827 = sst [smem:[#allocation33_spill]] %s2803_s0 }
   0x2   :  { %2828 = sst [smem:[#allocation34_spill]] %s2804_s1 }
   0x3   :  { %2829 = sst [smem:[#allocation35_spill]] %s2805_s2 }
   0x4   :  { %2830 = sst [smem:[#allocation36_spill]] %s2806_s3 }
   0x5   :  { %2831 = sst [smem:[#allocation37_spill]] %s2807_s4 }
   0x6   :  { %25 = vsyncpa [#allocation4], 0 }
   0x7   :  { %26 = vsyncpa [#allocation6], 0 }
   0x8   :  { %27 = vsyncpa [#allocation9], 0 }
   0x9   :  { %28 = vsyncpa [#allocation12], 0 }
   0xa   :  { %29 = vsyncpa [#allocation15], 0 }
   0xb   :  { %30 = vsyncpa [#allocation18], 0 }
   0xc   :  { %31 = vsyncpa [#allocation21], 0  ;;  %s57_s23 = sshll.u32 %s2808_s5, 4  ;;  %s58_s23 = int_to_ptr.hbm [resolvable:$true] %s57_s23 }
   0xd   :  { %32 = vsyncpa [#allocation24], 0  ;;  %s2294_s24 = smov [#allocation5]   ;;  %s79_s26 = sshll.u32 %s2810_s7, 4  ;;  %s80_s26 = int_to_ptr.hbm [resolvable:$true] %s79_s26 }
   0xe   :  { %s59_s2 = sshll.u32 %s2294_s24, 4  ;;  %s2295_s27 = smov [#allocation8]   ;;  %s60_s2 = int_to_ptr.vmem [resolvable:$true] %s59_s2 }
   0xf   :  { %62 = dma.hbm_to_vmem [thread:$0]  %s58_s23, 16, %s60_s2, [#allocation6]  }
  0x10   :  { %s81_s28 = sshll.u32 %s2295_s27, 4  ;;  %s102_s30 = sshll.u32 %s2813_s10, 4  ;;  %s82_s28 = int_to_ptr.vmem [resolvable:$true] %s81_s28  ;;  %s103_s30 = int_to_ptr.hbm [resolvable:$true] %s102_s30 }
  0x11   :  { %84 = dma.hbm_to_vmem [thread:$0]  %s80_s26, 16, %s82_s28, [#allocation9]  }
  0x12   :  { %s2296_s5 = smov [#allocation11]   ;;  %s127_s22 = sshll.u32 %s2815_s12, 4  ;;  %s128_s22 = int_to_ptr.hbm [resolvable:$true] %s127_s22 }
  0x13   :  { %s104_s0 = sshll.u32 %s2296_s5, 4  ;;  %s2297_s24 = smov 128   ;;  %s105_s0 = int_to_ptr.vmem [resolvable:$true] %s104_s0 }
  0x14   :  { %s2298_s7 = smov 8   ;;  %s2299_s23 = smov [#allocation14]  }
  0x15   :  { %110 = dma.hbm_to_vmem [thread:$0]  %s103_s30, 512, %s105_s0, [#allocation12], %s2297_s24, %s2297_s24, %s2298_s7  }
  0x16   :  { %s129_s2 = sshll.u32 %s2299_s23, 4  ;;  %s148_s10 = sshll.u32 %s2817_s14, 4  ;;  %s130_s2 = int_to_ptr.vmem [resolvable:$true] %s129_s2  ;;  %s149_s10 = int_to_ptr.hbm [resolvable:$true] %s148_s10 }
  0x17   :  { %132 = dma.hbm_to_vmem [thread:$0]  %s128_s22, 16, %s130_s2, [#allocation15]  }
  0x18   :  { %s175_s28 = sshll.u32 %s2820_s17, 4  ;;  %s2300_s4 = smov [#allocation17]   ;;  %s176_s28 = int_to_ptr.hbm [resolvable:$true] %s175_s28 }
  0x19   :  { %s150_s12 = sshll.u32 %s2300_s4, 4  ;;  %s2301_s29 = smov [#allocation20]   ;;  %s151_s12 = int_to_ptr.vmem [resolvable:$true] %s150_s12 }
  0x1a   :  { %156 = dma.hbm_to_vmem [thread:$0]  %s149_s10, 512, %s151_s12, [#allocation18], %s2297_s24, %s2297_s24, %s2298_s7  }
  0x1b   :  { %s177_s30 = sshll.u32 %s2301_s29, 4  ;;  %s2832_s21 = sld [smem:[#allocation36_spill]]  ;;  %s178_s30 = int_to_ptr.vmem [resolvable:$true] %s177_s30 }
  0x1c   :  { %180 = dma.hbm_to_vmem [thread:$0]  %s176_s28, 16, %s178_s30, [#allocation21]  }
  0x1d   :  { %s68_s23 = sshll.u32 %s2809_s6, 4  ;;  %s2302_s17 = smov [#allocation3]   ;;  %s69_s23 = int_to_ptr.hbm [resolvable:$true] %s68_s23 }
  0x1e   :  { %s46_s2 = sshll.u32 %s2302_s17, 4  ;;  %s2303_s25 = smov [#allocation7]   ;;  %s47_s2 = int_to_ptr.vmem [resolvable:$true] %s46_s2 }
  0x1f   :  { %s70_s24 = sshll.u32 %s2303_s25, 4  ;;  %s92_s26 = sshll.u32 %s2812_s9, 4  ;;  %s71_s24 = int_to_ptr.vmem [resolvable:$true] %s70_s24  ;;  %s93_s26 = int_to_ptr.hbm [resolvable:$true] %s92_s26 }
  0x20   :  { %73 = dma.hbm_to_vmem [thread:$0]  %s69_s23, 16, %s71_s24, [#allocation6]  }
  0x21   :  { %s44_s1 = sshll.u32 %s2832_s21, 4  ;;  %s116_s4 = sshll.u32 %s2814_s11, 4  ;;  %s45_s1 = int_to_ptr.hbm [resolvable:$true] %s44_s1  ;;  %s117_s4 = int_to_ptr.hbm [resolvable:$true] %s116_s4 }
  0x22   :  { %49 = dma.hbm_to_vmem [thread:$0]  %s45_s1, 16, %s47_s2, [#allocation4]  }
  0x23   :  { %s2304_s12 = smov [#allocation10]   ;;  %s2305_s29 = smov [#allocation13]  }
  0x24   :  { %s94_s6 = sshll.u32 %s2304_s12, 4  ;;  %s118_s30 = sshll.u32 %s2305_s29, 4  ;;  %s95_s6 = int_to_ptr.vmem [resolvable:$true] %s94_s6  ;;  %s119_s30 = int_to_ptr.vmem [resolvable:$true] %s118_s30 }
  0x25   :  { %97 = dma.hbm_to_vmem [thread:$0]  %s93_s26, 16, %s95_s6, [#allocation9]  }
  0x26   :  { %s138_s21 = sshll.u32 %s2816_s13, 4  ;;  %s162_s14 = sshll.u32 %s2818_s15, 4  ;;  %s139_s21 = int_to_ptr.hbm [resolvable:$true] %s138_s21  ;;  %s163_s14 = int_to_ptr.hbm [resolvable:$true] %s162_s14 }
  0x27   :  { %121 = dma.hbm_to_vmem [thread:$0]  %s117_s4, 16, %s119_s30, [#allocation12]  }
  0x28   :  { %s2306_s22 = smov [#allocation16]   ;;  %s2307_s23 = smov [#allocation19]  }
  0x29   :  { %s140_s11 = sshll.u32 %s2306_s22, 4  ;;  %s164_s17 = sshll.u32 %s2307_s23, 4  ;;  %s141_s11 = int_to_ptr.vmem [resolvable:$true] %s140_s11  ;;  %s165_s17 = int_to_ptr.vmem [resolvable:$true] %s164_s17 }
  0x2a   :  { %143 = dma.hbm_to_vmem [thread:$0]  %s139_s21, 16, %s141_s11, [#allocation15]  }
  0x2b   :  { %s186_s24 = sshll.u32 %s2821_s18, 4  ;;  %s197_s10 = sshll.u32 %s2822_s19, 4  ;;  %s187_s24 = int_to_ptr.hbm [resolvable:$true] %s186_s24  ;;  %s198_s10 = int_to_ptr.hbm [resolvable:$true] %s197_s10 }
  0x2c   :  { %167 = dma.hbm_to_vmem [thread:$0]  %s163_s14, 16, %s165_s17, [#allocation18]  }
  0x2d   :  { %s2308_s26 = smov [#allocation22]   ;;  %s2309_s27 = smov [#allocation23]  }
  0x2e   :  { %s188_s15 = sshll.u32 %s2308_s26, 4  ;;  %s199_s28 = sshll.u32 %s2309_s27, 4  ;;  %s189_s15 = int_to_ptr.vmem [resolvable:$true] %s188_s15  ;;  %s200_s28 = int_to_ptr.vmem [resolvable:$true] %s199_s28 }
  0x2f   :  { %191 = dma.hbm_to_vmem [thread:$0]  %s187_s24, 16, %s189_s15, [#allocation21]  }
  0x30   :  { %202 = dma.hbm_to_vmem [thread:$0]  %s198_s10, 16, %s200_s28, [#allocation24]  }
  0x31   :  { %2278 = dma.done.wait [#allocation4], 16  }
  0x32   :  { %2279 = vsyncadd [#allocation4], 4294967280 }
  0x33   :  { %2280 = dma.done.wait [#allocation6], 32  }
  0x34   :  { %2281 = vsyncadd [#allocation6], 4294967264 }
  0x35   :  { %2282 = dma.done.wait [#allocation9], 32  }
  0x36   :  { %2283 = vsyncadd [#allocation9], 4294967264 }
  0x37   :  { %2284 = dma.done.wait [#allocation12], 528  }
  0x38   :  { %2285 = vsyncadd [#allocation12], 4294966768 }
  0x39   :  { %2286 = dma.done.wait [#allocation15], 32  }
  0x3a   :  { %2287 = vsyncadd [#allocation15], 4294967264 }
  0x3b   :  { %2288 = dma.done.wait [#allocation18], 528  }
  0x3c   :  { %2289 = vsyncadd [#allocation18], 4294966768 }
  0x3d   :  { %2290 = dma.done.wait [#allocation21], 32  }
  0x3e   :  { %2291 = vsyncadd [#allocation21], 4294967264 }
  0x3f   :  { %2292 = dma.done.wait [#allocation24], 16  }
  0x40   :  { %2293 = vsyncadd [#allocation24], 4294967280  ;;  %s2833_s4 = sld [smem:[#allocation35_spill]]  ;;  %vm270_vm0 = vcmask 261120   ;;  %v1858_v5 = vld [vmem:[#allocation3] ss:$0 sm:$0xff] }
  0x41   :  { %s2834_s1 = sld [smem:[#allocation33_spill]]  ;;  %s2310_s14 = smov 64   ;;  %vm341_vm1 = vcmask 1043456   ;;  %vm297_vm2 = vcmask 64512   ;;  %vm323_vm3 = vcmask 27648   ;;  %vm337_vm4 = vcmask 31744  }
  0x42   :  { %s2311_s22 = smov 120   ;;  %s2312_s11 = smov 96   ;;  %vm364_vm5 = vcmask 60416   ;;  %vm437_vm6 = vcmask 126016   ;;  %vm510_vm7 = vcmask 191616   ;;  %vm583_vm8 = vcmask 257216  }
  0x43   :  { %s2313_s23 = smov 56   ;;  %s2314_s17 = smov 88  }
  0x44   :  { %s2315_s2 = smov 72   ;;  %s2316_s25 = smov 112  }
  0x45   :  { %s2317_s24 = smov 80   ;;  %s2318_s13 = smov 104  }
  0x46   :  { %v265_v0 = vld [vmem:[%s2833_s4 + $0x18] sm:$0xff]  ;;  %v264_v1 = vld [vmem:[%s2833_s4 + $0x10] sm:$0xff]  ;;  %v263_v2 = vld [vmem:[%s2833_s4 + $0x8] sm:$0xff]  ;;  %s2319_s3 = smov 48   ;;  %s2320_s10 = smov 40  }
  0x47   :  { %286 = vmatpush.msra.mxu0 %v265_v0  ;;  %v262_v3 = vld [vmem:[%s2833_s4] sm:$0xff]  ;;  %s2321_s26 = smov 16   ;;  %s2322_s15 = smov 24  }
  0x48   :  { %v2488_v4 = vld [vmem:[%s2834_s1] sm:$0xff]  ;;  %s2835_s18 = sld [smem:[#allocation37_spill]] }
  0x49   :  { %287 = vmatpush.msra.mxu0 %v264_v1  ;;  %s2836_s27 = sld [smem:[#allocation34_spill]] }
  0x4b   :  { %288 = vmatpush.msra.mxu0 %v263_v2 }
  0x4d   :  { %289 = vmatpush.msra.mxu0 %v262_v3 }
  0x4e   :  { %1754 = vmatmul.msk.f32.vlgmr.msra.gmra.mxu0 %vm270_vm0, %v2488_v4 }
  0xcb   :  { %v291_v6 = vpop.f32.mrf.mxu0 }
  0xcc   :  { %v2492_v7 = vadd.f32 %v1858_v5, %v291_v6 }
  0xce   :  { %335 = vrot.lane.b32.xlu2 %v2492_v7, %s2310_s14  ;;  %366 = vrot.lane.b32.xlu1 %v2492_v7, %s2311_s22  ;;  %v2509_v8 = vrot.slane %v2492_v7, 4 }
  0xcf   :  { %295 = vrot.lane.b32.xlu0 %v2492_v7, %s2312_s11 }
  0xd6   :  { %406 = vrot.lane.b32.xlu2 %v2492_v7, %s2313_s23 }
  0xd7   :  { %368 = vrot.lane.b32.xlu0 %v2492_v7, %s2314_s17 }
  0xde   :  { %514 = vrot.lane.b32.xlu2 %v2492_v7, %s2315_s2 }
  0xdf   :  { %439 = vrot.lane.b32.xlu0 %v2492_v7, %s2316_s25 }
  0xe6   :  { %441 = vrot.lane.b32.xlu2 %v2492_v7, %s2317_s24 }
  0xe7   :  { %726 = vrot.lane.b32.xlu0 %v2509_v8, %s2317_s24 }
 0x128   :  { %v336_v9 = vpop.permute.xlu2 %335 }
 0x129   :  { %1757 = vmatpush.msk.msra.mxu2 %vm341_vm1, %v336_v9 }
 0x130   :  { %v407_v10 = vpop.permute.xlu2 %406 }
 0x131   :  { %1761 = vmatpush.msk.msrb.mxu2 %vm341_vm1, %v407_v10 }
 0x138   :  { %v2517_v11 = vpop.permute.xlu2 %514 }
 0x140   :  { %v442_v12 = vpop.permute.xlu2 %441  ;;  %v367_v15 = vpop.permute.xlu1 %366 }
 0x141   :  { %v296_v13 = vpop.permute.xlu0 %295 }
 0x142   :  { %1755 = vmatpush.xpose.msk.msra.mxu1 %vm297_vm2, %v296_v13 }
 0x145   :  { %1756 = vmatmul.msk.f32.vlgmr.msra.gmra.mxu1 %vm297_vm2, %v2492_v7 }
 0x146   :  { %1763 = vmatpush.xpose.msk.msrb.mxu1 %vm297_vm2, %v442_v12 }
 0x149   :  { %v369_v14 = vpop.permute.xlu0 %368 }
 0x14a   :  { %1759 = vmatpush.xpose.msk.msra.mxu3 %vm297_vm2, %v369_v14 }
 0x14d   :  { %1760 = vmatmul.msk.f32.vlgmr.msra.gmra.mxu3 %vm297_vm2, %v367_v15 }
 0x151   :  { %v440_v16 = vpop.permute.xlu0 %439 }
 0x152   :  { %1764 = vmatmul.msk.f32.vlgmr.msrb.gmra.mxu1 %vm297_vm2, %v440_v16 }
 0x159   :  { %v727_v32 = vpop.permute.xlu0 %726 }
 0x1c2   :  { %v319_v17 = vpop.f32.mrf.mxu1 }
 0x1c3   :  { %v322_v18 = vmul.f32 0.35355338, %v319_v17 }
 0x1c5   :  { %v324_v19 = vsel %vm323_vm3, %v322_v18, -inf }
 0x1c6   :  { %325 = vmax.xlane.f32.xlu1 %v324_v19 }
 0x1cf   :  { %v464_v38 = vpop.f32.mrf.mxu1 }
 0x1d0   :  { %v391_v20 = vpop.f32.mrf.mxu3  ;;  %v467_v39 = vmul.f32 0.35355338, %v464_v38 }
 0x1d1   :  { %v394_v21 = vmul.f32 0.35355338, %v391_v20 }
 0x1d2   :  { %v468_v40 = vsel %vm323_vm3, %v467_v39, -inf }
 0x1d3   :  { %v395_v22 = vsel %vm323_vm3, %v394_v21, -inf }
 0x1d4   :  { %396 = vmax.xlane.f32.xlu2 %v395_v22 }
 0x1df   :  { %512 = vrot.lane.b32.xlu1 %v2492_v7, %s2318_s13 }
 0x1e7   :  { %652 = vrot.lane.b32.xlu1 %v2509_v8, %s2311_s22 }
 0x1ec   :  { %586 = vrot.lane.b32.xlu2 %v2509_v8, %s2312_s11 }
 0x1ef   :  { %724 = vrot.lane.b32.xlu1 %v2509_v8, %s2316_s25 }
 0x239   :  { %v326_v23 = vpop.xlane.xlu1 %325 }
 0x23a   :  { %v327_v24 = vsub.f32 %v322_v18, %v326_v23 }
 0x23c   :  { %v328_v25 = vmul.f32 1.442695, %v327_v24 }
 0x23e   :  { %1870 = vpow2.f32 %v328_v25 }
 0x244   :  { %v1871_v26 = vpop.eup %1870 }
 0x245   :  { %v330_v27 = vsel %vm323_vm3, %v1871_v26, 0.0 }
 0x246   :  { %331 = vadd.xlane.f32.xlu2 %v330_v27 }
 0x247   :  { %v397_v28 = vpop.xlane.xlu2 %396 }
 0x248   :  { %v398_v29 = vsub.f32 %v394_v21, %v397_v28 }
 0x24a   :  { %v399_v30 = vmul.f32 1.442695, %v398_v29 }
 0x24c   :  { %1872 = vpow2.f32 %v399_v30 }
 0x24f   :  { %v587_v31 = vpop.permute.xlu2 %586 }
 0x250   :  { %1771 = vmatpush.xpose.msk.msra.mxu1 %vm297_vm2, %v587_v31 }
 0x251   :  { %v513_v33 = vpop.permute.xlu1 %512 }
 0x252   :  { %v1873_v34 = vpop.eup %1872 }
 0x253   :  { %1772 = vmatmul.msk.f32.vlgmr.msra.gmra.mxu1 %vm297_vm2, %v2509_v8  ;;  %v401_v35 = vsel %vm323_vm3, %v1873_v34, 0.0 }
 0x254   :  { %1779 = vmatpush.xpose.msk.msrb.mxu1 %vm297_vm2, %v727_v32  ;;  %402 = vadd.xlane.f32.xlu0 %v401_v35 }
 0x259   :  { %v653_v36 = vpop.permute.xlu1 %652 }
 0x25e   :  { %654 = vrot.lane.b32.xlu2 %v2509_v8, %s2314_s17 }
 0x261   :  { %v725_v37 = vpop.permute.xlu1 %724 }
 0x262   :  { %1780 = vmatmul.msk.f32.vlgmr.msrb.gmra.mxu1 %vm297_vm2, %v725_v37 }
 0x266   :  { %798 = vrot.lane.b32.xlu2 %v2509_v8, %s2315_s2 }
 0x268   :  { %796 = vrot.lane.b32.xlu0 %v2509_v8, %s2318_s13 }
 0x28f   :  { %469 = vmax.xlane.f32.xlu2 %v468_v40 }
 0x2b9   :  { %v332_v41 = vpop.xlane.xlu2 %331 }
 0x2ba   :  { %1874 = vrcp.f32 %v332_v41 }
 0x2c0   :  { %v1875_v42 = vpop.eup %1874 }
 0x2c1   :  { %v655_v43 = vpop.permute.xlu2 %654  ;;  %v334_v44 = vmul.f32 %v1875_v42, %v1871_v26 }
 0x2c2   :  { %1775 = vmatpush.xpose.msk.msrb.mxu0 %vm297_vm2, %v655_v43 }
 0x2c3   :  { %1758 = vmatmul.msk.f32.vlgmr.msra.gmra.mxu2 %vm337_vm4, %v334_v44 }
 0x2c4   :  { %1767 = vmatpush.xpose.msk.msra.mxu2 %vm297_vm2, %v2517_v11 }
 0x2c5   :  { %1776 = vmatmul.msk.f32.vlgmr.msrb.gmra.mxu0 %vm297_vm2, %v653_v36 }
 0x2c7   :  { %v403_v45 = vpop.xlane.xlu0 %402 }
 0x2c8   :  { %1876 = vrcp.f32 %v403_v45 }
 0x2c9   :  { %v799_v46 = vpop.permute.xlu2 %798 }
 0x2ca   :  { %1783 = vmatpush.xpose.msk.msra.mxu0 %vm297_vm2, %v799_v46 }
 0x2ce   :  { %v1877_v47 = vpop.eup %1876 }
 0x2cf   :  { %v405_v48 = vmul.f32 %v1877_v47, %v1873_v34 }
 0x2d0   :  { %v609_v49 = vpop.f32.mrf.mxu1 }
 0x2d1   :  { %v612_v50 = vmul.f32 0.35355338, %v609_v49  ;;  %1762 = vmatmul.msk.f32.vlgmr.msrb.gmra.mxu2 %vm337_vm4, %v405_v48 }
 0x2d3   :  { %v613_v51 = vsel %vm323_vm3, %v612_v50, -inf }
 0x2d4   :  { %614 = vmax.xlane.f32.xlu0 %v613_v51 }
 0x2d9   :  { %1768 = vmatmul.msk.f32.vlgmr.msra.gmra.mxu2 %vm297_vm2, %v513_v33 }
 0x2da   :  { %v797_v52 = vpop.permute.xlu0 %796 }
 0x2db   :  { %1784 = vmatmul.msk.f32.vlgmr.msra.gmra.mxu0 %vm297_vm2, %v797_v52 }
 0x2df   :  { %v749_v12 = vpop.f32.mrf.mxu1 }
 0x2e0   :  { %v752_v13 = vmul.f32 0.35355338, %v749_v12 }
 0x2e2   :  { %v753_v15 = vsel %vm323_vm3, %v752_v13, -inf }
 0x302   :  { %v470_v53 = vpop.xlane.xlu2 %469 }
 0x303   :  { %v471_v54 = vsub.f32 %v467_v39, %v470_v53 }
 0x305   :  { %v472_v55 = vmul.f32 1.442695, %v471_v54 }
 0x307   :  { %1878 = vpow2.f32 %v472_v55 }
 0x30d   :  { %v1879_v60 = vpop.eup %1878 }
 0x30e   :  { %v474_v61 = vsel %vm323_vm3, %v1879_v60, 0.0 }
 0x342   :  { %v677_v56 = vpop.f32.mrf.mxu0 }
 0x343   :  { %v680_v57 = vmul.f32 0.35355338, %v677_v56 }
 0x345   :  { %v681_v58 = vsel %vm323_vm3, %v680_v57, -inf }
 0x346   :  { %v361_v59 = vpop.f32.mrf.mxu2  ;;  %682 = vmax.xlane.f32.xlu2 %v681_v58 }
 0x347   :  { %365 = vst.msk [vmem:[#allocation2] sm:$0xf] %vm364_vm5, %v361_v59  ;;  %v615_v62 = vpop.xlane.xlu0 %614 }
 0x348   :  { %v616_v63 = vsub.f32 %v612_v50, %v615_v62 }
 0x34a   :  { %v617_v1 = vmul.f32 1.442695, %v616_v63 }
 0x34c   :  { %1880 = vpow2.f32 %v617_v1 }
 0x34e   :  { %475 = vadd.xlane.f32.xlu2 %v474_v61 }
 0x352   :  { %v2567_v11 = vpop.eup %1880 }
 0x353   :  { %v619_v14 = vsel %vm323_vm3, %v2567_v11, 0.0 }
 0x354   :  { %v2563_v0 = vpop.f32.mrf.mxu2 }
 0x358   :  { %v821_v2 = vpop.f32.mrf.mxu0 }
 0x359   :  { %v824_v3 = vmul.f32 0.35355338, %v821_v2  ;;  %v872_v2 = vld [vmem:[%s2835_s18 + $0x18] sm:$0xff] }
 0x35a   :  { %892 = vmatpush.msra.mxu1 %v872_v2 }
 0x35b   :  { %v825_v5 = vsel %vm323_vm3, %v824_v3, -inf }
 0x35c   :  { %v537_v6 = vpop.f32.mrf.mxu2  ;;  %826 = vmax.xlane.f32.xlu0 %v825_v5  ;;  %v870_v5 = vld [vmem:[%s2835_s18 + $0x8] sm:$0xff] }
 0x35d   :  { %v540_v9 = vmul.f32 0.35355338, %v537_v6  ;;  %v869_v6 = vld [vmem:[%s2835_s18] sm:$0xff] }
 0x35f   :  { %v541_v10 = vsel %vm323_vm3, %v540_v9, -inf }
 0x360   :  { %542 = vmax.xlane.f32.xlu1 %v541_v10 }
 0x364   :  { %620 = vadd.xlane.f32.xlu0 %v619_v14  ;;  %v1859_v14 = vld [vmem:[#allocation5] ss:$0 sm:$0xff] }
 0x366   :  { %479 = vrot.lane.b32.xlu2 %v2492_v7, %s2319_s3 }
 0x368   :  { %754 = vmax.xlane.f32.xlu1 %v753_v15 }
 0x378   :  { %552 = vrot.lane.b32.xlu0 %v2492_v7, %s2320_s10 }
 0x380   :  { %692 = vrot.lane.b32.xlu0 %v2509_v8, %s2313_s23 }
 0x388   :  { %764 = vrot.lane.b32.xlu0 %v2509_v8, %s2319_s3 }
 0x390   :  { %836 = vrot.lane.b32.xlu0 %v2509_v8, %s2320_s10 }
 0x3b9   :  { %v683_v16 = vpop.xlane.xlu2 %682 }
 0x3ba   :  { %v684_v17 = vsub.f32 %v680_v57, %v683_v16 }
 0x3bc   :  { %v685_v18 = vmul.f32 1.442695, %v684_v17 }
 0x3be   :  { %1882 = vpow2.f32 %v685_v18 }
 0x3c1   :  { %v476_v19 = vpop.xlane.xlu2 %475 }
 0x3c2   :  { %1884 = vrcp.f32 %v476_v19  ;;  %v2323_v19 = vmov 32.0  }
 0x3c4   :  { %v1883_v20 = vpop.eup %1882 }
 0x3c5   :  { %v687_v21 = vsel %vm323_vm3, %v1883_v20, 0.0 }
 0x3c6   :  { %688 = vadd.xlane.f32.xlu1 %v687_v21  ;;  %v943_v21 = vld [vmem:[%s2811_s8 + $0x18] sm:$0xff] }
 0x3c8   :  { %v1885_v22 = vpop.eup %1884 }
 0x3c9   :  { %v480_v23 = vpop.permute.xlu2 %479  ;;  %v478_v7 = vmul.f32 %v1885_v22, %v1879_v60 }
 0x3ca   :  { %1765 = vmatpush.msk.msrb.mxu3 %vm341_vm1, %v480_v23 }
 0x3cb   :  { %1766 = vmatmul.msk.f32.vlgmr.msrb.gmra.mxu3 %vm337_vm4, %v478_v7  ;;  %v941_v7 = vld [vmem:[%s2811_s8 + $0x8] sm:$0xff] }
 0x3cf   :  { %v827_v24 = vpop.xlane.xlu0 %826 }
 0x3d0   :  { %v828_v25 = vsub.f32 %v824_v3, %v827_v24  ;;  %v871_v3 = vld [vmem:[%s2835_s18 + $0x10] sm:$0xff] }
 0x3d1   :  { %893 = vmatpush.msra.mxu1 %v871_v3 }
 0x3d2   :  { %v829_v26 = vmul.f32 1.442695, %v828_v25 }
 0x3d3   :  { %v543_v27 = vpop.xlane.xlu1 %542  ;;  %894 = vmatpush.msra.mxu1 %v870_v5 }
 0x3d4   :  { %1886 = vpow2.f32 %v829_v26  ;;  %v544_v32 = vsub.f32 %v540_v9, %v543_v27 }
 0x3d5   :  { %895 = vmatpush.msra.mxu1 %v869_v6 }
 0x3d6   :  { %v545_v34 = vmul.f32 1.442695, %v544_v32 }
 0x3d7   :  { %v621_v35 = vpop.xlane.xlu0 %620 }
 0x3da   :  { %v1887_v28 = vpop.eup %1886 }
 0x3db   :  { %v755_v29 = vpop.xlane.xlu1 %754  ;;  %v831_v30 = vsel %vm323_vm3, %v1887_v28, 0.0 }
 0x3dc   :  { %v756_v31 = vsub.f32 %v752_v13, %v755_v29  ;;  %832 = vadd.xlane.f32.xlu2 %v831_v30 }
 0x3de   :  { %v757_v33 = vmul.f32 1.442695, %v756_v31 }
 0x3e0   :  { %1888 = vpow2.f32 %v757_v33 }
 0x3e1   :  { %1890 = vpow2.f32 %v545_v34 }
 0x3e6   :  { %v1889_v36 = vpop.eup %1888 }
 0x3e7   :  { %v759_v37 = vsel %vm323_vm3, %v1889_v36, 0.0  ;;  %v1891_v39 = vpop.eup %1890 }
 0x3e8   :  { %760 = vadd.xlane.f32.xlu1 %v759_v37  ;;  %v547_v40 = vsel %vm323_vm3, %v1891_v39, 0.0 }
 0x3ea   :  { %v553_v38 = vpop.permute.xlu0 %552 }
 0x3eb   :  { %1769 = vmatpush.msk.msrb.mxu2 %vm341_vm1, %v553_v38 }
 0x3f0   :  { %548 = vadd.xlane.f32.xlu1 %v547_v40 }
 0x3f2   :  { %v693_v41 = vpop.permute.xlu0 %692 }
 0x3f3   :  { %1777 = vmatpush.msk.msra.mxu2 %vm341_vm1, %v693_v41  ;;  %v260_v41 = vld [vmem:[%s2836_s27] sm:$0xff] }
 0x3fa   :  { %v765_v45 = vpop.permute.xlu0 %764 }
 0x402   :  { %v837_v49 = vpop.permute.xlu0 %836 }
 0x409   :  { %624 = vrot.lane.b32.xlu1 %v2509_v8, %s2310_s14 }
 0x411   :  { %434 = vrot.lane.b32.xlu1 %v2563_v0, %s2298_s7 }
 0x439   :  { %v689_v43 = vpop.xlane.xlu1 %688 }
 0x44e   :  { %v503_v42 = vpop.f32.mrf.mxu3 }
 0x44f   :  { %507 = vrot.lane.b32.xlu1 %v503_v42, %s2321_s26  ;;  %v833_v8 = vpop.xlane.xlu2 %832  ;;  %v261_v42 = vld [vmem:[%s2836_s27 + $0x8] sm:$0xff] }
 0x45b   :  { %v761_v44 = vpop.xlane.xlu1 %760 }
 0x463   :  { %v549_v46 = vpop.xlane.xlu1 %548 }
 0x464   :  { %1892 = vrcp.f32 %v549_v46 }
 0x465   :  { %1894 = vrcp.f32 %v689_v43  ;;  %v1862_v43 = vld [vmem:[#allocation10] ss:$0 sm:$0xff] }
 0x466   :  { %1896 = vrcp.f32 %v621_v35 }
 0x467   :  { %1898 = vrcp.f32 %v833_v8 }
 0x468   :  { %1900 = vrcp.f32 %v761_v44 }
 0x469   :  { %1902 = vrcp.f32 %v2323_v19 }
 0x46a   :  { %v1893_v47 = vpop.eup %1892 }
 0x46b   :  { %v551_v48 = vmul.f32 %v1893_v47, %v1891_v39  ;;  %v1895_v50 = vpop.eup %1894 }
 0x46c   :  { %v691_v51 = vmul.f32 %v1895_v50, %v1883_v20  ;;  %v1897_v52 = vpop.eup %1896  ;;  %v942_v20 = vld [vmem:[%s2811_s8 + $0x10] sm:$0xff] }
 0x46d   :  { %1770 = vmatmul.msk.f32.vlgmr.msrb.gmra.mxu2 %vm337_vm4, %v551_v48  ;;  %v1899_v53 = vpop.eup %1898  ;;  %v623_v54 = vmul.f32 %v1897_v52, %v2567_v11  ;;  %v1848_v22 = vpack.i.bf16 %v942_v20, %v943_v21  ;;  %v1860_v52 = vld [vmem:[#allocation7] ss:$0 sm:$0xff] }
 0x46e   :  { %1785 = vmatpush.msk.msrb.mxu2 %vm341_vm1, %v837_v49  ;;  %v835_v55 = vmul.f32 %v1899_v53, %v1887_v28  ;;  %v1901_v57 = vpop.eup %1900 }
 0x46f   :  { %v763_v58 = vmul.f32 %v1901_v57, %v1889_v36  ;;  %v1903_v23 = vpop.eup %1902 }
 0x470   :  { %v907_v24 = vmul.f32 32.0, %v1903_v23  ;;  %vm911_vm9 = vweird.f32 %v1903_v23 }
 0x472   :  { %v908_v26 = vsub.f32 1.0, %v907_v24 }
 0x474   :  { %v909_v27 = vmul.f32 %v1903_v23, %v908_v26 }
 0x475   :  { %1778 = vmatmul.msk.f32.vlgmr.msra.gmra.mxu2 %vm337_vm4, %v691_v51 }
 0x476   :  { %v910_v28 = vadd.f32 %v1903_v23, %v909_v27 }
 0x478   :  { %v2640_v29 = vsel %vm911_vm9, %v1903_v23, %v910_v28 }
 0x47b   :  { %v625_v56 = vpop.permute.xlu1 %624 }
 0x47c   :  { %1773 = vmatpush.msk.msra.mxu3 %vm341_vm1, %v625_v56 }
 0x47d   :  { %1774 = vmatmul.msk.f32.vlgmr.msra.gmra.mxu3 %vm337_vm4, %v623_v54  ;;  %1786 = vmatmul.msk.f32.vlgmr.msrb.gmra.mxu2 %vm337_vm4, %v835_v55  ;;  %v1861_v55 = vld [vmem:[#allocation8] ss:$0 sm:$0xff] }
 0x47e   :  { %1781 = vmatpush.msk.msrb.mxu3 %vm341_vm1, %v765_v45  ;;  %vm1684_vm1 = vcmask 523264  }
 0x480   :  { %963 = vmatpush.msra.mxu3 %v943_v21 }
 0x482   :  { %964 = vmatpush.msra.mxu3 %v942_v20 }
 0x483   :  { %v435_v59 = vpop.permute.xlu1 %434 }
 0x484   :  { %438 = vst.msk [vmem:[#allocation2] sm:$0xf] %vm437_vm6, %v435_v59  ;;  %965 = vmatpush.msra.mxu3 %v941_v7 }
 0x485   :  { %1782 = vmatmul.msk.f32.vlgmr.msrb.gmra.mxu3 %vm337_vm4, %v763_v58 }
 0x4c1   :  { %v508_v60 = vpop.permute.xlu1 %507 }
 0x4c2   :  { %511 = vst.msk [vmem:[#allocation2] sm:$0xf] %vm510_vm7, %v508_v60 }
 0x4f0   :  { %v576_v61 = vpop.f32.mrf.mxu2 }
 0x4f1   :  { %580 = vrot.lane.b32.xlu1 %v576_v61, %s2322_s15 }
 0x4f8   :  { %v716_v62 = vpop.f32.mrf.mxu2 }
 0x4f9   :  { %720 = vrot.lane.b32.xlu0 %v716_v62, %s2298_s7 }
 0x500   :  { %v648_v63 = vpop.f32.mrf.mxu3  ;;  %v860_v0 = vpop.f32.mrf.mxu2 }
 0x501   :  { %651 = vst.msk [vmem:[#allocation2 + $0x4] sm:$0xf] %vm364_vm5, %v648_v63  ;;  %864 = vrot.lane.b32.xlu2 %v860_v0, %s2322_s15 }
 0x508   :  { %v788_v1 = vpop.f32.mrf.mxu3 }
 0x509   :  { %792 = vrot.lane.b32.xlu0 %v788_v1, %s2321_s26  ;;  %1849 = vrot.lane.b32.xlu2 %v1848_v22, %s2312_s11 }
 0x55b   :  { %v865_v12 = vpop.permute.xlu2 %864 }
 0x563   :  { %v581_v9 = vpop.permute.xlu1 %580  ;;  %v1850_v35 = vpop.permute.xlu2 %1849 }
 0x564   :  { %584 = vst.msk [vmem:[#allocation2] sm:$0xf] %vm583_vm8, %v581_v9  ;;  %v1852_v36 = vunpack.i.h.bf16 %v1850_v35  ;;  %v1851_v37 = vunpack.i.l.bf16 %v1850_v35 }
 0x566   :  { %1008 = vmatpush.msrb.mxu0 %v1851_v37 }
 0x568   :  { %1009 = vmatpush.msrb.mxu0 %v1852_v36 }
 0x56b   :  { %v721_v10 = vpop.permute.xlu0 %720 }
 0x56c   :  { %723 = vst.msk [vmem:[#allocation2 + $0x4] sm:$0xf] %vm437_vm6, %v721_v10 }
 0x57b   :  { %v793_v11 = vpop.permute.xlu0 %792 }
 0x57c   :  { %795 = vst.msk [vmem:[#allocation2 + $0x4] sm:$0xf] %vm510_vm7, %v793_v11 }
 0x57d   :  { %867 = vst.msk [vmem:[#allocation2 + $0x4] sm:$0xf] %vm583_vm8, %v865_v12 }
 0x584   :  { %v868_v13 = vld [vmem:[#allocation2] sm:$0xff] }
 0x585   :  { %1787 = vmatmul.msk.f32.vlgmr.msra.gmra.mxu1 %vm270_vm0, %v868_v13 }
 0x602   :  { %v897_v15 = vpop.f32.mrf.mxu1 }
 0x603   :  { %v898_v16 = vadd.f32 %v1859_v14, %v897_v15 }
 0x605   :  { %v900_v17 = vadd.f32 %v898_v16, %v2488_v4  ;;  %v940_v4 = vld [vmem:[%s2811_s8] sm:$0xff] }
 0x606   :  { %v1853_v25 = vpack.i.bf16 %v940_v4, %v941_v7  ;;  %966 = vmatpush.msra.mxu3 %v940_v4 }
 0x607   :  { %v903_v18 = vsel %vm270_vm0, %v900_v17, 0.0 }
 0x608   :  { %904 = vadd.xlane.f32.xlu0 %v903_v18  ;;  %1854 = vrot.lane.b32.xlu2 %v1853_v25, %s2312_s11 }
 0x610   :  { %987 = vrot.lane.b32.xlu2 %v1862_v43, %s2312_s11 }
 0x662   :  { %v1855_v38 = vpop.permute.xlu2 %1854 }
 0x663   :  { %v1856_v39 = vunpack.i.l.bf16 %v1855_v38  ;;  %v1857_v40 = vunpack.i.h.bf16 %v1855_v38 }
 0x665   :  { %1010 = vmatpush.msrb.mxu0 %v1856_v39 }
 0x667   :  { %1011 = vmatpush.msrb.mxu0 %v1857_v40 }
 0x668   :  { %1789 = vmatmul.msk.f32.vlgmr.msrb.gmra.mxu0 %vm270_vm0, %v260_v41 }
 0x66a   :  { %v988_v58 = vpop.permute.xlu2 %987 }
 0x670   :  { %1790 = vmatmul.msk.f32.gmra.mxu0 %vm270_vm0, %v261_v42 }
 0x67b   :  { %v905_v30 = vpop.xlane.xlu0 %904 }
 0x67c   :  { %v913_v31 = vmul.f32 %v2640_v29, %v905_v30 }
 0x67e   :  { %v914_v32 = vsub.f32 %v900_v17, %v913_v31 }
 0x680   :  { %v915_v33 = vmul.f32 %v914_v32, %v914_v32 }
 0x682   :  { %v916_v34 = vsel %vm270_vm0, %v915_v33, 0.0 }
 0x683   :  { %917 = vadd.xlane.f32.xlu1 %v916_v34 }
 0x6e5   :  { %v1013_v59 = vpop.f32.mrf.mxu0 }
 0x6e6   :  { %v2658_v60 = vadd.f32 %v1013_v59, %v988_v58 }
 0x6e8   :  { %1057 = vrot.lane.b32.xlu1 %v2658_v60, %s2312_s11  ;;  %1086 = vrot.lane.b32.xlu2 %v2658_v60, %s2311_s22 }
 0x6e9   :  { %1791 = vmatpush.xpose.msk.msra.mxu2 %vm297_vm2, %v2658_v60 }
 0x6ed   :  { %v1016_v61 = vpop.f32.mrf.mxu0 }
 0x6ee   :  { %v2670_v62 = vadd.f32 %v1016_v61, %v988_v58 }
 0x6f0   :  { %1157 = vrot.lane.b32.xlu2 %v2658_v60, %s2316_s25  ;;  %1364 = vrot.lane.b32.xlu1 %v2670_v62, %s2311_s22 }
 0x6f6   :  { %v918_v44 = vpop.xlane.xlu1 %917 }
 0x6f7   :  { %v919_v45 = vmul.f32 %v918_v44, %v2640_v29 }
 0x6f8   :  { %1228 = vrot.lane.b32.xlu2 %v2658_v60, %s2318_s13 }
 0x6f9   :  { %v920_v46 = vadd.f32 1e-05, %v919_v45 }
 0x6fb   :  { %1904 = vrsqrt.f32 %v920_v46  ;;  %vm927_vm11 = vweird.f32 %v920_v46 }
 0x701   :  { %v1905_v47 = vpop.eup %1904 }
 0x702   :  { %v922_v48 = vmul.f32 %v1905_v47, %v920_v46  ;;  %vm928_vm10 = vweird.f32 %v1905_v47 }
 0x703   :  { %vm929_vm12 = vmor %vm927_vm11, %vm928_vm10 }
 0x704   :  { %v923_v49 = vmul.f32 %v1905_v47, %v922_v48 }
 0x706   :  { %v924_v8 = vmul.f32 0.5, %v923_v49 }
 0x708   :  { %v925_v50 = vsub.f32 1.5, %v924_v8 }
 0x70a   :  { %v926_v51 = vmul.f32 %v1905_v47, %v925_v50 }
 0x70c   :  { %v930_v53 = vsel %vm929_vm12, %v1905_v47, %v926_v51 }
 0x70d   :  { %v931_v54 = vmul.f32 %v930_v53, %v914_v32 }
 0x70f   :  { %v935_v56 = vmul.f32 %v1860_v52, %v931_v54 }
 0x711   :  { %v2654_v57 = vadd.f32 %v1861_v55, %v935_v56 }
 0x713   :  { %1788 = vmatmul.msk.f32.vlgmr.msra.gmra.mxu3 %vm270_vm0, %v2654_v57 }
 0x742   :  { %v1087_v2 = vpop.permute.xlu2 %1086 }
 0x743   :  { %1794 = vmatpush.xpose.msk.msrb.mxu3 %vm297_vm2, %v1087_v2 }
 0x74a   :  { %v1158_v3 = vpop.permute.xlu2 %1157 }
 0x752   :  { %v1229_v5 = vpop.permute.xlu2 %1228 }
 0x753   :  { %1800 = vmatpush.xpose.msk.msra.mxu0 %vm297_vm2, %v1229_v5 }
 0x75a   :  { %v1058_v6 = vpop.permute.xlu1 %1057 }
 0x75b   :  { %1078 = vmatpush.msrb.mxu1 %v1058_v6 }
 0x75d   :  { %1797 = vmatpush.xpose.msk.msra.mxu1 %vm297_vm2, %v1158_v3 }
 0x762   :  { %v1365_v9 = vpop.permute.xlu1 %1364 }
 0x763   :  { %1806 = vmatpush.xpose.msk.msrb.mxu0 %vm297_vm2, %v1365_v9 }
 0x796   :  { %v968_v63 = vpop.f32.mrf.mxu3 }
 0x797   :  { %v969_v0 = vadd.f32 %v1862_v43, %v968_v63 }
 0x799   :  { %1226 = vrot.lane.b32.xlu2 %v969_v0, %s2318_s13  ;;  %1792 = vmatmul.msk.f32.vlgmr.msra.gmra.mxu2 %vm297_vm2, %v969_v0  ;;  %v1297_v1 = vrot.slane %v969_v0, 4 }
 0x7a1   :  { %1435 = vrot.lane.b32.xlu2 %v2670_v62, %s2316_s25 }
 0x7a9   :  { %1504 = vrot.lane.b32.xlu2 %v1297_v1, %s2318_s13 }
 0x7f3   :  { %v1227_v10 = vpop.permute.xlu2 %1226 }
 0x7f4   :  { %1801 = vmatmul.msk.f32.vlgmr.msra.gmra.mxu0 %vm297_vm2, %v1227_v10 }
 0x7fb   :  { %v1436_v26 = vpop.permute.xlu2 %1435 }
 0x803   :  { %v1505_v32 = vpop.permute.xlu2 %1504 }
 0x81c   :  { %v1042_v11 = vpop.f32.mrf.mxu2 }
 0x81d   :  { %v1045_v12 = vmul.f32 0.35355338, %v1042_v11 }
 0x81f   :  { %v1046_v13 = vsel %vm364_vm5, %v1045_v12, -inf }
 0x820   :  { %1047 = vmax.xlane.f32.xlu0 %v1046_v13 }
 0x834   :  { %1084 = vrot.lane.b32.xlu0 %v969_v0, %s2311_s22 }
 0x83c   :  { %1155 = vrot.lane.b32.xlu0 %v969_v0, %s2316_s25 }
 0x844   :  { %1362 = vrot.lane.b32.xlu0 %v1297_v1, %s2311_s22 }
 0x84c   :  { %1433 = vrot.lane.b32.xlu0 %v1297_v1, %s2316_s25 }
 0x871   :  { %v1251_v14 = vpop.f32.mrf.mxu0 }
 0x872   :  { %v1254_v15 = vmul.f32 0.35355338, %v1251_v14 }
 0x874   :  { %v1255_v16 = vsel %vm364_vm5, %v1254_v15, -inf }
 0x875   :  { %1256 = vmax.xlane.f32.xlu2 %v1255_v16 }
 0x893   :  { %v1048_v17 = vpop.xlane.xlu0 %1047 }
 0x894   :  { %v1049_v18 = vsub.f32 %v1045_v12, %v1048_v17 }
 0x896   :  { %v1050_v19 = vmul.f32 1.442695, %v1049_v18 }
 0x898   :  { %1906 = vpow2.f32 %v1050_v19 }
 0x89e   :  { %v1907_v20 = vpop.eup %1906 }
 0x89f   :  { %v1052_v21 = vsel %vm364_vm5, %v1907_v20, 0.0 }
 0x8a0   :  { %1053 = vadd.xlane.f32.xlu1 %v1052_v21 }
 0x8a6   :  { %v1085_v22 = vpop.permute.xlu0 %1084 }
 0x8a7   :  { %1795 = vmatmul.msk.f32.vlgmr.msrb.gmra.mxu3 %vm297_vm2, %v1085_v22 }
 0x8ae   :  { %v1156_v23 = vpop.permute.xlu0 %1155 }
 0x8b6   :  { %v1363_v4 = vpop.permute.xlu0 %1362 }
 0x8b7   :  { %1807 = vmatmul.msk.f32.vlgmr.msrb.gmra.mxu0 %vm297_vm2, %v1363_v4 }
 0x8b9   :  { %1506 = vrot.lane.b32.xlu1 %v2670_v62, %s2318_s13 }
 0x8be   :  { %v1434_v33 = vpop.permute.xlu0 %1433 }
 0x8e8   :  { %v1257_v41 = vpop.xlane.xlu2 %1256 }
 0x8e9   :  { %v1258_v45 = vsub.f32 %v1254_v15, %v1257_v41 }
 0x8eb   :  { %v1259_v46 = vmul.f32 1.442695, %v1258_v45 }
 0x913   :  { %v1054_v7 = vpop.xlane.xlu1 %1053 }
 0x914   :  { %1908 = vrcp.f32 %v1054_v7 }
 0x91a   :  { %v1909_v24 = vpop.eup %1908 }
 0x91b   :  { %v1056_v25 = vmul.f32 %v1909_v24, %v1907_v20 }
 0x91d   :  { %1793 = vmatmul.msk.f32.vlgmr.msrb.gmra.mxu1 %vm297_vm2, %v1056_v25 }
 0x91e   :  { %1803 = vmatpush.xpose.msk.msrb.mxu1 %vm297_vm2, %v2670_v62 }
 0x925   :  { %1798 = vmatmul.msk.f32.vlgmr.msra.gmra.mxu1 %vm297_vm2, %v1156_v23 }
 0x926   :  { %1809 = vmatpush.xpose.msk.msra.mxu1 %vm297_vm2, %v1436_v26 }
 0x92a   :  { %v1109_v27 = vpop.f32.mrf.mxu3 }
 0x92b   :  { %v1112_v28 = vmul.f32 0.35355338, %v1109_v27  ;;  %v1507_v30 = vpop.permute.xlu1 %1506 }
 0x92c   :  { %1812 = vmatpush.xpose.msk.msra.mxu0 %vm297_vm2, %v1507_v30 }
 0x92d   :  { %1804 = vmatmul.msk.f32.vlgmr.msrb.gmra.mxu1 %vm297_vm2, %v1297_v1  ;;  %v1113_v31 = vsel %vm364_vm5, %v1112_v28, -inf }
 0x92e   :  { %1114 = vmax.xlane.f32.xlu1 %v1113_v31 }
 0x92f   :  { %1813 = vmatmul.msk.f32.vlgmr.msra.gmra.mxu0 %vm297_vm2, %v1505_v32 }
 0x934   :  { %v1387_v34 = vpop.f32.mrf.mxu0 }
 0x935   :  { %v1390_v35 = vmul.f32 0.35355338, %v1387_v34  ;;  %1810 = vmatmul.msk.f32.vlgmr.msra.gmra.mxu1 %vm297_vm2, %v1434_v33 }
 0x937   :  { %v1391_v36 = vsel %vm364_vm5, %v1390_v35, -inf }
 0x938   :  { %1392 = vmax.xlane.f32.xlu2 %v1391_v36 }
 0x99a   :  { %v1080_v37 = vpop.f32.mrf.mxu1 }
 0x99b   :  { %1083 = vst.msk [vmem:[#allocation2] sm:$0xf] %vm364_vm5, %v1080_v37 }
 0x9a1   :  { %v1115_v38 = vpop.xlane.xlu1 %1114 }
 0x9a2   :  { %v1116_v39 = vsub.f32 %v1112_v28, %v1115_v38  ;;  %v1180_v40 = vpop.f32.mrf.mxu1 }
 0x9a3   :  { %v1183_v42 = vmul.f32 0.35355338, %v1180_v40 }
 0x9a4   :  { %v1117_v43 = vmul.f32 1.442695, %v1116_v39 }
 0x9a5   :  { %v1184_v44 = vsel %vm364_vm5, %v1183_v42, -inf }
 0x9a6   :  { %1910 = vpow2.f32 %v1117_v43  ;;  %1185 = vmax.xlane.f32.xlu0 %v1184_v44 }
 0x9a7   :  { %1912 = vpow2.f32 %v1259_v46 }
 0x9aa   :  { %v1320_v52 = vpop.f32.mrf.mxu1 }
 0x9ab   :  { %v1393_v47 = vpop.xlane.xlu2 %1392  ;;  %v1323_v63 = vmul.f32 0.35355338, %v1320_v52 }
 0x9ac   :  { %v1911_v48 = vpop.eup %1910  ;;  %v1394_v49 = vsub.f32 %v1390_v35, %v1393_v47  ;;  %v1529_v8 = vpop.f32.mrf.mxu0 }
 0x9ad   :  { %v2708_v50 = vmul.f32 0.35355338, %v1529_v8  ;;  %v1119_v51 = vsel %vm364_vm5, %v1911_v48, 0.0  ;;  %v2713_v55 = vpop.eup %1912  ;;  %v1324_v1 = vsel %vm364_vm5, %v1323_v63, -inf }
 0x9ae   :  { %v1395_v53 = vmul.f32 1.442695, %v1394_v49  ;;  %1120 = vadd.xlane.f32.xlu2 %v1119_v51  ;;  %v1261_v58 = vsel %vm364_vm5, %v2713_v55, 0.0 }
 0x9af   :  { %v1533_v54 = vsel %vm364_vm5, %v2708_v50, -inf }
 0x9b0   :  { %1914 = vpow2.f32 %v1395_v53  ;;  %1534 = vmax.xlane.f32.xlu1 %v1533_v54 }
 0x9b2   :  { %v1458_v61 = vpop.f32.mrf.mxu1 }
 0x9b3   :  { %v1461_v0 = vmul.f32 0.35355338, %v1458_v61 }
 0x9b5   :  { %v1462_v2 = vsel %vm364_vm5, %v1461_v0, -inf }
 0x9b6   :  { %v2715_v56 = vpop.eup %1914 }
 0x9b7   :  { %v1397_v59 = vsel %vm364_vm5, %v2715_v56, 0.0 }
 0x9b8   :  { %1262 = vadd.xlane.f32.xlu1 %v1261_v58  ;;  %1398 = vadd.xlane.f32.xlu0 %v1397_v59 }
 0x9c0   :  { %1325 = vmax.xlane.f32.xlu1 %v1324_v1  ;;  %1463 = vmax.xlane.f32.xlu0 %v1462_v2  ;;  %v1579_v1 = vld [vmem:[#allocation11 + $0x18] sm:$0xff]  ;;  %v1578_v2 = vld [vmem:[#allocation11 + $0x10] sm:$0xff] }
 0x9c1   :  { %1599 = vmatpush.msrb.mxu1 %v1579_v1 }
 0x9c3   :  { %1600 = vmatpush.msrb.mxu1 %v1578_v2 }
 0x9c6   :  { %1124 = vrot.lane.b32.xlu2 %v2658_v60, %s2314_s17 }
 0x9d9   :  { %1195 = vrot.lane.b32.xlu1 %v2658_v60, %s2317_s24 }
 0x9e1   :  { %1335 = vrot.lane.b32.xlu1 %v2670_v62, %s2312_s11 }
 0x9e9   :  { %1402 = vrot.lane.b32.xlu1 %v2670_v62, %s2314_s17 }
 0x9f1   :  { %1473 = vrot.lane.b32.xlu1 %v2670_v62, %s2317_s24 }
 0x9f9   :  { %1544 = vrot.lane.b32.xlu1 %v2670_v62, %s2315_s2 }
 0xa19   :  { %v1186_v3 = vpop.xlane.xlu0 %1185 }
 0xa1a   :  { %v1187_v5 = vsub.f32 %v1183_v42, %v1186_v3  ;;  %v1577_v3 = vld [vmem:[#allocation11 + $0x8] sm:$0xff] }
 0xa1b   :  { %1601 = vmatpush.msrb.mxu1 %v1577_v3 }
 0xa1c   :  { %v1188_v6 = vmul.f32 1.442695, %v1187_v5  ;;  %v1576_v5 = vld [vmem:[#allocation11] sm:$0xff] }
 0xa1d   :  { %1602 = vmatpush.msrb.mxu1 %v1576_v5  ;;  %v1868_v5 = vld [vmem:[#allocation22] ss:$0 sm:$0xff] }
 0xa1e   :  { %1916 = vpow2.f32 %v1188_v6 }
 0xa21   :  { %v1121_v9 = vpop.xlane.xlu2 %1120 }
 0xa22   :  { %1918 = vrcp.f32 %v1121_v9 }
 0xa23   :  { %v1535_v10 = vpop.xlane.xlu1 %1534 }
 0xa24   :  { %v1917_v11 = vpop.eup %1916  ;;  %v1536_v27 = vsub.f32 %v2708_v50, %v1535_v10  ;;  %v1863_v10 = vld [vmem:[#allocation13] ss:$0 sm:$0xff] }
 0xa25   :  { %v1190_v12 = vsel %vm364_vm5, %v1917_v11, 0.0 }
 0xa26   :  { %1191 = vadd.xlane.f32.xlu0 %v1190_v12  ;;  %v1537_v28 = vmul.f32 1.442695, %v1536_v27  ;;  %v1675_v27 = vld [vmem:[%s2819_s16 + $0x18] sm:$0xff] }
 0xa28   :  { %v1919_v13 = vpop.eup %1918 }
 0xa29   :  { %v1123_v14 = vmul.f32 %v1919_v13, %v1911_v48  ;;  %v1125_v15 = vpop.permute.xlu2 %1124 }
 0xa2a   :  { %1145 = vmatpush.msrb.mxu2 %v1125_v15 }
 0xa2b   :  { %v1263_v16 = vpop.xlane.xlu1 %1262  ;;  %1796 = vmatmul.msk.f32.vlgmr.msrb.gmra.mxu2 %vm297_vm2, %v1123_v14  ;;  %v1399_v17 = vpop.xlane.xlu0 %1398 }
 0xa33   :  { %v1326_v62 = vpop.xlane.xlu1 %1325  ;;  %v1464_v18 = vpop.xlane.xlu0 %1463 }
 0xa34   :  { %v1327_v19 = vsub.f32 %v1323_v63, %v1326_v62  ;;  %v1465_v20 = vsub.f32 %v1461_v0, %v1464_v18 }
 0xa36   :  { %v1328_v21 = vmul.f32 1.442695, %v1327_v19  ;;  %v1466_v22 = vmul.f32 1.442695, %v1465_v20  ;;  %v1643_v19 = vld [vmem:[#allocation17 + $0x18] sm:$0xff]  ;;  %v1642_v20 = vld [vmem:[#allocation17 + $0x10] sm:$0xff] }
 0xa38   :  { %1920 = vpow2.f32 %v1328_v21  ;;  %v1641_v21 = vld [vmem:[#allocation17 + $0x8] sm:$0xff] }
 0xa39   :  { %1922 = vpow2.f32 %v1466_v22  ;;  %v1640_v22 = vld [vmem:[#allocation17] sm:$0xff] }
 0xa3a   :  { %1924 = vpow2.f32 %v1537_v28 }
 0xa3e   :  { %v1921_v23 = vpop.eup %1920 }
 0xa3f   :  { %v1923_v4 = vpop.eup %1922  ;;  %v1330_v7 = vsel %vm364_vm5, %v1921_v23, 0.0 }
 0xa40   :  { %1331 = vadd.xlane.f32.xlu0 %v1330_v7  ;;  %v1468_v24 = vsel %vm364_vm5, %v1923_v4, 0.0  ;;  %v1925_v30 = vpop.eup %1924 }
 0xa41   :  { %1469 = vadd.xlane.f32.xlu2 %v1468_v24  ;;  %v1539_v31 = vsel %vm364_vm5, %v1925_v30, 0.0 }
 0xa4b   :  { %v1196_v25 = vpop.permute.xlu1 %1195 }
 0xa4c   :  { %1216 = vmatpush.msra.mxu3 %v1196_v25  ;;  %v1676_v25 = vld [vmem:[%s2819_s16 + $0x20] sm:$0xff] }
 0xa53   :  { %v1336_v26 = vpop.permute.xlu1 %1335 }
 0xa54   :  { %1356 = vmatpush.msrb.mxu3 %v1336_v26  ;;  %1266 = vrot.lane.b32.xlu0 %v2658_v60, %s2315_s2 }
 0xa5b   :  { %v1403_v32 = vpop.permute.xlu1 %1402 }
 0xa63   :  { %v1474_v36 = vpop.permute.xlu1 %1473 }
 0xa6b   :  { %v1545_v46 = vpop.permute.xlu1 %1544 }
 0xa7e   :  { %1540 = vadd.xlane.f32.xlu0 %v1539_v31 }
 0xa99   :  { %v1192_v33 = vpop.xlane.xlu0 %1191 }
 0xa9a   :  { %1926 = vrcp.f32 %v1192_v33 }
 0xaa0   :  { %v1927_v34 = vpop.eup %1926 }
 0xaa1   :  { %v1194_v35 = vmul.f32 %v1927_v34, %v1917_v11 }
 0xaa3   :  { %1799 = vmatmul.msk.f32.vlgmr.msra.gmra.mxu3 %vm297_vm2, %v1194_v35  ;;  %v1864_v35 = vld [vmem:[#allocation14] ss:$0 sm:$0xff] }
 0xaa4   :  { %1494 = vmatpush.msra.mxu3 %v1474_v36 }
 0xaae   :  { %v1147_v37 = vpop.f32.mrf.mxu2 }
 0xaaf   :  { %1151 = vrot.lane.b32.xlu1 %v1147_v37, %s2298_s7 }
 0xab3   :  { %v1332_v60 = vpop.xlane.xlu0 %1331 }
 0xab4   :  { %1928 = vrcp.f32 %v1332_v60  ;;  %v1470_v38 = vpop.xlane.xlu2 %1469  ;;  %v1865_v60 = vld [vmem:[#allocation16] ss:$0 sm:$0xff] }
 0xab5   :  { %1930 = vrcp.f32 %v1470_v38 }
 0xab6   :  { %1932 = vrcp.f32 %v1263_v16 }
 0xab7   :  { %1934 = vrcp.f32 %v1399_v17 }
 0xaba   :  { %v1929_v39 = vpop.eup %1928 }
 0xabb   :  { %v1334_v40 = vmul.f32 %v1929_v39, %v1921_v23  ;;  %v1931_v41 = vpop.eup %1930  ;;  %v1678_v23 = vld [vmem:[%s2819_s16 + $0x30] sm:$0xff] }
 0xabc   :  { %v1933_v42 = vpop.eup %1932  ;;  %v1472_v43 = vmul.f32 %v1931_v41, %v1923_v4  ;;  %v1677_v4 = vld [vmem:[%s2819_s16 + $0x28] sm:$0xff] }
 0xabd   :  { %1805 = vmatmul.msk.f32.vlgmr.msrb.gmra.mxu3 %vm297_vm2, %v1334_v40  ;;  %v1265_v44 = vmul.f32 %v1933_v42, %v2713_v55  ;;  %v1935_v47 = vpop.eup %1934  ;;  %v1674_v40 = vld [vmem:[%s2819_s16 + $0x10] sm:$0xff]  ;;  %v1673_v41 = vld [vmem:[%s2819_s16 + $0x8] sm:$0xff]  ;;  %v1672_v42 = vld [vmem:[%s2819_s16] sm:$0xff] }
 0xabe   :  { %v1401_v48 = vmul.f32 %v1935_v47, %v2715_v56  ;;  %1663 = vmatpush.msrb.mxu3 %v1643_v19  ;;  %v1867_v47 = vld [vmem:[#allocation20] ss:$0 sm:$0xff] }
 0xac0   :  { %1664 = vmatpush.msrb.mxu3 %v1642_v20 }
 0xac2   :  { %1665 = vmatpush.msrb.mxu3 %v1641_v21 }
 0xac4   :  { %1666 = vmatpush.msrb.mxu3 %v1640_v22 }
 0xac5   :  { %1811 = vmatmul.msk.f32.vlgmr.msra.gmra.mxu3 %vm297_vm2, %v1472_v43  ;;  %v1866_v43 = vld [vmem:[#allocation19] ss:$0 sm:$0xff] }
 0xac6   :  { %v1267_v45 = vpop.permute.xlu0 %1266 }
 0xac7   :  { %1287 = vmatpush.msra.mxu2 %v1267_v45 }
 0xac8   :  { %1802 = vmatmul.msk.f32.vlgmr.msra.gmra.mxu2 %vm297_vm2, %v1265_v44 }
 0xac9   :  { %1423 = vmatpush.msrb.mxu2 %v1403_v32 }
 0xacb   :  { %1565 = vmatpush.msra.mxu2 %v1545_v46 }
 0xad0   :  { %1808 = vmatmul.msk.f32.vlgmr.msrb.gmra.mxu2 %vm297_vm2, %v1401_v48 }
 0xaf1   :  { %v1541_v49 = vpop.xlane.xlu0 %1540 }
 0xaf2   :  { %1936 = vrcp.f32 %v1541_v49 }
 0xaf8   :  { %v1937_v8 = vpop.eup %1936 }
 0xaf9   :  { %v1543_v50 = vmul.f32 %v1937_v8, %v1925_v30 }
 0xafb   :  { %1814 = vmatmul.msk.f32.vlgmr.msra.gmra.mxu2 %vm297_vm2, %v1543_v50 }
 0xb21   :  { %v1152_v51 = vpop.permute.xlu1 %1151 }
 0xb22   :  { %1154 = vst.msk [vmem:[#allocation2] sm:$0xf] %vm437_vm6, %v1152_v51 }
 0xb26   :  { %v1218_v52 = vpop.f32.mrf.mxu3 }
 0xb27   :  { %1222 = vrot.lane.b32.xlu1 %v1218_v52, %s2321_s26 }
 0xb40   :  { %v1358_v53 = vpop.f32.mrf.mxu3 }
 0xb41   :  { %1361 = vst.msk [vmem:[#allocation2 + $0x4] sm:$0xf] %vm364_vm5, %v1358_v53 }
 0xb48   :  { %v1496_v54 = vpop.f32.mrf.mxu3 }
 0xb49   :  { %1500 = vrot.lane.b32.xlu0 %v1496_v54, %s2321_s26 }
 0xb4b   :  { %v1289_v55 = vpop.f32.mrf.mxu2 }
 0xb4c   :  { %1293 = vrot.lane.b32.xlu1 %v1289_v55, %s2322_s15 }
 0xb53   :  { %v1425_v56 = vpop.f32.mrf.mxu2 }
 0xb54   :  { %1429 = vrot.lane.b32.xlu2 %v1425_v56, %s2298_s7 }
 0xb7e   :  { %v1567_v58 = vpop.f32.mrf.mxu2 }
 0xb7f   :  { %1571 = vrot.lane.b32.xlu1 %v1567_v58, %s2322_s15 }
 0xb99   :  { %v1223_v59 = vpop.permute.xlu1 %1222 }
 0xb9a   :  { %1225 = vst.msk [vmem:[#allocation2] sm:$0xf] %vm510_vm7, %v1223_v59 }
 0xbae   :  { %v1430_v61 = vpop.permute.xlu2 %1429 }
 0xbaf   :  { %1432 = vst.msk [vmem:[#allocation2 + $0x4] sm:$0xf] %vm437_vm6, %v1430_v61 }
 0xbbb   :  { %v1501_v63 = vpop.permute.xlu0 %1500 }
 0xbbc   :  { %1503 = vst.msk [vmem:[#allocation2 + $0x4] sm:$0xf] %vm510_vm7, %v1501_v63 }
 0xbbe   :  { %v1294_v0 = vpop.permute.xlu1 %1293 }
 0xbbf   :  { %1296 = vst.msk [vmem:[#allocation2] sm:$0xf] %vm583_vm8, %v1294_v0 }
 0xbf1   :  { %v1572_v6 = vpop.permute.xlu1 %1571 }
 0xbf2   :  { %1574 = vst.msk [vmem:[#allocation2 + $0x4] sm:$0xf] %vm583_vm8, %v1572_v6 }
 0xbf9   :  { %v1575_v9 = vld [vmem:[#allocation2] sm:$0xff] }
 0xbfa   :  { %1815 = vmatmul.msk.f32.vlgmr.msrb.gmra.mxu1 %vm270_vm0, %v1575_v9  ;;  %v1869_v9 = vld [vmem:[#allocation23] ss:$0 sm:$0xff] }
 0xc77   :  { %v1604_v11 = vpop.f32.mrf.mxu1 }
 0xc78   :  { %v1605_v12 = vadd.f32 %v1863_v10, %v1604_v11 }
 0xc7a   :  { %v1607_v13 = vadd.f32 %v1605_v12, %v2654_v57  ;;  %v1679_v57 = vld [vmem:[%s2819_s16 + $0x38] sm:$0xff] }
 0xc7b   :  { %1696 = vmatpush.msrb.mxu0 %v1679_v57 }
 0xc7c   :  { %v1610_v14 = vsel %vm270_vm0, %v1607_v13, 0.0 }
 0xc7d   :  { %1611 = vadd.xlane.f32.xlu2 %v1610_v14  ;;  %1697 = vmatpush.msrb.mxu0 %v1678_v23 }
 0xc7f   :  { %1698 = vmatpush.msrb.mxu0 %v1677_v4 }
 0xc81   :  { %1699 = vmatpush.msrb.mxu0 %v1676_v25 }
 0xc83   :  { %1700 = vmatpush.msrb.mxu0 %v1675_v27 }
 0xc85   :  { %1701 = vmatpush.msrb.mxu0 %v1674_v40 }
 0xc87   :  { %1702 = vmatpush.msrb.mxu0 %v1673_v41 }
 0xc89   :  { %1703 = vmatpush.msrb.mxu0 %v1672_v42 }
 0xcf0   :  { %v1612_v15 = vpop.xlane.xlu2 %1611 }
 0xcf1   :  { %v1613_v16 = vmul.f32 %v1612_v15, %v2640_v29 }
 0xcf3   :  { %v1614_v17 = vsub.f32 %v1607_v13, %v1613_v16 }
 0xcf5   :  { %v1615_v62 = vmul.f32 %v1614_v17, %v1614_v17 }
 0xcf7   :  { %v1616_v18 = vsel %vm270_vm0, %v1615_v62, 0.0 }
 0xcf8   :  { %1617 = vadd.xlane.f32.xlu1 %v1616_v18 }
 0xd6b   :  { %v1618_v7 = vpop.xlane.xlu1 %1617 }
 0xd6c   :  { %v1619_v24 = vmul.f32 %v1618_v7, %v2640_v29 }
 0xd6e   :  { %v1620_v26 = vadd.f32 1e-05, %v1619_v24 }
 0xd70   :  { %1938 = vrsqrt.f32 %v1620_v26  ;;  %vm1627_vm14 = vweird.f32 %v1620_v26 }
 0xd76   :  { %v1939_v28 = vpop.eup %1938 }
 0xd77   :  { %v1622_v30 = vmul.f32 %v1939_v28, %v1620_v26  ;;  %vm1628_vm13 = vweird.f32 %v1939_v28 }
 0xd78   :  { %vm1629_vm15 = vmor %vm1627_vm14, %vm1628_vm13 }
 0xd79   :  { %v1623_v31 = vmul.f32 %v1939_v28, %v1622_v30 }
 0xd7b   :  { %v1624_v32 = vmul.f32 0.5, %v1623_v31 }
 0xd7d   :  { %v1625_v33 = vsub.f32 1.5, %v1624_v32 }
 0xd7f   :  { %v1626_v34 = vmul.f32 %v1939_v28, %v1625_v33 }
 0xd81   :  { %v1630_v36 = vsel %vm1629_vm15, %v1939_v28, %v1626_v34 }
 0xd82   :  { %v1631_v37 = vmul.f32 %v1630_v36, %v1614_v17 }
 0xd84   :  { %v1635_v38 = vmul.f32 %v1864_v35, %v1631_v37 }
 0xd86   :  { %v1639_v39 = vadd.f32 %v1865_v60, %v1635_v38 }
 0xd88   :  { %1816 = vmatmul.msk.f32.vlgmr.msrb.gmra.mxu3 %vm270_vm0, %v1639_v39 }
 0xe0b   :  { %v1668_v44 = vpop.f32.mrf.mxu3 }
 0xe0c   :  { %v1669_v45 = vadd.f32 %v1866_v43, %v1668_v44 }
 0xe0e   :  { %v1671_v46 = vmax.f32 %v1669_v45, 0.0 }
 0xe10   :  { %1817 = vmatmul.msk.f32.vlgmr.msrb.gmra.mxu0 %vm1684_vm1, %v1671_v46 }
 0xe8d   :  { %v1705_v48 = vpop.f32.mrf.mxu0 }
 0xe8e   :  { %v1706_v49 = vadd.f32 %v1867_v47, %v1705_v48 }
 0xe90   :  { %v1708_v8 = vadd.f32 %v1706_v49, %v1639_v39 }
 0xe92   :  { %v1711_v50 = vsel %vm270_vm0, %v1708_v8, 0.0 }
 0xe93   :  { %1712 = vadd.xlane.f32.xlu0 %v1711_v50 }
 0xf06   :  { %v1713_v51 = vpop.xlane.xlu0 %1712 }
 0xf07   :  { %v1714_v52 = vmul.f32 %v1713_v51, %v2640_v29 }
 0xf09   :  { %v1715_v53 = vsub.f32 %v1708_v8, %v1714_v52 }
 0xf0b   :  { %v1716_v54 = vmul.f32 %v1715_v53, %v1715_v53 }
 0xf0d   :  { %v1717_v55 = vsel %vm270_vm0, %v1716_v54, 0.0 }
 0xf0e   :  { %1718 = vadd.xlane.f32.xlu2 %v1717_v55 }
 0xf81   :  { %v1719_v56 = vpop.xlane.xlu2 %1718 }
 0xf82   :  { %v1720_v58 = vmul.f32 %v1719_v56, %v2640_v29 }
 0xf84   :  { %v1721_v59 = vadd.f32 1e-05, %v1720_v58 }
 0xf86   :  { %1940 = vrsqrt.f32 %v1721_v59  ;;  %vm1728_vm3 = vweird.f32 %v1721_v59 }
 0xf8c   :  { %v1941_v61 = vpop.eup %1940 }
 0xf8d   :  { %v1723_v63 = vmul.f32 %v1941_v61, %v1721_v59  ;;  %vm1729_vm2 = vweird.f32 %v1941_v61 }
 0xf8e   :  { %vm1730_vm4 = vmor %vm1728_vm3, %vm1729_vm2 }
 0xf8f   :  { %v1724_v0 = vmul.f32 %v1941_v61, %v1723_v63 }
 0xf91   :  { %v1725_v1 = vmul.f32 0.5, %v1724_v0 }
 0xf93   :  { %v1726_v2 = vsub.f32 1.5, %v1725_v1 }
 0xf95   :  { %v1727_v3 = vmul.f32 %v1941_v61, %v1726_v2 }
 0xf97   :  { %v1731_v6 = vsel %vm1730_vm4, %v1941_v61, %v1727_v3 }
 0xf98   :  { %v1732_v10 = vmul.f32 %v1731_v6, %v1715_v53 }
 0xf9a   :  { %v1736_v11 = vmul.f32 %v1868_v5, %v1732_v10 }
 0xf9c   :  { %v1740_v12 = vadd.f32 %v1869_v9, %v1736_v11 }
 0xf9e   :  { %1741 = vst.msk [vmem:[%s2823_s20] sm:$0xff] %vm270_vm0, %v1740_v12 }
 0xf9f   :  { %1746 = vsyncpa [#allocation4], 1 }
 0xfa0   :  { %1747 = vsyncpa [#allocation6], 1 }
 0xfa1   :  { %1748 = vsyncpa [#allocation9], 1 }
 0xfa2   :  { %1749 = vsyncpa [#allocation12], 1 }
 0xfa3   :  { %1750 = vsyncpa [#allocation15], 1 }
 0xfa4   :  { %1751 = vsyncpa [#allocation18], 1 }
 0xfa5   :  { %1752 = vsyncpa [#allocation21], 1 }
 0xfa6   :  { %1753 = vsyncpa [#allocation24], 1 }

</bundles_post_ra>
